<compile_context>
chip_gen: v7x
topology: tpu7x:2x2x1
jax: 0.10.0
libtpu: 0.0.40
codegen_flags: <defaults>
</compile_context>

<pallas_src>
import jax
import jax.numpy as jnp
from jax.experimental import pallas as pl
from jax.experimental.pallas import tpu as pltpu

# ----------------------------- model sizes ---------------------------------
V = 50          # vocab size (embedding_matrix.shape[0])
VP = 64         # vocab padded (one-hot width / table rows)
E = 64          # embedding dim (embedding_matrix.shape[1])
H = 128         # LSTM hidden size (fixed by the module)
NUM_LAYERS = 2
B = 2           # batch
T = 8           # sequence length
FEAT = 4 * H    # 512 = concat(avg_pool, max_pool) of bidirectional output
OUT = 7

VMEM_SPEC = pl.BlockSpec(memory_space=pltpu.MemorySpace.VMEM)
ANY_SPEC = pl.BlockSpec(memory_space=pl.ANY)     # raw HBM ref, manual DMA


# ------------------------- fused Pallas kernel ------------------------------
def fused_forward_kernel(
        ids_ref, emb_ref, wih0_ref, whh0_ref, b0_ref,
        wih1_hbm, whh1_hbm, b1_ref,
        bn_ref, whead_hbm, bhead_ref, wo_ref, bo_ref,
        o_ref,
        xp_sc, h0_sc, h1_sc, g_sc, wih1_sc, whh1_sc, whead_sc, dma_sem):
    """Entire NeuralNet eval forward in one kernel invocation (no grid).

    ids_ref  : (T*B, 1) int32, time-major (row = t*B + b)
    emb_ref  : (VP, E) padded embedding table
    wih*     : (Din, 8H) bf16 = [W_ih_fwd^T | W_ih_bwd^T], gate cols (i,f,o,g)
    whh*     : (H, 8H) f32    = [W_hh_fwd^T | W_hh_bwd^T], gate cols (i,f,o,g)
    b*       : (1, 8H) f32 combined b_ih + b_hh
    whead    : (FEAT, 2*FEAT) bf16 = [hidden1.W^T | hidden2.W^T]
    Layer-1 / head weights arrive in HBM (pl.ANY) and are DMA'd into the
    *_sc VMEM scratch buffers, overlapped with layer-0 compute.
    """
    # ---- kick off late-use weight DMA; overlap with layer-0 compute --------
    cp_wih1 = pltpu.make_async_copy(wih1_hbm, wih1_sc, dma_sem.at[0])
    cp_whh1 = pltpu.make_async_copy(whh1_hbm, whh1_sc, dma_sem.at[1])
    cp_whead = pltpu.make_async_copy(whead_hbm, whead_sc, dma_sem.at[2])
    cp_wih1.start()
    cp_whh1.start()
    cp_whead.start()

    # ---- embedding gather as a one-hot matmul (MXU is idle here) -----------
    col = jax.lax.broadcasted_iota(jnp.int32, (T * B, VP), 1)
    onehot = (col == ids_ref[...]).astype(jnp.float32)            # (T*B, VP)
    x0 = jnp.dot(onehot, emb_ref[...],
                 preferred_element_type=jnp.float32)              # (T*B, E)

    def bilstm_layer(x_flat, wih, bias, whh_ref, out_sc):
        """Bidirectional LSTM layer; fwd/bwd directions fused in one loop."""
        # Single fused input projection for all timesteps and both directions.
        xp_sc[...] = jnp.dot(x_flat, wih,
                             preferred_element_type=jnp.float32) + bias
        # fwd / bwd carries stacked along sublanes: rows [0:B]=fwd, [B:2B]=bwd
        h = jnp.zeros((2 * B, H), jnp.float32)
        c = jnp.zeros((2 * B, H), jnp.float32)

        # Fully unrolled static time loop: fwd walks t=0..T-1 while bwd walks
        # t=T-1..0, so one loop drives both recurrences.
        for s in range(T):
            tf = s
            tb = T - 1 - s
            # ONE fused recurrent matmul per step (redundant FLOPs are free at
            # M=4); operand fed as a ref load, not a hoisted value.
            r = jnp.dot(h, whh_ref[...],
                        preferred_element_type=jnp.float32)        # (2B, 8H)
            # assemble gate pre-activations into the (2B, 4H) scratch
            g_sc[0:B, :] = xp_sc[tf * B:(tf + 1) * B, 0:4 * H] + r[0:B, 0:4 * H]
            g_sc[B:2 * B, :] = (xp_sc[tb * B:(tb + 1) * B, 4 * H:8 * H]
                                + r[B:2 * B, 4 * H:8 * H])
            gates = g_sc[...]                                      # (2B, 4H)
            # gate columns pre-permuted to (i, f, o, g): 1 sigmoid + 1 tanh
            sig = jax.nn.sigmoid(gates[:, 0:3 * H])
            i_g = sig[:, 0:H]
            f_g = sig[:, H:2 * H]
            o_g = sig[:, 2 * H:3 * H]
            g_g = jnp.tanh(gates[:, 3 * H:4 * H])
            c = f_g * c + i_g * g_g
            h = o_g * jnp.tanh(c)
            out_sc[tf * B:(tf + 1) * B, 0:H] = h[0:B]              # fwd @ tf
            out_sc[tb * B:(tb + 1) * B, H:2 * H] = h[B:2 * B]      # bwd @ tb

    # layer 0: weights already resident in VMEM (auto-copied, needed first)
    bilstm_layer(x0, wih0_ref[...].astype(jnp.float32), b0_ref[...],
                 whh0_ref, h0_sc)

    # layer 1: only now block on the prefetched weights
    cp_wih1.wait()
    cp_whh1.wait()
    bilstm_layer(h0_sc[...], wih1_sc[...].astype(jnp.float32), b1_ref[...],
                 whh1_sc, h1_sc)

    # ---- avg / max pooling over time: log2(T) tree reduction ---------------
    # rows are t*B + b, so halving the row count keeps batch alignment.
    s_acc = h1_sc[...]
    m_acc = h1_sc[...]
    n = T * B
    while n > B:
        half = n // 2
        s_acc = s_acc[0:half, :] + s_acc[half:n, :]
        m_acc = jnp.maximum(m_acc[0:half, :], m_acc[half:n, :])
        n = half
    avg = s_acc * (1.0 / T)                                        # (B, 2H)

    # ---- BN(eval) + residual MLP head + output projection -------------------
    h_conc = jnp.concatenate([avg, m_acc], axis=-1)                # (B, 4H)
    h_conc = h_conc * bn_ref[0:1, :] + bn_ref[1:2, :]              # BN (eval)
    cp_whead.wait()
    w1 = whead_sc[:, 0:FEAT].astype(jnp.float32)
    w2 = whead_sc[:, FEAT:2 * FEAT].astype(jnp.float32)
    l1 = jnp.maximum(
        jnp.dot(h_conc, w1, preferred_element_type=jnp.float32)
        + bhead_ref[0:1, :], 0.0)
    l2 = jnp.maximum(
        jnp.dot(l1, w2, preferred_element_type=jnp.float32)
        + bhead_ref[1:2, :], 0.0)
    hidden = h_conc + l1 + l2
    o_ref[...] = (
        jnp.dot(hidden, wo_ref[...], preferred_element_type=jnp.float32)
        + bo_ref[...])


# --------------------------- Pallas wrapper ---------------------------------
@jax.jit
def forward(x_ids, P):
    """x_ids: (B, T) int32 token ids -> (B, 7) logits (one fused kernel)."""
    ids_tm = x_ids.T.reshape(T * B, 1).astype(jnp.int32)   # time-major ids
    l0, l1 = P["lstm"]
    return pl.pallas_call(
        fused_forward_kernel,
        out_shape=jax.ShapeDtypeStruct((B, OUT), jnp.float32),
        in_specs=[
            VMEM_SPEC,   # ids (time-major)
            VMEM_SPEC,   # embedding table (VP, E)
            VMEM_SPEC,   # wih0_cat bf16 (needed immediately)
            VMEM_SPEC,   # whh0_cat f32  (needed immediately)
            VMEM_SPEC,   # b0_cat
            ANY_SPEC,    # wih1_cat bf16  -> manual DMA (late use)
            ANY_SPEC,    # whh1_cat f32   -> manual DMA (late use)
            VMEM_SPEC,   # b1_cat (tiny)
            VMEM_SPEC,   # bn_pack (tiny)
            ANY_SPEC,    # whead bf16     -> manual DMA (late use)
            VMEM_SPEC,   # bhead (tiny)
            VMEM_SPEC,   # wo_t (tiny)
            VMEM_SPEC,   # bo (tiny)
        ],
        out_specs=VMEM_SPEC,
        scratch_shapes=[
            pltpu.VMEM((T * B, 8 * H), jnp.float32),     # xp_sc (gate proj)
            pltpu.VMEM((T * B, 2 * H), jnp.float32),     # layer-0 output
            pltpu.VMEM((T * B, 2 * H), jnp.float32),     # layer-1 output
            pltpu.VMEM((2 * B, 4 * H), jnp.float32),     # per-step gate scratch
            pltpu.VMEM((2 * H, 8 * H), jnp.bfloat16),    # wih1 landing buffer
            pltpu.VMEM((H, 8 * H), jnp.float32),         # whh1 landing buffer
            pltpu.VMEM((FEAT, 2 * FEAT), jnp.bfloat16),  # head-weight buffer
            pltpu.SemaphoreType.DMA((3,)),
        ],
    )(ids_tm, P["emb_pad"],
      l0["wih_cat"], l0["whh_cat"], l0["b_cat"],
      l1["wih_cat"], l1["whh_cat"], l1["b_cat"],
      P["bn_pack"], P["whead"], P["bhead"], P["wo_t"], P["bo"])


# ------------------------- pure-JAX reference -------------------------------
def ref_forward(x_ids, P):
    emb = P["emb"][x_ids]                        # (B, T, E)
    h = jnp.transpose(emb, (1, 0, 2))            # (T, B, E) time-major
    for layer in range(NUM_LAYERS):
        p = P["lstm"][layer]
        wih = p["wih_cat"].astype(jnp.float32)   # same bf16-rounded weights
        whh = p["whh_cat"]
        bias = p["b_cat"]
        outs = []
        for d, rev in enumerate((False, True)):
            wih_d = wih[:, d * 4 * H:(d + 1) * 4 * H]
            whh_d = whh[:, d * 4 * H:(d + 1) * 4 * H]
            b_d = bias[:, d * 4 * H:(d + 1) * 4 * H]
            xp = jnp.einsum("tbd,dg->tbg", h, wih_d) + b_d
            hs = jnp.zeros((B, H), jnp.float32)
            cs = jnp.zeros((B, H), jnp.float32)
            buf = [None] * T
            order = range(T - 1, -1, -1) if rev else range(T)
            for t in order:
                gates = xp[t] + hs @ whh_d
                # packed gate column order is (i, f, o, g)
                i_g = jax.nn.sigmoid(gates[:, 0:H])
                f_g = jax.nn.sigmoid(gates[:, H:2 * H])
                o_g = jax.nn.sigmoid(gates[:, 2 * H:3 * H])
                g_g = jnp.tanh(gates[:, 3 * H:4 * H])
                cs = f_g * cs + i_g * g_g
                hs = o_g * jnp.tanh(cs)
                buf[t] = hs
            outs.append(jnp.stack(buf, axis=0))
        h = jnp.concatenate(outs, axis=-1)
    avg_pool = jnp.mean(h, axis=0)
    max_pool = jnp.max(h, axis=0)
    hc = jnp.concatenate([avg_pool, max_pool], axis=-1)
    hc = hc * P["bn_pack"][0:1, :] + P["bn_pack"][1:2, :]
    wh = P["whead"].astype(jnp.float32)
    l1 = jax.nn.relu(hc @ wh[:, 0:FEAT] + P["bhead"][0:1, :])
    l2 = jax.nn.relu(l1 @ wh[:, FEAT:2 * FEAT] + P["bhead"][1:2, :])
    hidden = hc + l1 + l2
    return hidden @ P["wo_t"] + P["bo"]


# ------------------------- deterministic params ------------------------------
def pack_ifog(w):
    """(4H, X) PyTorch gate-row order (i,f,g,o) -> (X, 4H) cols (i,f,o,g)."""
    i, f, g, o = w[0:H], w[H:2 * H], w[2 * H:3 * H], w[3 * H:4 * H]
    return jnp.concatenate([i, f, o, g], axis=0).T


def init_params(key):
    def nrm(k, shape, scale=0.1):
        return scale * jax.random.normal(k, shape, jnp.float32)

    keys = iter(jax.random.split(key, 64))
    emb = nrm(next(keys), (V, E), 1.0)
    P = {"emb": emb,
         "emb_pad": jnp.zeros((VP, E), jnp.float32).at[:V, :].set(emb)}

    lstm = []
    for layer in range(NUM_LAYERS):
        in_dim = E if layer == 0 else 2 * H
        per_dir = []
        for _ in range(2):  # fwd, bwd
            wih = nrm(next(keys), (4 * H, in_dim))
            whh = nrm(next(keys), (4 * H, H))
            b = nrm(next(keys), (4 * H,), 0.05) + nrm(next(keys), (4 * H,), 0.05)
            per_dir.append((pack_ifog(wih), pack_ifog(whh),
                            pack_ifog(b.reshape(4 * H, 1))))
        (wf, whf, bf), (wb, whb, bb) = per_dir
        lstm.append({
            # bf16 input-to-gate weights (halves the weight DMA)
            "wih_cat": jnp.concatenate([wf, wb], axis=1).astype(jnp.bfloat16),
            # recurrent weights stay f32 (recurrence numerics)
            "whh_cat": jnp.concatenate([whf, whb], axis=1),      # (H, 8H)
            "b_cat": jnp.concatenate([bf, bb], axis=1),          # (1, 8H)
        })
    P["lstm"] = lstm

    # BatchNorm1d(512), eval mode: running_mean=0, running_var=1 (folded)
    gamma = 1.0 + nrm(next(keys), (FEAT,), 0.1)
    beta = nrm(next(keys), (FEAT,), 0.1)
    eps = 1e-5
    P["bn_pack"] = jnp.stack([gamma / jnp.sqrt(1.0 + eps), beta], axis=0)

    w1_t = nrm(next(keys), (FEAT, FEAT)).T
    w2_t = nrm(next(keys), (FEAT, FEAT)).T
    P["whead"] = jnp.concatenate([w1_t, w2_t], axis=1).astype(jnp.bfloat16)
    b1 = nrm(next(keys), (FEAT,), 0.05)
    b2 = nrm(next(keys), (FEAT,), 0.05)
    P["bhead"] = jnp.stack([b1, b2], axis=0)                     # (2, FEAT)
    P["wo_t"] = nrm(next(keys), (OUT, FEAT)).T                   # (FEAT, OUT)
    P["bo"] = nrm(next(keys), (1, OUT), 0.05)
    return P


# ---------------------------------- main -------------------------------------
if __name__ == "__main__":
    key = jax.random.PRNGKey(0)
    k_param, k_ids = jax.random.split(key)
    params = init_params(k_param)
    x_ids = jax.random.randint(k_ids, (B, T), 0, V, dtype=jnp.int32)

    out = jax.block_until_ready(forward(x_ids, params))
    assert out.shape == (B, OUT), out.shape

    ref = jax.block_until_ready(ref_forward(x_ids, params))
    max_abs_err = float(jnp.max(jnp.abs(out - ref)))
    assert max_abs_err < 2e-3, (
        f"Pallas output mismatch vs reference: max abs err {max_abs_err}")

    print("KERNEL_OK")
</pallas_src>

<mosaic_0001>
module attributes {stable_mosaic.version = 11 : i64} {
  func.func @fused_forward_kernel(%arg0: memref<16x1xi32, #tpu.memory_space<vmem>>, %arg1: memref<64x64xf32, #tpu.memory_space<vmem>>, %arg2: memref<64x1024xbf16, #tpu.memory_space<vmem>>, %arg3: memref<128x1024xf32, #tpu.memory_space<vmem>>, %arg4: memref<1x1024xf32, #tpu.memory_space<vmem>>, %arg5: memref<256x1024xbf16, #tpu.memory_space<any>>, %arg6: memref<128x1024xf32, #tpu.memory_space<any>>, %arg7: memref<1x1024xf32, #tpu.memory_space<vmem>>, %arg8: memref<2x512xf32, #tpu.memory_space<vmem>>, %arg9: memref<512x1024xbf16, #tpu.memory_space<any>>, %arg10: memref<2x512xf32, #tpu.memory_space<vmem>>, %arg11: memref<512x7xf32, #tpu.memory_space<vmem>>, %arg12: memref<1x7xf32, #tpu.memory_space<vmem>>, %arg13: memref<2x7xf32, #tpu.memory_space<vmem>>, %arg14: memref<16x1024xf32, #tpu.memory_space<vmem>>, %arg15: memref<16x256xf32, #tpu.memory_space<vmem>>, %arg16: memref<16x256xf32, #tpu.memory_space<vmem>>, %arg17: memref<4x512xf32, #tpu.memory_space<vmem>>, %arg18: memref<256x1024xbf16, #tpu.memory_space<vmem>>, %arg19: memref<128x1024xf32, #tpu.memory_space<vmem>>, %arg20: memref<512x1024xbf16, #tpu.memory_space<vmem>>, %arg21: memref<3x!tpu.dma_semaphore, #tpu.memory_space<semaphore_mem>>) attributes {dimension_semantics = [], scalar_prefetch = 0 : i64, scratch_operands = 8 : i64, tpu.core_type = #tpu.core_type<tc>} {
    %c0_i32 = arith.constant 0 : i32
    %0 = tpu.memref_slice %arg21[%c0_i32] : memref<3x!tpu.dma_semaphore, #tpu.memory_space<semaphore_mem>> -> memref<1x!tpu.dma_semaphore, #tpu.memory_space<semaphore_mem>>
    %1 = tpu.memref_squeeze %0 : memref<1x!tpu.dma_semaphore, #tpu.memory_space<semaphore_mem>> -> memref<!tpu.dma_semaphore, #tpu.memory_space<semaphore_mem>>
    tpu.enqueue_dma source(%arg5 : memref<256x1024xbf16, #tpu.memory_space<any>>) target(%arg18 : memref<256x1024xbf16, #tpu.memory_space<vmem>>) target_semaphore(%1 : memref<!tpu.dma_semaphore, #tpu.memory_space<semaphore_mem>>)
    %c1_i32 = arith.constant 1 : i32
    %2 = tpu.memref_slice %arg21[%c1_i32] : memref<3x!tpu.dma_semaphore, #tpu.memory_space<semaphore_mem>> -> memref<1x!tpu.dma_semaphore, #tpu.memory_space<semaphore_mem>>
    %3 = tpu.memref_squeeze %2 : memref<1x!tpu.dma_semaphore, #tpu.memory_space<semaphore_mem>> -> memref<!tpu.dma_semaphore, #tpu.memory_space<semaphore_mem>>
    tpu.enqueue_dma source(%arg6 : memref<128x1024xf32, #tpu.memory_space<any>>) target(%arg19 : memref<128x1024xf32, #tpu.memory_space<vmem>>) target_semaphore(%3 : memref<!tpu.dma_semaphore, #tpu.memory_space<semaphore_mem>>)
    %c2_i32 = arith.constant 2 : i32
    %4 = tpu.memref_slice %arg21[%c2_i32] : memref<3x!tpu.dma_semaphore, #tpu.memory_space<semaphore_mem>> -> memref<1x!tpu.dma_semaphore, #tpu.memory_space<semaphore_mem>>
    %5 = tpu.memref_squeeze %4 : memref<1x!tpu.dma_semaphore, #tpu.memory_space<semaphore_mem>> -> memref<!tpu.dma_semaphore, #tpu.memory_space<semaphore_mem>>
    tpu.enqueue_dma source(%arg9 : memref<512x1024xbf16, #tpu.memory_space<any>>) target(%arg20 : memref<512x1024xbf16, #tpu.memory_space<vmem>>) target_semaphore(%5 : memref<!tpu.dma_semaphore, #tpu.memory_space<semaphore_mem>>)
    %6 = tpu.iota {dimensions = array<i32: 1>} : vector<16x64xi32>
    %c0 = arith.constant 0 : index
    %c0_0 = arith.constant 0 : index
    %7 = vector.load %arg0[%c0, %c0_0] : memref<16x1xi32, #tpu.memory_space<vmem>>, vector<16x1xi32>
    %8 = vector.broadcast %7 : vector<16x1xi32> to vector<16x64xi32>
    %9 = arith.cmpi eq, %6, %8 : vector<16x64xi32>
    %10 = arith.extui %9 : vector<16x64xi1> to vector<16x64xi32>
    %11 = arith.sitofp %10 : vector<16x64xi32> to vector<16x64xf32>
    %c0_1 = arith.constant 0 : index
    %c0_2 = arith.constant 0 : index
    %12 = vector.load %arg1[%c0_1, %c0_2] : memref<64x64xf32, #tpu.memory_space<vmem>>, vector<64x64xf32>
    %cst = arith.constant dense<0.000000e+00> : vector<16x64xf32>
    %13 = tpu.matmul %11, %12, %cst {dimension_numbers = #tpu.dot_dimension_numbers<[1], [0], [0], [1], [0, 0, 1, 1], [], []>} : vector<16x64xf32>, vector<64x64xf32>, vector<16x64xf32> -> vector<16x64xf32>
    %c0_3 = arith.constant 0 : index
    %c0_4 = arith.constant 0 : index
    %14 = vector.load %arg2[%c0_3, %c0_4] : memref<64x1024xbf16, #tpu.memory_space<vmem>>, vector<64x1024xbf16>
    %15 = arith.extf %14 : vector<64x1024xbf16> to vector<64x1024xf32>
    %c0_5 = arith.constant 0 : index
    %c0_6 = arith.constant 0 : index
    %16 = vector.load %arg4[%c0_5, %c0_6] : memref<1x1024xf32, #tpu.memory_space<vmem>>, vector<1x1024xf32>
    %cst_7 = arith.constant dense<0.000000e+00> : vector<16x1024xf32>
    %17 = tpu.matmul %13, %15, %cst_7 {dimension_numbers = #tpu.dot_dimension_numbers<[1], [0], [0], [1], [0, 0, 1, 1], [], []>} : vector<16x64xf32>, vector<64x1024xf32>, vector<16x1024xf32> -> vector<16x1024xf32>
    %18 = vector.broadcast %16 : vector<1x1024xf32> to vector<16x1024xf32>
    %19 = arith.addf %17, %18 : vector<16x1024xf32>
    %c0_8 = arith.constant 0 : index
    %c0_9 = arith.constant 0 : index
    %20 = vector.load %arg14[%c0_8, %c0_9] : memref<16x1024xf32, #tpu.memory_space<vmem>>, vector<16x1024xf32>
    tpu.vector_store %arg14[%c0_8, %c0_9], %19 {strides = array<i32>} : memref<16x1024xf32, #tpu.memory_space<vmem>>, vector<16x1024xf32>,
    %cst_10 = arith.constant 0.000000e+00 : f32
    %21 = vector.broadcast %cst_10 : f32 to vector<4x128xf32>
    %cst_11 = arith.constant 0.000000e+00 : f32
    %22 = vector.broadcast %cst_11 : f32 to vector<4x128xf32>
    %c0_12 = arith.constant 0 : index
    %c0_13 = arith.constant 0 : index
    %23 = vector.load %arg3[%c0_12, %c0_13] : memref<128x1024xf32, #tpu.memory_space<vmem>>, vector<128x1024xf32>
    %cst_14 = arith.constant dense<0.000000e+00> : vector<4x1024xf32>
    %24 = tpu.matmul %21, %23, %cst_14 {dimension_numbers = #tpu.dot_dimension_numbers<[1], [0], [0], [1], [0, 0, 1, 1], [], []>} : vector<4x128xf32>, vector<128x1024xf32>, vector<4x1024xf32> -> vector<4x1024xf32>
    %c0_15 = arith.constant 0 : index
    %c0_16 = arith.constant 0 : index
    %25 = vector.load %arg14[%c0_15, %c0_16] : memref<16x1024xf32, #tpu.memory_space<vmem>>, vector<2x512xf32>
    %26 = vector.extract_strided_slice %24 {offsets = [0, 0], sizes = [2, 512], strides = [1, 1]} : vector<4x1024xf32> to vector<2x512xf32>
    %27 = arith.addf %25, %26 : vector<2x512xf32>
    %c0_17 = arith.constant 0 : index
    %c0_18 = arith.constant 0 : index
    %28 = vector.load %arg17[%c0_17, %c0_18] : memref<4x512xf32, #tpu.memory_space<vmem>>, vector<2x512xf32>
    tpu.vector_store %arg17[%c0_17, %c0_18], %27 {strides = array<i32>} : memref<4x512xf32, #tpu.memory_space<vmem>>, vector<2x512xf32>,
    %c14 = arith.constant 14 : index
    %c512 = arith.constant 512 : index
    %29 = vector.load %arg14[%c14, %c512] : memref<16x1024xf32, #tpu.memory_space<vmem>>, vector<2x512xf32>
    %30 = vector.extract_strided_slice %24 {offsets = [2, 512], sizes = [2, 512], strides = [1, 1]} : vector<4x1024xf32> to vector<2x512xf32>
    %31 = arith.addf %29, %30 : vector<2x512xf32>
    %c2 = arith.constant 2 : index
    %c0_19 = arith.constant 0 : index
    %32 = vector.load %arg17[%c2, %c0_19] : memref<4x512xf32, #tpu.memory_space<vmem>>, vector<2x512xf32>
    tpu.vector_store %arg17[%c2, %c0_19], %31 {strides = array<i32>} : memref<4x512xf32, #tpu.memory_space<vmem>>, vector<2x512xf32>,
    %c0_20 = arith.constant 0 : index
    %c0_21 = arith.constant 0 : index
    %33 = vector.load %arg17[%c0_20, %c0_21] : memref<4x512xf32, #tpu.memory_space<vmem>>, vector<4x512xf32>
    %34 = vector.extract_strided_slice %33 {offsets = [0, 0], sizes = [4, 384], strides = [1, 1]} : vector<4x512xf32> to vector<4x384xf32>
    %35 = arith.negf %34 : vector<4x384xf32>
    %36 = math.exp %35 : vector<4x384xf32>
    %cst_22 = arith.constant 1.000000e+00 : f32
    %37 = vector.broadcast %cst_22 : f32 to vector<4x384xf32>
    %38 = arith.addf %37, %36 : vector<4x384xf32>
    %39 = arith.divf %37, %38 : vector<4x384xf32>
    %40 = vector.extract_strided_slice %39 {offsets = [0, 0], sizes = [4, 128], strides = [1, 1]} : vector<4x384xf32> to vector<4x128xf32>
    %41 = vector.extract_strided_slice %39 {offsets = [0, 128], sizes = [4, 128], strides = [1, 1]} : vector<4x384xf32> to vector<4x128xf32>
    %42 = vector.extract_strided_slice %39 {offsets = [0, 256], sizes = [4, 128], strides = [1, 1]} : vector<4x384xf32> to vector<4x128xf32>
    %43 = vector.extract_strided_slice %33 {offsets = [0, 384], sizes = [4, 128], strides = [1, 1]} : vector<4x512xf32> to vector<4x128xf32>
    %44 = math.tanh %43 : vector<4x128xf32>
    %45 = arith.mulf %41, %22 : vector<4x128xf32>
    %46 = arith.mulf %40, %44 : vector<4x128xf32>
    %47 = arith.addf %45, %46 : vector<4x128xf32>
    %48 = math.tanh %47 : vector<4x128xf32>
    %49 = arith.mulf %42, %48 : vector<4x128xf32>
    %50 = vector.extract_strided_slice %49 {offsets = [0, 0], sizes = [2, 128], strides = [1, 1]} : vector<4x128xf32> to vector<2x128xf32>
    %c0_23 = arith.constant 0 : index
    %c0_24 = arith.constant 0 : index
    %51 = vector.load %arg15[%c0_23, %c0_24] : memref<16x256xf32, #tpu.memory_space<vmem>>, vector<2x128xf32>
    tpu.vector_store %arg15[%c0_23, %c0_24], %50 {strides = array<i32>} : memref<16x256xf32, #tpu.memory_space<vmem>>, vector<2x128xf32>,
    %52 = vector.extract_strided_slice %49 {offsets = [2, 0], sizes = [2, 128], strides = [1, 1]} : vector<4x128xf32> to vector<2x128xf32>
    %c14_25 = arith.constant 14 : index
    %c128 = arith.constant 128 : index
    %53 = vector.load %arg15[%c14_25, %c128] : memref<16x256xf32, #tpu.memory_space<vmem>>, vector<2x128xf32>
    tpu.vector_store %arg15[%c14_25, %c128], %52 {strides = array<i32>} : memref<16x256xf32, #tpu.memory_space<vmem>>, vector<2x128xf32>,
    %c0_26 = arith.constant 0 : index
    %c0_27 = arith.constant 0 : index
    %54 = vector.load %arg3[%c0_26, %c0_27] : memref<128x1024xf32, #tpu.memory_space<vmem>>, vector<128x1024xf32>
    %cst_28 = arith.constant dense<0.000000e+00> : vector<4x1024xf32>
    %55 = tpu.matmul %49, %54, %cst_28 {dimension_numbers = #tpu.dot_dimension_numbers<[1], [0], [0], [1], [0, 0, 1, 1], [], []>} : vector<4x128xf32>, vector<128x1024xf32>, vector<4x1024xf32> -> vector<4x1024xf32>
    %c2_29 = arith.constant 2 : index
    %c0_30 = arith.constant 0 : index
    %56 = vector.load %arg14[%c2_29, %c0_30] : memref<16x1024xf32, #tpu.memory_space<vmem>>, vector<2x512xf32>
    %57 = vector.extract_strided_slice %55 {offsets = [0, 0], sizes = [2, 512], strides = [1, 1]} : vector<4x1024xf32> to vector<2x512xf32>
    %58 = arith.addf %56, %57 : vector<2x512xf32>
    %c0_31 = arith.constant 0 : index
    %c0_32 = arith.constant 0 : index
    %59 = vector.load %arg17[%c0_31, %c0_32] : memref<4x512xf32, #tpu.memory_space<vmem>>, vector<2x512xf32>
    tpu.vector_store %arg17[%c0_31, %c0_32], %58 {strides = array<i32>} : memref<4x512xf32, #tpu.memory_space<vmem>>, vector<2x512xf32>,
    %c12 = arith.constant 12 : index
    %c512_33 = arith.constant 512 : index
    %60 = vector.load %arg14[%c12, %c512_33] : memref<16x1024xf32, #tpu.memory_space<vmem>>, vector<2x512xf32>
    %61 = vector.extract_strided_slice %55 {offsets = [2, 512], sizes = [2, 512], strides = [1, 1]} : vector<4x1024xf32> to vector<2x512xf32>
    %62 = arith.addf %60, %61 : vector<2x512xf32>
    %c2_34 = arith.constant 2 : index
    %c0_35 = arith.constant 0 : index
    %63 = vector.load %arg17[%c2_34, %c0_35] : memref<4x512xf32, #tpu.memory_space<vmem>>, vector<2x512xf32>
    tpu.vector_store %arg17[%c2_34, %c0_35], %62 {strides = array<i32>} : memref<4x512xf32, #tpu.memory_space<vmem>>, vector<2x512xf32>,
    %c0_36 = arith.constant 0 : index
    %c0_37 = arith.constant 0 : index
    %64 = vector.load %arg17[%c0_36, %c0_37] : memref<4x512xf32, #tpu.memory_space<vmem>>, vector<4x512xf32>
    %65 = vector.extract_strided_slice %64 {offsets = [0, 0], sizes = [4, 384], strides = [1, 1]} : vector<4x512xf32> to vector<4x384xf32>
    %66 = arith.negf %65 : vector<4x384xf32>
    %67 = math.exp %66 : vector<4x384xf32>
    %cst_38 = arith.constant 1.000000e+00 : f32
    %68 = vector.broadcast %cst_38 : f32 to vector<4x384xf32>
    %69 = arith.addf %68, %67 : vector<4x384xf32>
    %70 = arith.divf %68, %69 : vector<4x384xf32>
    %71 = vector.extract_strided_slice %70 {offsets = [0, 0], sizes = [4, 128], strides = [1, 1]} : vector<4x384xf32> to vector<4x128xf32>
    %72 = vector.extract_strided_slice %70 {offsets = [0, 128], sizes = [4, 128], strides = [1, 1]} : vector<4x384xf32> to vector<4x128xf32>
    %73 = vector.extract_strided_slice %70 {offsets = [0, 256], sizes = [4, 128], strides = [1, 1]} : vector<4x384xf32> to vector<4x128xf32>
    %74 = vector.extract_strided_slice %64 {offsets = [0, 384], sizes = [4, 128], strides = [1, 1]} : vector<4x512xf32> to vector<4x128xf32>
    %75 = math.tanh %74 : vector<4x128xf32>
    %76 = arith.mulf %72, %47 : vector<4x128xf32>
    %77 = arith.mulf %71, %75 : vector<4x128xf32>
    %78 = arith.addf %76, %77 : vector<4x128xf32>
    %79 = math.tanh %78 : vector<4x128xf32>
    %80 = arith.mulf %73, %79 : vector<4x128xf32>
    %81 = vector.extract_strided_slice %80 {offsets = [0, 0], sizes = [2, 128], strides = [1, 1]} : vector<4x128xf32> to vector<2x128xf32>
    %c2_39 = arith.constant 2 : index
    %c0_40 = arith.constant 0 : index
    %82 = vector.load %arg15[%c2_39, %c0_40] : memref<16x256xf32, #tpu.memory_space<vmem>>, vector<2x128xf32>
    tpu.vector_store %arg15[%c2_39, %c0_40], %81 {strides = array<i32>} : memref<16x256xf32, #tpu.memory_space<vmem>>, vector<2x128xf32>,
    %83 = vector.extract_strided_slice %80 {offsets = [2, 0], sizes = [2, 128], strides = [1, 1]} : vector<4x128xf32> to vector<2x128xf32>
    %c12_41 = arith.constant 12 : index
    %c128_42 = arith.constant 128 : index
    %84 = vector.load %arg15[%c12_41, %c128_42] : memref<16x256xf32, #tpu.memory_space<vmem>>, vector<2x128xf32>
    tpu.vector_store %arg15[%c12_41, %c128_42], %83 {strides = array<i32>} : memref<16x256xf32, #tpu.memory_space<vmem>>, vector<2x128xf32>,
    %c0_43 = arith.constant 0 : index
    %c0_44 = arith.constant 0 : index
    %85 = vector.load %arg3[%c0_43, %c0_44] : memref<128x1024xf32, #tpu.memory_space<vmem>>, vector<128x1024xf32>
    %cst_45 = arith.constant dense<0.000000e+00> : vector<4x1024xf32>
    %86 = tpu.matmul %80, %85, %cst_45 {dimension_numbers = #tpu.dot_dimension_numbers<[1], [0], [0], [1], [0, 0, 1, 1], [], []>} : vector<4x128xf32>, vector<128x1024xf32>, vector<4x1024xf32> -> vector<4x1024xf32>
    %c4 = arith.constant 4 : index
    %c0_46 = arith.constant 0 : index
    %87 = vector.load %arg14[%c4, %c0_46] : memref<16x1024xf32, #tpu.memory_space<vmem>>, vector<2x512xf32>
    %88 = vector.extract_strided_slice %86 {offsets = [0, 0], sizes = [2, 512], strides = [1, 1]} : vector<4x1024xf32> to vector<2x512xf32>
    %89 = arith.addf %87, %88 : vector<2x512xf32>
    %c0_47 = arith.constant 0 : index
    %c0_48 = arith.constant 0 : index
    %90 = vector.load %arg17[%c0_47, %c0_48] : memref<4x512xf32, #tpu.memory_space<vmem>>, vector<2x512xf32>
    tpu.vector_store %arg17[%c0_47, %c0_48], %89 {strides = array<i32>} : memref<4x512xf32, #tpu.memory_space<vmem>>, vector<2x512xf32>,
    %c10 = arith.constant 10 : index
    %c512_49 = arith.constant 512 : index
    %91 = vector.load %arg14[%c10, %c512_49] : memref<16x1024xf32, #tpu.memory_space<vmem>>, vector<2x512xf32>
    %92 = vector.extract_strided_slice %86 {offsets = [2, 512], sizes = [2, 512], strides = [1, 1]} : vector<4x1024xf32> to vector<2x512xf32>
    %93 = arith.addf %91, %92 : vector<2x512xf32>
    %c2_50 = arith.constant 2 : index
    %c0_51 = arith.constant 0 : index
    %94 = vector.load %arg17[%c2_50, %c0_51] : memref<4x512xf32, #tpu.memory_space<vmem>>, vector<2x512xf32>
    tpu.vector_store %arg17[%c2_50, %c0_51], %93 {strides = array<i32>} : memref<4x512xf32, #tpu.memory_space<vmem>>, vector<2x512xf32>,
    %c0_52 = arith.constant 0 : index
    %c0_53 = arith.constant 0 : index
    %95 = vector.load %arg17[%c0_52, %c0_53] : memref<4x512xf32, #tpu.memory_space<vmem>>, vector<4x512xf32>
    %96 = vector.extract_strided_slice %95 {offsets = [0, 0], sizes = [4, 384], strides = [1, 1]} : vector<4x512xf32> to vector<4x384xf32>
    %97 = arith.negf %96 : vector<4x384xf32>
    %98 = math.exp %97 : vector<4x384xf32>
    %cst_54 = arith.constant 1.000000e+00 : f32
    %99 = vector.broadcast %cst_54 : f32 to vector<4x384xf32>
    %100 = arith.addf %99, %98 : vector<4x384xf32>
    %101 = arith.divf %99, %100 : vector<4x384xf32>
    %102 = vector.extract_strided_slice %101 {offsets = [0, 0], sizes = [4, 128], strides = [1, 1]} : vector<4x384xf32> to vector<4x128xf32>
    %103 = vector.extract_strided_slice %101 {offsets = [0, 128], sizes = [4, 128], strides = [1, 1]} : vector<4x384xf32> to vector<4x128xf32>
    %104 = vector.extract_strided_slice %101 {offsets = [0, 256], sizes = [4, 128], strides = [1, 1]} : vector<4x384xf32> to vector<4x128xf32>
    %105 = vector.extract_strided_slice %95 {offsets = [0, 384], sizes = [4, 128], strides = [1, 1]} : vector<4x512xf32> to vector<4x128xf32>
    %106 = math.tanh %105 : vector<4x128xf32>
    %107 = arith.mulf %103, %78 : vector<4x128xf32>
    %108 = arith.mulf %102, %106 : vector<4x128xf32>
    %109 = arith.addf %107, %108 : vector<4x128xf32>
    %110 = math.tanh %109 : vector<4x128xf32>
    %111 = arith.mulf %104, %110 : vector<4x128xf32>
    %112 = vector.extract_strided_slice %111 {offsets = [0, 0], sizes = [2, 128], strides = [1, 1]} : vector<4x128xf32> to vector<2x128xf32>
    %c4_55 = arith.constant 4 : index
    %c0_56 = arith.constant 0 : index
    %113 = vector.load %arg15[%c4_55, %c0_56] : memref<16x256xf32, #tpu.memory_space<vmem>>, vector<2x128xf32>
    tpu.vector_store %arg15[%c4_55, %c0_56], %112 {strides = array<i32>} : memref<16x256xf32, #tpu.memory_space<vmem>>, vector<2x128xf32>,
    %114 = vector.extract_strided_slice %111 {offsets = [2, 0], sizes = [2, 128], strides = [1, 1]} : vector<4x128xf32> to vector<2x128xf32>
    %c10_57 = arith.constant 10 : index
    %c128_58 = arith.constant 128 : index
    %115 = vector.load %arg15[%c10_57, %c128_58] : memref<16x256xf32, #tpu.memory_space<vmem>>, vector<2x128xf32>
    tpu.vector_store %arg15[%c10_57, %c128_58], %114 {strides = array<i32>} : memref<16x256xf32, #tpu.memory_space<vmem>>, vector<2x128xf32>,
    %c0_59 = arith.constant 0 : index
    %c0_60 = arith.constant 0 : index
    %116 = vector.load %arg3[%c0_59, %c0_60] : memref<128x1024xf32, #tpu.memory_space<vmem>>, vector<128x1024xf32>
    %cst_61 = arith.constant dense<0.000000e+00> : vector<4x1024xf32>
    %117 = tpu.matmul %111, %116, %cst_61 {dimension_numbers = #tpu.dot_dimension_numbers<[1], [0], [0], [1], [0, 0, 1, 1], [], []>} : vector<4x128xf32>, vector<128x1024xf32>, vector<4x1024xf32> -> vector<4x1024xf32>
    %c6 = arith.constant 6 : index
    %c0_62 = arith.constant 0 : index
    %118 = vector.load %arg14[%c6, %c0_62] : memref<16x1024xf32, #tpu.memory_space<vmem>>, vector<2x512xf32>
    %119 = vector.extract_strided_slice %117 {offsets = [0, 0], sizes = [2, 512], strides = [1, 1]} : vector<4x1024xf32> to vector<2x512xf32>
    %120 = arith.addf %118, %119 : vector<2x512xf32>
    %c0_63 = arith.constant 0 : index
    %c0_64 = arith.constant 0 : index
    %121 = vector.load %arg17[%c0_63, %c0_64] : memref<4x512xf32, #tpu.memory_space<vmem>>, vector<2x512xf32>
    tpu.vector_store %arg17[%c0_63, %c0_64], %120 {strides = array<i32>} : memref<4x512xf32, #tpu.memory_space<vmem>>, vector<2x512xf32>,
    %c8 = arith.constant 8 : index
    %c512_65 = arith.constant 512 : index
    %122 = vector.load %arg14[%c8, %c512_65] : memref<16x1024xf32, #tpu.memory_space<vmem>>, vector<2x512xf32>
    %123 = vector.extract_strided_slice %117 {offsets = [2, 512], sizes = [2, 512], strides = [1, 1]} : vector<4x1024xf32> to vector<2x512xf32>
    %124 = arith.addf %122, %123 : vector<2x512xf32>
    %c2_66 = arith.constant 2 : index
    %c0_67 = arith.constant 0 : index
    %125 = vector.load %arg17[%c2_66, %c0_67] : memref<4x512xf32, #tpu.memory_space<vmem>>, vector<2x512xf32>
    tpu.vector_store %arg17[%c2_66, %c0_67], %124 {strides = array<i32>} : memref<4x512xf32, #tpu.memory_space<vmem>>, vector<2x512xf32>,
    %c0_68 = arith.constant 0 : index
    %c0_69 = arith.constant 0 : index
    %126 = vector.load %arg17[%c0_68, %c0_69] : memref<4x512xf32, #tpu.memory_space<vmem>>, vector<4x512xf32>
    %127 = vector.extract_strided_slice %126 {offsets = [0, 0], sizes = [4, 384], strides = [1, 1]} : vector<4x512xf32> to vector<4x384xf32>
    %128 = arith.negf %127 : vector<4x384xf32>
    %129 = math.exp %128 : vector<4x384xf32>
    %cst_70 = arith.constant 1.000000e+00 : f32
    %130 = vector.broadcast %cst_70 : f32 to vector<4x384xf32>
    %131 = arith.addf %130, %129 : vector<4x384xf32>
    %132 = arith.divf %130, %131 : vector<4x384xf32>
    %133 = vector.extract_strided_slice %132 {offsets = [0, 0], sizes = [4, 128], strides = [1, 1]} : vector<4x384xf32> to vector<4x128xf32>
    %134 = vector.extract_strided_slice %132 {offsets = [0, 128], sizes = [4, 128], strides = [1, 1]} : vector<4x384xf32> to vector<4x128xf32>
    %135 = vector.extract_strided_slice %132 {offsets = [0, 256], sizes = [4, 128], strides = [1, 1]} : vector<4x384xf32> to vector<4x128xf32>
    %136 = vector.extract_strided_slice %126 {offsets = [0, 384], sizes = [4, 128], strides = [1, 1]} : vector<4x512xf32> to vector<4x128xf32>
    %137 = math.tanh %136 : vector<4x128xf32>
    %138 = arith.mulf %134, %109 : vector<4x128xf32>
    %139 = arith.mulf %133, %137 : vector<4x128xf32>
    %140 = arith.addf %138, %139 : vector<4x128xf32>
    %141 = math.tanh %140 : vector<4x128xf32>
    %142 = arith.mulf %135, %141 : vector<4x128xf32>
    %143 = vector.extract_strided_slice %142 {offsets = [0, 0], sizes = [2, 128], strides = [1, 1]} : vector<4x128xf32> to vector<2x128xf32>
    %c6_71 = arith.constant 6 : index
    %c0_72 = arith.constant 0 : index
    %144 = vector.load %arg15[%c6_71, %c0_72] : memref<16x256xf32, #tpu.memory_space<vmem>>, vector<2x128xf32>
    tpu.vector_store %arg15[%c6_71, %c0_72], %143 {strides = array<i32>} : memref<16x256xf32, #tpu.memory_space<vmem>>, vector<2x128xf32>,
    %145 = vector.extract_strided_slice %142 {offsets = [2, 0], sizes = [2, 128], strides = [1, 1]} : vector<4x128xf32> to vector<2x128xf32>
    %c8_73 = arith.constant 8 : index
    %c128_74 = arith.constant 128 : index
    %146 = vector.load %arg15[%c8_73, %c128_74] : memref<16x256xf32, #tpu.memory_space<vmem>>, vector<2x128xf32>
    tpu.vector_store %arg15[%c8_73, %c128_74], %145 {strides = array<i32>} : memref<16x256xf32, #tpu.memory_space<vmem>>, vector<2x128xf32>,
    %c0_75 = arith.constant 0 : index
    %c0_76 = arith.constant 0 : index
    %147 = vector.load %arg3[%c0_75, %c0_76] : memref<128x1024xf32, #tpu.memory_space<vmem>>, vector<128x1024xf32>
    %cst_77 = arith.constant dense<0.000000e+00> : vector<4x1024xf32>
    %148 = tpu.matmul %142, %147, %cst_77 {dimension_numbers = #tpu.dot_dimension_numbers<[1], [0], [0], [1], [0, 0, 1, 1], [], []>} : vector<4x128xf32>, vector<128x1024xf32>, vector<4x1024xf32> -> vector<4x1024xf32>
    %c8_78 = arith.constant 8 : index
    %c0_79 = arith.constant 0 : index
    %149 = vector.load %arg14[%c8_78, %c0_79] : memref<16x1024xf32, #tpu.memory_space<vmem>>, vector<2x512xf32>
    %150 = vector.extract_strided_slice %148 {offsets = [0, 0], sizes = [2, 512], strides = [1, 1]} : vector<4x1024xf32> to vector<2x512xf32>
    %151 = arith.addf %149, %150 : vector<2x512xf32>
    %c0_80 = arith.constant 0 : index
    %c0_81 = arith.constant 0 : index
    %152 = vector.load %arg17[%c0_80, %c0_81] : memref<4x512xf32, #tpu.memory_space<vmem>>, vector<2x512xf32>
    tpu.vector_store %arg17[%c0_80, %c0_81], %151 {strides = array<i32>} : memref<4x512xf32, #tpu.memory_space<vmem>>, vector<2x512xf32>,
    %c6_82 = arith.constant 6 : index
    %c512_83 = arith.constant 512 : index
    %153 = vector.load %arg14[%c6_82, %c512_83] : memref<16x1024xf32, #tpu.memory_space<vmem>>, vector<2x512xf32>
    %154 = vector.extract_strided_slice %148 {offsets = [2, 512], sizes = [2, 512], strides = [1, 1]} : vector<4x1024xf32> to vector<2x512xf32>
    %155 = arith.addf %153, %154 : vector<2x512xf32>
    %c2_84 = arith.constant 2 : index
    %c0_85 = arith.constant 0 : index
    %156 = vector.load %arg17[%c2_84, %c0_85] : memref<4x512xf32, #tpu.memory_space<vmem>>, vector<2x512xf32>
    tpu.vector_store %arg17[%c2_84, %c0_85], %155 {strides = array<i32>} : memref<4x512xf32, #tpu.memory_space<vmem>>, vector<2x512xf32>,
    %c0_86 = arith.constant 0 : index
    %c0_87 = arith.constant 0 : index
    %157 = vector.load %arg17[%c0_86, %c0_87] : memref<4x512xf32, #tpu.memory_space<vmem>>, vector<4x512xf32>
    %158 = vector.extract_strided_slice %157 {offsets = [0, 0], sizes = [4, 384], strides = [1, 1]} : vector<4x512xf32> to vector<4x384xf32>
    %159 = arith.negf %158 : vector<4x384xf32>
    %160 = math.exp %159 : vector<4x384xf32>
    %cst_88 = arith.constant 1.000000e+00 : f32
    %161 = vector.broadcast %cst_88 : f32 to vector<4x384xf32>
    %162 = arith.addf %161, %160 : vector<4x384xf32>
    %163 = arith.divf %161, %162 : vector<4x384xf32>
    %164 = vector.extract_strided_slice %163 {offsets = [0, 0], sizes = [4, 128], strides = [1, 1]} : vector<4x384xf32> to vector<4x128xf32>
    %165 = vector.extract_strided_slice %163 {offsets = [0, 128], sizes = [4, 128], strides = [1, 1]} : vector<4x384xf32> to vector<4x128xf32>
    %166 = vector.extract_strided_slice %163 {offsets = [0, 256], sizes = [4, 128], strides = [1, 1]} : vector<4x384xf32> to vector<4x128xf32>
    %167 = vector.extract_strided_slice %157 {offsets = [0, 384], sizes = [4, 128], strides = [1, 1]} : vector<4x512xf32> to vector<4x128xf32>
    %168 = math.tanh %167 : vector<4x128xf32>
    %169 = arith.mulf %165, %140 : vector<4x128xf32>
    %170 = arith.mulf %164, %168 : vector<4x128xf32>
    %171 = arith.addf %169, %170 : vector<4x128xf32>
    %172 = math.tanh %171 : vector<4x128xf32>
    %173 = arith.mulf %166, %172 : vector<4x128xf32>
    %174 = vector.extract_strided_slice %173 {offsets = [0, 0], sizes = [2, 128], strides = [1, 1]} : vector<4x128xf32> to vector<2x128xf32>
    %c8_89 = arith.constant 8 : index
    %c0_90 = arith.constant 0 : index
    %175 = vector.load %arg15[%c8_89, %c0_90] : memref<16x256xf32, #tpu.memory_space<vmem>>, vector<2x128xf32>
    tpu.vector_store %arg15[%c8_89, %c0_90], %174 {strides = array<i32>} : memref<16x256xf32, #tpu.memory_space<vmem>>, vector<2x128xf32>,
    %176 = vector.extract_strided_slice %173 {offsets = [2, 0], sizes = [2, 128], strides = [1, 1]} : vector<4x128xf32> to vector<2x128xf32>
    %c6_91 = arith.constant 6 : index
    %c128_92 = arith.constant 128 : index
    %177 = vector.load %arg15[%c6_91, %c128_92] : memref<16x256xf32, #tpu.memory_space<vmem>>, vector<2x128xf32>
    tpu.vector_store %arg15[%c6_91, %c128_92], %176 {strides = array<i32>} : memref<16x256xf32, #tpu.memory_space<vmem>>, vector<2x128xf32>,
    %c0_93 = arith.constant 0 : index
    %c0_94 = arith.constant 0 : index
    %178 = vector.load %arg3[%c0_93, %c0_94] : memref<128x1024xf32, #tpu.memory_space<vmem>>, vector<128x1024xf32>
    %cst_95 = arith.constant dense<0.000000e+00> : vector<4x1024xf32>
    %179 = tpu.matmul %173, %178, %cst_95 {dimension_numbers = #tpu.dot_dimension_numbers<[1], [0], [0], [1], [0, 0, 1, 1], [], []>} : vector<4x128xf32>, vector<128x1024xf32>, vector<4x1024xf32> -> vector<4x1024xf32>
    %c10_96 = arith.constant 10 : index
    %c0_97 = arith.constant 0 : index
    %180 = vector.load %arg14[%c10_96, %c0_97] : memref<16x1024xf32, #tpu.memory_space<vmem>>, vector<2x512xf32>
    %181 = vector.extract_strided_slice %179 {offsets = [0, 0], sizes = [2, 512], strides = [1, 1]} : vector<4x1024xf32> to vector<2x512xf32>
    %182 = arith.addf %180, %181 : vector<2x512xf32>
    %c0_98 = arith.constant 0 : index
    %c0_99 = arith.constant 0 : index
    %183 = vector.load %arg17[%c0_98, %c0_99] : memref<4x512xf32, #tpu.memory_space<vmem>>, vector<2x512xf32>
    tpu.vector_store %arg17[%c0_98, %c0_99], %182 {strides = array<i32>} : memref<4x512xf32, #tpu.memory_space<vmem>>, vector<2x512xf32>,
    %c4_100 = arith.constant 4 : index
    %c512_101 = arith.constant 512 : index
    %184 = vector.load %arg14[%c4_100, %c512_101] : memref<16x1024xf32, #tpu.memory_space<vmem>>, vector<2x512xf32>
    %185 = vector.extract_strided_slice %179 {offsets = [2, 512], sizes = [2, 512], strides = [1, 1]} : vector<4x1024xf32> to vector<2x512xf32>
    %186 = arith.addf %184, %185 : vector<2x512xf32>
    %c2_102 = arith.constant 2 : index
    %c0_103 = arith.constant 0 : index
    %187 = vector.load %arg17[%c2_102, %c0_103] : memref<4x512xf32, #tpu.memory_space<vmem>>, vector<2x512xf32>
    tpu.vector_store %arg17[%c2_102, %c0_103], %186 {strides = array<i32>} : memref<4x512xf32, #tpu.memory_space<vmem>>, vector<2x512xf32>,
    %c0_104 = arith.constant 0 : index
    %c0_105 = arith.constant 0 : index
    %188 = vector.load %arg17[%c0_104, %c0_105] : memref<4x512xf32, #tpu.memory_space<vmem>>, vector<4x512xf32>
    %189 = vector.extract_strided_slice %188 {offsets = [0, 0], sizes = [4, 384], strides = [1, 1]} : vector<4x512xf32> to vector<4x384xf32>
    %190 = arith.negf %189 : vector<4x384xf32>
    %191 = math.exp %190 : vector<4x384xf32>
    %cst_106 = arith.constant 1.000000e+00 : f32
    %192 = vector.broadcast %cst_106 : f32 to vector<4x384xf32>
    %193 = arith.addf %192, %191 : vector<4x384xf32>
    %194 = arith.divf %192, %193 : vector<4x384xf32>
    %195 = vector.extract_strided_slice %194 {offsets = [0, 0], sizes = [4, 128], strides = [1, 1]} : vector<4x384xf32> to vector<4x128xf32>
    %196 = vector.extract_strided_slice %194 {offsets = [0, 128], sizes = [4, 128], strides = [1, 1]} : vector<4x384xf32> to vector<4x128xf32>
    %197 = vector.extract_strided_slice %194 {offsets = [0, 256], sizes = [4, 128], strides = [1, 1]} : vector<4x384xf32> to vector<4x128xf32>
    %198 = vector.extract_strided_slice %188 {offsets = [0, 384], sizes = [4, 128], strides = [1, 1]} : vector<4x512xf32> to vector<4x128xf32>
    %199 = math.tanh %198 : vector<4x128xf32>
    %200 = arith.mulf %196, %171 : vector<4x128xf32>
    %201 = arith.mulf %195, %199 : vector<4x128xf32>
    %202 = arith.addf %200, %201 : vector<4x128xf32>
    %203 = math.tanh %202 : vector<4x128xf32>
    %204 = arith.mulf %197, %203 : vector<4x128xf32>
    %205 = vector.extract_strided_slice %204 {offsets = [0, 0], sizes = [2, 128], strides = [1, 1]} : vector<4x128xf32> to vector<2x128xf32>
    %c10_107 = arith.constant 10 : index
    %c0_108 = arith.constant 0 : index
    %206 = vector.load %arg15[%c10_107, %c0_108] : memref<16x256xf32, #tpu.memory_space<vmem>>, vector<2x128xf32>
    tpu.vector_store %arg15[%c10_107, %c0_108], %205 {strides = array<i32>} : memref<16x256xf32, #tpu.memory_space<vmem>>, vector<2x128xf32>,
    %207 = vector.extract_strided_slice %204 {offsets = [2, 0], sizes = [2, 128], strides = [1, 1]} : vector<4x128xf32> to vector<2x128xf32>
    %c4_109 = arith.constant 4 : index
    %c128_110 = arith.constant 128 : index
    %208 = vector.load %arg15[%c4_109, %c128_110] : memref<16x256xf32, #tpu.memory_space<vmem>>, vector<2x128xf32>
    tpu.vector_store %arg15[%c4_109, %c128_110], %207 {strides = array<i32>} : memref<16x256xf32, #tpu.memory_space<vmem>>, vector<2x128xf32>,
    %c0_111 = arith.constant 0 : index
    %c0_112 = arith.constant 0 : index
    %209 = vector.load %arg3[%c0_111, %c0_112] : memref<128x1024xf32, #tpu.memory_space<vmem>>, vector<128x1024xf32>
    %cst_113 = arith.constant dense<0.000000e+00> : vector<4x1024xf32>
    %210 = tpu.matmul %204, %209, %cst_113 {dimension_numbers = #tpu.dot_dimension_numbers<[1], [0], [0], [1], [0, 0, 1, 1], [], []>} : vector<4x128xf32>, vector<128x1024xf32>, vector<4x1024xf32> -> vector<4x1024xf32>
    %c12_114 = arith.constant 12 : index
    %c0_115 = arith.constant 0 : index
    %211 = vector.load %arg14[%c12_114, %c0_115] : memref<16x1024xf32, #tpu.memory_space<vmem>>, vector<2x512xf32>
    %212 = vector.extract_strided_slice %210 {offsets = [0, 0], sizes = [2, 512], strides = [1, 1]} : vector<4x1024xf32> to vector<2x512xf32>
    %213 = arith.addf %211, %212 : vector<2x512xf32>
    %c0_116 = arith.constant 0 : index
    %c0_117 = arith.constant 0 : index
    %214 = vector.load %arg17[%c0_116, %c0_117] : memref<4x512xf32, #tpu.memory_space<vmem>>, vector<2x512xf32>
    tpu.vector_store %arg17[%c0_116, %c0_117], %213 {strides = array<i32>} : memref<4x512xf32, #tpu.memory_space<vmem>>, vector<2x512xf32>,
    %c2_118 = arith.constant 2 : index
    %c512_119 = arith.constant 512 : index
    %215 = vector.load %arg14[%c2_118, %c512_119] : memref<16x1024xf32, #tpu.memory_space<vmem>>, vector<2x512xf32>
    %216 = vector.extract_strided_slice %210 {offsets = [2, 512], sizes = [2, 512], strides = [1, 1]} : vector<4x1024xf32> to vector<2x512xf32>
    %217 = arith.addf %215, %216 : vector<2x512xf32>
    %c2_120 = arith.constant 2 : index
    %c0_121 = arith.constant 0 : index
    %218 = vector.load %arg17[%c2_120, %c0_121] : memref<4x512xf32, #tpu.memory_space<vmem>>, vector<2x512xf32>
    tpu.vector_store %arg17[%c2_120, %c0_121], %217 {strides = array<i32>} : memref<4x512xf32, #tpu.memory_space<vmem>>, vector<2x512xf32>,
    %c0_122 = arith.constant 0 : index
    %c0_123 = arith.constant 0 : index
    %219 = vector.load %arg17[%c0_122, %c0_123] : memref<4x512xf32, #tpu.memory_space<vmem>>, vector<4x512xf32>
    %220 = vector.extract_strided_slice %219 {offsets = [0, 0], sizes = [4, 384], strides = [1, 1]} : vector<4x512xf32> to vector<4x384xf32>
    %221 = arith.negf %220 : vector<4x384xf32>
    %222 = math.exp %221 : vector<4x384xf32>
    %cst_124 = arith.constant 1.000000e+00 : f32
    %223 = vector.broadcast %cst_124 : f32 to vector<4x384xf32>
    %224 = arith.addf %223, %222 : vector<4x384xf32>
    %225 = arith.divf %223, %224 : vector<4x384xf32>
    %226 = vector.extract_strided_slice %225 {offsets = [0, 0], sizes = [4, 128], strides = [1, 1]} : vector<4x384xf32> to vector<4x128xf32>
    %227 = vector.extract_strided_slice %225 {offsets = [0, 128], sizes = [4, 128], strides = [1, 1]} : vector<4x384xf32> to vector<4x128xf32>
    %228 = vector.extract_strided_slice %225 {offsets = [0, 256], sizes = [4, 128], strides = [1, 1]} : vector<4x384xf32> to vector<4x128xf32>
    %229 = vector.extract_strided_slice %219 {offsets = [0, 384], sizes = [4, 128], strides = [1, 1]} : vector<4x512xf32> to vector<4x128xf32>
    %230 = math.tanh %229 : vector<4x128xf32>
    %231 = arith.mulf %227, %202 : vector<4x128xf32>
    %232 = arith.mulf %226, %230 : vector<4x128xf32>
    %233 = arith.addf %231, %232 : vector<4x128xf32>
    %234 = math.tanh %233 : vector<4x128xf32>
    %235 = arith.mulf %228, %234 : vector<4x128xf32>
    %236 = vector.extract_strided_slice %235 {offsets = [0, 0], sizes = [2, 128], strides = [1, 1]} : vector<4x128xf32> to vector<2x128xf32>
    %c12_125 = arith.constant 12 : index
    %c0_126 = arith.constant 0 : index
    %237 = vector.load %arg15[%c12_125, %c0_126] : memref<16x256xf32, #tpu.memory_space<vmem>>, vector<2x128xf32>
    tpu.vector_store %arg15[%c12_125, %c0_126], %236 {strides = array<i32>} : memref<16x256xf32, #tpu.memory_space<vmem>>, vector<2x128xf32>,
    %238 = vector.extract_strided_slice %235 {offsets = [2, 0], sizes = [2, 128], strides = [1, 1]} : vector<4x128xf32> to vector<2x128xf32>
    %c2_127 = arith.constant 2 : index
    %c128_128 = arith.constant 128 : index
    %239 = vector.load %arg15[%c2_127, %c128_128] : memref<16x256xf32, #tpu.memory_space<vmem>>, vector<2x128xf32>
    tpu.vector_store %arg15[%c2_127, %c128_128], %238 {strides = array<i32>} : memref<16x256xf32, #tpu.memory_space<vmem>>, vector<2x128xf32>,
    %c0_129 = arith.constant 0 : index
    %c0_130 = arith.constant 0 : index
    %240 = vector.load %arg3[%c0_129, %c0_130] : memref<128x1024xf32, #tpu.memory_space<vmem>>, vector<128x1024xf32>
    %cst_131 = arith.constant dense<0.000000e+00> : vector<4x1024xf32>
    %241 = tpu.matmul %235, %240, %cst_131 {dimension_numbers = #tpu.dot_dimension_numbers<[1], [0], [0], [1], [0, 0, 1, 1], [], []>} : vector<4x128xf32>, vector<128x1024xf32>, vector<4x1024xf32> -> vector<4x1024xf32>
    %c14_132 = arith.constant 14 : index
    %c0_133 = arith.constant 0 : index
    %242 = vector.load %arg14[%c14_132, %c0_133] : memref<16x1024xf32, #tpu.memory_space<vmem>>, vector<2x512xf32>
    %243 = vector.extract_strided_slice %241 {offsets = [0, 0], sizes = [2, 512], strides = [1, 1]} : vector<4x1024xf32> to vector<2x512xf32>
    %244 = arith.addf %242, %243 : vector<2x512xf32>
    %c0_134 = arith.constant 0 : index
    %c0_135 = arith.constant 0 : index
    %245 = vector.load %arg17[%c0_134, %c0_135] : memref<4x512xf32, #tpu.memory_space<vmem>>, vector<2x512xf32>
    tpu.vector_store %arg17[%c0_134, %c0_135], %244 {strides = array<i32>} : memref<4x512xf32, #tpu.memory_space<vmem>>, vector<2x512xf32>,
    %c0_136 = arith.constant 0 : index
    %c512_137 = arith.constant 512 : index
    %246 = vector.load %arg14[%c0_136, %c512_137] : memref<16x1024xf32, #tpu.memory_space<vmem>>, vector<2x512xf32>
    %247 = vector.extract_strided_slice %241 {offsets = [2, 512], sizes = [2, 512], strides = [1, 1]} : vector<4x1024xf32> to vector<2x512xf32>
    %248 = arith.addf %246, %247 : vector<2x512xf32>
    %c2_138 = arith.constant 2 : index
    %c0_139 = arith.constant 0 : index
    %249 = vector.load %arg17[%c2_138, %c0_139] : memref<4x512xf32, #tpu.memory_space<vmem>>, vector<2x512xf32>
    tpu.vector_store %arg17[%c2_138, %c0_139], %248 {strides = array<i32>} : memref<4x512xf32, #tpu.memory_space<vmem>>, vector<2x512xf32>,
    %c0_140 = arith.constant 0 : index
    %c0_141 = arith.constant 0 : index
    %250 = vector.load %arg17[%c0_140, %c0_141] : memref<4x512xf32, #tpu.memory_space<vmem>>, vector<4x512xf32>
    %251 = vector.extract_strided_slice %250 {offsets = [0, 0], sizes = [4, 384], strides = [1, 1]} : vector<4x512xf32> to vector<4x384xf32>
    %252 = arith.negf %251 : vector<4x384xf32>
    %253 = math.exp %252 : vector<4x384xf32>
    %cst_142 = arith.constant 1.000000e+00 : f32
    %254 = vector.broadcast %cst_142 : f32 to vector<4x384xf32>
    %255 = arith.addf %254, %253 : vector<4x384xf32>
    %256 = arith.divf %254, %255 : vector<4x384xf32>
    %257 = vector.extract_strided_slice %256 {offsets = [0, 0], sizes = [4, 128], strides = [1, 1]} : vector<4x384xf32> to vector<4x128xf32>
    %258 = vector.extract_strided_slice %256 {offsets = [0, 128], sizes = [4, 128], strides = [1, 1]} : vector<4x384xf32> to vector<4x128xf32>
    %259 = vector.extract_strided_slice %256 {offsets = [0, 256], sizes = [4, 128], strides = [1, 1]} : vector<4x384xf32> to vector<4x128xf32>
    %260 = vector.extract_strided_slice %250 {offsets = [0, 384], sizes = [4, 128], strides = [1, 1]} : vector<4x512xf32> to vector<4x128xf32>
    %261 = math.tanh %260 : vector<4x128xf32>
    %262 = arith.mulf %258, %233 : vector<4x128xf32>
    %263 = arith.mulf %257, %261 : vector<4x128xf32>
    %264 = arith.addf %262, %263 : vector<4x128xf32>
    %265 = math.tanh %264 : vector<4x128xf32>
    %266 = arith.mulf %259, %265 : vector<4x128xf32>
    %267 = vector.extract_strided_slice %266 {offsets = [0, 0], sizes = [2, 128], strides = [1, 1]} : vector<4x128xf32> to vector<2x128xf32>
    %c14_143 = arith.constant 14 : index
    %c0_144 = arith.constant 0 : index
    %268 = vector.load %arg15[%c14_143, %c0_144] : memref<16x256xf32, #tpu.memory_space<vmem>>, vector<2x128xf32>
    tpu.vector_store %arg15[%c14_143, %c0_144], %267 {strides = array<i32>} : memref<16x256xf32, #tpu.memory_space<vmem>>, vector<2x128xf32>,
    %269 = vector.extract_strided_slice %266 {offsets = [2, 0], sizes = [2, 128], strides = [1, 1]} : vector<4x128xf32> to vector<2x128xf32>
    %c0_145 = arith.constant 0 : index
    %c128_146 = arith.constant 128 : index
    %270 = vector.load %arg15[%c0_145, %c128_146] : memref<16x256xf32, #tpu.memory_space<vmem>>, vector<2x128xf32>
    tpu.vector_store %arg15[%c0_145, %c128_146], %269 {strides = array<i32>} : memref<16x256xf32, #tpu.memory_space<vmem>>, vector<2x128xf32>,
    %c0_i32_147 = arith.constant 0 : i32
    %271 = tpu.memref_slice %arg21[%c0_i32_147] : memref<3x!tpu.dma_semaphore, #tpu.memory_space<semaphore_mem>> -> memref<1x!tpu.dma_semaphore, #tpu.memory_space<semaphore_mem>>
    %272 = tpu.memref_squeeze %271 : memref<1x!tpu.dma_semaphore, #tpu.memory_space<semaphore_mem>> -> memref<!tpu.dma_semaphore, #tpu.memory_space<semaphore_mem>>
    tpu.wait_dma2 semaphore(%272 : memref<!tpu.dma_semaphore, #tpu.memory_space<semaphore_mem>>) src(%arg5 : memref<256x1024xbf16, #tpu.memory_space<any>>) dst(%arg18 : memref<256x1024xbf16, #tpu.memory_space<vmem>>)
    %c1_i32_148 = arith.constant 1 : i32
    %273 = tpu.memref_slice %arg21[%c1_i32_148] : memref<3x!tpu.dma_semaphore, #tpu.memory_space<semaphore_mem>> -> memref<1x!tpu.dma_semaphore, #tpu.memory_space<semaphore_mem>>
    %274 = tpu.memref_squeeze %273 : memref<1x!tpu.dma_semaphore, #tpu.memory_space<semaphore_mem>> -> memref<!tpu.dma_semaphore, #tpu.memory_space<semaphore_mem>>
    tpu.wait_dma2 semaphore(%274 : memref<!tpu.dma_semaphore, #tpu.memory_space<semaphore_mem>>) src(%arg6 : memref<128x1024xf32, #tpu.memory_space<any>>) dst(%arg19 : memref<128x1024xf32, #tpu.memory_space<vmem>>)
    %c0_149 = arith.constant 0 : index
    %c0_150 = arith.constant 0 : index
    %275 = vector.load %arg15[%c0_149, %c0_150] : memref<16x256xf32, #tpu.memory_space<vmem>>, vector<16x256xf32>
    %c0_151 = arith.constant 0 : index
    %c0_152 = arith.constant 0 : index
    %276 = vector.load %arg18[%c0_151, %c0_152] : memref<256x1024xbf16, #tpu.memory_space<vmem>>, vector<256x1024xbf16>
    %277 = arith.extf %276 : vector<256x1024xbf16> to vector<256x1024xf32>
    %c0_153 = arith.constant 0 : index
    %c0_154 = arith.constant 0 : index
    %278 = vector.load %arg7[%c0_153, %c0_154] : memref<1x1024xf32, #tpu.memory_space<vmem>>, vector<1x1024xf32>
    %cst_155 = arith.constant dense<0.000000e+00> : vector<16x1024xf32>
    %279 = tpu.matmul %275, %277, %cst_155 {dimension_numbers = #tpu.dot_dimension_numbers<[1], [0], [0], [1], [0, 0, 1, 1], [], []>} : vector<16x256xf32>, vector<256x1024xf32>, vector<16x1024xf32> -> vector<16x1024xf32>
    %280 = vector.broadcast %278 : vector<1x1024xf32> to vector<16x1024xf32>
    %281 = arith.addf %279, %280 : vector<16x1024xf32>
    %c0_156 = arith.constant 0 : index
    %c0_157 = arith.constant 0 : index
    %282 = vector.load %arg14[%c0_156, %c0_157] : memref<16x1024xf32, #tpu.memory_space<vmem>>, vector<16x1024xf32>
    tpu.vector_store %arg14[%c0_156, %c0_157], %281 {strides = array<i32>} : memref<16x1024xf32, #tpu.memory_space<vmem>>, vector<16x1024xf32>,
    %cst_158 = arith.constant 0.000000e+00 : f32
    %283 = vector.broadcast %cst_158 : f32 to vector<4x128xf32>
    %cst_159 = arith.constant 0.000000e+00 : f32
    %284 = vector.broadcast %cst_159 : f32 to vector<4x128xf32>
    %c0_160 = arith.constant 0 : index
    %c0_161 = arith.constant 0 : index
    %285 = vector.load %arg19[%c0_160, %c0_161] : memref<128x1024xf32, #tpu.memory_space<vmem>>, vector<128x1024xf32>
    %cst_162 = arith.constant dense<0.000000e+00> : vector<4x1024xf32>
    %286 = tpu.matmul %283, %285, %cst_162 {dimension_numbers = #tpu.dot_dimension_numbers<[1], [0], [0], [1], [0, 0, 1, 1], [], []>} : vector<4x128xf32>, vector<128x1024xf32>, vector<4x1024xf32> -> vector<4x1024xf32>
    %c0_163 = arith.constant 0 : index
    %c0_164 = arith.constant 0 : index
    %287 = vector.load %arg14[%c0_163, %c0_164] : memref<16x1024xf32, #tpu.memory_space<vmem>>, vector<2x512xf32>
    %288 = vector.extract_strided_slice %286 {offsets = [0, 0], sizes = [2, 512], strides = [1, 1]} : vector<4x1024xf32> to vector<2x512xf32>
    %289 = arith.addf %287, %288 : vector<2x512xf32>
    %c0_165 = arith.constant 0 : index
    %c0_166 = arith.constant 0 : index
    %290 = vector.load %arg17[%c0_165, %c0_166] : memref<4x512xf32, #tpu.memory_space<vmem>>, vector<2x512xf32>
    tpu.vector_store %arg17[%c0_165, %c0_166], %289 {strides = array<i32>} : memref<4x512xf32, #tpu.memory_space<vmem>>, vector<2x512xf32>,
    %c14_167 = arith.constant 14 : index
    %c512_168 = arith.constant 512 : index
    %291 = vector.load %arg14[%c14_167, %c512_168] : memref<16x1024xf32, #tpu.memory_space<vmem>>, vector<2x512xf32>
    %292 = vector.extract_strided_slice %286 {offsets = [2, 512], sizes = [2, 512], strides = [1, 1]} : vector<4x1024xf32> to vector<2x512xf32>
    %293 = arith.addf %291, %292 : vector<2x512xf32>
    %c2_169 = arith.constant 2 : index
    %c0_170 = arith.constant 0 : index
    %294 = vector.load %arg17[%c2_169, %c0_170] : memref<4x512xf32, #tpu.memory_space<vmem>>, vector<2x512xf32>
    tpu.vector_store %arg17[%c2_169, %c0_170], %293 {strides = array<i32>} : memref<4x512xf32, #tpu.memory_space<vmem>>, vector<2x512xf32>,
    %c0_171 = arith.constant 0 : index
    %c0_172 = arith.constant 0 : index
    %295 = vector.load %arg17[%c0_171, %c0_172] : memref<4x512xf32, #tpu.memory_space<vmem>>, vector<4x512xf32>
    %296 = vector.extract_strided_slice %295 {offsets = [0, 0], sizes = [4, 384], strides = [1, 1]} : vector<4x512xf32> to vector<4x384xf32>
    %297 = arith.negf %296 : vector<4x384xf32>
    %298 = math.exp %297 : vector<4x384xf32>
    %cst_173 = arith.constant 1.000000e+00 : f32
    %299 = vector.broadcast %cst_173 : f32 to vector<4x384xf32>
    %300 = arith.addf %299, %298 : vector<4x384xf32>
    %301 = arith.divf %299, %300 : vector<4x384xf32>
    %302 = vector.extract_strided_slice %301 {offsets = [0, 0], sizes = [4, 128], strides = [1, 1]} : vector<4x384xf32> to vector<4x128xf32>
    %303 = vector.extract_strided_slice %301 {offsets = [0, 128], sizes = [4, 128], strides = [1, 1]} : vector<4x384xf32> to vector<4x128xf32>
    %304 = vector.extract_strided_slice %301 {offsets = [0, 256], sizes = [4, 128], strides = [1, 1]} : vector<4x384xf32> to vector<4x128xf32>
    %305 = vector.extract_strided_slice %295 {offsets = [0, 384], sizes = [4, 128], strides = [1, 1]} : vector<4x512xf32> to vector<4x128xf32>
    %306 = math.tanh %305 : vector<4x128xf32>
    %307 = arith.mulf %303, %284 : vector<4x128xf32>
    %308 = arith.mulf %302, %306 : vector<4x128xf32>
    %309 = arith.addf %307, %308 : vector<4x128xf32>
    %310 = math.tanh %309 : vector<4x128xf32>
    %311 = arith.mulf %304, %310 : vector<4x128xf32>
    %312 = vector.extract_strided_slice %311 {offsets = [0, 0], sizes = [2, 128], strides = [1, 1]} : vector<4x128xf32> to vector<2x128xf32>
    %c0_174 = arith.constant 0 : index
    %c0_175 = arith.constant 0 : index
    %313 = vector.load %arg16[%c0_174, %c0_175] : memref<16x256xf32, #tpu.memory_space<vmem>>, vector<2x128xf32>
    tpu.vector_store %arg16[%c0_174, %c0_175], %312 {strides = array<i32>} : memref<16x256xf32, #tpu.memory_space<vmem>>, vector<2x128xf32>,
    %314 = vector.extract_strided_slice %311 {offsets = [2, 0], sizes = [2, 128], strides = [1, 1]} : vector<4x128xf32> to vector<2x128xf32>
    %c14_176 = arith.constant 14 : index
    %c128_177 = arith.constant 128 : index
    %315 = vector.load %arg16[%c14_176, %c128_177] : memref<16x256xf32, #tpu.memory_space<vmem>>, vector<2x128xf32>
    tpu.vector_store %arg16[%c14_176, %c128_177], %314 {strides = array<i32>} : memref<16x256xf32, #tpu.memory_space<vmem>>, vector<2x128xf32>,
    %c0_178 = arith.constant 0 : index
    %c0_179 = arith.constant 0 : index
    %316 = vector.load %arg19[%c0_178, %c0_179] : memref<128x1024xf32, #tpu.memory_space<vmem>>, vector<128x1024xf32>
    %cst_180 = arith.constant dense<0.000000e+00> : vector<4x1024xf32>
    %317 = tpu.matmul %311, %316, %cst_180 {dimension_numbers = #tpu.dot_dimension_numbers<[1], [0], [0], [1], [0, 0, 1, 1], [], []>} : vector<4x128xf32>, vector<128x1024xf32>, vector<4x1024xf32> -> vector<4x1024xf32>
    %c2_181 = arith.constant 2 : index
    %c0_182 = arith.constant 0 : index
    %318 = vector.load %arg14[%c2_181, %c0_182] : memref<16x1024xf32, #tpu.memory_space<vmem>>, vector<2x512xf32>
    %319 = vector.extract_strided_slice %317 {offsets = [0, 0], sizes = [2, 512], strides = [1, 1]} : vector<4x1024xf32> to vector<2x512xf32>
    %320 = arith.addf %318, %319 : vector<2x512xf32>
    %c0_183 = arith.constant 0 : index
    %c0_184 = arith.constant 0 : index
    %321 = vector.load %arg17[%c0_183, %c0_184] : memref<4x512xf32, #tpu.memory_space<vmem>>, vector<2x512xf32>
    tpu.vector_store %arg17[%c0_183, %c0_184], %320 {strides = array<i32>} : memref<4x512xf32, #tpu.memory_space<vmem>>, vector<2x512xf32>,
    %c12_185 = arith.constant 12 : index
    %c512_186 = arith.constant 512 : index
    %322 = vector.load %arg14[%c12_185, %c512_186] : memref<16x1024xf32, #tpu.memory_space<vmem>>, vector<2x512xf32>
    %323 = vector.extract_strided_slice %317 {offsets = [2, 512], sizes = [2, 512], strides = [1, 1]} : vector<4x1024xf32> to vector<2x512xf32>
    %324 = arith.addf %322, %323 : vector<2x512xf32>
    %c2_187 = arith.constant 2 : index
    %c0_188 = arith.constant 0 : index
    %325 = vector.load %arg17[%c2_187, %c0_188] : memref<4x512xf32, #tpu.memory_space<vmem>>, vector<2x512xf32>
    tpu.vector_store %arg17[%c2_187, %c0_188], %324 {strides = array<i32>} : memref<4x512xf32, #tpu.memory_space<vmem>>, vector<2x512xf32>,
    %c0_189 = arith.constant 0 : index
    %c0_190 = arith.constant 0 : index
    %326 = vector.load %arg17[%c0_189, %c0_190] : memref<4x512xf32, #tpu.memory_space<vmem>>, vector<4x512xf32>
    %327 = vector.extract_strided_slice %326 {offsets = [0, 0], sizes = [4, 384], strides = [1, 1]} : vector<4x512xf32> to vector<4x384xf32>
    %328 = arith.negf %327 : vector<4x384xf32>
    %329 = math.exp %328 : vector<4x384xf32>
    %cst_191 = arith.constant 1.000000e+00 : f32
    %330 = vector.broadcast %cst_191 : f32 to vector<4x384xf32>
    %331 = arith.addf %330, %329 : vector<4x384xf32>
    %332 = arith.divf %330, %331 : vector<4x384xf32>
    %333 = vector.extract_strided_slice %332 {offsets = [0, 0], sizes = [4, 128], strides = [1, 1]} : vector<4x384xf32> to vector<4x128xf32>
    %334 = vector.extract_strided_slice %332 {offsets = [0, 128], sizes = [4, 128], strides = [1, 1]} : vector<4x384xf32> to vector<4x128xf32>
    %335 = vector.extract_strided_slice %332 {offsets = [0, 256], sizes = [4, 128], strides = [1, 1]} : vector<4x384xf32> to vector<4x128xf32>
    %336 = vector.extract_strided_slice %326 {offsets = [0, 384], sizes = [4, 128], strides = [1, 1]} : vector<4x512xf32> to vector<4x128xf32>
    %337 = math.tanh %336 : vector<4x128xf32>
    %338 = arith.mulf %334, %309 : vector<4x128xf32>
    %339 = arith.mulf %333, %337 : vector<4x128xf32>
    %340 = arith.addf %338, %339 : vector<4x128xf32>
    %341 = math.tanh %340 : vector<4x128xf32>
    %342 = arith.mulf %335, %341 : vector<4x128xf32>
    %343 = vector.extract_strided_slice %342 {offsets = [0, 0], sizes = [2, 128], strides = [1, 1]} : vector<4x128xf32> to vector<2x128xf32>
    %c2_192 = arith.constant 2 : index
    %c0_193 = arith.constant 0 : index
    %344 = vector.load %arg16[%c2_192, %c0_193] : memref<16x256xf32, #tpu.memory_space<vmem>>, vector<2x128xf32>
    tpu.vector_store %arg16[%c2_192, %c0_193], %343 {strides = array<i32>} : memref<16x256xf32, #tpu.memory_space<vmem>>, vector<2x128xf32>,
    %345 = vector.extract_strided_slice %342 {offsets = [2, 0], sizes = [2, 128], strides = [1, 1]} : vector<4x128xf32> to vector<2x128xf32>
    %c12_194 = arith.constant 12 : index
    %c128_195 = arith.constant 128 : index
    %346 = vector.load %arg16[%c12_194, %c128_195] : memref<16x256xf32, #tpu.memory_space<vmem>>, vector<2x128xf32>
    tpu.vector_store %arg16[%c12_194, %c128_195], %345 {strides = array<i32>} : memref<16x256xf32, #tpu.memory_space<vmem>>, vector<2x128xf32>,
    %c0_196 = arith.constant 0 : index
    %c0_197 = arith.constant 0 : index
    %347 = vector.load %arg19[%c0_196, %c0_197] : memref<128x1024xf32, #tpu.memory_space<vmem>>, vector<128x1024xf32>
    %cst_198 = arith.constant dense<0.000000e+00> : vector<4x1024xf32>
    %348 = tpu.matmul %342, %347, %cst_198 {dimension_numbers = #tpu.dot_dimension_numbers<[1], [0], [0], [1], [0, 0, 1, 1], [], []>} : vector<4x128xf32>, vector<128x1024xf32>, vector<4x1024xf32> -> vector<4x1024xf32>
    %c4_199 = arith.constant 4 : index
    %c0_200 = arith.constant 0 : index
    %349 = vector.load %arg14[%c4_199, %c0_200] : memref<16x1024xf32, #tpu.memory_space<vmem>>, vector<2x512xf32>
    %350 = vector.extract_strided_slice %348 {offsets = [0, 0], sizes = [2, 512], strides = [1, 1]} : vector<4x1024xf32> to vector<2x512xf32>
    %351 = arith.addf %349, %350 : vector<2x512xf32>
    %c0_201 = arith.constant 0 : index
    %c0_202 = arith.constant 0 : index
    %352 = vector.load %arg17[%c0_201, %c0_202] : memref<4x512xf32, #tpu.memory_space<vmem>>, vector<2x512xf32>
    tpu.vector_store %arg17[%c0_201, %c0_202], %351 {strides = array<i32>} : memref<4x512xf32, #tpu.memory_space<vmem>>, vector<2x512xf32>,
    %c10_203 = arith.constant 10 : index
    %c512_204 = arith.constant 512 : index
    %353 = vector.load %arg14[%c10_203, %c512_204] : memref<16x1024xf32, #tpu.memory_space<vmem>>, vector<2x512xf32>
    %354 = vector.extract_strided_slice %348 {offsets = [2, 512], sizes = [2, 512], strides = [1, 1]} : vector<4x1024xf32> to vector<2x512xf32>
    %355 = arith.addf %353, %354 : vector<2x512xf32>
    %c2_205 = arith.constant 2 : index
    %c0_206 = arith.constant 0 : index
    %356 = vector.load %arg17[%c2_205, %c0_206] : memref<4x512xf32, #tpu.memory_space<vmem>>, vector<2x512xf32>
    tpu.vector_store %arg17[%c2_205, %c0_206], %355 {strides = array<i32>} : memref<4x512xf32, #tpu.memory_space<vmem>>, vector<2x512xf32>,
    %c0_207 = arith.constant 0 : index
    %c0_208 = arith.constant 0 : index
    %357 = vector.load %arg17[%c0_207, %c0_208] : memref<4x512xf32, #tpu.memory_space<vmem>>, vector<4x512xf32>
    %358 = vector.extract_strided_slice %357 {offsets = [0, 0], sizes = [4, 384], strides = [1, 1]} : vector<4x512xf32> to vector<4x384xf32>
    %359 = arith.negf %358 : vector<4x384xf32>
    %360 = math.exp %359 : vector<4x384xf32>
    %cst_209 = arith.constant 1.000000e+00 : f32
    %361 = vector.broadcast %cst_209 : f32 to vector<4x384xf32>
    %362 = arith.addf %361, %360 : vector<4x384xf32>
    %363 = arith.divf %361, %362 : vector<4x384xf32>
    %364 = vector.extract_strided_slice %363 {offsets = [0, 0], sizes = [4, 128], strides = [1, 1]} : vector<4x384xf32> to vector<4x128xf32>
    %365 = vector.extract_strided_slice %363 {offsets = [0, 128], sizes = [4, 128], strides = [1, 1]} : vector<4x384xf32> to vector<4x128xf32>
    %366 = vector.extract_strided_slice %363 {offsets = [0, 256], sizes = [4, 128], strides = [1, 1]} : vector<4x384xf32> to vector<4x128xf32>
    %367 = vector.extract_strided_slice %357 {offsets = [0, 384], sizes = [4, 128], strides = [1, 1]} : vector<4x512xf32> to vector<4x128xf32>
    %368 = math.tanh %367 : vector<4x128xf32>
    %369 = arith.mulf %365, %340 : vector<4x128xf32>
    %370 = arith.mulf %364, %368 : vector<4x128xf32>
    %371 = arith.addf %369, %370 : vector<4x128xf32>
    %372 = math.tanh %371 : vector<4x128xf32>
    %373 = arith.mulf %366, %372 : vector<4x128xf32>
    %374 = vector.extract_strided_slice %373 {offsets = [0, 0], sizes = [2, 128], strides = [1, 1]} : vector<4x128xf32> to vector<2x128xf32>
    %c4_210 = arith.constant 4 : index
    %c0_211 = arith.constant 0 : index
    %375 = vector.load %arg16[%c4_210, %c0_211] : memref<16x256xf32, #tpu.memory_space<vmem>>, vector<2x128xf32>
    tpu.vector_store %arg16[%c4_210, %c0_211], %374 {strides = array<i32>} : memref<16x256xf32, #tpu.memory_space<vmem>>, vector<2x128xf32>,
    %376 = vector.extract_strided_slice %373 {offsets = [2, 0], sizes = [2, 128], strides = [1, 1]} : vector<4x128xf32> to vector<2x128xf32>
    %c10_212 = arith.constant 10 : index
    %c128_213 = arith.constant 128 : index
    %377 = vector.load %arg16[%c10_212, %c128_213] : memref<16x256xf32, #tpu.memory_space<vmem>>, vector<2x128xf32>
    tpu.vector_store %arg16[%c10_212, %c128_213], %376 {strides = array<i32>} : memref<16x256xf32, #tpu.memory_space<vmem>>, vector<2x128xf32>,
    %c0_214 = arith.constant 0 : index
    %c0_215 = arith.constant 0 : index
    %378 = vector.load %arg19[%c0_214, %c0_215] : memref<128x1024xf32, #tpu.memory_space<vmem>>, vector<128x1024xf32>
    %cst_216 = arith.constant dense<0.000000e+00> : vector<4x1024xf32>
    %379 = tpu.matmul %373, %378, %cst_216 {dimension_numbers = #tpu.dot_dimension_numbers<[1], [0], [0], [1], [0, 0, 1, 1], [], []>} : vector<4x128xf32>, vector<128x1024xf32>, vector<4x1024xf32> -> vector<4x1024xf32>
    %c6_217 = arith.constant 6 : index
    %c0_218 = arith.constant 0 : index
    %380 = vector.load %arg14[%c6_217, %c0_218] : memref<16x1024xf32, #tpu.memory_space<vmem>>, vector<2x512xf32>
    %381 = vector.extract_strided_slice %379 {offsets = [0, 0], sizes = [2, 512], strides = [1, 1]} : vector<4x1024xf32> to vector<2x512xf32>
    %382 = arith.addf %380, %381 : vector<2x512xf32>
    %c0_219 = arith.constant 0 : index
    %c0_220 = arith.constant 0 : index
    %383 = vector.load %arg17[%c0_219, %c0_220] : memref<4x512xf32, #tpu.memory_space<vmem>>, vector<2x512xf32>
    tpu.vector_store %arg17[%c0_219, %c0_220], %382 {strides = array<i32>} : memref<4x512xf32, #tpu.memory_space<vmem>>, vector<2x512xf32>,
    %c8_221 = arith.constant 8 : index
    %c512_222 = arith.constant 512 : index
    %384 = vector.load %arg14[%c8_221, %c512_222] : memref<16x1024xf32, #tpu.memory_space<vmem>>, vector<2x512xf32>
    %385 = vector.extract_strided_slice %379 {offsets = [2, 512], sizes = [2, 512], strides = [1, 1]} : vector<4x1024xf32> to vector<2x512xf32>
    %386 = arith.addf %384, %385 : vector<2x512xf32>
    %c2_223 = arith.constant 2 : index
    %c0_224 = arith.constant 0 : index
    %387 = vector.load %arg17[%c2_223, %c0_224] : memref<4x512xf32, #tpu.memory_space<vmem>>, vector<2x512xf32>
    tpu.vector_store %arg17[%c2_223, %c0_224], %386 {strides = array<i32>} : memref<4x512xf32, #tpu.memory_space<vmem>>, vector<2x512xf32>,
    %c0_225 = arith.constant 0 : index
    %c0_226 = arith.constant 0 : index
    %388 = vector.load %arg17[%c0_225, %c0_226] : memref<4x512xf32, #tpu.memory_space<vmem>>, vector<4x512xf32>
    %389 = vector.extract_strided_slice %388 {offsets = [0, 0], sizes = [4, 384], strides = [1, 1]} : vector<4x512xf32> to vector<4x384xf32>
    %390 = arith.negf %389 : vector<4x384xf32>
    %391 = math.exp %390 : vector<4x384xf32>
    %cst_227 = arith.constant 1.000000e+00 : f32
    %392 = vector.broadcast %cst_227 : f32 to vector<4x384xf32>
    %393 = arith.addf %392, %391 : vector<4x384xf32>
    %394 = arith.divf %392, %393 : vector<4x384xf32>
    %395 = vector.extract_strided_slice %394 {offsets = [0, 0], sizes = [4, 128], strides = [1, 1]} : vector<4x384xf32> to vector<4x128xf32>
    %396 = vector.extract_strided_slice %394 {offsets = [0, 128], sizes = [4, 128], strides = [1, 1]} : vector<4x384xf32> to vector<4x128xf32>
    %397 = vector.extract_strided_slice %394 {offsets = [0, 256], sizes = [4, 128], strides = [1, 1]} : vector<4x384xf32> to vector<4x128xf32>
    %398 = vector.extract_strided_slice %388 {offsets = [0, 384], sizes = [4, 128], strides = [1, 1]} : vector<4x512xf32> to vector<4x128xf32>
    %399 = math.tanh %398 : vector<4x128xf32>
    %400 = arith.mulf %396, %371 : vector<4x128xf32>
    %401 = arith.mulf %395, %399 : vector<4x128xf32>
    %402 = arith.addf %400, %401 : vector<4x128xf32>
    %403 = math.tanh %402 : vector<4x128xf32>
    %404 = arith.mulf %397, %403 : vector<4x128xf32>
    %405 = vector.extract_strided_slice %404 {offsets = [0, 0], sizes = [2, 128], strides = [1, 1]} : vector<4x128xf32> to vector<2x128xf32>
    %c6_228 = arith.constant 6 : index
    %c0_229 = arith.constant 0 : index
    %406 = vector.load %arg16[%c6_228, %c0_229] : memref<16x256xf32, #tpu.memory_space<vmem>>, vector<2x128xf32>
    tpu.vector_store %arg16[%c6_228, %c0_229], %405 {strides = array<i32>} : memref<16x256xf32, #tpu.memory_space<vmem>>, vector<2x128xf32>,
    %407 = vector.extract_strided_slice %404 {offsets = [2, 0], sizes = [2, 128], strides = [1, 1]} : vector<4x128xf32> to vector<2x128xf32>
    %c8_230 = arith.constant 8 : index
    %c128_231 = arith.constant 128 : index
    %408 = vector.load %arg16[%c8_230, %c128_231] : memref<16x256xf32, #tpu.memory_space<vmem>>, vector<2x128xf32>
    tpu.vector_store %arg16[%c8_230, %c128_231], %407 {strides = array<i32>} : memref<16x256xf32, #tpu.memory_space<vmem>>, vector<2x128xf32>,
    %c0_232 = arith.constant 0 : index
    %c0_233 = arith.constant 0 : index
    %409 = vector.load %arg19[%c0_232, %c0_233] : memref<128x1024xf32, #tpu.memory_space<vmem>>, vector<128x1024xf32>
    %cst_234 = arith.constant dense<0.000000e+00> : vector<4x1024xf32>
    %410 = tpu.matmul %404, %409, %cst_234 {dimension_numbers = #tpu.dot_dimension_numbers<[1], [0], [0], [1], [0, 0, 1, 1], [], []>} : vector<4x128xf32>, vector<128x1024xf32>, vector<4x1024xf32> -> vector<4x1024xf32>
    %c8_235 = arith.constant 8 : index
    %c0_236 = arith.constant 0 : index
    %411 = vector.load %arg14[%c8_235, %c0_236] : memref<16x1024xf32, #tpu.memory_space<vmem>>, vector<2x512xf32>
    %412 = vector.extract_strided_slice %410 {offsets = [0, 0], sizes = [2, 512], strides = [1, 1]} : vector<4x1024xf32> to vector<2x512xf32>
    %413 = arith.addf %411, %412 : vector<2x512xf32>
    %c0_237 = arith.constant 0 : index
    %c0_238 = arith.constant 0 : index
    %414 = vector.load %arg17[%c0_237, %c0_238] : memref<4x512xf32, #tpu.memory_space<vmem>>, vector<2x512xf32>
    tpu.vector_store %arg17[%c0_237, %c0_238], %413 {strides = array<i32>} : memref<4x512xf32, #tpu.memory_space<vmem>>, vector<2x512xf32>,
    %c6_239 = arith.constant 6 : index
    %c512_240 = arith.constant 512 : index
    %415 = vector.load %arg14[%c6_239, %c512_240] : memref<16x1024xf32, #tpu.memory_space<vmem>>, vector<2x512xf32>
    %416 = vector.extract_strided_slice %410 {offsets = [2, 512], sizes = [2, 512], strides = [1, 1]} : vector<4x1024xf32> to vector<2x512xf32>
    %417 = arith.addf %415, %416 : vector<2x512xf32>
    %c2_241 = arith.constant 2 : index
    %c0_242 = arith.constant 0 : index
    %418 = vector.load %arg17[%c2_241, %c0_242] : memref<4x512xf32, #tpu.memory_space<vmem>>, vector<2x512xf32>
    tpu.vector_store %arg17[%c2_241, %c0_242], %417 {strides = array<i32>} : memref<4x512xf32, #tpu.memory_space<vmem>>, vector<2x512xf32>,
    %c0_243 = arith.constant 0 : index
    %c0_244 = arith.constant 0 : index
    %419 = vector.load %arg17[%c0_243, %c0_244] : memref<4x512xf32, #tpu.memory_space<vmem>>, vector<4x512xf32>
    %420 = vector.extract_strided_slice %419 {offsets = [0, 0], sizes = [4, 384], strides = [1, 1]} : vector<4x512xf32> to vector<4x384xf32>
    %421 = arith.negf %420 : vector<4x384xf32>
    %422 = math.exp %421 : vector<4x384xf32>
    %cst_245 = arith.constant 1.000000e+00 : f32
    %423 = vector.broadcast %cst_245 : f32 to vector<4x384xf32>
    %424 = arith.addf %423, %422 : vector<4x384xf32>
    %425 = arith.divf %423, %424 : vector<4x384xf32>
    %426 = vector.extract_strided_slice %425 {offsets = [0, 0], sizes = [4, 128], strides = [1, 1]} : vector<4x384xf32> to vector<4x128xf32>
    %427 = vector.extract_strided_slice %425 {offsets = [0, 128], sizes = [4, 128], strides = [1, 1]} : vector<4x384xf32> to vector<4x128xf32>
    %428 = vector.extract_strided_slice %425 {offsets = [0, 256], sizes = [4, 128], strides = [1, 1]} : vector<4x384xf32> to vector<4x128xf32>
    %429 = vector.extract_strided_slice %419 {offsets = [0, 384], sizes = [4, 128], strides = [1, 1]} : vector<4x512xf32> to vector<4x128xf32>
    %430 = math.tanh %429 : vector<4x128xf32>
    %431 = arith.mulf %427, %402 : vector<4x128xf32>
    %432 = arith.mulf %426, %430 : vector<4x128xf32>
    %433 = arith.addf %431, %432 : vector<4x128xf32>
    %434 = math.tanh %433 : vector<4x128xf32>
    %435 = arith.mulf %428, %434 : vector<4x128xf32>
    %436 = vector.extract_strided_slice %435 {offsets = [0, 0], sizes = [2, 128], strides = [1, 1]} : vector<4x128xf32> to vector<2x128xf32>
    %c8_246 = arith.constant 8 : index
    %c0_247 = arith.constant 0 : index
    %437 = vector.load %arg16[%c8_246, %c0_247] : memref<16x256xf32, #tpu.memory_space<vmem>>, vector<2x128xf32>
    tpu.vector_store %arg16[%c8_246, %c0_247], %436 {strides = array<i32>} : memref<16x256xf32, #tpu.memory_space<vmem>>, vector<2x128xf32>,
    %438 = vector.extract_strided_slice %435 {offsets = [2, 0], sizes = [2, 128], strides = [1, 1]} : vector<4x128xf32> to vector<2x128xf32>
    %c6_248 = arith.constant 6 : index
    %c128_249 = arith.constant 128 : index
    %439 = vector.load %arg16[%c6_248, %c128_249] : memref<16x256xf32, #tpu.memory_space<vmem>>, vector<2x128xf32>
    tpu.vector_store %arg16[%c6_248, %c128_249], %438 {strides = array<i32>} : memref<16x256xf32, #tpu.memory_space<vmem>>, vector<2x128xf32>,
    %c0_250 = arith.constant 0 : index
    %c0_251 = arith.constant 0 : index
    %440 = vector.load %arg19[%c0_250, %c0_251] : memref<128x1024xf32, #tpu.memory_space<vmem>>, vector<128x1024xf32>
    %cst_252 = arith.constant dense<0.000000e+00> : vector<4x1024xf32>
    %441 = tpu.matmul %435, %440, %cst_252 {dimension_numbers = #tpu.dot_dimension_numbers<[1], [0], [0], [1], [0, 0, 1, 1], [], []>} : vector<4x128xf32>, vector<128x1024xf32>, vector<4x1024xf32> -> vector<4x1024xf32>
    %c10_253 = arith.constant 10 : index
    %c0_254 = arith.constant 0 : index
    %442 = vector.load %arg14[%c10_253, %c0_254] : memref<16x1024xf32, #tpu.memory_space<vmem>>, vector<2x512xf32>
    %443 = vector.extract_strided_slice %441 {offsets = [0, 0], sizes = [2, 512], strides = [1, 1]} : vector<4x1024xf32> to vector<2x512xf32>
    %444 = arith.addf %442, %443 : vector<2x512xf32>
    %c0_255 = arith.constant 0 : index
    %c0_256 = arith.constant 0 : index
    %445 = vector.load %arg17[%c0_255, %c0_256] : memref<4x512xf32, #tpu.memory_space<vmem>>, vector<2x512xf32>
    tpu.vector_store %arg17[%c0_255, %c0_256], %444 {strides = array<i32>} : memref<4x512xf32, #tpu.memory_space<vmem>>, vector<2x512xf32>,
    %c4_257 = arith.constant 4 : index
    %c512_258 = arith.constant 512 : index
    %446 = vector.load %arg14[%c4_257, %c512_258] : memref<16x1024xf32, #tpu.memory_space<vmem>>, vector<2x512xf32>
    %447 = vector.extract_strided_slice %441 {offsets = [2, 512], sizes = [2, 512], strides = [1, 1]} : vector<4x1024xf32> to vector<2x512xf32>
    %448 = arith.addf %446, %447 : vector<2x512xf32>
    %c2_259 = arith.constant 2 : index
    %c0_260 = arith.constant 0 : index
    %449 = vector.load %arg17[%c2_259, %c0_260] : memref<4x512xf32, #tpu.memory_space<vmem>>, vector<2x512xf32>
    tpu.vector_store %arg17[%c2_259, %c0_260], %448 {strides = array<i32>} : memref<4x512xf32, #tpu.memory_space<vmem>>, vector<2x512xf32>,
    %c0_261 = arith.constant 0 : index
    %c0_262 = arith.constant 0 : index
    %450 = vector.load %arg17[%c0_261, %c0_262] : memref<4x512xf32, #tpu.memory_space<vmem>>, vector<4x512xf32>
    %451 = vector.extract_strided_slice %450 {offsets = [0, 0], sizes = [4, 384], strides = [1, 1]} : vector<4x512xf32> to vector<4x384xf32>
    %452 = arith.negf %451 : vector<4x384xf32>
    %453 = math.exp %452 : vector<4x384xf32>
    %cst_263 = arith.constant 1.000000e+00 : f32
    %454 = vector.broadcast %cst_263 : f32 to vector<4x384xf32>
    %455 = arith.addf %454, %453 : vector<4x384xf32>
    %456 = arith.divf %454, %455 : vector<4x384xf32>
    %457 = vector.extract_strided_slice %456 {offsets = [0, 0], sizes = [4, 128], strides = [1, 1]} : vector<4x384xf32> to vector<4x128xf32>
    %458 = vector.extract_strided_slice %456 {offsets = [0, 128], sizes = [4, 128], strides = [1, 1]} : vector<4x384xf32> to vector<4x128xf32>
    %459 = vector.extract_strided_slice %456 {offsets = [0, 256], sizes = [4, 128], strides = [1, 1]} : vector<4x384xf32> to vector<4x128xf32>
    %460 = vector.extract_strided_slice %450 {offsets = [0, 384], sizes = [4, 128], strides = [1, 1]} : vector<4x512xf32> to vector<4x128xf32>
    %461 = math.tanh %460 : vector<4x128xf32>
    %462 = arith.mulf %458, %433 : vector<4x128xf32>
    %463 = arith.mulf %457, %461 : vector<4x128xf32>
    %464 = arith.addf %462, %463 : vector<4x128xf32>
    %465 = math.tanh %464 : vector<4x128xf32>
    %466 = arith.mulf %459, %465 : vector<4x128xf32>
    %467 = vector.extract_strided_slice %466 {offsets = [0, 0], sizes = [2, 128], strides = [1, 1]} : vector<4x128xf32> to vector<2x128xf32>
    %c10_264 = arith.constant 10 : index
    %c0_265 = arith.constant 0 : index
    %468 = vector.load %arg16[%c10_264, %c0_265] : memref<16x256xf32, #tpu.memory_space<vmem>>, vector<2x128xf32>
    tpu.vector_store %arg16[%c10_264, %c0_265], %467 {strides = array<i32>} : memref<16x256xf32, #tpu.memory_space<vmem>>, vector<2x128xf32>,
    %469 = vector.extract_strided_slice %466 {offsets = [2, 0], sizes = [2, 128], strides = [1, 1]} : vector<4x128xf32> to vector<2x128xf32>
    %c4_266 = arith.constant 4 : index
    %c128_267 = arith.constant 128 : index
    %470 = vector.load %arg16[%c4_266, %c128_267] : memref<16x256xf32, #tpu.memory_space<vmem>>, vector<2x128xf32>
    tpu.vector_store %arg16[%c4_266, %c128_267], %469 {strides = array<i32>} : memref<16x256xf32, #tpu.memory_space<vmem>>, vector<2x128xf32>,
    %c0_268 = arith.constant 0 : index
    %c0_269 = arith.constant 0 : index
    %471 = vector.load %arg19[%c0_268, %c0_269] : memref<128x1024xf32, #tpu.memory_space<vmem>>, vector<128x1024xf32>
    %cst_270 = arith.constant dense<0.000000e+00> : vector<4x1024xf32>
    %472 = tpu.matmul %466, %471, %cst_270 {dimension_numbers = #tpu.dot_dimension_numbers<[1], [0], [0], [1], [0, 0, 1, 1], [], []>} : vector<4x128xf32>, vector<128x1024xf32>, vector<4x1024xf32> -> vector<4x1024xf32>
    %c12_271 = arith.constant 12 : index
    %c0_272 = arith.constant 0 : index
    %473 = vector.load %arg14[%c12_271, %c0_272] : memref<16x1024xf32, #tpu.memory_space<vmem>>, vector<2x512xf32>
    %474 = vector.extract_strided_slice %472 {offsets = [0, 0], sizes = [2, 512], strides = [1, 1]} : vector<4x1024xf32> to vector<2x512xf32>
    %475 = arith.addf %473, %474 : vector<2x512xf32>
    %c0_273 = arith.constant 0 : index
    %c0_274 = arith.constant 0 : index
    %476 = vector.load %arg17[%c0_273, %c0_274] : memref<4x512xf32, #tpu.memory_space<vmem>>, vector<2x512xf32>
    tpu.vector_store %arg17[%c0_273, %c0_274], %475 {strides = array<i32>} : memref<4x512xf32, #tpu.memory_space<vmem>>, vector<2x512xf32>,
    %c2_275 = arith.constant 2 : index
    %c512_276 = arith.constant 512 : index
    %477 = vector.load %arg14[%c2_275, %c512_276] : memref<16x1024xf32, #tpu.memory_space<vmem>>, vector<2x512xf32>
    %478 = vector.extract_strided_slice %472 {offsets = [2, 512], sizes = [2, 512], strides = [1, 1]} : vector<4x1024xf32> to vector<2x512xf32>
    %479 = arith.addf %477, %478 : vector<2x512xf32>
    %c2_277 = arith.constant 2 : index
    %c0_278 = arith.constant 0 : index
    %480 = vector.load %arg17[%c2_277, %c0_278] : memref<4x512xf32, #tpu.memory_space<vmem>>, vector<2x512xf32>
    tpu.vector_store %arg17[%c2_277, %c0_278], %479 {strides = array<i32>} : memref<4x512xf32, #tpu.memory_space<vmem>>, vector<2x512xf32>,
    %c0_279 = arith.constant 0 : index
    %c0_280 = arith.constant 0 : index
    %481 = vector.load %arg17[%c0_279, %c0_280] : memref<4x512xf32, #tpu.memory_space<vmem>>, vector<4x512xf32>
    %482 = vector.extract_strided_slice %481 {offsets = [0, 0], sizes = [4, 384], strides = [1, 1]} : vector<4x512xf32> to vector<4x384xf32>
    %483 = arith.negf %482 : vector<4x384xf32>
    %484 = math.exp %483 : vector<4x384xf32>
    %cst_281 = arith.constant 1.000000e+00 : f32
    %485 = vector.broadcast %cst_281 : f32 to vector<4x384xf32>
    %486 = arith.addf %485, %484 : vector<4x384xf32>
    %487 = arith.divf %485, %486 : vector<4x384xf32>
    %488 = vector.extract_strided_slice %487 {offsets = [0, 0], sizes = [4, 128], strides = [1, 1]} : vector<4x384xf32> to vector<4x128xf32>
    %489 = vector.extract_strided_slice %487 {offsets = [0, 128], sizes = [4, 128], strides = [1, 1]} : vector<4x384xf32> to vector<4x128xf32>
    %490 = vector.extract_strided_slice %487 {offsets = [0, 256], sizes = [4, 128], strides = [1, 1]} : vector<4x384xf32> to vector<4x128xf32>
    %491 = vector.extract_strided_slice %481 {offsets = [0, 384], sizes = [4, 128], strides = [1, 1]} : vector<4x512xf32> to vector<4x128xf32>
    %492 = math.tanh %491 : vector<4x128xf32>
    %493 = arith.mulf %489, %464 : vector<4x128xf32>
    %494 = arith.mulf %488, %492 : vector<4x128xf32>
    %495 = arith.addf %493, %494 : vector<4x128xf32>
    %496 = math.tanh %495 : vector<4x128xf32>
    %497 = arith.mulf %490, %496 : vector<4x128xf32>
    %498 = vector.extract_strided_slice %497 {offsets = [0, 0], sizes = [2, 128], strides = [1, 1]} : vector<4x128xf32> to vector<2x128xf32>
    %c12_282 = arith.constant 12 : index
    %c0_283 = arith.constant 0 : index
    %499 = vector.load %arg16[%c12_282, %c0_283] : memref<16x256xf32, #tpu.memory_space<vmem>>, vector<2x128xf32>
    tpu.vector_store %arg16[%c12_282, %c0_283], %498 {strides = array<i32>} : memref<16x256xf32, #tpu.memory_space<vmem>>, vector<2x128xf32>,
    %500 = vector.extract_strided_slice %497 {offsets = [2, 0], sizes = [2, 128], strides = [1, 1]} : vector<4x128xf32> to vector<2x128xf32>
    %c2_284 = arith.constant 2 : index
    %c128_285 = arith.constant 128 : index
    %501 = vector.load %arg16[%c2_284, %c128_285] : memref<16x256xf32, #tpu.memory_space<vmem>>, vector<2x128xf32>
    tpu.vector_store %arg16[%c2_284, %c128_285], %500 {strides = array<i32>} : memref<16x256xf32, #tpu.memory_space<vmem>>, vector<2x128xf32>,
    %c0_286 = arith.constant 0 : index
    %c0_287 = arith.constant 0 : index
    %502 = vector.load %arg19[%c0_286, %c0_287] : memref<128x1024xf32, #tpu.memory_space<vmem>>, vector<128x1024xf32>
    %cst_288 = arith.constant dense<0.000000e+00> : vector<4x1024xf32>
    %503 = tpu.matmul %497, %502, %cst_288 {dimension_numbers = #tpu.dot_dimension_numbers<[1], [0], [0], [1], [0, 0, 1, 1], [], []>} : vector<4x128xf32>, vector<128x1024xf32>, vector<4x1024xf32> -> vector<4x1024xf32>
    %c14_289 = arith.constant 14 : index
    %c0_290 = arith.constant 0 : index
    %504 = vector.load %arg14[%c14_289, %c0_290] : memref<16x1024xf32, #tpu.memory_space<vmem>>, vector<2x512xf32>
    %505 = vector.extract_strided_slice %503 {offsets = [0, 0], sizes = [2, 512], strides = [1, 1]} : vector<4x1024xf32> to vector<2x512xf32>
    %506 = arith.addf %504, %505 : vector<2x512xf32>
    %c0_291 = arith.constant 0 : index
    %c0_292 = arith.constant 0 : index
    %507 = vector.load %arg17[%c0_291, %c0_292] : memref<4x512xf32, #tpu.memory_space<vmem>>, vector<2x512xf32>
    tpu.vector_store %arg17[%c0_291, %c0_292], %506 {strides = array<i32>} : memref<4x512xf32, #tpu.memory_space<vmem>>, vector<2x512xf32>,
    %c0_293 = arith.constant 0 : index
    %c512_294 = arith.constant 512 : index
    %508 = vector.load %arg14[%c0_293, %c512_294] : memref<16x1024xf32, #tpu.memory_space<vmem>>, vector<2x512xf32>
    %509 = vector.extract_strided_slice %503 {offsets = [2, 512], sizes = [2, 512], strides = [1, 1]} : vector<4x1024xf32> to vector<2x512xf32>
    %510 = arith.addf %508, %509 : vector<2x512xf32>
    %c2_295 = arith.constant 2 : index
    %c0_296 = arith.constant 0 : index
    %511 = vector.load %arg17[%c2_295, %c0_296] : memref<4x512xf32, #tpu.memory_space<vmem>>, vector<2x512xf32>
    tpu.vector_store %arg17[%c2_295, %c0_296], %510 {strides = array<i32>} : memref<4x512xf32, #tpu.memory_space<vmem>>, vector<2x512xf32>,
    %c0_297 = arith.constant 0 : index
    %c0_298 = arith.constant 0 : index
    %512 = vector.load %arg17[%c0_297, %c0_298] : memref<4x512xf32, #tpu.memory_space<vmem>>, vector<4x512xf32>
    %513 = vector.extract_strided_slice %512 {offsets = [0, 0], sizes = [4, 384], strides = [1, 1]} : vector<4x512xf32> to vector<4x384xf32>
    %514 = arith.negf %513 : vector<4x384xf32>
    %515 = math.exp %514 : vector<4x384xf32>
    %cst_299 = arith.constant 1.000000e+00 : f32
    %516 = vector.broadcast %cst_299 : f32 to vector<4x384xf32>
    %517 = arith.addf %516, %515 : vector<4x384xf32>
    %518 = arith.divf %516, %517 : vector<4x384xf32>
    %519 = vector.extract_strided_slice %518 {offsets = [0, 0], sizes = [4, 128], strides = [1, 1]} : vector<4x384xf32> to vector<4x128xf32>
    %520 = vector.extract_strided_slice %518 {offsets = [0, 128], sizes = [4, 128], strides = [1, 1]} : vector<4x384xf32> to vector<4x128xf32>
    %521 = vector.extract_strided_slice %518 {offsets = [0, 256], sizes = [4, 128], strides = [1, 1]} : vector<4x384xf32> to vector<4x128xf32>
    %522 = vector.extract_strided_slice %512 {offsets = [0, 384], sizes = [4, 128], strides = [1, 1]} : vector<4x512xf32> to vector<4x128xf32>
    %523 = math.tanh %522 : vector<4x128xf32>
    %524 = arith.mulf %520, %495 : vector<4x128xf32>
    %525 = arith.mulf %519, %523 : vector<4x128xf32>
    %526 = arith.addf %524, %525 : vector<4x128xf32>
    %527 = math.tanh %526 : vector<4x128xf32>
    %528 = arith.mulf %521, %527 : vector<4x128xf32>
    %529 = vector.extract_strided_slice %528 {offsets = [0, 0], sizes = [2, 128], strides = [1, 1]} : vector<4x128xf32> to vector<2x128xf32>
    %c14_300 = arith.constant 14 : index
    %c0_301 = arith.constant 0 : index
    %530 = vector.load %arg16[%c14_300, %c0_301] : memref<16x256xf32, #tpu.memory_space<vmem>>, vector<2x128xf32>
    tpu.vector_store %arg16[%c14_300, %c0_301], %529 {strides = array<i32>} : memref<16x256xf32, #tpu.memory_space<vmem>>, vector<2x128xf32>,
    %531 = vector.extract_strided_slice %528 {offsets = [2, 0], sizes = [2, 128], strides = [1, 1]} : vector<4x128xf32> to vector<2x128xf32>
    %c0_302 = arith.constant 0 : index
    %c128_303 = arith.constant 128 : index
    %532 = vector.load %arg16[%c0_302, %c128_303] : memref<16x256xf32, #tpu.memory_space<vmem>>, vector<2x128xf32>
    tpu.vector_store %arg16[%c0_302, %c128_303], %531 {strides = array<i32>} : memref<16x256xf32, #tpu.memory_space<vmem>>, vector<2x128xf32>,
    %c0_304 = arith.constant 0 : index
    %c0_305 = arith.constant 0 : index
    %533 = vector.load %arg16[%c0_304, %c0_305] : memref<16x256xf32, #tpu.memory_space<vmem>>, vector<16x256xf32>
    %c0_306 = arith.constant 0 : index
    %c0_307 = arith.constant 0 : index
    %534 = vector.load %arg16[%c0_306, %c0_307] : memref<16x256xf32, #tpu.memory_space<vmem>>, vector<16x256xf32>
    %535 = vector.extract_strided_slice %533 {offsets = [0, 0], sizes = [8, 256], strides = [1, 1]} : vector<16x256xf32> to vector<8x256xf32>
    %536 = vector.extract_strided_slice %533 {offsets = [8, 0], sizes = [8, 256], strides = [1, 1]} : vector<16x256xf32> to vector<8x256xf32>
    %537 = arith.addf %535, %536 : vector<8x256xf32>
    %538 = vector.extract_strided_slice %534 {offsets = [0, 0], sizes = [8, 256], strides = [1, 1]} : vector<16x256xf32> to vector<8x256xf32>
    %539 = vector.extract_strided_slice %534 {offsets = [8, 0], sizes = [8, 256], strides = [1, 1]} : vector<16x256xf32> to vector<8x256xf32>
    %540 = arith.maximumf %538, %539 : vector<8x256xf32>
    %541 = vector.extract_strided_slice %537 {offsets = [0, 0], sizes = [4, 256], strides = [1, 1]} : vector<8x256xf32> to vector<4x256xf32>
    %542 = vector.extract_strided_slice %537 {offsets = [4, 0], sizes = [4, 256], strides = [1, 1]} : vector<8x256xf32> to vector<4x256xf32>
    %543 = arith.addf %541, %542 : vector<4x256xf32>
    %544 = vector.extract_strided_slice %540 {offsets = [0, 0], sizes = [4, 256], strides = [1, 1]} : vector<8x256xf32> to vector<4x256xf32>
    %545 = vector.extract_strided_slice %540 {offsets = [4, 0], sizes = [4, 256], strides = [1, 1]} : vector<8x256xf32> to vector<4x256xf32>
    %546 = arith.maximumf %544, %545 : vector<4x256xf32>
    %547 = vector.extract_strided_slice %543 {offsets = [0, 0], sizes = [2, 256], strides = [1, 1]} : vector<4x256xf32> to vector<2x256xf32>
    %548 = vector.extract_strided_slice %543 {offsets = [2, 0], sizes = [2, 256], strides = [1, 1]} : vector<4x256xf32> to vector<2x256xf32>
    %549 = arith.addf %547, %548 : vector<2x256xf32>
    %550 = vector.extract_strided_slice %546 {offsets = [0, 0], sizes = [2, 256], strides = [1, 1]} : vector<4x256xf32> to vector<2x256xf32>
    %551 = vector.extract_strided_slice %546 {offsets = [2, 0], sizes = [2, 256], strides = [1, 1]} : vector<4x256xf32> to vector<2x256xf32>
    %552 = arith.maximumf %550, %551 : vector<2x256xf32>
    %cst_308 = arith.constant 1.250000e-01 : f32
    %553 = vector.broadcast %cst_308 : f32 to vector<2x256xf32>
    %554 = arith.mulf %549, %553 : vector<2x256xf32>
    %555 = tpu.concatenate %554, %552 in 1 : vector<2x256xf32>, vector<2x256xf32> -> vector<2x512xf32>
    %c0_309 = arith.constant 0 : index
    %c0_310 = arith.constant 0 : index
    %556 = vector.load %arg8[%c0_309, %c0_310] : memref<2x512xf32, #tpu.memory_space<vmem>>, vector<1x512xf32>
    %557 = vector.broadcast %556 : vector<1x512xf32> to vector<2x512xf32>
    %558 = arith.mulf %555, %557 : vector<2x512xf32>
    %c1 = arith.constant 1 : index
    %c0_311 = arith.constant 0 : index
    %559 = vector.load %arg8[%c1, %c0_311] : memref<2x512xf32, #tpu.memory_space<vmem>>, vector<1x512xf32>
    %560 = vector.broadcast %559 : vector<1x512xf32> to vector<2x512xf32>
    %561 = arith.addf %558, %560 : vector<2x512xf32>
    %c2_i32_312 = arith.constant 2 : i32
    %562 = tpu.memref_slice %arg21[%c2_i32_312] : memref<3x!tpu.dma_semaphore, #tpu.memory_space<semaphore_mem>> -> memref<1x!tpu.dma_semaphore, #tpu.memory_space<semaphore_mem>>
    %563 = tpu.memref_squeeze %562 : memref<1x!tpu.dma_semaphore, #tpu.memory_space<semaphore_mem>> -> memref<!tpu.dma_semaphore, #tpu.memory_space<semaphore_mem>>
    tpu.wait_dma2 semaphore(%563 : memref<!tpu.dma_semaphore, #tpu.memory_space<semaphore_mem>>) src(%arg9 : memref<512x1024xbf16, #tpu.memory_space<any>>) dst(%arg20 : memref<512x1024xbf16, #tpu.memory_space<vmem>>)
    %c0_313 = arith.constant 0 : index
    %c0_314 = arith.constant 0 : index
    %564 = vector.load %arg20[%c0_313, %c0_314] : memref<512x1024xbf16, #tpu.memory_space<vmem>>, vector<512x512xbf16>
    %565 = arith.extf %564 : vector<512x512xbf16> to vector<512x512xf32>
    %c0_315 = arith.constant 0 : index
    %c512_316 = arith.constant 512 : index
    %566 = vector.load %arg20[%c0_315, %c512_316] : memref<512x1024xbf16, #tpu.memory_space<vmem>>, vector<512x512xbf16>
    %567 = arith.extf %566 : vector<512x512xbf16> to vector<512x512xf32>
    %cst_317 = arith.constant dense<0.000000e+00> : vector<2x512xf32>
    %568 = tpu.matmul %561, %565, %cst_317 {dimension_numbers = #tpu.dot_dimension_numbers<[1], [0], [0], [1], [0, 0, 1, 1], [], []>} : vector<2x512xf32>, vector<512x512xf32>, vector<2x512xf32> -> vector<2x512xf32>
    %c0_318 = arith.constant 0 : index
    %c0_319 = arith.constant 0 : index
    %569 = vector.load %arg10[%c0_318, %c0_319] : memref<2x512xf32, #tpu.memory_space<vmem>>, vector<1x512xf32>
    %570 = vector.broadcast %569 : vector<1x512xf32> to vector<2x512xf32>
    %571 = arith.addf %568, %570 : vector<2x512xf32>
    %cst_320 = arith.constant 0.000000e+00 : f32
    %572 = vector.broadcast %cst_320 : f32 to vector<2x512xf32>
    %573 = arith.maximumf %571, %572 : vector<2x512xf32>
    %cst_321 = arith.constant dense<0.000000e+00> : vector<2x512xf32>
    %574 = tpu.matmul %573, %567, %cst_321 {dimension_numbers = #tpu.dot_dimension_numbers<[1], [0], [0], [1], [0, 0, 1, 1], [], []>} : vector<2x512xf32>, vector<512x512xf32>, vector<2x512xf32> -> vector<2x512xf32>
    %c1_322 = arith.constant 1 : index
    %c0_323 = arith.constant 0 : index
    %575 = vector.load %arg10[%c1_322, %c0_323] : memref<2x512xf32, #tpu.memory_space<vmem>>, vector<1x512xf32>
    %576 = vector.broadcast %575 : vector<1x512xf32> to vector<2x512xf32>
    %577 = arith.addf %574, %576 : vector<2x512xf32>
    %cst_324 = arith.constant 0.000000e+00 : f32
    %578 = vector.broadcast %cst_324 : f32 to vector<2x512xf32>
    %579 = arith.maximumf %577, %578 : vector<2x512xf32>
    %580 = arith.addf %561, %573 : vector<2x512xf32>
    %581 = arith.addf %580, %579 : vector<2x512xf32>
    %c0_325 = arith.constant 0 : index
    %c0_326 = arith.constant 0 : index
    %582 = vector.load %arg11[%c0_325, %c0_326] : memref<512x7xf32, #tpu.memory_space<vmem>>, vector<512x7xf32>
    %cst_327 = arith.constant dense<0.000000e+00> : vector<2x7xf32>
    %583 = tpu.matmul %581, %582, %cst_327 {dimension_numbers = #tpu.dot_dimension_numbers<[1], [0], [0], [1], [0, 0, 1, 1], [], []>} : vector<2x512xf32>, vector<512x7xf32>, vector<2x7xf32> -> vector<2x7xf32>
    %c0_328 = arith.constant 0 : index
    %c0_329 = arith.constant 0 : index
    %584 = vector.load %arg12[%c0_328, %c0_329] : memref<1x7xf32, #tpu.memory_space<vmem>>, vector<1x7xf32>
    %585 = vector.broadcast %584 : vector<1x7xf32> to vector<2x7xf32>
    %586 = arith.addf %583, %585 : vector<2x7xf32>
    %c0_330 = arith.constant 0 : index
    %c0_331 = arith.constant 0 : index
    %587 = vector.load %arg13[%c0_330, %c0_331] : memref<2x7xf32, #tpu.memory_space<vmem>>, vector<2x7xf32>
    tpu.vector_store %arg13[%c0_330, %c0_331], %586 {strides = array<i32>} : memref<2x7xf32, #tpu.memory_space<vmem>>, vector<2x7xf32>,
    return
  }
}

</mosaic_0001>

<bundles_post_ra>
// kernel: forward.1
= control target key start
LH: loop header
LB: loop body
LE: loop exit
PB: predicated region body
PF: predicated region fallthrough
CT: control target
= control target key end

     0   :  { %18 = vsyncpa [#allocation11], 0  ;;  %s17546_s0 = inlined_call_operand.vmem [shape: s32[16,1], index: 0, kind: input, shape index: {}]   ;;  %s17547_s1 = inlined_call_operand.vmem [shape: f32[64,64], index: 1, kind: input, shape index: {}]   ;;  %s17548_s2 = inlined_call_operand.vmem [shape: bf16[64,1024], index: 2, kind: input, shape index: {}]   ;;  %s17549_s3 = inlined_call_operand.hbm [shape: f32[128,1024], index: 3, kind: input, shape index: {}]   ;;  %s17550_s4 = inlined_call_operand.vmem [shape: f32[1,1024], index: 4, kind: input, shape index: {}]   ;;  %s17551_s5 = inlined_call_operand.hbm [shape: bf16[256,1024], index: 5, kind: input, shape index: {}]   ;;  %s17552_s6 = inlined_call_operand.hbm [shape: f32[128,1024], index: 6, kind: input, shape index: {}]   ;;  %s17553_s7 = inlined_call_operand.vmem [shape: f32[1,1024], index: 7, kind: input, shape index: {}]   ;;  %s17554_s8 = inlined_call_operand.vmem [shape: f32[2,512], index: 8, kind: input, shape index: {}]   ;;  %s17555_s9 = inlined_call_operand.hbm [shape: bf16[512,1024], index: 9, kind: input, shape index: {}]   ;;  %s17556_s10 = inlined_call_operand.vmem [shape: f32[2,512], index: 10, kind: input, shape index: {}]   ;;  %s17557_s11 = inlined_call_operand.vmem [shape: f32[512,7], index: 11, kind: input, shape index: {}]   ;;  %s17558_s12 = inlined_call_operand.vmem [shape: f32[1,7], index: 12, kind: input, shape index: {}]   ;;  %s17559_s13 = inlined_call_operand.hbm [shape: f32[2,7], index: 13, kind: output, shape index: {}]  }
   0x1   :  { %19 = vsyncpa [#allocation12], 0  ;;  %s14679_s25 = smov [#allocation10]   ;;  %s14603_s29 = scalar_lea.hbm %s17549_s3, 16384 }
   0x2   :  { %s31_s26 = sshll.u32 %s14679_s25, 4  ;;  %p14604_p0 = scmp.ne.s32.totalorder %s17549_s3, %s14603_s29  ;;  %s32_s26 = int_to_ptr.vmem [resolvable:$true] %s31_s26 }
   0x3   :  { %p14607_p1 = scmp.lt.u32.totalorder %s14603_s29, %s17549_s3 }
   0x5   :  { %p14609_p2 = pnand %p14607_p1, %p14604_p0 }
   0x7   :  { %14612 = shalt.err (!%p14609_p2)
}
   0x8   :  { %s14613_s17 = scalar_lea.vmem %s32_s26, 16384  ;;  %p14618_p4 = scmp.lt.s32.totalorder %s32_s26, %s32_s26 }
   0x9   :  { %p14614_p3 = scmp.ne.s32.totalorder %s32_s26, %s14613_s17  ;;  %p14619_p5 = scmp.lt.s32.totalorder %s14613_s17, %s14613_s17 }
   0xb   :  { %p14620_p6 = por %p14619_p5, %p14618_p4 }
   0xd   :  { %p14621_p7 = pnand %p14620_p6, %p14614_p3 }
   0xf   :  { %14624 = shalt.err (!%p14621_p7)
}
  0x10   :  { %s14680_s18 = smov 1024   ;;  %s14681_s19 = smov 64  }
  0x11   :  { %37 = dma.hbm_to_vmem [thread:$0]  %s17549_s3, 16384, %s32_s26, [#allocation11], %s14680_s18, %s14680_s18, %s14681_s19  }
  0x12   :  { %14669 = dma.done.wait [#allocation11], 16384  }
  0x13   :  { %14670 = vsyncadd [#allocation11], 4294950912  ;;  %s57_s22 = sld [smem:[#allocation0]]   ;;  %69 = sst [smem:[#allocation15]] %s14680_s18  ;;  %v14682_v0 = vmov 0  }
  0x14   :  { %14410 = vset.pattern.permute.xlu0 %v14682_v0  ;;  %71 = sst [smem:[#allocation15 + $0x1]] %s14680_s18  ;;  %s14683_s23 = smov 8  }
  0x15   :  { %73 = sst [smem:[#allocation15 + $0x2]] %s14683_s23  ;;  %s14684_s24 = smov 128  }
  0x16   :  { %75 = sst [smem:[#allocation15 + $0x3]] %s14681_s19  ;;  %s14685_s25 = smov 2  }
  0x17   :  { %77 = sst [smem:[#allocation15 + $0x4]] %s14684_s24  ;;  %s14686_s27 = smov [#allocation6]  }
  0x18   :  { %79 = sst [smem:[#allocation15 + $0x5]] %s14685_s25  ;;  %s65_s28 = sshll.u32 %s14686_s27, 4  ;;  %s66_s28 = int_to_ptr.vmem [resolvable:$true] %s65_s28 }
  0x19   :  { %s11215_s3 = sshll.u32 %s57_s22, 26  ;;  %s14687_s26 = smov 512  }
  0x1a   :  { %81 = sst [smem:[#allocation15 + $0x6]] %s14687_s26  ;;  %s14785_s29 = sadd.s32 134217728, %s11215_s3 }
  0x1b   :  { %83 = sst [smem:[#allocation15 + $0x7]] %s14681_s19  ;;  %s14688_s30 = smov 4  }
  0x1c   :  { %85 = sst [smem:[#allocation15 + $0x8]] %s14688_s30  ;;  %s14689_s14 = smov [#allocation9]  }
  0x1d   :  { %s14690_s15 = smov [#allocation14]   ;;  %s14691_s20 = smov [#allocation7]  }
  0x1e   :  { %87 = dma.general %s17551_s5, 16384, %s66_s28, %s14689_s14, %s14690_s15, [#allocation15], %s14785_s29, 0  }
  0x1f   :  { %116 = sst [smem:[#allocation21]] %s14680_s18  ;;  %s96_s21 = sshll.u32 %s14691_s20, 4  ;;  %s97_s21 = int_to_ptr.vmem [resolvable:$true] %s96_s21 }
  0x20   :  { %118 = sst [smem:[#allocation21 + $0x1]] %s14680_s18  ;;  %s14692_s22 = smov [#allocation8]  }
  0x21   :  { %120 = sst [smem:[#allocation21 + $0x2]] %s14683_s23  ;;  %s112_s27 = sshll.u32 %s14692_s22, 4  ;;  %s113_s27 = int_to_ptr.vmem [resolvable:$true] %s112_s27 }
  0x22   :  { %122 = sst [smem:[#allocation21 + $0x3]] %s14681_s19  ;;  %s14625_s3 = scalar_lea.hbm %s17552_s6, 16384 }
  0x23   :  { %124 = sst [smem:[#allocation21 + $0x4]] %s14684_s24  ;;  %p14626_p8 = scmp.ne.s32.totalorder %s17552_s6, %s14625_s3 }
  0x24   :  { %126 = sst [smem:[#allocation21 + $0x5]] %s14685_s25  ;;  %p14629_p9 = scmp.lt.u32.totalorder %s14625_s3, %s17552_s6 }
  0x25   :  { %128 = sst [smem:[#allocation21 + $0x6]] %s14687_s26 }
  0x26   :  { %130 = sst [smem:[#allocation21 + $0x7]] %s14681_s19  ;;  %p14631_p10 = pnand %p14629_p9, %p14626_p8 }
  0x27   :  { %132 = sst [smem:[#allocation21 + $0x8]] %s14688_s30 }
  0x28   :  { %14634 = shalt.err (!%p14631_p10)  }
  0x29   :  { %s14635_s24 = scalar_lea.vmem %s97_s21, 16384  ;;  %p14640_p12 = scmp.lt.s32.totalorder %s97_s21, %s97_s21 }
  0x2a   :  { %p14636_p11 = scmp.ne.s32.totalorder %s97_s21, %s14635_s24  ;;  %p14641_p13 = scmp.lt.s32.totalorder %s14635_s24, %s14635_s24 }
  0x2c   :  { %p14642_p0 = por %p14641_p13, %p14640_p12 }
  0x2e   :  { %p14643_p1 = pnand %p14642_p0, %p14636_p11 }
  0x30   :  { %14646 = shalt.err (!%p14643_p1)  }
  0x31   :  { %99 = dma.hbm_to_vmem [thread:$0]  %s17552_s6, 16384, %s97_s21, [#allocation9 + $0x1]  ;;  %v17561_v9 = vmov 0.0   ;;  %v17560_v36 = vlaneseq  ;;  %vm159_vm0 = vcmask 523264  }
  0x32   :  { %s14693_s26 = smov [#allocation9 + $0x2]   ;;  %s14694_s30 = smov [#allocation20]   ;;  %449 = vmatprep.mubr.f32.mxu1 %v17561_v9 }
  0x33   :  { %134 = dma.general %s17555_s9, 32768, %s113_s27, %s14693_s26, %s14694_s30, [#allocation21], %s14785_s29, 0   ;;  %v136_v37 = vand.u32 127, %v17560_v36 }
  0x34   :  { %v137_v1 = vld [vmem:[%s17546_s0] sm:$0xff]  ;;  %v152_v3 = vld [vmem:[%s17547_s1 + $0x8] sm:$0xff]  ;;  %v153_v4 = vld [vmem:[%s17547_s1 + $0x10] sm:$0xff] }
  0x35   :  { %v151_v2 = vld [vmem:[%s17547_s1] sm:$0xff]  ;;  %140 = vperm.xlu0 %14410, %v137_v1   ;;  %v154_v5 = vld [vmem:[%s17547_s1 + $0x18] sm:$0xff]  ;;  %v138_v6 = vld [vmem:[%s17546_s0 + $0x8] sm:$0xff] }
  0x36   :  { %v11384_v7 = vpack.c.bf16 %v152_v3, %v151_v2  ;;  %v11388_v8 = vpack.c.bf16 %v154_v5, %v153_v4  ;;  %v155_v10 = vld [vmem:[%s17547_s1 + $0x20] sm:$0xff]  ;;  %v156_v11 = vld [vmem:[%s17547_s1 + $0x28] sm:$0xff]  ;;  %v157_v13 = vld [vmem:[%s17547_s1 + $0x30] sm:$0xff] }
  0x37   :  { %v11392_v12 = vpack.c.bf16 %v156_v11, %v155_v10  ;;  %v158_v14 = vld [vmem:[%s17547_s1 + $0x38] sm:$0xff]  ;;  %v241_v15 = vld [vmem:[%s17548_s2] sm:$0xff]  ;;  %v242_v17 = vld [vmem:[%s17548_s2 + $0x8] sm:$0xff] }
  0x38   :  { %11385 = vmatprep.subr.bf16.mxu0 %v11384_v7  ;;  %v245_v16 = vld [vmem:[%s17548_s2 + $0x20] sm:$0xff]  ;;  %v246_v19 = vld [vmem:[%s17548_s2 + $0x28] sm:$0xff]  ;;  %v11396_v25 = vpack.c.bf16 %v158_v14, %v157_v13  ;;  %v243_v54 = vld [vmem:[%s17548_s2 + $0x10] sm:$0xff] }
  0x39   :  { %143 = vperm.xlu0 %14410, %v138_v6   ;;  %11387 = vmatpush3.bf16.msra.mxu0 %v11384_v7  ;;  %v14360_v18 = vcombine.high %v241_v15, %v245_v16  ;;  %v14361_v20 = vcombine.low %v241_v15, %v245_v16  ;;  %v249_v21 = vld [vmem:[%s17548_s2 + $0x40] sm:$0xff]  ;;  %v14369_v23 = vcombine.low %v242_v17, %v246_v19  ;;  %v250_v40 = vld [vmem:[%s17548_s2 + $0x48] sm:$0xff]  ;;  %v247_v55 = vld [vmem:[%s17548_s2 + $0x30] sm:$0xff] }
  0x3a   :  { %11389 = vmatprep.subr.bf16.mxu0 %v11388_v8  ;;  %v253_v22 = vld [vmem:[%s17548_s2 + $0x60] sm:$0xff]  ;;  %v14368_v30 = vcombine.high %v242_v17, %v246_v19  ;;  %v254_v41 = vld [vmem:[%s17548_s2 + $0x68] sm:$0xff]  ;;  %v244_v56 = vld [vmem:[%s17548_s2 + $0x18] sm:$0xff]  ;;  %v14376_v57 = vcombine.high %v243_v54, %v247_v55  ;;  %v14377_v59 = vcombine.low %v243_v54, %v247_v55 }
  0x3b   :  { %v14362_v24 = vcombine.high %v249_v21, %v253_v22  ;;  %11401 = vmatprep.subr.bf16.mxu1 %v14360_v18  ;;  %v14363_v26 = vcombine.low %v249_v21, %v253_v22  ;;  %v257_v27 = vld [vmem:[%s17548_s2 + $0x80] sm:$0xff]  ;;  %v14370_v43 = vcombine.high %v250_v40, %v254_v41  ;;  %v258_v45 = vld [vmem:[%s17548_s2 + $0x88] sm:$0xff]  ;;  %v14371_v47 = vcombine.low %v250_v40, %v254_v41  ;;  %v248_v58 = vld [vmem:[%s17548_s2 + $0x38] sm:$0xff] }
  0x3c   :  { %11403 = vmatpush1.bf16.msra.mxu1 %v14361_v20  ;;  %v261_v28 = vld [vmem:[%s17548_s2 + $0xa0] sm:$0xff]  ;;  %v262_v46 = vld [vmem:[%s17548_s2 + $0xa8] sm:$0xff]  ;;  %v14384_v60 = vcombine.high %v244_v56, %v248_v58  ;;  %v14385_v61 = vcombine.low %v244_v56, %v248_v58  ;;  %v251_v62 = vld [vmem:[%s17548_s2 + $0x50] sm:$0xff] }
  0x3d   :  { %11391 = vmatpush3.bf16.msra.mxu0 %v11388_v8  ;;  %11405 = vmatprep.subr.bf16.mxu1 %v14362_v24  ;;  %v14364_v29 = vcombine.high %v257_v27, %v261_v28  ;;  %v14365_v31 = vcombine.low %v257_v27, %v261_v28  ;;  %v265_v32 = vld [vmem:[%s17548_s2 + $0xc0] sm:$0xff]  ;;  %v14372_v48 = vcombine.high %v258_v45, %v262_v46  ;;  %v266_v49 = vld [vmem:[%s17548_s2 + $0xc8] sm:$0xff]  ;;  %v255_v63 = vld [vmem:[%s17548_s2 + $0x70] sm:$0xff] }
  0x3e   :  { %11393 = vmatprep.subr.bf16.mxu0 %v11392_v12  ;;  %v269_v33 = vld [vmem:[%s17548_s2 + $0xe0] sm:$0xff]  ;;  %v270_v50 = vld [vmem:[%s17548_s2 + $0xe8] sm:$0xff]  ;;  %v14373_v51 = vcombine.low %v258_v45, %v262_v46  ;;  %v252_v0 = vld [vmem:[%s17548_s2 + $0x58] sm:$0xff]  ;;  %v14378_v5 = vcombine.high %v251_v62, %v255_v63  ;;  %v14379_v11 = vcombine.low %v251_v62, %v255_v63 }
  0x3f   :  { %v14366_v34 = vcombine.high %v265_v32, %v269_v33  ;;  %v14367_v35 = vcombine.low %v265_v32, %v269_v33  ;;  %v14374_v52 = vcombine.high %v266_v49, %v270_v50  ;;  %v14375_v53 = vcombine.low %v266_v49, %v270_v50  ;;  %v256_v1 = vld [vmem:[%s17548_s2 + $0x78] sm:$0xff]  ;;  %v259_v3 = vld [vmem:[%s17548_s2 + $0x90] sm:$0xff]  ;;  %v711_v33 = vld [vmem:[#allocation10 + $0x10] sm:$0xff] }
  0x40   :  { %11407 = vmatpush1.bf16.msra.mxu1 %v14363_v26  ;;  %v14386_v6 = vcombine.high %v252_v0, %v256_v1  ;;  %v263_v7 = vld [vmem:[%s17548_s2 + $0xb0] sm:$0xff]  ;;  %v260_v8 = vld [vmem:[%s17548_s2 + $0x98] sm:$0xff]  ;;  %v720_v26 = vld [vmem:[#allocation10 + $0x58] sm:$0xff] }
  0x41   :  { %11395 = vmatpush3.bf16.msra.mxu0 %v11392_v12  ;;  %11409 = vmatprep.subr.bf16.mxu1 %v14364_v29  ;;  %v264_v10 = vld [vmem:[%s17548_s2 + $0xb8] sm:$0xff]  ;;  %v14387_v12 = vcombine.low %v252_v0, %v256_v1  ;;  %v14380_v13 = vcombine.high %v259_v3, %v263_v7  ;;  %v267_v15 = vld [vmem:[%s17548_s2 + $0xd0] sm:$0xff]  ;;  %v14381_v19 = vcombine.low %v259_v3, %v263_v7  ;;  %v735_v45 = vld [vmem:[#allocation10 + $0xd0] sm:$0xff] }
  0x42   :  { %11397 = vmatprep.subr.bf16.mxu0 %v11396_v25  ;;  %v14388_v14 = vcombine.high %v260_v8, %v264_v10  ;;  %v271_v16 = vld [vmem:[%s17548_s2 + $0xf0] sm:$0xff]  ;;  %v268_v17 = vld [vmem:[%s17548_s2 + $0xd8] sm:$0xff]  ;;  %v14389_v20 = vcombine.low %v260_v8, %v264_v10  ;;  %v744_v50 = vld [vmem:[#allocation10 + $0x118] sm:$0xff] }
  0x43   :  { %v272_v18 = vld [vmem:[%s17548_s2 + $0xf8] sm:$0xff]  ;;  %v14382_v21 = vcombine.high %v267_v15, %v271_v16  ;;  %v14383_v27 = vcombine.low %v267_v15, %v271_v16  ;;  %v709_v29 = vld [vmem:[#allocation10] sm:$0xff]  ;;  %v743_v58 = vld [vmem:[#allocation10 + $0x110] sm:$0xff] }
  0x44   :  { %11411 = vmatpush1.bf16.msra.mxu1 %v14365_v31  ;;  %v14390_v22 = vcombine.high %v268_v17, %v272_v18  ;;  %v718_v24 = vld [vmem:[#allocation10 + $0x48] sm:$0xff]  ;;  %v14391_v28 = vcombine.low %v268_v17, %v272_v18  ;;  %v717_v32 = vld [vmem:[#allocation10 + $0x40] sm:$0xff]  ;;  %v760_v62 = vld [vmem:[#allocation10 + $0x198] sm:$0xff] }
  0x45   :  { %11399 = vmatpush3.bf16.msra.mxu0 %v11396_v25  ;;  %11413 = vmatprep.subr.bf16.mxu1 %v14366_v34  ;;  %v712_v25 = vld [vmem:[#allocation10 + $0x18] sm:$0xff]  ;;  %v719_v34 = vld [vmem:[#allocation10 + $0x50] sm:$0xff]  ;;  %v14965_v40 = vpack.c.bf16 %v717_v32, %v709_v29  ;;  %v742_v46 = vld [vmem:[#allocation10 + $0x108] sm:$0xff] }
  0x46   :  { %11417 = vmatprep.subr.bf16.mxu0 %v14368_v30  ;;  %v14963_v31 = vpack.c.bf16 %v720_v26, %v712_v25  ;;  %v14967_v41 = vpack.c.bf16 %v719_v34, %v711_v33  ;;  %v750_v49 = vld [vmem:[#allocation10 + $0x148] sm:$0xff]  ;;  %v741_v54 = vld [vmem:[#allocation10 + $0x100] sm:$0xff]  ;;  %v768_v63 = vld [vmem:[#allocation10 + $0x1d8] sm:$0xff] }
  0x47   :  { %v749_v55 = vld [vmem:[#allocation10 + $0x140] sm:$0xff]  ;;  %v14987_v56 = vpack.c.bf16 %v750_v49, %v742_v46  ;;  %v759_v7 = vld [vmem:[#allocation10 + $0x190] sm:$0xff]  ;;  %v774_v8 = vld [vmem:[#allocation10 + $0x208] sm:$0xff] }
  0x48   :  { %11415 = vmatpush1.bf16.msra.mxu1 %v14367_v35  ;;  %v726_v35 = vld [vmem:[#allocation10 + $0x88] sm:$0xff]  ;;  %v14999_v0 = vpack.c.bf16 %v749_v55, %v741_v54  ;;  %v757_v3 = vld [vmem:[#allocation10 + $0x180] sm:$0xff]  ;;  %v791_v33 = vld [vmem:[#allocation10 + $0x290] sm:$0xff] }
  0x49   :  { %11433 = vmatprep.subr.bf16.mxu1 %v14376_v57  ;;  %v782_v10 = vld [vmem:[#allocation10 + $0x248] sm:$0xff]  ;;  %v773_v15 = vld [vmem:[#allocation10 + $0x200] sm:$0xff]  ;;  %v799_v34 = vld [vmem:[#allocation10 + $0x2d0] sm:$0xff] }
  0x4a   :  { %v781_v16 = vld [vmem:[#allocation10 + $0x240] sm:$0xff]  ;;  %v15019_v17 = vpack.c.bf16 %v782_v10, %v774_v8  ;;  %v822_v54 = vld [vmem:[#allocation10 + $0x388] sm:$0xff] }
  0x4b   :  { %v15025_v25 = vpack.c.bf16 %v781_v16, %v773_v15  ;;  %v830_v55 = vld [vmem:[#allocation10 + $0x3c8] sm:$0xff] }
  0x4c   :  { %v714_v8 = vld [vmem:[#allocation10 + $0x28] sm:$0xff] }
  0x4d   :  { %v722_v10 = vld [vmem:[#allocation10 + $0x68] sm:$0xff] }
  0x4e   :  { %v794_v36 = vld [vmem:[#allocation10 + $0x2a8] sm:$0xff] }
  0xb4   :  { %v141_v38 = vpop.permute.xlu0 %140 }
  0xb5   :  { %vm145_vm1 = vcmp.eq.s32.totalorder %v136_v37, %v141_v38  ;;  %v728_v38 = vld [vmem:[#allocation10 + $0x98] sm:$0xff] }
  0xb6   :  { %v11219_v39 = vsel %vm145_vm1, 1.0, %v17561_v9 }
  0xb7   :  { %11381 = vmatprep.mubr.msk.f32.mxu0 %vm159_vm0, %v11219_v39  ;;  %v736_v39 = vld [vmem:[#allocation10 + $0xd8] sm:$0xff] }
  0xb8   :  { %v144_v42 = vpop.permute.xlu0 %143 }
  0xb9   :  { %vm146_vm2 = vcmp.eq.s32.totalorder %v136_v37, %v144_v42  ;;  %v734_v37 = vld [vmem:[#allocation10 + $0xc8] sm:$0xff]  ;;  %v725_v42 = vld [vmem:[#allocation10 + $0x80] sm:$0xff] }
  0xba   :  { %v11220_v44 = vsel %vm146_vm2, 1.0, %v17561_v9 }
  0xbb   :  { %11382 = vmatmul.mubr.msk.f32.vlgmr.msra.gmra.mrb[0].mxu0 %vm159_vm0, %v11220_v44  ;;  %v727_v44 = vld [vmem:[#allocation10 + $0x90] sm:$0xff] }
  0xbc   :  { %11419 = vmatpush1.bf16.msra.mxu0 %v14369_v23  ;;  %526 = vmatprep.mubr.f32.mxu0 %v17561_v9  ;;  %v710_v23 = vld [vmem:[#allocation10 + $0x8] sm:$0xff] }
  0xbd   :  { %11421 = vmatprep.subr.bf16.mxu0 %v14370_v43  ;;  %v14961_v30 = vpack.c.bf16 %v718_v24, %v710_v23  ;;  %v733_v43 = vld [vmem:[#allocation10 + $0xc0] sm:$0xff]  ;;  %v792_v23 = vld [vmem:[#allocation10 + $0x298] sm:$0xff] }
  0xbe   :  { %v800_v24 = vld [vmem:[#allocation10 + $0x2d8] sm:$0xff] }
  0xbf   :  { %v15033_v32 = vpack.c.bf16 %v800_v24, %v792_v23  ;;  %v715_v23 = vld [vmem:[#allocation10 + $0x30] sm:$0xff] }
  0xc0   :  { %11423 = vmatpush1.bf16.msra.mxu0 %v14371_v47  ;;  %v14971_v47 = vpack.c.bf16 %v734_v37, %v726_v35  ;;  %v806_v35 = vld [vmem:[#allocation10 + $0x308] sm:$0xff]  ;;  %v723_v24 = vld [vmem:[#allocation10 + $0x70] sm:$0xff] }
  0xc1   :  { %11425 = vmatprep.subr.bf16.mxu0 %v14372_v48  ;;  %v14973_v48 = vpack.c.bf16 %v736_v39, %v728_v38  ;;  %v814_v37 = vld [vmem:[#allocation10 + $0x348] sm:$0xff]  ;;  %v808_v38 = vld [vmem:[#allocation10 + $0x318] sm:$0xff] }
  0xc2   :  { %v816_v39 = vld [vmem:[#allocation10 + $0x358] sm:$0xff]  ;;  %v15043_v46 = vpack.c.bf16 %v814_v37, %v806_v35  ;;  %v15075_v37 = vpack.c.bf16 %v723_v24, %v715_v23 }
  0xc3   :  { %v15045_v49 = vpack.c.bf16 %v816_v39, %v808_v38  ;;  %v729_v38 = vld [vmem:[#allocation10 + $0xa0] sm:$0xff]  ;;  %v764_v23 = vld [vmem:[#allocation10 + $0x1b8] sm:$0xff] }
  0xc4   :  { %11427 = vmatpush1.bf16.msra.mxu0 %v14373_v51  ;;  %v752_v51 = vld [vmem:[#allocation10 + $0x158] sm:$0xff]  ;;  %v737_v39 = vld [vmem:[#allocation10 + $0xe0] sm:$0xff] }
  0xc5   :  { %11429 = vmatprep.subr.bf16.mxu0 %v14374_v52  ;;  %v14981_v52 = vpack.c.bf16 %v733_v43, %v725_v42  ;;  %v14989_v57 = vpack.c.bf16 %v752_v51, %v744_v50  ;;  %v15039_v43 = vpack.c.bf16 %v799_v34, %v791_v33  ;;  %v807_v50 = vld [vmem:[#allocation10 + $0x310] sm:$0xff]  ;;  %v732_v33 = vld [vmem:[#allocation10 + $0xb8] sm:$0xff] }
  0xc6   :  { %v815_v51 = vld [vmem:[#allocation10 + $0x350] sm:$0xff]  ;;  %v740_v34 = vld [vmem:[#allocation10 + $0xf8] sm:$0xff] }
  0xc7   :  { %v772_v24 = vld [vmem:[#allocation10 + $0x1f8] sm:$0xff] }
  0xc8   :  { %11431 = vmatpush1.bf16.msra.mxu0 %v14375_v53  ;;  %v14983_v53 = vpack.c.bf16 %v735_v45, %v727_v44  ;;  %v805_v44 = vld [vmem:[#allocation10 + $0x300] sm:$0xff] }
  0xc9   :  { %11449 = vmatprep.subr.bf16.mxu0 %v14384_v60  ;;  %v758_v60 = vld [vmem:[#allocation10 + $0x188] sm:$0xff]  ;;  %v813_v45 = vld [vmem:[#allocation10 + $0x340] sm:$0xff] }
 0x18e   :  { %v14921_v2 = vpop.f32.mrb[0].mxu0 }
 0x18f   :  { %v14926_v4 = vpop.f32.mrb[1].mxu0 }
 0x190   :  { %11223 = vmatmul.mubr.msk.f32.vlgmr.msra.gmra.mrb[0].mxu1 %vm159_vm0, %v14926_v4  ;;  %11225 = vmatmul.mubr.msk.f32.vlgmr.msra.gmra.mrb[2].mxu0 %vm159_vm0, %v14926_v4 }
 0x191   :  { %11435 = vmatpush1.bf16.msra.mxu1 %v14377_v59  ;;  %11451 = vmatpush1.bf16.msra.mxu0 %v14385_v61  ;;  %v751_v59 = vld [vmem:[#allocation10 + $0x150] sm:$0xff]  ;;  %v766_v61 = vld [vmem:[#allocation10 + $0x1c8] sm:$0xff] }
 0x192   :  { %455 = vmatprep.mubr.f32.mxu1 %v17561_v9  ;;  %532 = vmatprep.mubr.f32.mxu0 %v17561_v9  ;;  %v15001_v1 = vpack.c.bf16 %v751_v59, %v743_v58  ;;  %v824_v58 = vld [vmem:[#allocation10 + $0x398] sm:$0xff] }
 0x193   :  { %11437 = vmatprep.subr.bf16.mxu1 %v14378_v5  ;;  %11453 = vmatprep.subr.bf16.mxu0 %v14386_v6  ;;  %v15005_v5 = vpack.c.bf16 %v766_v61, %v758_v60  ;;  %v15007_v6 = vpack.c.bf16 %v768_v63, %v760_v62  ;;  %v832_v59 = vld [vmem:[#allocation10 + $0x3d8] sm:$0xff]  ;;  %v15049_v60 = vpack.c.bf16 %v813_v45, %v805_v44  ;;  %v821_v62 = vld [vmem:[#allocation10 + $0x380] sm:$0xff] }
 0x194   :  { %11224 = vmatmul.mubr.msk.f32.gmra.mrb[2].mxu1 %vm159_vm0, %v14921_v2  ;;  %11226 = vmatmul.mubr.msk.f32.gmra.mrb[4].mxu0 %vm159_vm0, %v14921_v2  ;;  %v15051_v61 = vpack.c.bf16 %v815_v51, %v807_v50  ;;  %v829_v63 = vld [vmem:[#allocation10 + $0x3c0] sm:$0xff]  ;;  %v15081_v45 = vpack.c.bf16 %v740_v34, %v732_v33  ;;  %v731_v50 = vld [vmem:[#allocation10 + $0xb0] sm:$0xff] }
 0x195   :  { %11439 = vmatpush1.bf16.msra.mxu1 %v14379_v11  ;;  %11455 = vmatpush1.bf16.msra.mxu0 %v14387_v12  ;;  %v776_v11 = vld [vmem:[#allocation10 + $0x218] sm:$0xff]  ;;  %v15061_v15 = vpack.c.bf16 %v829_v63, %v821_v62  ;;  %v739_v51 = vld [vmem:[#allocation10 + $0xf0] sm:$0xff]  ;;  %v15087_v62 = vpack.c.bf16 %v737_v39, %v729_v38  ;;  %v761_v33 = vld [vmem:[#allocation10 + $0x1a0] sm:$0xff]  ;;  %v15109_v39 = vpack.c.bf16 %v772_v24, %v764_v23 }
 0x196   :  { %11441 = vmatprep.subr.bf16.mxu1 %v14380_v13  ;;  %11457 = vmatprep.subr.bf16.mxu0 %v14388_v14  ;;  %v784_v12 = vld [vmem:[#allocation10 + $0x258] sm:$0xff]  ;;  %v15089_v63 = vpack.c.bf16 %v739_v51, %v731_v50  ;;  %v769_v34 = vld [vmem:[#allocation10 + $0x1e0] sm:$0xff]  ;;  %v763_v50 = vld [vmem:[#allocation10 + $0x1b0] sm:$0xff] }
 0x197   :  { %603 = vmatprep.mubr.f32.mxu1 %v17561_v9  ;;  %680 = vmatprep.mubr.f32.mxu0 %v17561_v9  ;;  %v15021_v18 = vpack.c.bf16 %v784_v12, %v776_v11  ;;  %v716_v11 = vld [vmem:[#allocation10 + $0x38] sm:$0xff]  ;;  %17679 = vst [vmem:[#allocation30_spill] sm:$0xff] %v15109_v39  ;;  %v771_v51 = vld [vmem:[#allocation10 + $0x1f0] sm:$0xff] }
 0x198   :  { %v724_v12 = vld [vmem:[#allocation10 + $0x78] sm:$0xff]  ;;  %v779_v23 = vld [vmem:[#allocation10 + $0x230] sm:$0xff] }
 0x199   :  { %11443 = vmatpush1.bf16.msra.mxu1 %v14381_v19  ;;  %11459 = vmatpush1.bf16.msra.mxu0 %v14389_v20  ;;  %v775_v19 = vld [vmem:[#allocation10 + $0x210] sm:$0xff] }
 0x19a   :  { %11445 = vmatprep.subr.bf16.mxu1 %v14382_v21  ;;  %11461 = vmatprep.subr.bf16.mxu0 %v14390_v22  ;;  %v783_v20 = vld [vmem:[#allocation10 + $0x250] sm:$0xff]  ;;  %v790_v21 = vld [vmem:[#allocation10 + $0x288] sm:$0xff] }
 0x19b   :  { %v798_v22 = vld [vmem:[#allocation10 + $0x2c8] sm:$0xff]  ;;  %v15027_v26 = vpack.c.bf16 %v783_v20, %v775_v19  ;;  %v713_v19 = vld [vmem:[#allocation10 + $0x20] sm:$0xff]  ;;  %v787_v24 = vld [vmem:[#allocation10 + $0x270] sm:$0xff] }
 0x19c   :  { %v15031_v29 = vpack.c.bf16 %v798_v22, %v790_v21  ;;  %v721_v20 = vld [vmem:[#allocation10 + $0x60] sm:$0xff]  ;;  %v15067_v21 = vpack.c.bf16 %v722_v10, %v714_v8  ;;  %v15069_v22 = vpack.c.bf16 %v724_v12, %v716_v11  ;;  %v747_v11 = vld [vmem:[#allocation10 + $0x130] sm:$0xff] }
 0x19d   :  { %11447 = vmatpush1.bf16.msra.mxu1 %v14383_v27  ;;  %11463 = vmatpush1.bf16.msra.mxu0 %v14391_v28  ;;  %v789_v27 = vld [vmem:[#allocation10 + $0x280] sm:$0xff]  ;;  %v15073_v35 = vpack.c.bf16 %v721_v20, %v713_v19  ;;  %v755_v12 = vld [vmem:[#allocation10 + $0x170] sm:$0xff]  ;;  %v762_v19 = vld [vmem:[#allocation10 + $0x1a8] sm:$0xff] }
 0x19e   :  { %11465 = vmatprep.subr.bf16.mxu1 %v14961_v30  ;;  %11497 = vmatprep.subr.bf16.mxu0 %v14963_v31  ;;  %v797_v28 = vld [vmem:[#allocation10 + $0x2c0] sm:$0xff]  ;;  %v770_v20 = vld [vmem:[#allocation10 + $0x1e8] sm:$0xff] }
 0x19f   :  { %v15037_v42 = vpack.c.bf16 %v797_v28, %v789_v27  ;;  %v730_v27 = vld [vmem:[#allocation10 + $0xa8] sm:$0xff]  ;;  %v15107_v38 = vpack.c.bf16 %v770_v20, %v762_v19 }
 0x1a0   :  { %11227 = vmatmul.mubr.msk.f32.vlgmr.msra.gmra.mrb[4].mxu1 %vm159_vm0, %v14926_v4  ;;  %11229 = vmatmul.mubr.msk.f32.vlgmr.msra.gmra.mrb[6].mxu0 %vm159_vm0, %v14926_v4  ;;  %v765_v4 = vld [vmem:[#allocation10 + $0x1c0] sm:$0xff]  ;;  %v738_v28 = vld [vmem:[#allocation10 + $0xe8] sm:$0xff] }
 0x1a1   :  { %11467 = vmatpush1.bf16.msra.mxu1 %v14965_v40  ;;  %11499 = vmatpush1.bf16.msra.mxu0 %v14967_v41  ;;  %v15013_v13 = vpack.c.bf16 %v765_v4, %v757_v3  ;;  %v15055_v3 = vpack.c.bf16 %v830_v55, %v822_v54  ;;  %v15057_v4 = vpack.c.bf16 %v832_v59, %v824_v58  ;;  %v746_v54 = vld [vmem:[#allocation10 + $0x128] sm:$0xff]  ;;  %v748_v58 = vld [vmem:[#allocation10 + $0x138] sm:$0xff] }
 0x1a2   :  { %609 = vmatprep.mubr.f32.mxu1 %v17561_v9  ;;  %686 = vmatprep.mubr.f32.mxu0 %v17561_v9  ;;  %v15079_v44 = vpack.c.bf16 %v738_v28, %v730_v27  ;;  %v754_v55 = vld [vmem:[#allocation10 + $0x168] sm:$0xff]  ;;  %v756_v59 = vld [vmem:[#allocation10 + $0x178] sm:$0xff]  ;;  %v15103_v28 = vpack.c.bf16 %v755_v12, %v747_v11  ;;  %17678 = vst [vmem:[#allocation29_spill] sm:$0xff] %v15107_v38  ;;  %v777_v11 = vld [vmem:[#allocation10 + $0x220] sm:$0xff] }
 0x1a3   :  { %11469 = vmatprep.subr.bf16.mxu1 %v14971_v47  ;;  %11501 = vmatprep.subr.bf16.mxu0 %v14973_v48  ;;  %v15093_v8 = vpack.c.bf16 %v754_v55, %v746_v54  ;;  %v15095_v10 = vpack.c.bf16 %v756_v59, %v748_v58  ;;  %v778_v54 = vld [vmem:[#allocation10 + $0x228] sm:$0xff]  ;;  %v780_v58 = vld [vmem:[#allocation10 + $0x238] sm:$0xff]  ;;  %v785_v12 = vld [vmem:[#allocation10 + $0x260] sm:$0xff] }
 0x1a4   :  { %11228 = vmatmul.mubr.msk.f32.gmra.mrb[6].mxu1 %vm159_vm0, %v14921_v2  ;;  %11230 = vmatmul.mubr.msk.f32.gmra.mrb[8].mxu0 %vm159_vm0, %v14921_v2  ;;  %v767_v2 = vld [vmem:[#allocation10 + $0x1d0] sm:$0xff]  ;;  %17677 = vst [vmem:[#allocation28_spill] sm:$0xff] %v15103_v28  ;;  %v786_v55 = vld [vmem:[#allocation10 + $0x268] sm:$0xff]  ;;  %v788_v59 = vld [vmem:[#allocation10 + $0x278] sm:$0xff] }
 0x1a5   :  { %11471 = vmatpush1.bf16.msra.mxu1 %v14981_v52  ;;  %11503 = vmatpush1.bf16.msra.mxu0 %v14983_v53  ;;  %v15015_v14 = vpack.c.bf16 %v767_v2, %v759_v7  ;;  %v823_v7 = vld [vmem:[#allocation10 + $0x390] sm:$0xff]  ;;  %v15119_v19 = vpack.c.bf16 %v786_v55, %v778_v54  ;;  %v15121_v20 = vpack.c.bf16 %v788_v59, %v780_v58 }
 0x1a6   :  { %11473 = vmatprep.subr.bf16.mxu1 %v14987_v56  ;;  %11505 = vmatprep.subr.bf16.mxu0 %v14989_v57  ;;  %v831_v2 = vld [vmem:[#allocation10 + $0x3d0] sm:$0xff] }
 0x1a7   :  { %901 = vmatprep.mubr.f32.mxu1 %v17561_v9  ;;  %972 = vmatprep.mubr.f32.mxu0 %v17561_v9  ;;  %v15063_v16 = vpack.c.bf16 %v831_v2, %v823_v7  ;;  %v745_v7 = vld [vmem:[#allocation10 + $0x120] sm:$0xff]  ;;  %17682 = vst [vmem:[#allocation33_spill] sm:$0xff] %v15119_v19  ;;  %17683 = vst [vmem:[#allocation34_spill] sm:$0xff] %v15121_v20  ;;  %v795_v58 = vld [vmem:[#allocation10 + $0x2b0] sm:$0xff] }
 0x1a8   :  { %v753_v2 = vld [vmem:[#allocation10 + $0x160] sm:$0xff]  ;;  %v803_v59 = vld [vmem:[#allocation10 + $0x2f0] sm:$0xff] }
 0x1a9   :  { %11475 = vmatpush1.bf16.msra.mxu1 %v14999_v0  ;;  %11507 = vmatpush1.bf16.msra.mxu0 %v15001_v1  ;;  %v15101_v27 = vpack.c.bf16 %v753_v2, %v745_v7  ;;  %v15113_v7 = vpack.c.bf16 %v769_v34, %v761_v33  ;;  %v15115_v2 = vpack.c.bf16 %v771_v51, %v763_v50  ;;  %v793_v50 = vld [vmem:[#allocation10 + $0x2a0] sm:$0xff] }
 0x1aa   :  { %11477 = vmatprep.subr.bf16.mxu1 %v15005_v5  ;;  %11509 = vmatprep.subr.bf16.mxu0 %v15007_v6  ;;  %v15125_v33 = vpack.c.bf16 %v785_v12, %v777_v11  ;;  %v15127_v34 = vpack.c.bf16 %v787_v24, %v779_v23  ;;  %v801_v51 = vld [vmem:[#allocation10 + $0x2e0] sm:$0xff]  ;;  %v15139_v12 = vpack.c.bf16 %v803_v59, %v795_v58  ;;  %v835_v59 = vld [vmem:[#allocation10 + $0x3f0] sm:$0xff] }
 0x1ab   :  { %17676 = vst [vmem:[#allocation27_spill] sm:$0xff] %v15101_v27  ;;  %17680 = vst [vmem:[#allocation31_spill] sm:$0xff] %v15113_v7  ;;  %v15137_v11 = vpack.c.bf16 %v801_v51, %v793_v50  ;;  %v809_v23 = vld [vmem:[#allocation10 + $0x320] sm:$0xff] }
 0x1ac   :  { %17681 = vst [vmem:[#allocation32_spill] sm:$0xff] %v15115_v2  ;;  %17684 = vst [vmem:[#allocation35_spill] sm:$0xff] %v15125_v33  ;;  %v817_v24 = vld [vmem:[#allocation10 + $0x360] sm:$0xff] }
 0x1ad   :  { %11479 = vmatpush1.bf16.msra.mxu1 %v15013_v13  ;;  %11511 = vmatpush1.bf16.msra.mxu0 %v15015_v14  ;;  %17685 = vst [vmem:[#allocation36_spill] sm:$0xff] %v15127_v34  ;;  %v15149_v50 = vpack.c.bf16 %v817_v24, %v809_v23  ;;  %v825_v58 = vld [vmem:[#allocation10 + $0x3a0] sm:$0xff] }
 0x1ae   :  { %11481 = vmatprep.subr.bf16.mxu1 %v15019_v17  ;;  %11513 = vmatprep.subr.bf16.mxu0 %v15021_v18 }
 0x1b1   :  { %11483 = vmatpush1.bf16.msra.mxu1 %v15025_v25  ;;  %11515 = vmatpush1.bf16.msra.mxu0 %v15027_v26 }
 0x1b2   :  { %11485 = vmatprep.subr.bf16.mxu1 %v15031_v29  ;;  %11517 = vmatprep.subr.bf16.mxu0 %v15033_v32 }
 0x1b5   :  { %11487 = vmatpush1.bf16.msra.mxu1 %v15037_v42  ;;  %11519 = vmatpush1.bf16.msra.mxu0 %v15039_v43 }
 0x1b6   :  { %11489 = vmatprep.subr.bf16.mxu1 %v15043_v46  ;;  %11521 = vmatprep.subr.bf16.mxu0 %v15045_v49 }
 0x1b9   :  { %11491 = vmatpush1.bf16.msra.mxu1 %v15049_v60  ;;  %11523 = vmatpush1.bf16.msra.mxu0 %v15051_v61 }
 0x1ba   :  { %11493 = vmatprep.subr.bf16.mxu1 %v15055_v3  ;;  %11525 = vmatprep.subr.bf16.mxu0 %v15057_v4 }
 0x1bd   :  { %11495 = vmatpush1.bf16.msra.mxu1 %v15061_v15  ;;  %11527 = vmatpush1.bf16.msra.mxu0 %v15063_v16 }
 0x1be   :  { %11529 = vmatprep.subr.bf16.mxu1 %v15067_v21  ;;  %11561 = vmatprep.subr.bf16.mxu0 %v15069_v22 }
 0x1c0   :  { %902 = vmatmul.mubr.f32.vlgmr.msra.gmra.mrb[8].mxu1 %v17561_v9  ;;  %973 = vmatmul.mubr.f32.vlgmr.msra.gmra.mrb[10].mxu0 %v17561_v9 }
 0x1c1   :  { %11531 = vmatpush1.bf16.msra.mxu1 %v15073_v35  ;;  %11563 = vmatpush1.bf16.msra.mxu0 %v15075_v37 }
 0x1c2   :  { %11533 = vmatprep.subr.bf16.mxu1 %v15079_v44  ;;  %11565 = vmatprep.subr.bf16.mxu0 %v15081_v45 }
 0x1c3   :  { %1043 = vmatprep.mubr.f32.mxu1 %v17561_v9  ;;  %1114 = vmatprep.mubr.f32.mxu0 %v17561_v9  ;;  %v802_v9 = vld [vmem:[#allocation10 + $0x2e8] sm:$0xff] }
 0x1c4   :  { %v15131_v54 = vpack.c.bf16 %v802_v9, %v794_v36 }
 0x1c5   :  { %11535 = vmatpush1.bf16.msra.mxu1 %v15087_v62  ;;  %11567 = vmatpush1.bf16.msra.mxu0 %v15089_v63 }
 0x1c6   :  { %11537 = vmatprep.subr.bf16.mxu1 %v15093_v8  ;;  %11569 = vmatprep.subr.bf16.mxu0 %v15095_v10 }
 0x1c9   :  { %11539 = vmatpush1.bf16.msra.mxu1 %v15101_v27  ;;  %11571 = vmatpush1.bf16.msra.mxu0 %v15103_v28  ;;  %v796_v27 = vld [vmem:[#allocation10 + $0x2b8] sm:$0xff] }
 0x1ca   :  { %11541 = vmatprep.subr.bf16.mxu1 %v15107_v38  ;;  %11573 = vmatprep.subr.bf16.mxu0 %v15109_v39  ;;  %v804_v28 = vld [vmem:[#allocation10 + $0x2f8] sm:$0xff]  ;;  %v810_v39 = vld [vmem:[#allocation10 + $0x328] sm:$0xff] }
 0x1cb   :  { %v15133_v55 = vpack.c.bf16 %v804_v28, %v796_v27  ;;  %v812_v38 = vld [vmem:[#allocation10 + $0x338] sm:$0xff]  ;;  %v811_v27 = vld [vmem:[#allocation10 + $0x330] sm:$0xff] }
 0x1cc   :  { %v819_v28 = vld [vmem:[#allocation10 + $0x370] sm:$0xff] }
 0x1cd   :  { %11543 = vmatpush1.bf16.msra.mxu1 %v15113_v7  ;;  %11575 = vmatpush1.bf16.msra.mxu0 %v15115_v2  ;;  %v818_v7 = vld [vmem:[#allocation10 + $0x368] sm:$0xff]  ;;  %v820_v2 = vld [vmem:[#allocation10 + $0x378] sm:$0xff]  ;;  %v15151_v51 = vpack.c.bf16 %v819_v28, %v811_v27 }
 0x1ce   :  { %11545 = vmatprep.subr.bf16.mxu1 %v15119_v19  ;;  %11577 = vmatprep.subr.bf16.mxu0 %v15121_v20  ;;  %v15143_v9 = vpack.c.bf16 %v818_v7, %v810_v39  ;;  %v15145_v36 = vpack.c.bf16 %v820_v2, %v812_v38  ;;  %v826_v20 = vld [vmem:[#allocation10 + $0x3a8] sm:$0xff]  ;;  %v828_v19 = vld [vmem:[#allocation10 + $0x3b8] sm:$0xff]  ;;  %v833_v7 = vld [vmem:[#allocation10 + $0x3e0] sm:$0xff] }
 0x1cf   :  { %v827_v2 = vld [vmem:[#allocation10 + $0x3b0] sm:$0xff]  ;;  %v15161_v23 = vpack.c.bf16 %v833_v7, %v825_v58 }
 0x1d0   :  { %v15163_v24 = vpack.c.bf16 %v835_v59, %v827_v2 }
 0x1d1   :  { %11547 = vmatpush1.bf16.msra.mxu1 %v15125_v33  ;;  %11579 = vmatpush1.bf16.msra.mxu0 %v15127_v34  ;;  %v834_v33 = vld [vmem:[#allocation10 + $0x3e8] sm:$0xff]  ;;  %v836_v34 = vld [vmem:[#allocation10 + $0x3f8] sm:$0xff] }
 0x1d2   :  { %11549 = vmatprep.subr.bf16.mxu1 %v15131_v54  ;;  %11581 = vmatprep.subr.bf16.mxu0 %v15133_v55  ;;  %v15155_v38 = vpack.c.bf16 %v834_v33, %v826_v20  ;;  %v15157_v39 = vpack.c.bf16 %v836_v34, %v828_v19  ;;  %v17686_v19 = vmov 0.0  }
 0x1d5   :  { %11551 = vmatpush1.bf16.msra.mxu1 %v15137_v11  ;;  %11583 = vmatpush1.bf16.msra.mxu0 %v15139_v12 }
 0x1d6   :  { %11553 = vmatprep.subr.bf16.mxu1 %v15143_v9  ;;  %11585 = vmatprep.subr.bf16.mxu0 %v15145_v36 }
 0x1d9   :  { %11555 = vmatpush1.bf16.msra.mxu1 %v15149_v50  ;;  %11587 = vmatpush1.bf16.msra.mxu0 %v15151_v51 }
 0x1da   :  { %11557 = vmatprep.subr.bf16.mxu1 %v15155_v38  ;;  %11589 = vmatprep.subr.bf16.mxu0 %v15157_v39 }
 0x1dd   :  { %11559 = vmatpush1.bf16.msra.mxu1 %v15161_v23  ;;  %11591 = vmatpush1.bf16.msra.mxu0 %v15163_v24 }
 0x1de   :  { %11593 = vmatprep.subr.bf16.mxu1 %v14961_v30  ;;  %11625 = vmatprep.subr.bf16.mxu0 %v14963_v31  ;;  %v17687_v30 = vlaneseq }
 0x1e0   :  { %1044 = vmatmul.mubr.f32.vlgmr.msra.gmra.mrb[10].mxu1 %v17686_v19  ;;  %1115 = vmatmul.mubr.f32.vlgmr.msra.gmra.mrb[12].mxu0 %v17686_v19  ;;  %v15208_v31 = vshrl.u32 %v17687_v30, 7 }
 0x1e1   :  { %11595 = vmatpush1.bf16.msra.mxu1 %v14965_v40  ;;  %11627 = vmatpush1.bf16.msra.mxu0 %v14967_v41 }
 0x1e2   :  { %11597 = vmatprep.subr.bf16.mxu1 %v14971_v47  ;;  %11629 = vmatprep.subr.bf16.mxu0 %v14973_v48  ;;  %17688 = vst [vmem:[#allocation37_spill] sm:$0xff] %v15208_v31  ;;  %v15211_v40 = vsub.s32 0, %v15208_v31  ;;  %v15214_v41 = vsub.s32 2, %v15208_v31  ;;  %v337_v47 = vld [vmem:[%s17550_s4] sm:$0xff]  ;;  %v15220_v48 = vsub.s32 1, %v15208_v31 }
 0x1e3   :  { %1392 = vmatprep.mubr.f32.mxu1 %v17686_v19  ;;  %1463 = vmatprep.mubr.f32.mxu0 %v17686_v19 }
 0x1e4   :  { %17689 = vst [vmem:[#allocation38_spill] sm:$0xff] %v15211_v40  ;;  %17690 = vst [vmem:[#allocation39_spill] sm:$0xff] %v15214_v41 }
 0x1e5   :  { %11599 = vmatpush1.bf16.msra.mxu1 %v14981_v52  ;;  %11631 = vmatpush1.bf16.msra.mxu0 %v14983_v53  ;;  %17691 = vst [vmem:[#allocation40_spill] sm:$0xff] %v15220_v48  ;;  %v15223_v52 = vsub.s32 3, %v15208_v31  ;;  %v342_v53 = vrot.slane %v337_v47, %v15211_v40  ;;  %v1780_v40 = vld [vmem:[#allocation10 + $0x238] sm:$0xff] }
 0x1e6   :  { %11601 = vmatprep.subr.bf16.mxu1 %v14987_v56  ;;  %11633 = vmatprep.subr.bf16.mxu0 %v14989_v57  ;;  %v350_v56 = vrot.slane %v337_v47, %v15214_v41  ;;  %v346_v57 = vrot.slane %v337_v47, %v15220_v48  ;;  %v1778_v48 = vld [vmem:[#allocation10 + $0x228] sm:$0xff] }
 0x1e7   :  { %17692 = vst [vmem:[#allocation41_spill] sm:$0xff] %v15223_v52  ;;  %v1786_v41 = vld [vmem:[#allocation10 + $0x268] sm:$0xff] }
 0x1e9   :  { %11603 = vmatpush1.bf16.msra.mxu1 %v14999_v0  ;;  %11635 = vmatpush1.bf16.msra.mxu0 %v15001_v1  ;;  %v354_v0 = vrot.slane %v337_v47, %v15223_v52  ;;  %v1764_v52 = vld [vmem:[#allocation10 + $0x1b8] sm:$0xff] }
 0x1ea   :  { %11605 = vmatprep.subr.bf16.mxu1 %v15005_v5  ;;  %11637 = vmatprep.subr.bf16.mxu0 %v15007_v6 }
 0x1ed   :  { %11607 = vmatpush1.bf16.msra.mxu1 %v15013_v13  ;;  %11639 = vmatpush1.bf16.msra.mxu0 %v15015_v14 }
 0x1ee   :  { %11609 = vmatprep.subr.bf16.mxu1 %v15019_v17  ;;  %11641 = vmatprep.subr.bf16.mxu0 %v15021_v18 }
 0x1f1   :  { %11611 = vmatpush1.bf16.msra.mxu1 %v15025_v25  ;;  %11643 = vmatpush1.bf16.msra.mxu0 %v15027_v26 }
 0x1f2   :  { %11613 = vmatprep.subr.bf16.mxu1 %v15031_v29  ;;  %11645 = vmatprep.subr.bf16.mxu0 %v15033_v32 }
 0x1f5   :  { %11615 = vmatpush1.bf16.msra.mxu1 %v15037_v42  ;;  %11647 = vmatpush1.bf16.msra.mxu0 %v15039_v43 }
 0x1f6   :  { %11617 = vmatprep.subr.bf16.mxu1 %v15043_v46  ;;  %11649 = vmatprep.subr.bf16.mxu0 %v15045_v49 }
 0x1f9   :  { %11619 = vmatpush1.bf16.msra.mxu1 %v15049_v60  ;;  %11651 = vmatpush1.bf16.msra.mxu0 %v15051_v61  ;;  %v17576_v61 = vsub.s32 4, %v15208_v31 }
 0x1fa   :  { %11621 = vmatprep.subr.bf16.mxu1 %v15055_v3  ;;  %11653 = vmatprep.subr.bf16.mxu0 %v15057_v4  ;;  %v17575_v3 = vsub.s32 6, %v15208_v31  ;;  %v17574_v4 = vsub.s32 5, %v15208_v31 }
 0x1fd   :  { %11623 = vmatpush1.bf16.msra.mxu1 %v15061_v15  ;;  %11655 = vmatpush1.bf16.msra.mxu0 %v15063_v16  ;;  %v17573_v15 = vsub.s32 7, %v15208_v31  ;;  %v358_v16 = vrot.slane %v337_v47, %v17576_v61 }
 0x1fe   :  { %11657 = vmatprep.subr.bf16.mxu1 %v15067_v21  ;;  %11689 = vmatprep.subr.bf16.mxu0 %v15069_v22  ;;  %v366_v21 = vrot.slane %v337_v47, %v17575_v3  ;;  %v362_v22 = vrot.slane %v337_v47, %v17574_v4 }
 0x1ff   :  { %v370_v20 = vrot.slane %v337_v47, %v17573_v15 }
 0x263   :  { %v451_v1 = vpop.f32.mrb[0].mxu1  ;;  %v528_v5 = vpop.f32.mrb[2].mxu0 }
 0x264   :  { %v452_v6 = vadd.f32 %v451_v1, %v342_v53  ;;  %v529_v13 = vadd.f32 %v528_v5, %v350_v56  ;;  %v453_v14 = vpop.f32.mrb[1].mxu1  ;;  %v530_v17 = vpop.f32.mrb[3].mxu0 }
 0x265   :  { %v454_v18 = vadd.f32 %v453_v14, %v346_v57  ;;  %v531_v25 = vadd.f32 %v530_v17, %v354_v0 }
 0x266   :  { %693 = vst [vmem:[#allocation2] sm:$0xff] %v452_v6  ;;  %695 = vst [vmem:[#allocation2 + $0x10] sm:$0xff] %v529_v13 }
 0x267   :  { %694 = vst [vmem:[#allocation2 + $0x8] sm:$0xff] %v454_v18  ;;  %696 = vst [vmem:[#allocation2 + $0x18] sm:$0xff] %v531_v25  ;;  %v457_v26 = vpop.f32.mrb[2].mxu1  ;;  %v534_v29 = vpop.f32.mrb[4].mxu0 }
 0x268   :  { %v458_v32 = vadd.f32 %v457_v26, %v342_v53  ;;  %v535_v42 = vadd.f32 %v534_v29, %v350_v56  ;;  %v459_v43 = vpop.f32.mrb[3].mxu1  ;;  %v536_v46 = vpop.f32.mrb[5].mxu0 }
 0x269   :  { %v460_v49 = vadd.f32 %v459_v43, %v346_v57  ;;  %v537_v60 = vadd.f32 %v536_v46, %v354_v0 }
 0x26a   :  { %701 = vst [vmem:[#allocation2 + $0x40] sm:$0xff] %v458_v32  ;;  %703 = vst [vmem:[#allocation2 + $0x50] sm:$0xff] %v535_v42 }
 0x26b   :  { %702 = vst [vmem:[#allocation2 + $0x48] sm:$0xff] %v460_v49  ;;  %704 = vst [vmem:[#allocation2 + $0x58] sm:$0xff] %v537_v60 }
 0x26d   :  { %v1121_v13 = vld [vmem:[#allocation2] sm:$0x3]  ;;  %v1123_v17 = vld [vmem:[#allocation2 + $0x10] sm:$0x3] }
 0x26e   :  { %v1122_v29 = vld [vmem:[#allocation2 + $0x8] sm:$0x3]  ;;  %v1124_v42 = vld [vmem:[#allocation2 + $0x18] sm:$0x3] }
 0x273   :  { %v605_v33 = vpop.f32.mrb[4].mxu1  ;;  %v682_v34 = vpop.f32.mrb[6].mxu0 }
 0x274   :  { %v606_v27 = vadd.f32 %v605_v33, %v358_v16  ;;  %v683_v28 = vadd.f32 %v682_v34, %v366_v21  ;;  %v607_v58 = vpop.f32.mrb[5].mxu1  ;;  %v684_v7 = vpop.f32.mrb[7].mxu0 }
 0x275   :  { %v608_v2 = vadd.f32 %v607_v58, %v362_v22  ;;  %v685_v59 = vadd.f32 %v684_v7, %v370_v20 }
 0x276   :  { %697 = vst [vmem:[#allocation2 + $0x20] sm:$0xff] %v606_v27  ;;  %699 = vst [vmem:[#allocation2 + $0x30] sm:$0xff] %v683_v28 }
 0x277   :  { %698 = vst [vmem:[#allocation2 + $0x28] sm:$0xff] %v608_v2  ;;  %700 = vst [vmem:[#allocation2 + $0x38] sm:$0xff] %v685_v59  ;;  %v611_v30 = vpop.f32.mrb[6].mxu1  ;;  %v688_v53 = vpop.f32.mrb[8].mxu0 }
 0x278   :  { %v612_v56 = vadd.f32 %v611_v30, %v358_v16  ;;  %v689_v57 = vadd.f32 %v688_v53, %v366_v21  ;;  %v613_v0 = vpop.f32.mrb[7].mxu1  ;;  %v690_v1 = vpop.f32.mrb[9].mxu0 }
 0x279   :  { %v614_v5 = vadd.f32 %v613_v0, %v362_v22  ;;  %v691_v47 = vadd.f32 %v690_v1, %v370_v20 }
 0x27a   :  { %705 = vst [vmem:[#allocation2 + $0x60] sm:$0xff] %v612_v56  ;;  %707 = vst [vmem:[#allocation2 + $0x70] sm:$0xff] %v689_v57 }
 0x27b   :  { %706 = vst [vmem:[#allocation2 + $0x68] sm:$0xff] %v614_v5  ;;  %708 = vst [vmem:[#allocation2 + $0x78] sm:$0xff] %v691_v47 }
 0x281   :  { %v1139_v27 = vld [vmem:[#allocation2 + $0x60] sm:$0xc0]  ;;  %v1141_v28 = vld [vmem:[#allocation2 + $0x70] sm:$0xc0] }
 0x282   :  { %v1140_v30 = vld [vmem:[#allocation2 + $0x68] sm:$0xc0]  ;;  %v1142_v53 = vld [vmem:[#allocation2 + $0x78] sm:$0xc0] }
 0x293   :  { %v903_v6 = vpop.f32.mrb[8].mxu1  ;;  %v974_v14 = vpop.f32.mrb[10].mxu0 }
 0x294   :  { %v1125_v18 = vadd.f32 %v1121_v13, %v903_v6  ;;  %v1127_v25 = vadd.f32 %v1123_v17, %v974_v14  ;;  %v905_v26 = vpop.f32.mrb[9].mxu1  ;;  %v976_v32 = vpop.f32.mrb[11].mxu0 }
 0x295   :  { %v1126_v43 = vadd.f32 %v1122_v29, %v905_v26  ;;  %v1128_v46 = vadd.f32 %v1124_v42, %v976_v32 }
 0x297   :  { %v1133_v49 = vcombine.low %v1125_v18, %v1126_v43  ;;  %v1134_v60 = vcombine.low %v1127_v25, %v1128_v46 }
 0x299   :  { %1137 = vst [vmem:[#allocation5] sm:$0x33] %v1133_v49  ;;  %1138 = vst [vmem:[#allocation5 + $0x8] sm:$0x33] %v1134_v60 }
 0x2b3   :  { %v1045_v16 = vpop.f32.mrb[10].mxu1  ;;  %v1116_v21 = vpop.f32.mrb[12].mxu0 }
 0x2b4   :  { %v1147_v22 = vrot.slane %v1045_v16, 4  ;;  %v1149_v20 = vrot.slane %v1116_v21, 4  ;;  %v1047_v33 = vpop.f32.mrb[11].mxu1  ;;  %v1118_v34 = vpop.f32.mrb[13].mxu0 }
 0x2b5   :  { %v1148_v58 = vrot.slane %v1047_v33, 4  ;;  %v1150_v7 = vrot.slane %v1118_v34, 4  ;;  %v17698_v33 = vld [vmem:[#allocation32_spill] sm:$0xff]  ;;  %v17699_v34 = vld [vmem:[#allocation33_spill] sm:$0xff] }
 0x2b6   :  { %v1155_v2 = vadd.f32 %v1147_v22, %v1139_v27  ;;  %v1157_v59 = vadd.f32 %v1149_v20, %v1141_v28  ;;  %v17695_v20 = vld [vmem:[#allocation29_spill] sm:$0xff]  ;;  %v1734_v27 = vld [vmem:[#allocation10 + $0xc8] sm:$0xff] }
 0x2b7   :  { %v1156_v56 = vadd.f32 %v1148_v58, %v1140_v30  ;;  %v1158_v57 = vadd.f32 %v1150_v7, %v1142_v53  ;;  %v1728_v28 = vld [vmem:[#allocation10 + $0x98] sm:$0xff]  ;;  %v1733_v30 = vld [vmem:[#allocation10 + $0xc0] sm:$0xff]  ;;  %v1727_v53 = vld [vmem:[#allocation10 + $0x90] sm:$0xff] }
 0x2b8   :  { %v1736_v58 = vld [vmem:[#allocation10 + $0xd8] sm:$0xff] }
 0x2b9   :  { %v1163_v0 = vcombine.high %v1155_v2, %v1156_v56  ;;  %v1164_v1 = vcombine.high %v1157_v59, %v1158_v57  ;;  %v15291_v2 = vpack.c.bf16 %v1736_v58, %v1728_v28  ;;  %v1725_v59 = vld [vmem:[#allocation10 + $0x80] sm:$0xff]  ;;  %v1735_v57 = vld [vmem:[#allocation10 + $0xd0] sm:$0xff] }
 0x2ba   :  { %v15294_v56 = vpack.c.bf16 %v1733_v30, %v1725_v59  ;;  %v1789_v59 = vld [vmem:[#allocation10 + $0x280] sm:$0xff] }
 0x2bb   :  { %1167 = vst [vmem:[#allocation5] sm:$0xcc] %v1163_v0  ;;  %1168 = vst [vmem:[#allocation5 + $0x8] sm:$0xcc] %v1164_v1  ;;  %v1742_v0 = vld [vmem:[#allocation10 + $0x108] sm:$0xff]  ;;  %v1797_v30 = vld [vmem:[#allocation10 + $0x2c0] sm:$0xff] }
 0x2bc   :  { %v1750_v1 = vld [vmem:[#allocation10 + $0x148] sm:$0xff] }
 0x2c2   :  { %v1169_v5 = vld [vmem:[#allocation5] sm:$0xff]  ;;  %v1170_v6 = vld [vmem:[#allocation5 + $0x8] sm:$0xff] }
 0x2c3   :  { %v11231_v47 = vmul.f32 -1.442695, %v1169_v5  ;;  %v11232_v13 = vmul.f32 -1.442695, %v1170_v6  ;;  %v1184_v18 = vrot.slane %v1170_v6, 4  ;;  %v15298_v5 = vpack.c.bf16 %v1735_v57, %v1727_v53  ;;  %v1744_v6 = vld [vmem:[#allocation10 + $0x118] sm:$0xff] }
 0x2c4   :  { %v1791_v53 = vld [vmem:[#allocation10 + $0x290] sm:$0xff] }
 0x2c5   :  { %14411 = vpow2.f32 %v11231_v47  ;;  %v15300_v47 = vpack.c.bf16 %v1750_v1, %v1742_v0  ;;  %v1799_v0 = vld [vmem:[#allocation10 + $0x2d0] sm:$0xff]  ;;  %v1806_v1 = vld [vmem:[#allocation10 + $0x308] sm:$0xff] }
 0x2c6   :  { %14413 = vpow2.f32 %v11232_v13  ;;  %v1752_v13 = vld [vmem:[#allocation10 + $0x158] sm:$0xff] }
 0x2cf   :  { %v14412_v14 = vpop.eup %14411 }
 0x2d0   :  { %v1177_v17 = vadd.f32 1.0, %v14412_v14  ;;  %v14414_v25 = vpop.eup %14413  ;;  %v1741_v14 = vld [vmem:[#allocation10 + $0x100] sm:$0xff] }
 0x2d1   :  { %v1178_v42 = vadd.f32 1.0, %v14414_v25  ;;  %v1743_v25 = vld [vmem:[#allocation10 + $0x110] sm:$0xff] }
 0x2d2   :  { %14415 = vrcp.f32 %v1177_v17  ;;  %v15302_v17 = vpack.c.bf16 %v1752_v13, %v1744_v6  ;;  %v1814_v6 = vld [vmem:[#allocation10 + $0x348] sm:$0xff]  ;;  %v1808_v13 = vld [vmem:[#allocation10 + $0x318] sm:$0xff] }
 0x2d3   :  { %14417 = vtanh.f32 %v1184_v18  ;;  %v1749_v18 = vld [vmem:[#allocation10 + $0x140] sm:$0xff] }
 0x2d4   :  { %14419 = vrcp.f32 %v1178_v42  ;;  %v1766_v42 = vld [vmem:[#allocation10 + $0x1c8] sm:$0xff] }
 0x2dc   :  { %v14416_v26 = vpop.eup %14415 }
 0x2dd   :  { %v1188_v29 = vrot.slane %v14416_v26, 4  ;;  %v14418_v32 = vpop.eup %14417 }
 0x2de   :  { %v1191_v46 = vmul.f32 %v14418_v32, %v14416_v26  ;;  %v14420_v60 = vpop.eup %14419  ;;  %v1751_v26 = vld [vmem:[#allocation10 + $0x150] sm:$0xff]  ;;  %v1758_v32 = vld [vmem:[#allocation10 + $0x188] sm:$0xff] }
 0x2df   :  { %v1190_v43 = vmul.f32 0.0, %v1188_v29  ;;  %v15305_v29 = vpack.c.bf16 %v1749_v18, %v1741_v14  ;;  %v1816_v14 = vld [vmem:[#allocation10 + $0x358] sm:$0xff]  ;;  %v15341_v18 = vpack.c.bf16 %v1797_v30, %v1789_v59 }
 0x2e0   :  { %v1724_v59 = vld [vmem:[#allocation10 + $0x78] sm:$0xff] }
 0x2e1   :  { %v15241_v49 = vadd.f32 %v1191_v46, %v1190_v43  ;;  %v1760_v43 = vld [vmem:[#allocation10 + $0x198] sm:$0xff]  ;;  %v15309_v46 = vpack.c.bf16 %v1751_v26, %v1743_v25  ;;  %v15345_v25 = vpack.c.bf16 %v1799_v0, %v1791_v53  ;;  %v15347_v26 = vpack.c.bf16 %v1814_v6, %v1806_v1 }
 0x2e3   :  { %14421 = vtanh.f32 %v15241_v49 }
 0x2ed   :  { %v14422_v16 = vpop.eup %14421 }
 0x2ee   :  { %v1194_v21 = vmul.f32 %v14422_v16, %v14420_v60  ;;  %v15311_v60 = vpack.c.bf16 %v1766_v42, %v1758_v32  ;;  %v1768_v16 = vld [vmem:[#allocation10 + $0x1d8] sm:$0xff]  ;;  %v1805_v32 = vld [vmem:[#allocation10 + $0x300] sm:$0xff] }
 0x2ef   :  { %v1813_v42 = vld [vmem:[#allocation10 + $0x340] sm:$0xff] }
 0x2f0   :  { %1195 = vst [vmem:[#allocation3] sm:$0x3] %v1194_v21  ;;  %v1197_v22 = vcombine.low %v1194_v21, %v1194_v21  ;;  %1393 = vmatmul.mubr.f32.vlgmr.msra.gmra.mrb[12].mxu1 %v1194_v21  ;;  %1464 = vmatmul.mubr.f32.vlgmr.msra.gmra.mrb[14].mxu0 %v1194_v21 }
 0x2f1   :  { %11659 = vmatpush1.bf16.msra.mxu1 %v15073_v35  ;;  %11691 = vmatpush1.bf16.msra.mxu0 %v15075_v37  ;;  %v17693_v35 = vld [vmem:[#allocation27_spill] sm:$0xff]  ;;  %v17694_v37 = vld [vmem:[#allocation28_spill] sm:$0xff] }
 0x2f2   :  { %1199 = vst [vmem:[#allocation3 + $0x18] sm:$0xc0] %v1197_v22  ;;  %11661 = vmatprep.subr.bf16.mxu1 %v15079_v44  ;;  %11693 = vmatprep.subr.bf16.mxu0 %v15081_v45  ;;  %v17696_v44 = vld [vmem:[#allocation30_spill] sm:$0xff]  ;;  %v17697_v45 = vld [vmem:[#allocation31_spill] sm:$0xff] }
 0x2f3   :  { %1534 = vmatprep.mubr.f32.mxu1 %v17686_v19  ;;  %1605 = vmatprep.mubr.f32.mxu0 %v17686_v19  ;;  %v1765_v22 = vld [vmem:[#allocation10 + $0x1c0] sm:$0xff] }
 0x2f5   :  { %11663 = vmatpush1.bf16.msra.mxu1 %v15087_v62  ;;  %11695 = vmatpush1.bf16.msra.mxu0 %v15089_v63  ;;  %v17700_v62 = vld [vmem:[#allocation34_spill] sm:$0xff]  ;;  %v17701_v63 = vld [vmem:[#allocation35_spill] sm:$0xff] }
 0x2f6   :  { %11665 = vmatprep.subr.bf16.mxu1 %v15093_v8  ;;  %11697 = vmatprep.subr.bf16.mxu0 %v15095_v10  ;;  %v17702_v8 = vld [vmem:[#allocation36_spill] sm:$0xff] }
 0x2f7   :  { %v1710_v10 = vld [vmem:[#allocation10 + $0x8] sm:$0xff] }
 0x2f9   :  { %11667 = vmatpush1.bf16.msra.mxu1 %v17693_v35  ;;  %11699 = vmatpush1.bf16.msra.mxu0 %v17694_v37  ;;  %v15314_v35 = vpack.c.bf16 %v1768_v16, %v1760_v43  ;;  %v1759_v37 = vld [vmem:[#allocation10 + $0x190] sm:$0xff]  ;;  %v15350_v16 = vpack.c.bf16 %v1816_v14, %v1808_v13 }
 0x2fa   :  { %11669 = vmatprep.subr.bf16.mxu1 %v17695_v20  ;;  %11701 = vmatprep.subr.bf16.mxu0 %v17696_v44  ;;  %v1767_v20 = vld [vmem:[#allocation10 + $0x1d0] sm:$0xff]  ;;  %v1774_v44 = vld [vmem:[#allocation10 + $0x208] sm:$0xff] }
 0x2fb   :  { %v1807_v43 = vld [vmem:[#allocation10 + $0x310] sm:$0xff] }
 0x2fd   :  { %11671 = vmatpush1.bf16.msra.mxu1 %v17697_v45  ;;  %11703 = vmatpush1.bf16.msra.mxu0 %v17698_v33  ;;  %v1782_v45 = vld [vmem:[#allocation10 + $0x248] sm:$0xff]  ;;  %v1776_v33 = vld [vmem:[#allocation10 + $0x218] sm:$0xff] }
 0x2fe   :  { %11673 = vmatprep.subr.bf16.mxu1 %v17699_v34  ;;  %11705 = vmatprep.subr.bf16.mxu0 %v17700_v62  ;;  %v1784_v34 = vld [vmem:[#allocation10 + $0x258] sm:$0xff] }
 0x301   :  { %11675 = vmatpush1.bf16.msra.mxu1 %v17701_v63  ;;  %11707 = vmatpush1.bf16.msra.mxu0 %v17702_v8  ;;  %v15321_v63 = vpack.c.bf16 %v1767_v20, %v1759_v37  ;;  %v15323_v8 = vpack.c.bf16 %v1782_v45, %v1774_v44  ;;  %v1830_v37 = vld [vmem:[#allocation10 + $0x3c8] sm:$0xff]  ;;  %v1824_v20 = vld [vmem:[#allocation10 + $0x398] sm:$0xff]  ;;  %v15353_v45 = vpack.c.bf16 %v1813_v42, %v1805_v32 }
 0x302   :  { %11677 = vmatprep.subr.bf16.mxu1 %v15131_v54  ;;  %11709 = vmatprep.subr.bf16.mxu0 %v15133_v55  ;;  %v1718_v54 = vld [vmem:[#allocation10 + $0x48] sm:$0xff]  ;;  %v1712_v55 = vld [vmem:[#allocation10 + $0x18] sm:$0xff] }
 0x303   :  { %v1832_v44 = vld [vmem:[#allocation10 + $0x3d8] sm:$0xff] }
 0x305   :  { %11679 = vmatpush1.bf16.msra.mxu1 %v15137_v11  ;;  %11711 = vmatpush1.bf16.msra.mxu0 %v15139_v12  ;;  %v15278_v11 = vpack.c.bf16 %v1718_v54, %v1710_v10  ;;  %v1720_v12 = vld [vmem:[#allocation10 + $0x58] sm:$0xff]  ;;  %v1773_v10 = vld [vmem:[#allocation10 + $0x200] sm:$0xff] }
 0x306   :  { %11681 = vmatprep.subr.bf16.mxu1 %v15143_v9  ;;  %11713 = vmatprep.subr.bf16.mxu0 %v15145_v36  ;;  %v1709_v9 = vld [vmem:[#allocation10] sm:$0xff] }
 0x307   :  { %v1717_v36 = vld [vmem:[#allocation10 + $0x40] sm:$0xff] }
 0x308   :  { %v1781_v54 = vld [vmem:[#allocation10 + $0x240] sm:$0xff] }
 0x309   :  { %11683 = vmatpush1.bf16.msra.mxu1 %v15149_v50  ;;  %11715 = vmatpush1.bf16.msra.mxu0 %v15151_v51  ;;  %v15280_v50 = vpack.c.bf16 %v1720_v12, %v1712_v55  ;;  %v15282_v51 = vpack.c.bf16 %v1717_v36, %v1709_v9  ;;  %v1775_v55 = vld [vmem:[#allocation10 + $0x210] sm:$0xff]  ;;  %v15326_v12 = vpack.c.bf16 %v1784_v34, %v1776_v33  ;;  %v1790_v36 = vld [vmem:[#allocation10 + $0x288] sm:$0xff] }
 0x30a   :  { %11685 = vmatprep.subr.bf16.mxu1 %v15155_v38  ;;  %11717 = vmatprep.subr.bf16.mxu0 %v15157_v39  ;;  %v1711_v38 = vld [vmem:[#allocation10 + $0x10] sm:$0xff] }
 0x30b   :  { %v1719_v39 = vld [vmem:[#allocation10 + $0x50] sm:$0xff] }
 0x30c   :  { %v1783_v9 = vld [vmem:[#allocation10 + $0x250] sm:$0xff] }
 0x30d   :  { %11687 = vmatpush1.bf16.msra.mxu1 %v15161_v23  ;;  %11719 = vmatpush1.bf16.msra.mxu0 %v15163_v24  ;;  %v1726_v23 = vld [vmem:[#allocation10 + $0x88] sm:$0xff]  ;;  %v15285_v24 = vpack.c.bf16 %v1719_v39, %v1711_v38  ;;  %v1792_v39 = vld [vmem:[#allocation10 + $0x298] sm:$0xff]  ;;  %v15333_v28 = vpack.c.bf16 %v1783_v9, %v1775_v55  ;;  %v1823_v55 = vld [vmem:[#allocation10 + $0x390] sm:$0xff]  ;;  %v15362_v9 = vpack.c.bf16 %v1832_v44, %v1824_v20 }
 0x30e   :  { %11721 = vmatprep.subr.bf16.mxu1 %v15278_v11  ;;  %11753 = vmatprep.subr.bf16.mxu0 %v15280_v50  ;;  %v15289_v7 = vpack.c.bf16 %v1734_v27, %v1726_v23  ;;  %v1798_v38 = vld [vmem:[#allocation10 + $0x2c8] sm:$0xff]  ;;  %v1800_v23 = vld [vmem:[#allocation10 + $0x2d8] sm:$0xff]  ;;  %v15329_v27 = vpack.c.bf16 %v1781_v54, %v1773_v10  ;;  %v1821_v10 = vld [vmem:[#allocation10 + $0x380] sm:$0xff] }
 0x30f   :  { %v15335_v58 = vpack.c.bf16 %v1798_v38, %v1790_v36  ;;  %v15338_v57 = vpack.c.bf16 %v1800_v23, %v1792_v39  ;;  %v1829_v54 = vld [vmem:[#allocation10 + $0x3c0] sm:$0xff]  ;;  %v1831_v36 = vld [vmem:[#allocation10 + $0x3d0] sm:$0xff]  ;;  %v1714_v38 = vld [vmem:[#allocation10 + $0x28] sm:$0xff] }
 0x310   :  { %1535 = vmatmul.mubr.f32.vlgmr.msra.gmra.mrb[14].mxu1 %v1194_v21  ;;  %1606 = vmatmul.mubr.f32.vlgmr.msra.gmra.mrb[16].mxu0 %v1194_v21  ;;  %v1757_v21 = vld [vmem:[#allocation10 + $0x180] sm:$0xff]  ;;  %v1722_v39 = vld [vmem:[#allocation10 + $0x68] sm:$0xff]  ;;  %v1716_v23 = vld [vmem:[#allocation10 + $0x38] sm:$0xff]  ;;  %v15365_v30 = vpack.c.bf16 %v1829_v54, %v1821_v10  ;;  %v15369_v53 = vpack.c.bf16 %v1831_v36, %v1823_v55 }
 0x311   :  { %1901 = vmatprep.mubr.f32.mxu1 %v17686_v19  ;;  %1972 = vmatprep.mubr.f32.mxu0 %v17686_v19  ;;  %v15317_v62 = vpack.c.bf16 %v1765_v22, %v1757_v21  ;;  %v1815_v21 = vld [vmem:[#allocation10 + $0x350] sm:$0xff]  ;;  %v1822_v22 = vld [vmem:[#allocation10 + $0x388] sm:$0xff]  ;;  %v15371_v0 = vpack.c.bf16 %v1722_v39, %v1714_v38  ;;  %v15374_v1 = vpack.c.bf16 %v1724_v59, %v1716_v23  ;;  %v1613_v54 = vld [vmem:[#allocation2 + $0x8] sm:$0xc] }
 0x312   :  { %11723 = vmatpush1.bf16.msra.mxu1 %v15282_v51  ;;  %11755 = vmatpush1.bf16.msra.mxu0 %v15285_v24  ;;  %v15357_v33 = vpack.c.bf16 %v1815_v21, %v1807_v43  ;;  %v15359_v34 = vpack.c.bf16 %v1830_v37, %v1822_v22  ;;  %v1612_v21 = vld [vmem:[#allocation2] sm:$0xc]  ;;  %v1614_v22 = vld [vmem:[#allocation2 + $0x10] sm:$0xc]  ;;  %v1615_v55 = vld [vmem:[#allocation2 + $0x18] sm:$0xc] }
 0x313   :  { %11725 = vmatprep.subr.bf16.mxu1 %v15289_v7  ;;  %11757 = vmatprep.subr.bf16.mxu0 %v15291_v2 }
 0x316   :  { %11727 = vmatpush1.bf16.msra.mxu1 %v15294_v56  ;;  %11759 = vmatpush1.bf16.msra.mxu0 %v15298_v5 }
 0x317   :  { %11729 = vmatprep.subr.bf16.mxu1 %v15300_v47  ;;  %11761 = vmatprep.subr.bf16.mxu0 %v15302_v17 }
 0x31a   :  { %11731 = vmatpush1.bf16.msra.mxu1 %v15305_v29  ;;  %11763 = vmatpush1.bf16.msra.mxu0 %v15309_v46 }
 0x31b   :  { %11733 = vmatprep.subr.bf16.mxu1 %v15311_v60  ;;  %11765 = vmatprep.subr.bf16.mxu0 %v15314_v35 }
 0x31e   :  { %11735 = vmatpush1.bf16.msra.mxu1 %v15317_v62  ;;  %11767 = vmatpush1.bf16.msra.mxu0 %v15321_v63 }
 0x31f   :  { %11737 = vmatprep.subr.bf16.mxu1 %v15323_v8  ;;  %11769 = vmatprep.subr.bf16.mxu0 %v15326_v12 }
 0x322   :  { %11739 = vmatpush1.bf16.msra.mxu1 %v15329_v27  ;;  %11771 = vmatpush1.bf16.msra.mxu0 %v15333_v28 }
 0x323   :  { %11741 = vmatprep.subr.bf16.mxu1 %v15335_v58  ;;  %11773 = vmatprep.subr.bf16.mxu0 %v15338_v57 }
 0x326   :  { %11743 = vmatpush1.bf16.msra.mxu1 %v15341_v18  ;;  %11775 = vmatpush1.bf16.msra.mxu0 %v15345_v25 }
 0x327   :  { %11745 = vmatprep.subr.bf16.mxu1 %v15347_v26  ;;  %11777 = vmatprep.subr.bf16.mxu0 %v15350_v16 }
 0x32a   :  { %11747 = vmatpush1.bf16.msra.mxu1 %v15353_v45  ;;  %11779 = vmatpush1.bf16.msra.mxu0 %v15357_v33 }
 0x32b   :  { %11749 = vmatprep.subr.bf16.mxu1 %v15359_v34  ;;  %11781 = vmatprep.subr.bf16.mxu0 %v15362_v9 }
 0x32e   :  { %11751 = vmatpush1.bf16.msra.mxu1 %v15365_v30  ;;  %11783 = vmatpush1.bf16.msra.mxu0 %v15369_v53 }
 0x32f   :  { %11785 = vmatprep.subr.bf16.mxu1 %v15371_v0  ;;  %11817 = vmatprep.subr.bf16.mxu0 %v15374_v1 }
 0x3c3   :  { %v1394_v6 = vpop.f32.mrb[12].mxu1  ;;  %v1465_v13 = vpop.f32.mrb[14].mxu0 }
 0x3c4   :  { %v1620_v14 = vrot.slane %v1394_v6, 6  ;;  %v1622_v32 = vrot.slane %v1465_v13, 6  ;;  %v1396_v42 = vpop.f32.mrb[13].mxu1  ;;  %v1467_v43 = vpop.f32.mrb[15].mxu0 }
 0x3c5   :  { %v1621_v37 = vrot.slane %v1396_v42, 6  ;;  %v1623_v20 = vrot.slane %v1467_v43, 6  ;;  %v1646_v42 = vld [vmem:[#allocation2 + $0x60] sm:$0x30]  ;;  %v1648_v43 = vld [vmem:[#allocation2 + $0x70] sm:$0x30] }
 0x3c6   :  { %v1628_v44 = vadd.f32 %v1620_v14, %v1612_v21  ;;  %v1630_v10 = vadd.f32 %v1622_v32, %v1614_v22 }
 0x3c7   :  { %v1629_v36 = vadd.f32 %v1621_v37, %v1613_v54  ;;  %v1631_v38 = vadd.f32 %v1623_v20, %v1615_v55  ;;  %v1647_v37 = vld [vmem:[#allocation2 + $0x68] sm:$0x30]  ;;  %v1649_v20 = vld [vmem:[#allocation2 + $0x78] sm:$0x30] }
 0x3c9   :  { %v1636_v39 = vcombine.low %v1628_v44, %v1629_v36  ;;  %v1637_v23 = vcombine.low %v1630_v10, %v1631_v38 }
 0x3cb   :  { %v11233_v59 = vrot.slane %v1636_v39, 10  ;;  %v11234_v15 = vrot.slane %v1637_v23, 10 }
 0x3cd   :  { %1644 = vst [vmem:[#allocation5] sm:$0x33] %v11233_v59  ;;  %1645 = vst [vmem:[#allocation5 + $0x8] sm:$0x33] %v11234_v15 }
 0x3e3   :  { %v1536_v6 = vpop.f32.mrb[14].mxu1  ;;  %v1607_v13 = vpop.f32.mrb[16].mxu0 }
 0x3e4   :  { %v1654_v4 = vrot.slane %v1536_v6, 6  ;;  %v1656_v3 = vrot.slane %v1607_v13, 6  ;;  %v1538_v61 = vpop.f32.mrb[15].mxu1  ;;  %v1609_v31 = vpop.f32.mrb[17].mxu0 }
 0x3e5   :  { %v1655_v14 = vrot.slane %v1538_v61, 6  ;;  %v1657_v32 = vrot.slane %v1609_v31, 6 }
 0x3e6   :  { %v1662_v21 = vadd.f32 %v1654_v4, %v1646_v42  ;;  %v1664_v22 = vadd.f32 %v1656_v3, %v1648_v43 }
 0x3e7   :  { %v1663_v44 = vadd.f32 %v1655_v14, %v1647_v37  ;;  %v1665_v10 = vadd.f32 %v1657_v32, %v1649_v20  ;;  %v1721_v37 = vld [vmem:[#allocation10 + $0x60] sm:$0xff]  ;;  %v1715_v20 = vld [vmem:[#allocation10 + $0x30] sm:$0xff] }
 0x3e9   :  { %v1670_v54 = vcombine.high %v1662_v21, %v1663_v44  ;;  %v1671_v55 = vcombine.high %v1664_v22, %v1665_v10  ;;  %v1713_v22 = vld [vmem:[#allocation10 + $0x20] sm:$0xff]  ;;  %v1723_v44 = vld [vmem:[#allocation10 + $0x70] sm:$0xff]  ;;  %v1730_v10 = vld [vmem:[#allocation10 + $0xa8] sm:$0xff] }
 0x3eb   :  { %v1672_v36 = vrot.slane %v1670_v54, 6  ;;  %v1673_v15 = vrot.slane %v1671_v55, 6  ;;  %v1738_v54 = vld [vmem:[#allocation10 + $0xe8] sm:$0xff]  ;;  %v1732_v55 = vld [vmem:[#allocation10 + $0xb8] sm:$0xff] }
 0x3ed   :  { %1676 = vst [vmem:[#allocation5] sm:$0xcc] %v1672_v36  ;;  %1677 = vst [vmem:[#allocation5 + $0x8] sm:$0xcc] %v1673_v15  ;;  %v1740_v36 = vld [vmem:[#allocation10 + $0xf8] sm:$0xff] }
 0x3f4   :  { %v1678_v38 = vld [vmem:[#allocation5] sm:$0xff]  ;;  %v1679_v23 = vld [vmem:[#allocation5 + $0x8] sm:$0xff] }
 0x3f5   :  { %v11235_v39 = vmul.f32 -1.442695, %v1678_v38  ;;  %v11236_v59 = vmul.f32 -1.442695, %v1679_v23  ;;  %v1693_v31 = vrot.slane %v1679_v23, 4  ;;  %v15386_v23 = vpack.c.bf16 %v1723_v44, %v1715_v20  ;;  %v1745_v20 = vld [vmem:[#allocation10 + $0x120] sm:$0xff] }
 0x3f6   :  { %v1753_v44 = vld [vmem:[#allocation10 + $0x160] sm:$0xff] }
 0x3f7   :  { %14423 = vpow2.f32 %v11235_v39  ;;  %v15384_v39 = vpack.c.bf16 %v1721_v37, %v1713_v22 }
 0x3f8   :  { %14425 = vpow2.f32 %v11236_v59  ;;  %v1737_v59 = vld [vmem:[#allocation10 + $0xe0] sm:$0xff] }
 0x401   :  { %v14424_v6 = vpop.eup %14423 }
 0x402   :  { %v1686_v61 = vadd.f32 1.0, %v14424_v6  ;;  %v14426_v3 = vpop.eup %14425 }
 0x403   :  { %v1687_v43 = vadd.f32 1.0, %v14426_v3  ;;  %v1731_v3 = vld [vmem:[#allocation10 + $0xb0] sm:$0xff] }
 0x404   :  { %14427 = vrcp.f32 %v1686_v61  ;;  %v15390_v61 = vpack.c.bf16 %v1738_v54, %v1730_v10 }
 0x405   :  { %14429 = vtanh.f32 %v1693_v31  ;;  %v15392_v31 = vpack.c.bf16 %v1740_v36, %v1732_v55  ;;  %v1747_v55 = vld [vmem:[#allocation10 + $0x130] sm:$0xff] }
 0x406   :  { %14431 = vrcp.f32 %v1687_v43  ;;  %v1748_v43 = vld [vmem:[#allocation10 + $0x138] sm:$0xff]  ;;  %v1755_v36 = vld [vmem:[#allocation10 + $0x170] sm:$0xff] }
 0x40e   :  { %v14428_v4 = vpop.eup %14427 }
 0x40f   :  { %v1697_v13 = vrot.slane %v14428_v4, 4  ;;  %v14430_v42 = vpop.eup %14429 }
 0x410   :  { %v1700_v32 = vmul.f32 %v14430_v42, %v14428_v4  ;;  %v14432_v15 = vpop.eup %14431  ;;  %v1739_v4 = vld [vmem:[#allocation10 + $0xf0] sm:$0xff]  ;;  %v1754_v42 = vld [vmem:[#allocation10 + $0x168] sm:$0xff] }
 0x411   :  { %v1699_v14 = vmul.f32 %v1697_v13, %v15241_v49  ;;  %v1729_v49 = vld [vmem:[#allocation10 + $0xa0] sm:$0xff]  ;;  %v1746_v13 = vld [vmem:[#allocation10 + $0x128] sm:$0xff]  ;;  %v15401_v37 = vpack.c.bf16 %v1739_v4, %v1731_v3  ;;  %v15415_v3 = vpack.c.bf16 %v1755_v36, %v1747_v55 }
 0x412   :  { %v15399_v22 = vpack.c.bf16 %v1737_v59, %v1729_v49  ;;  %v15405_v10 = vpack.c.bf16 %v1754_v42, %v1746_v13  ;;  %v1772_v49 = vld [vmem:[#allocation10 + $0x1f8] sm:$0xff]  ;;  %v15413_v59 = vpack.c.bf16 %v1753_v44, %v1745_v20  ;;  %v1761_v4 = vld [vmem:[#allocation10 + $0x1a0] sm:$0xff] }
 0x413   :  { %v15381_v21 = vadd.f32 %v1700_v32, %v1699_v14  ;;  %v1756_v14 = vld [vmem:[#allocation10 + $0x178] sm:$0xff]  ;;  %17703 = vst [vmem:[#allocation27_spill] sm:$0xff] %v15401_v37  ;;  %17707 = vst [vmem:[#allocation31_spill] sm:$0xff] %v15415_v3  ;;  %v1769_v13 = vld [vmem:[#allocation10 + $0x1e0] sm:$0xff] }
 0x414   :  { %17704 = vst [vmem:[#allocation28_spill] sm:$0xff] %v15405_v10  ;;  %v15407_v54 = vpack.c.bf16 %v1756_v14, %v1748_v43  ;;  %17706 = vst [vmem:[#allocation30_spill] sm:$0xff] %v15413_v59  ;;  %v15421_v43 = vpack.c.bf16 %v1772_v49, %v1764_v52  ;;  %v1763_v14 = vld [vmem:[#allocation10 + $0x1b0] sm:$0xff]  ;;  %v15425_v20 = vpack.c.bf16 %v1769_v13, %v1761_v4  ;;  %v1777_v55 = vld [vmem:[#allocation10 + $0x220] sm:$0xff] }
 0x415   :  { %14433 = vtanh.f32 %v15381_v21  ;;  %v1785_v36 = vld [vmem:[#allocation10 + $0x260] sm:$0xff]  ;;  %v15431_v52 = vpack.c.bf16 %v1786_v41, %v1778_v48  ;;  %v1787_v49 = vld [vmem:[#allocation10 + $0x270] sm:$0xff] }
 0x416   :  { %17705 = vst [vmem:[#allocation29_spill] sm:$0xff] %v15407_v54  ;;  %17709 = vst [vmem:[#allocation33_spill] sm:$0xff] %v15421_v43  ;;  %v15437_v4 = vpack.c.bf16 %v1785_v36, %v1777_v55  ;;  %v1795_v48 = vld [vmem:[#allocation10 + $0x2b0] sm:$0xff] }
 0x417   :  { %17710 = vst [vmem:[#allocation34_spill] sm:$0xff] %v15425_v20  ;;  %17712 = vst [vmem:[#allocation36_spill] sm:$0xff] %v15431_v52 }
 0x418   :  { %17714 = vst [vmem:[#allocation43_spill] sm:$0xff] %v15437_v4 }
 0x41f   :  { %v14434_v38 = vpop.eup %14433 }
 0x420   :  { %v15388_v6 = vmul.f32 %v14434_v38, %v14432_v15  ;;  %v1762_v15 = vld [vmem:[#allocation10 + $0x1a8] sm:$0xff] }
 0x421   :  { %v1770_v38 = vld [vmem:[#allocation10 + $0x1e8] sm:$0xff] }
 0x422   :  { %v1705_v32 = vrot.slane %v15388_v6, 6  ;;  %1902 = vmatmul.mubr.f32.vlgmr.msra.gmra.mrb[16].mxu1 %v15388_v6  ;;  %1973 = vmatmul.mubr.f32.vlgmr.msra.gmra.mrb[18].mxu0 %v15388_v6  ;;  %v15419_v42 = vpack.c.bf16 %v1770_v38, %v1762_v15  ;;  %v1779_v38 = vld [vmem:[#allocation10 + $0x230] sm:$0xff] }
 0x423   :  { %11787 = vmatpush1.bf16.msra.mxu1 %v15384_v39  ;;  %11819 = vmatpush1.bf16.msra.mxu0 %v15386_v23  ;;  %v15439_v13 = vpack.c.bf16 %v1787_v49, %v1779_v38  ;;  %v1809_v38 = vld [vmem:[#allocation10 + $0x320] sm:$0xff] }
 0x424   :  { %1707 = vst [vmem:[#allocation3] ss:$28 sps:$4 sm:$0x3c] %v1705_v32   ;;  %11789 = vmatprep.subr.bf16.mxu1 %v15390_v61  ;;  %11821 = vmatprep.subr.bf16.mxu0 %v15392_v31  ;;  %17708 = vst [vmem:[#allocation32_spill] sm:$0xff] %v15419_v42  ;;  %v1771_v32 = vld [vmem:[#allocation10 + $0x1f0] sm:$0xff]  ;;  %v1817_v49 = vld [vmem:[#allocation10 + $0x360] sm:$0xff] }
 0x425   :  { %2043 = vmatprep.mubr.f32.mxu1 %v17686_v19  ;;  %2114 = vmatprep.mubr.f32.mxu0 %v17686_v19  ;;  %v15427_v44 = vpack.c.bf16 %v1771_v32, %v1763_v14  ;;  %17715 = vst [vmem:[#allocation44_spill] sm:$0xff] %v15439_v13  ;;  %v1793_v14 = vld [vmem:[#allocation10 + $0x2a0] sm:$0xff] }
 0x426   :  { %v1801_v32 = vld [vmem:[#allocation10 + $0x2e0] sm:$0xff] }
 0x427   :  { %11791 = vmatpush1.bf16.msra.mxu1 %v15399_v22  ;;  %11823 = vmatpush1.bf16.msra.mxu0 %v15401_v37  ;;  %v1788_v37 = vld [vmem:[#allocation10 + $0x278] sm:$0xff]  ;;  %17711 = vst [vmem:[#allocation35_spill] sm:$0xff] %v15427_v44  ;;  %v15449_v55 = vpack.c.bf16 %v1801_v32, %v1793_v14  ;;  %v15461_v14 = vpack.c.bf16 %v1817_v49, %v1809_v38 }
 0x428   :  { %11793 = vmatprep.subr.bf16.mxu1 %v15405_v10  ;;  %11825 = vmatprep.subr.bf16.mxu0 %v15407_v54  ;;  %v15433_v15 = vpack.c.bf16 %v1788_v37, %v1780_v40  ;;  %v1794_v54 = vld [vmem:[#allocation10 + $0x2a8] sm:$0xff]  ;;  %v1796_v10 = vld [vmem:[#allocation10 + $0x2b8] sm:$0xff]  ;;  %v1803_v37 = vld [vmem:[#allocation10 + $0x2f0] sm:$0xff] }
 0x429   :  { %v15451_v36 = vpack.c.bf16 %v1803_v37, %v1795_v48  ;;  %v1825_v48 = vld [vmem:[#allocation10 + $0x3a0] sm:$0xff]  ;;  %v1835_v37 = vld [vmem:[#allocation10 + $0x3f0] sm:$0xff] }
 0x42a   :  { %17713 = vst [vmem:[#allocation42_spill] sm:$0xff] %v15433_v15 }
 0x42b   :  { %11795 = vmatpush1.bf16.msra.mxu1 %v15413_v59  ;;  %11827 = vmatpush1.bf16.msra.mxu0 %v15415_v3  ;;  %v1802_v59 = vld [vmem:[#allocation10 + $0x2e8] sm:$0xff]  ;;  %v1804_v3 = vld [vmem:[#allocation10 + $0x2f8] sm:$0xff] }
 0x42c   :  { %11797 = vmatprep.subr.bf16.mxu1 %v15419_v42  ;;  %11829 = vmatprep.subr.bf16.mxu0 %v15421_v43  ;;  %v15443_v40 = vpack.c.bf16 %v1802_v59, %v1794_v54  ;;  %v15445_v41 = vpack.c.bf16 %v1804_v3, %v1796_v10  ;;  %v1810_v43 = vld [vmem:[#allocation10 + $0x328] sm:$0xff]  ;;  %v1812_v42 = vld [vmem:[#allocation10 + $0x338] sm:$0xff]  ;;  %v1811_v59 = vld [vmem:[#allocation10 + $0x330] sm:$0xff] }
 0x42d   :  { %v1819_v3 = vld [vmem:[#allocation10 + $0x370] sm:$0xff] }
 0x42e   :  { %v15463_v32 = vpack.c.bf16 %v1819_v3, %v1811_v59 }
 0x42f   :  { %11799 = vmatpush1.bf16.msra.mxu1 %v15425_v20  ;;  %11831 = vmatpush1.bf16.msra.mxu0 %v15427_v44  ;;  %v1818_v20 = vld [vmem:[#allocation10 + $0x368] sm:$0xff]  ;;  %v1820_v44 = vld [vmem:[#allocation10 + $0x378] sm:$0xff] }
 0x430   :  { %11801 = vmatprep.subr.bf16.mxu1 %v15431_v52  ;;  %11833 = vmatprep.subr.bf16.mxu0 %v15433_v15  ;;  %v15455_v10 = vpack.c.bf16 %v1818_v20, %v1810_v43  ;;  %v15457_v54 = vpack.c.bf16 %v1820_v44, %v1812_v42  ;;  %v1826_v15 = vld [vmem:[#allocation10 + $0x3a8] sm:$0xff]  ;;  %v1828_v52 = vld [vmem:[#allocation10 + $0x3b8] sm:$0xff]  ;;  %v1833_v20 = vld [vmem:[#allocation10 + $0x3e0] sm:$0xff] }
 0x431   :  { %v1827_v44 = vld [vmem:[#allocation10 + $0x3b0] sm:$0xff]  ;;  %v15473_v38 = vpack.c.bf16 %v1833_v20, %v1825_v48 }
 0x432   :  { %v15475_v49 = vpack.c.bf16 %v1835_v37, %v1827_v44 }
 0x433   :  { %11803 = vmatpush1.bf16.msra.mxu1 %v15437_v4  ;;  %11835 = vmatpush1.bf16.msra.mxu0 %v15439_v13  ;;  %v1834_v4 = vld [vmem:[#allocation10 + $0x3e8] sm:$0xff]  ;;  %v1836_v13 = vld [vmem:[#allocation10 + $0x3f8] sm:$0xff] }
 0x434   :  { %11805 = vmatprep.subr.bf16.mxu1 %v15443_v40  ;;  %11837 = vmatprep.subr.bf16.mxu0 %v15445_v41  ;;  %v15467_v42 = vpack.c.bf16 %v1834_v4, %v1826_v15  ;;  %v15469_v43 = vpack.c.bf16 %v1836_v13, %v1828_v52 }
 0x437   :  { %11807 = vmatpush1.bf16.msra.mxu1 %v15449_v55  ;;  %11839 = vmatpush1.bf16.msra.mxu0 %v15451_v36 }
 0x438   :  { %11809 = vmatprep.subr.bf16.mxu1 %v15455_v10  ;;  %11841 = vmatprep.subr.bf16.mxu0 %v15457_v54 }
 0x43b   :  { %11811 = vmatpush1.bf16.msra.mxu1 %v15461_v14  ;;  %11843 = vmatpush1.bf16.msra.mxu0 %v15463_v32 }
 0x43c   :  { %11813 = vmatprep.subr.bf16.mxu1 %v15467_v42  ;;  %11845 = vmatprep.subr.bf16.mxu0 %v15469_v43 }
 0x43f   :  { %11815 = vmatpush1.bf16.msra.mxu1 %v15473_v38  ;;  %11847 = vmatpush1.bf16.msra.mxu0 %v15475_v49 }
 0x440   :  { %11849 = vmatprep.subr.bf16.mxu1 %v15278_v11  ;;  %11881 = vmatprep.subr.bf16.mxu0 %v15280_v50 }
 0x442   :  { %2044 = vmatmul.mubr.f32.vlgmr.msra.gmra.mrb[18].mxu1 %v15388_v6  ;;  %2115 = vmatmul.mubr.f32.vlgmr.msra.gmra.mrb[20].mxu0 %v15388_v6 }
 0x443   :  { %11851 = vmatpush1.bf16.msra.mxu1 %v15282_v51  ;;  %11883 = vmatpush1.bf16.msra.mxu0 %v15285_v24 }
 0x444   :  { %11853 = vmatprep.subr.bf16.mxu1 %v15289_v7  ;;  %11885 = vmatprep.subr.bf16.mxu0 %v15291_v2 }
 0x445   :  { %2392 = vmatprep.mubr.f32.mxu1 %v17686_v19  ;;  %2463 = vmatprep.mubr.f32.mxu0 %v17686_v19 }
 0x447   :  { %11855 = vmatpush1.bf16.msra.mxu1 %v15294_v56  ;;  %11887 = vmatpush1.bf16.msra.mxu0 %v15298_v5  ;;  %v2121_v56 = vld [vmem:[#allocation2] sm:$0x30]  ;;  %v2123_v5 = vld [vmem:[#allocation2 + $0x10] sm:$0x30] }
 0x448   :  { %11857 = vmatprep.subr.bf16.mxu1 %v15300_v47  ;;  %11889 = vmatprep.subr.bf16.mxu0 %v15302_v17 }
 0x44b   :  { %11859 = vmatpush1.bf16.msra.mxu1 %v15305_v29  ;;  %11891 = vmatpush1.bf16.msra.mxu0 %v15309_v46 }
 0x44c   :  { %11861 = vmatprep.subr.bf16.mxu1 %v15311_v60  ;;  %11893 = vmatprep.subr.bf16.mxu0 %v15314_v35  ;;  %v2122_v60 = vld [vmem:[#allocation2 + $0x8] sm:$0x30]  ;;  %v2124_v35 = vld [vmem:[#allocation2 + $0x18] sm:$0x30] }
 0x44f   :  { %11863 = vmatpush1.bf16.msra.mxu1 %v15317_v62  ;;  %11895 = vmatpush1.bf16.msra.mxu0 %v15321_v63 }
 0x450   :  { %11865 = vmatprep.subr.bf16.mxu1 %v15323_v8  ;;  %11897 = vmatprep.subr.bf16.mxu0 %v15326_v12 }
 0x453   :  { %11867 = vmatpush1.bf16.msra.mxu1 %v15329_v27  ;;  %11899 = vmatpush1.bf16.msra.mxu0 %v15333_v28  ;;  %v2151_v28 = vld [vmem:[#allocation2 + $0x60] sm:$0xc] }
 0x454   :  { %11869 = vmatprep.subr.bf16.mxu1 %v15335_v58  ;;  %11901 = vmatprep.subr.bf16.mxu0 %v15338_v57  ;;  %v2153_v57 = vld [vmem:[#allocation2 + $0x70] sm:$0xc] }
 0x457   :  { %11871 = vmatpush1.bf16.msra.mxu1 %v15341_v18  ;;  %11903 = vmatpush1.bf16.msra.mxu0 %v15345_v25 }
 0x458   :  { %11873 = vmatprep.subr.bf16.mxu1 %v15347_v26  ;;  %11905 = vmatprep.subr.bf16.mxu0 %v15350_v16  ;;  %v2152_v16 = vld [vmem:[#allocation2 + $0x68] sm:$0xc] }
 0x45b   :  { %11875 = vmatpush1.bf16.msra.mxu1 %v15353_v45  ;;  %11907 = vmatpush1.bf16.msra.mxu0 %v15357_v33  ;;  %v2154_v33 = vld [vmem:[#allocation2 + $0x78] sm:$0xc] }
 0x45c   :  { %11877 = vmatprep.subr.bf16.mxu1 %v15359_v34  ;;  %11909 = vmatprep.subr.bf16.mxu0 %v15362_v9 }
 0x45f   :  { %11879 = vmatpush1.bf16.msra.mxu1 %v15365_v30  ;;  %11911 = vmatpush1.bf16.msra.mxu0 %v15369_v53 }
 0x460   :  { %11913 = vmatprep.subr.bf16.mxu1 %v15371_v0  ;;  %11945 = vmatprep.subr.bf16.mxu0 %v15374_v1 }
 0x4f5   :  { %v1903_v11 = vpop.f32.mrb[16].mxu1  ;;  %v1974_v50 = vpop.f32.mrb[18].mxu0 }
 0x4f6   :  { %v2129_v51 = vrot.slane %v1903_v11, 4  ;;  %v2131_v24 = vrot.slane %v1974_v50, 4  ;;  %v1905_v7 = vpop.f32.mrb[17].mxu1  ;;  %v1976_v2 = vpop.f32.mrb[19].mxu0 }
 0x4f7   :  { %v2130_v47 = vrot.slane %v1905_v7, 4  ;;  %v2132_v17 = vrot.slane %v1976_v2, 4 }
 0x4f8   :  { %v2137_v29 = vadd.f32 %v2129_v51, %v2121_v56  ;;  %v2139_v46 = vadd.f32 %v2131_v24, %v2123_v5  ;;  %v17717_v56 = vld [vmem:[#allocation28_spill] sm:$0xff]  ;;  %v17718_v5 = vld [vmem:[#allocation29_spill] sm:$0xff] }
 0x4f9   :  { %v2138_v62 = vadd.f32 %v2130_v47, %v2122_v60  ;;  %v2140_v63 = vadd.f32 %v2132_v17, %v2124_v35  ;;  %v17721_v47 = vld [vmem:[#allocation32_spill] sm:$0xff]  ;;  %v17724_v17 = vld [vmem:[#allocation35_spill] sm:$0xff] }
 0x4fa   :  { %v17728_v60 = vld [vmem:[#allocation44_spill] sm:$0xff] }
 0x4fb   :  { %v2145_v8 = vcombine.high %v2137_v29, %v2138_v62  ;;  %v2146_v12 = vcombine.high %v2139_v46, %v2140_v63  ;;  %v17725_v29 = vld [vmem:[#allocation36_spill] sm:$0xff]  ;;  %v17727_v46 = vld [vmem:[#allocation43_spill] sm:$0xff]  ;;  %v2728_v63 = vld [vmem:[#allocation10 + $0x98] sm:$0xff] }
 0x4fc   :  { %v2734_v62 = vld [vmem:[#allocation10 + $0xc8] sm:$0xff] }
 0x4fd   :  { %2149 = vst [vmem:[#allocation5] sm:$0x33] %v2145_v8  ;;  %2150 = vst [vmem:[#allocation5 + $0x8] sm:$0x33] %v2146_v12  ;;  %v2736_v8 = vld [vmem:[#allocation10 + $0xd8] sm:$0xff] }
 0x515   :  { %v2045_v27 = vpop.f32.mrb[18].mxu1  ;;  %v2116_v58 = vpop.f32.mrb[20].mxu0 }
 0x516   :  { %v2155_v18 = vadd.f32 %v2151_v28, %v2045_v27  ;;  %v2157_v25 = vadd.f32 %v2153_v57, %v2116_v58  ;;  %v2047_v26 = vpop.f32.mrb[19].mxu1  ;;  %v2118_v45 = vpop.f32.mrb[21].mxu0  ;;  %v15570_v27 = vpack.c.bf16 %v2736_v8, %v2728_v63  ;;  %v2725_v28 = vld [vmem:[#allocation10 + $0x80] sm:$0xff]  ;;  %v2727_v57 = vld [vmem:[#allocation10 + $0x90] sm:$0xff]  ;;  %v2808_v63 = vld [vmem:[#allocation10 + $0x318] sm:$0xff] }
 0x517   :  { %v2156_v34 = vadd.f32 %v2152_v16, %v2047_v26  ;;  %v2158_v9 = vadd.f32 %v2154_v33, %v2118_v45  ;;  %v2733_v58 = vld [vmem:[#allocation10 + $0xc0] sm:$0xff]  ;;  %v2742_v26 = vld [vmem:[#allocation10 + $0x108] sm:$0xff]  ;;  %v2816_v8 = vld [vmem:[#allocation10 + $0x358] sm:$0xff] }
 0x518   :  { %v2750_v16 = vld [vmem:[#allocation10 + $0x148] sm:$0xff] }
 0x519   :  { %v2163_v30 = vcombine.low %v2155_v18, %v2156_v34  ;;  %v2164_v53 = vcombine.low %v2157_v25, %v2158_v9  ;;  %v15573_v18 = vpack.c.bf16 %v2733_v58, %v2725_v28  ;;  %v2735_v25 = vld [vmem:[#allocation10 + $0xd0] sm:$0xff]  ;;  %v15579_v33 = vpack.c.bf16 %v2750_v16, %v2742_v26  ;;  %v2744_v34 = vld [vmem:[#allocation10 + $0x118] sm:$0xff]  ;;  %v2813_v26 = vld [vmem:[#allocation10 + $0x340] sm:$0xff] }
 0x51a   :  { %v15577_v45 = vpack.c.bf16 %v2735_v25, %v2727_v57  ;;  %v2752_v9 = vld [vmem:[#allocation10 + $0x158] sm:$0xff]  ;;  %v2805_v25 = vld [vmem:[#allocation10 + $0x300] sm:$0xff]  ;;  %v2807_v16 = vld [vmem:[#allocation10 + $0x310] sm:$0xff] }
 0x51b   :  { %2167 = vst [vmem:[#allocation5] sm:$0xcc] %v2163_v30  ;;  %2168 = vst [vmem:[#allocation5 + $0x8] sm:$0xcc] %v2164_v53  ;;  %v2741_v30 = vld [vmem:[#allocation10 + $0x100] sm:$0xff]  ;;  %v15581_v53 = vpack.c.bf16 %v2752_v9, %v2744_v34  ;;  %v15629_v34 = vpack.c.bf16 %v2816_v8, %v2808_v63  ;;  %v2815_v9 = vld [vmem:[#allocation10 + $0x350] sm:$0xff] }
 0x522   :  { %v2169_v0 = vld [vmem:[#allocation5] sm:$0xff]  ;;  %v2170_v6 = vld [vmem:[#allocation5 + $0x8] sm:$0xff] }
 0x523   :  { %v11237_v1 = vmul.f32 -1.442695, %v2169_v0  ;;  %v11238_v52 = vmul.f32 -1.442695, %v2170_v6  ;;  %v2184_v13 = vrot.slane %v2170_v6, 4  ;;  %v2749_v0 = vld [vmem:[#allocation10 + $0x140] sm:$0xff] }
 0x524   :  { %v2751_v6 = vld [vmem:[#allocation10 + $0x150] sm:$0xff] }
 0x525   :  { %14435 = vpow2.f32 %v11237_v1  ;;  %v2743_v1 = vld [vmem:[#allocation10 + $0x110] sm:$0xff] }
 0x526   :  { %14437 = vpow2.f32 %v11238_v52  ;;  %v15584_v52 = vpack.c.bf16 %v2749_v0, %v2741_v30  ;;  %v2822_v30 = vld [vmem:[#allocation10 + $0x388] sm:$0xff] }
 0x527   :  { %v2830_v0 = vld [vmem:[#allocation10 + $0x3c8] sm:$0xff] }
 0x52f   :  { %v14436_v15 = vpop.eup %14435 }
 0x530   :  { %v2177_v4 = vadd.f32 1.0, %v14436_v15  ;;  %v14438_v59 = vpop.eup %14437  ;;  %v2758_v15 = vld [vmem:[#allocation10 + $0x188] sm:$0xff] }
 0x531   :  { %v2178_v44 = vadd.f32 1.0, %v14438_v59  ;;  %v15588_v59 = vpack.c.bf16 %v2751_v6, %v2743_v1  ;;  %v2824_v1 = vld [vmem:[#allocation10 + $0x398] sm:$0xff] }
 0x532   :  { %14439 = vrcp.f32 %v2177_v4  ;;  %v2766_v4 = vld [vmem:[#allocation10 + $0x1c8] sm:$0xff]  ;;  %v2832_v6 = vld [vmem:[#allocation10 + $0x3d8] sm:$0xff] }
 0x533   :  { %14441 = vtanh.f32 %v2184_v13  ;;  %v2760_v13 = vld [vmem:[#allocation10 + $0x198] sm:$0xff] }
 0x534   :  { %14443 = vrcp.f32 %v2178_v44  ;;  %v2765_v44 = vld [vmem:[#allocation10 + $0x1c0] sm:$0xff] }
 0x53c   :  { %v14440_v3 = vpop.eup %14439 }
 0x53d   :  { %v2188_v48 = vrot.slane %v14440_v3, 4  ;;  %v14442_v20 = vpop.eup %14441 }
 0x53e   :  { %v2191_v11 = vmul.f32 %v14442_v20, %v14440_v3  ;;  %v14444_v51 = vpop.eup %14443  ;;  %v15590_v3 = vpack.c.bf16 %v2766_v4, %v2758_v15  ;;  %v2757_v20 = vld [vmem:[#allocation10 + $0x180] sm:$0xff]  ;;  %v15632_v15 = vpack.c.bf16 %v2813_v26, %v2805_v25  ;;  %v15636_v4 = vpack.c.bf16 %v2815_v9, %v2807_v16  ;;  %v2613_v25 = vld [vmem:[#allocation2 + $0x8] sm:$0xc0]  ;;  %v2615_v26 = vld [vmem:[#allocation2 + $0x18] sm:$0xc0] }
 0x53f   :  { %v2190_v37 = vmul.f32 %v2188_v48, %v15381_v21  ;;  %v17716_v21 = vld [vmem:[#allocation27_spill] sm:$0xff]  ;;  %v2768_v48 = vld [vmem:[#allocation10 + $0x1d8] sm:$0xff] }
 0x541   :  { %v15520_v50 = vadd.f32 %v2191_v11, %v2190_v37  ;;  %v15593_v37 = vpack.c.bf16 %v2768_v48, %v2760_v13  ;;  %v2759_v11 = vld [vmem:[#allocation10 + $0x190] sm:$0xff]  ;;  %v15638_v13 = vpack.c.bf16 %v2830_v0, %v2822_v30  ;;  %v2821_v48 = vld [vmem:[#allocation10 + $0x380] sm:$0xff] }
 0x543   :  { %14445 = vtanh.f32 %v15520_v50 }
 0x54d   :  { %v14446_v24 = vpop.eup %14445 }
 0x54e   :  { %v2194_v7 = vmul.f32 %v14446_v24, %v14444_v51  ;;  %v2767_v51 = vld [vmem:[#allocation10 + $0x1d0] sm:$0xff]  ;;  %v2774_v24 = vld [vmem:[#allocation10 + $0x208] sm:$0xff] }
 0x550   :  { %v2196_v2 = vcombine.low %v2194_v7, %v2194_v7  ;;  %2199 = vst [vmem:[#allocation3 + $0x18] sm:$0xc] %v2194_v7  ;;  %2393 = vmatmul.mubr.f32.vlgmr.msra.gmra.mrb[20].mxu1 %v2194_v7  ;;  %2464 = vmatmul.mubr.f32.vlgmr.msra.gmra.mrb[22].mxu0 %v2194_v7 }
 0x551   :  { %11915 = vmatpush1.bf16.msra.mxu1 %v15384_v39  ;;  %11947 = vmatpush1.bf16.msra.mxu0 %v15386_v23  ;;  %v17719_v39 = vld [vmem:[#allocation30_spill] sm:$0xff]  ;;  %v17720_v23 = vld [vmem:[#allocation31_spill] sm:$0xff] }
 0x552   :  { %2198 = vst [vmem:[#allocation3] sm:$0x30] %v2196_v2  ;;  %11917 = vmatprep.subr.bf16.mxu1 %v15390_v61  ;;  %11949 = vmatprep.subr.bf16.mxu0 %v15392_v31  ;;  %v17722_v61 = vld [vmem:[#allocation33_spill] sm:$0xff]  ;;  %v17723_v31 = vld [vmem:[#allocation34_spill] sm:$0xff] }
 0x553   :  { %2534 = vmatprep.mubr.f32.mxu1 %v17686_v19  ;;  %2605 = vmatprep.mubr.f32.mxu0 %v17686_v19  ;;  %v2776_v2 = vld [vmem:[#allocation10 + $0x218] sm:$0xff] }
 0x555   :  { %11919 = vmatpush1.bf16.msra.mxu1 %v15399_v22  ;;  %11951 = vmatpush1.bf16.msra.mxu0 %v17716_v21  ;;  %v17726_v22 = vld [vmem:[#allocation42_spill] sm:$0xff] }
 0x556   :  { %11921 = vmatprep.subr.bf16.mxu1 %v17717_v56  ;;  %11953 = vmatprep.subr.bf16.mxu0 %v17718_v5  ;;  %v2784_v21 = vld [vmem:[#allocation10 + $0x258] sm:$0xff]  ;;  %v15596_v56 = vpack.c.bf16 %v2765_v44, %v2757_v20  ;;  %v15600_v5 = vpack.c.bf16 %v2767_v51, %v2759_v11  ;;  %v2829_v20 = vld [vmem:[#allocation10 + $0x3c0] sm:$0xff]  ;;  %v2823_v44 = vld [vmem:[#allocation10 + $0x390] sm:$0xff]  ;;  %v15641_v11 = vpack.c.bf16 %v2832_v6, %v2824_v1 }
 0x557   :  { %v2831_v51 = vld [vmem:[#allocation10 + $0x3d0] sm:$0xff] }
 0x559   :  { %11923 = vmatpush1.bf16.msra.mxu1 %v17719_v39  ;;  %11955 = vmatpush1.bf16.msra.mxu0 %v17720_v23  ;;  %v2773_v23 = vld [vmem:[#allocation10 + $0x200] sm:$0xff] }
 0x55a   :  { %11925 = vmatprep.subr.bf16.mxu1 %v17721_v47  ;;  %11957 = vmatprep.subr.bf16.mxu0 %v17722_v61  ;;  %v2781_v47 = vld [vmem:[#allocation10 + $0x240] sm:$0xff]  ;;  %v2775_v61 = vld [vmem:[#allocation10 + $0x210] sm:$0xff] }
 0x55d   :  { %11927 = vmatpush1.bf16.msra.mxu1 %v17723_v31  ;;  %11959 = vmatpush1.bf16.msra.mxu0 %v17724_v17  ;;  %v15605_v31 = vpack.c.bf16 %v2784_v21, %v2776_v2  ;;  %v2783_v17 = vld [vmem:[#allocation10 + $0x250] sm:$0xff]  ;;  %v2716_v2 = vld [vmem:[#allocation10 + $0x38] sm:$0xff] }
 0x55e   :  { %11929 = vmatprep.subr.bf16.mxu1 %v17725_v29  ;;  %11961 = vmatprep.subr.bf16.mxu0 %v17726_v22  ;;  %v2790_v29 = vld [vmem:[#allocation10 + $0x288] sm:$0xff]  ;;  %v2724_v21 = vld [vmem:[#allocation10 + $0x78] sm:$0xff] }
 0x55f   :  { %v2798_v22 = vld [vmem:[#allocation10 + $0x2c8] sm:$0xff] }
 0x561   :  { %11931 = vmatpush1.bf16.msra.mxu1 %v17727_v46  ;;  %11963 = vmatpush1.bf16.msra.mxu0 %v17728_v60  ;;  %v2792_v46 = vld [vmem:[#allocation10 + $0x298] sm:$0xff] }
 0x562   :  { %11933 = vmatprep.subr.bf16.mxu1 %v15443_v40  ;;  %11965 = vmatprep.subr.bf16.mxu0 %v15445_v41  ;;  %v2710_v40 = vld [vmem:[#allocation10 + $0x8] sm:$0xff]  ;;  %v2800_v60 = vld [vmem:[#allocation10 + $0x2d8] sm:$0xff] }
 0x563   :  { %v2718_v41 = vld [vmem:[#allocation10 + $0x48] sm:$0xff] }
 0x565   :  { %11935 = vmatpush1.bf16.msra.mxu1 %v15449_v55  ;;  %11967 = vmatpush1.bf16.msra.mxu0 %v15451_v36  ;;  %v2712_v55 = vld [vmem:[#allocation10 + $0x18] sm:$0xff]  ;;  %v15557_v36 = vpack.c.bf16 %v2718_v41, %v2710_v40  ;;  %v15608_v40 = vpack.c.bf16 %v2781_v47, %v2773_v23  ;;  %v15612_v41 = vpack.c.bf16 %v2783_v17, %v2775_v61 }
 0x566   :  { %11937 = vmatprep.subr.bf16.mxu1 %v15455_v10  ;;  %11969 = vmatprep.subr.bf16.mxu0 %v15457_v54  ;;  %v2720_v10 = vld [vmem:[#allocation10 + $0x58] sm:$0xff]  ;;  %v2709_v54 = vld [vmem:[#allocation10] sm:$0xff]  ;;  %v15644_v23 = vpack.c.bf16 %v2829_v20, %v2821_v48  ;;  %v15648_v47 = vpack.c.bf16 %v2831_v51, %v2823_v44  ;;  %v15653_v17 = vpack.c.bf16 %v2724_v21, %v2716_v2  ;;  %v2646_v2 = vld [vmem:[#allocation2 + $0x60] sm:$0x3] }
 0x567   :  { %v2648_v21 = vld [vmem:[#allocation2 + $0x70] sm:$0x3] }
 0x569   :  { %11939 = vmatpush1.bf16.msra.mxu1 %v15461_v14  ;;  %11971 = vmatpush1.bf16.msra.mxu0 %v15463_v32  ;;  %v2717_v14 = vld [vmem:[#allocation10 + $0x40] sm:$0xff]  ;;  %v15559_v32 = vpack.c.bf16 %v2720_v10, %v2712_v55  ;;  %v15614_v55 = vpack.c.bf16 %v2798_v22, %v2790_v29 }
 0x56a   :  { %11941 = vmatprep.subr.bf16.mxu1 %v15467_v42  ;;  %11973 = vmatprep.subr.bf16.mxu0 %v15469_v43  ;;  %v15561_v42 = vpack.c.bf16 %v2717_v14, %v2709_v54  ;;  %v2711_v43 = vld [vmem:[#allocation10 + $0x10] sm:$0xff]  ;;  %v2789_v10 = vld [vmem:[#allocation10 + $0x280] sm:$0xff] }
 0x56b   :  { %v2797_v54 = vld [vmem:[#allocation10 + $0x2c0] sm:$0xff]  ;;  %v2791_v14 = vld [vmem:[#allocation10 + $0x290] sm:$0xff] }
 0x56c   :  { %v15620_v28 = vpack.c.bf16 %v2797_v54, %v2789_v10 }
 0x56d   :  { %11943 = vmatpush1.bf16.msra.mxu1 %v15473_v38  ;;  %11975 = vmatpush1.bf16.msra.mxu0 %v15475_v49  ;;  %v2719_v38 = vld [vmem:[#allocation10 + $0x50] sm:$0xff]  ;;  %v2726_v49 = vld [vmem:[#allocation10 + $0x88] sm:$0xff] }
 0x56e   :  { %11977 = vmatprep.subr.bf16.mxu1 %v15557_v36  ;;  %v15564_v35 = vpack.c.bf16 %v2719_v38, %v2711_v43  ;;  %12009 = vmatprep.subr.bf16.mxu0 %v15559_v32  ;;  %v15568_v12 = vpack.c.bf16 %v2734_v62, %v2726_v49  ;;  %v15617_v43 = vpack.c.bf16 %v2800_v60, %v2792_v46  ;;  %v2799_v38 = vld [vmem:[#allocation10 + $0x2d0] sm:$0xff]  ;;  %v2806_v49 = vld [vmem:[#allocation10 + $0x308] sm:$0xff] }
 0x56f   :  { %v2814_v62 = vld [vmem:[#allocation10 + $0x348] sm:$0xff]  ;;  %v15624_v58 = vpack.c.bf16 %v2799_v38, %v2791_v14  ;;  %v2612_v14 = vld [vmem:[#allocation2] sm:$0xc0]  ;;  %v2614_v38 = vld [vmem:[#allocation2 + $0x10] sm:$0xc0] }
 0x570   :  { %2535 = vmatmul.mubr.f32.vlgmr.msra.gmra.mrb[22].mxu1 %v2194_v7  ;;  %2606 = vmatmul.mubr.f32.vlgmr.msra.gmra.mrb[24].mxu0 %v2194_v7  ;;  %v2782_v7 = vld [vmem:[#allocation10 + $0x248] sm:$0xff]  ;;  %v15626_v57 = vpack.c.bf16 %v2814_v62, %v2806_v49 }
 0x571   :  { %2901 = vmatprep.mubr.f32.mxu1 %v17686_v19  ;;  %2972 = vmatprep.mubr.f32.mxu0 %v17686_v19  ;;  %v15602_v39 = vpack.c.bf16 %v2782_v7, %v2774_v24  ;;  %v2714_v24 = vld [vmem:[#allocation10 + $0x28] sm:$0xff] }
 0x572   :  { %11979 = vmatpush1.bf16.msra.mxu1 %v15561_v42  ;;  %12011 = vmatpush1.bf16.msra.mxu0 %v15564_v35  ;;  %v2722_v7 = vld [vmem:[#allocation10 + $0x68] sm:$0xff] }
 0x573   :  { %11981 = vmatprep.subr.bf16.mxu1 %v15568_v12  ;;  %12013 = vmatprep.subr.bf16.mxu0 %v15570_v27  ;;  %v15650_v61 = vpack.c.bf16 %v2722_v7, %v2714_v24 }
 0x576   :  { %11983 = vmatpush1.bf16.msra.mxu1 %v15573_v18  ;;  %12015 = vmatpush1.bf16.msra.mxu0 %v15577_v45 }
 0x577   :  { %11985 = vmatprep.subr.bf16.mxu1 %v15579_v33  ;;  %12017 = vmatprep.subr.bf16.mxu0 %v15581_v53 }
 0x57a   :  { %11987 = vmatpush1.bf16.msra.mxu1 %v15584_v52  ;;  %12019 = vmatpush1.bf16.msra.mxu0 %v15588_v59 }
 0x57b   :  { %11989 = vmatprep.subr.bf16.mxu1 %v15590_v3  ;;  %12021 = vmatprep.subr.bf16.mxu0 %v15593_v37 }
 0x57e   :  { %11991 = vmatpush1.bf16.msra.mxu1 %v15596_v56  ;;  %12023 = vmatpush1.bf16.msra.mxu0 %v15600_v5 }
 0x57f   :  { %11993 = vmatprep.subr.bf16.mxu1 %v15602_v39  ;;  %12025 = vmatprep.subr.bf16.mxu0 %v15605_v31 }
 0x582   :  { %11995 = vmatpush1.bf16.msra.mxu1 %v15608_v40  ;;  %12027 = vmatpush1.bf16.msra.mxu0 %v15612_v41 }
 0x583   :  { %11997 = vmatprep.subr.bf16.mxu1 %v15614_v55  ;;  %12029 = vmatprep.subr.bf16.mxu0 %v15617_v43 }
 0x586   :  { %11999 = vmatpush1.bf16.msra.mxu1 %v15620_v28  ;;  %12031 = vmatpush1.bf16.msra.mxu0 %v15624_v58 }
 0x587   :  { %12001 = vmatprep.subr.bf16.mxu1 %v15626_v57  ;;  %12033 = vmatprep.subr.bf16.mxu0 %v15629_v34 }
 0x58a   :  { %12003 = vmatpush1.bf16.msra.mxu1 %v15632_v15  ;;  %12035 = vmatpush1.bf16.msra.mxu0 %v15636_v4 }
 0x58b   :  { %12005 = vmatprep.subr.bf16.mxu1 %v15638_v13  ;;  %12037 = vmatprep.subr.bf16.mxu0 %v15641_v11 }
 0x58e   :  { %12007 = vmatpush1.bf16.msra.mxu1 %v15644_v23  ;;  %12039 = vmatpush1.bf16.msra.mxu0 %v15648_v47 }
 0x58f   :  { %12041 = vmatprep.subr.bf16.mxu1 %v15650_v61  ;;  %12073 = vmatprep.subr.bf16.mxu0 %v15653_v17 }
 0x623   :  { %v2394_v29 = vpop.f32.mrb[20].mxu1  ;;  %v2465_v22 = vpop.f32.mrb[22].mxu0 }
 0x624   :  { %v2620_v46 = vrot.slane %v2394_v29, 2  ;;  %v2622_v60 = vrot.slane %v2465_v22, 2  ;;  %v2396_v10 = vpop.f32.mrb[21].mxu1  ;;  %v2467_v54 = vpop.f32.mrb[23].mxu0 }
 0x625   :  { %v2621_v49 = vrot.slane %v2396_v10, 2  ;;  %v2623_v62 = vrot.slane %v2467_v54, 2  ;;  %v2647_v10 = vld [vmem:[#allocation2 + $0x68] sm:$0x3]  ;;  %v2649_v54 = vld [vmem:[#allocation2 + $0x78] sm:$0x3] }
 0x626   :  { %v2628_v63 = vadd.f32 %v2620_v46, %v2612_v14  ;;  %v2630_v8 = vadd.f32 %v2622_v60, %v2614_v38 }
 0x627   :  { %v2629_v16 = vadd.f32 %v2621_v49, %v2613_v25  ;;  %v2631_v9 = vadd.f32 %v2623_v62, %v2615_v26 }
 0x629   :  { %v2636_v30 = vcombine.high %v2628_v63, %v2629_v16  ;;  %v2637_v0 = vcombine.high %v2630_v8, %v2631_v9 }
 0x62b   :  { %v11239_v1 = vrot.slane %v2636_v30, 10  ;;  %v11240_v6 = vrot.slane %v2637_v0, 10 }
 0x62d   :  { %2644 = vst [vmem:[#allocation5] sm:$0x33] %v11239_v1  ;;  %2645 = vst [vmem:[#allocation5 + $0x8] sm:$0x33] %v11240_v6 }
 0x643   :  { %v2536_v48 = vpop.f32.mrb[22].mxu1  ;;  %v2607_v20 = vpop.f32.mrb[24].mxu0 }
 0x644   :  { %v2654_v44 = vrot.slane %v2536_v48, 2  ;;  %v2656_v51 = vrot.slane %v2607_v20, 2  ;;  %v2538_v24 = vpop.f32.mrb[23].mxu1  ;;  %v2609_v7 = vpop.f32.mrb[25].mxu0 }
 0x645   :  { %v2655_v29 = vrot.slane %v2538_v24, 2  ;;  %v2657_v22 = vrot.slane %v2609_v7, 2 }
 0x646   :  { %v2662_v46 = vadd.f32 %v2654_v44, %v2646_v2  ;;  %v2664_v60 = vadd.f32 %v2656_v51, %v2648_v21  ;;  %v2713_v21 = vld [vmem:[#allocation10 + $0x20] sm:$0xff] }
 0x647   :  { %v2663_v14 = vadd.f32 %v2655_v29, %v2647_v10  ;;  %v2665_v38 = vadd.f32 %v2657_v22, %v2649_v54  ;;  %v2721_v29 = vld [vmem:[#allocation10 + $0x60] sm:$0xff]  ;;  %v2715_v22 = vld [vmem:[#allocation10 + $0x30] sm:$0xff]  ;;  %v2738_v10 = vld [vmem:[#allocation10 + $0xe8] sm:$0xff] }
 0x648   :  { %v2732_v54 = vld [vmem:[#allocation10 + $0xb8] sm:$0xff] }
 0x649   :  { %v2670_v49 = vcombine.low %v2662_v46, %v2663_v14  ;;  %v2671_v62 = vcombine.low %v2664_v60, %v2665_v38  ;;  %v2723_v46 = vld [vmem:[#allocation10 + $0x70] sm:$0xff]  ;;  %v2730_v60 = vld [vmem:[#allocation10 + $0xa8] sm:$0xff]  ;;  %v2740_v14 = vld [vmem:[#allocation10 + $0xf8] sm:$0xff] }
 0x64b   :  { %v2672_v63 = vrot.slane %v2670_v49, 6  ;;  %v2673_v8 = vrot.slane %v2671_v62, 6  ;;  %v15663_v62 = vpack.c.bf16 %v2721_v29, %v2713_v21 }
 0x64d   :  { %2676 = vst [vmem:[#allocation5] sm:$0xcc] %v2672_v63  ;;  %2677 = vst [vmem:[#allocation5 + $0x8] sm:$0xcc] %v2673_v8  ;;  %v15665_v63 = vpack.c.bf16 %v2723_v46, %v2715_v22  ;;  %v2737_v8 = vld [vmem:[#allocation10 + $0xe0] sm:$0xff]  ;;  %v2747_v22 = vld [vmem:[#allocation10 + $0x130] sm:$0xff] }
 0x64e   :  { %v2755_v46 = vld [vmem:[#allocation10 + $0x170] sm:$0xff] }
 0x654   :  { %v2678_v25 = vld [vmem:[#allocation5] sm:$0xff]  ;;  %v2679_v16 = vld [vmem:[#allocation5 + $0x8] sm:$0xff] }
 0x655   :  { %v11241_v26 = vmul.f32 -1.442695, %v2678_v25  ;;  %v11242_v9 = vmul.f32 -1.442695, %v2679_v16  ;;  %v2693_v1 = vrot.slane %v2679_v16, 4  ;;  %v15671_v16 = vpack.c.bf16 %v2740_v14, %v2732_v54  ;;  %v2764_v54 = vld [vmem:[#allocation10 + $0x1b8] sm:$0xff] }
 0x656   :  { %v2772_v14 = vld [vmem:[#allocation10 + $0x1f8] sm:$0xff] }
 0x657   :  { %14447 = vpow2.f32 %v11241_v26  ;;  %v15669_v26 = vpack.c.bf16 %v2738_v10, %v2730_v60  ;;  %v2762_v60 = vld [vmem:[#allocation10 + $0x1a8] sm:$0xff] }
 0x658   :  { %14449 = vpow2.f32 %v11242_v9  ;;  %v2731_v9 = vld [vmem:[#allocation10 + $0xb0] sm:$0xff]  ;;  %v2770_v10 = vld [vmem:[#allocation10 + $0x1e8] sm:$0xff] }
 0x661   :  { %v14448_v30 = vpop.eup %14447 }
 0x662   :  { %v2686_v0 = vadd.f32 1.0, %v14448_v30  ;;  %v14450_v6 = vpop.eup %14449  ;;  %v2739_v30 = vld [vmem:[#allocation10 + $0xf0] sm:$0xff] }
 0x663   :  { %v2687_v51 = vadd.f32 1.0, %v14450_v6  ;;  %v2748_v6 = vld [vmem:[#allocation10 + $0x138] sm:$0xff] }
 0x664   :  { %14451 = vrcp.f32 %v2686_v0  ;;  %v2746_v0 = vld [vmem:[#allocation10 + $0x128] sm:$0xff] }
 0x665   :  { %14453 = vtanh.f32 %v2693_v1  ;;  %v2754_v1 = vld [vmem:[#allocation10 + $0x168] sm:$0xff] }
 0x666   :  { %14455 = vrcp.f32 %v2687_v51  ;;  %v15680_v51 = vpack.c.bf16 %v2739_v30, %v2731_v9  ;;  %v15684_v21 = vpack.c.bf16 %v2754_v1, %v2746_v0  ;;  %v15698_v9 = vpack.c.bf16 %v2770_v10, %v2762_v60  ;;  %v2763_v0 = vld [vmem:[#allocation10 + $0x1b0] sm:$0xff] }
 0x667   :  { %v15700_v30 = vpack.c.bf16 %v2772_v14, %v2764_v54  ;;  %v2771_v1 = vld [vmem:[#allocation10 + $0x1f0] sm:$0xff] }
 0x668   :  { %17729 = vst [vmem:[#allocation27_spill] sm:$0xff] %v15680_v51  ;;  %17730 = vst [vmem:[#allocation28_spill] sm:$0xff] %v15684_v21  ;;  %v2779_v54 = vld [vmem:[#allocation10 + $0x230] sm:$0xff] }
 0x669   :  { %17734 = vst [vmem:[#allocation32_spill] sm:$0xff] %v15698_v9  ;;  %17735 = vst [vmem:[#allocation33_spill] sm:$0xff] %v15700_v30  ;;  %v2787_v14 = vld [vmem:[#allocation10 + $0x270] sm:$0xff] }
 0x66e   :  { %v14452_v48 = vpop.eup %14451 }
 0x66f   :  { %v2697_v20 = vrot.slane %v14452_v48, 4  ;;  %v14454_v44 = vpop.eup %14453 }
 0x670   :  { %v2700_v7 = vmul.f32 %v14454_v44, %v14452_v48  ;;  %v14456_v38 = vpop.eup %14455  ;;  %v2756_v48 = vld [vmem:[#allocation10 + $0x178] sm:$0xff] }
 0x671   :  { %v2699_v24 = vmul.f32 %v2697_v20, %v15520_v50  ;;  %v2729_v50 = vld [vmem:[#allocation10 + $0xa0] sm:$0xff]  ;;  %v15686_v29 = vpack.c.bf16 %v2756_v48, %v2748_v6  ;;  %v2778_v6 = vld [vmem:[#allocation10 + $0x228] sm:$0xff] }
 0x672   :  { %v15678_v44 = vpack.c.bf16 %v2737_v8, %v2729_v50  ;;  %v2761_v50 = vld [vmem:[#allocation10 + $0x1a0] sm:$0xff]  ;;  %v2786_v48 = vld [vmem:[#allocation10 + $0x268] sm:$0xff] }
 0x673   :  { %v15660_v2 = vadd.f32 %v2700_v7, %v2699_v24  ;;  %v2745_v24 = vld [vmem:[#allocation10 + $0x120] sm:$0xff]  ;;  %17731 = vst [vmem:[#allocation29_spill] sm:$0xff] %v15686_v29  ;;  %v15710_v60 = vpack.c.bf16 %v2786_v48, %v2778_v6  ;;  %v2795_v48 = vld [vmem:[#allocation10 + $0x2b0] sm:$0xff] }
 0x674   :  { %v2753_v7 = vld [vmem:[#allocation10 + $0x160] sm:$0xff] }
 0x675   :  { %14457 = vtanh.f32 %v15660_v2  ;;  %v2769_v8 = vld [vmem:[#allocation10 + $0x1e0] sm:$0xff]  ;;  %17738 = vst [vmem:[#allocation36_spill] sm:$0xff] %v15710_v60 }
 0x67f   :  { %v14458_v49 = vpop.eup %14457 }
 0x680   :  { %v15667_v25 = vmul.f32 %v14458_v49, %v14456_v38  ;;  %v15692_v38 = vpack.c.bf16 %v2753_v7, %v2745_v24  ;;  %v15694_v49 = vpack.c.bf16 %v2755_v46, %v2747_v22  ;;  %v15704_v24 = vpack.c.bf16 %v2769_v8, %v2761_v50  ;;  %v2777_v22 = vld [vmem:[#allocation10 + $0x220] sm:$0xff] }
 0x681   :  { %v15706_v7 = vpack.c.bf16 %v2771_v1, %v2763_v0  ;;  %v2785_v46 = vld [vmem:[#allocation10 + $0x260] sm:$0xff]  ;;  %v15718_v8 = vpack.c.bf16 %v2787_v14, %v2779_v54 }
 0x682   :  { %v2705_v20 = vrot.slane %v15667_v25, 2  ;;  %2902 = vmatmul.mubr.f32.vlgmr.msra.gmra.mrb[24].mxu1 %v15667_v25  ;;  %2973 = vmatmul.mubr.f32.vlgmr.msra.gmra.mrb[26].mxu0 %v15667_v25  ;;  %17732 = vst [vmem:[#allocation30_spill] sm:$0xff] %v15692_v38  ;;  %17733 = vst [vmem:[#allocation31_spill] sm:$0xff] %v15694_v49  ;;  %v15716_v50 = vpack.c.bf16 %v2785_v46, %v2777_v22  ;;  %v2793_v0 = vld [vmem:[#allocation10 + $0x2a0] sm:$0xff] }
 0x683   :  { %12043 = vmatpush1.bf16.msra.mxu1 %v15663_v62  ;;  %12075 = vmatpush1.bf16.msra.mxu0 %v15665_v63  ;;  %17736 = vst [vmem:[#allocation34_spill] sm:$0xff] %v15704_v24  ;;  %17737 = vst [vmem:[#allocation35_spill] sm:$0xff] %v15706_v7  ;;  %v2801_v1 = vld [vmem:[#allocation10 + $0x2e0] sm:$0xff] }
 0x684   :  { %2707 = vst [vmem:[#allocation3 + $0x18] ss:$-20 sps:$4 sm:$0xc3] %v2705_v20   ;;  %12045 = vmatprep.subr.bf16.mxu1 %v15669_v26  ;;  %12077 = vmatprep.subr.bf16.mxu0 %v15671_v16  ;;  %v2780_v20 = vld [vmem:[#allocation10 + $0x238] sm:$0xff]  ;;  %17740 = vst [vmem:[#allocation43_spill] sm:$0xff] %v15716_v50  ;;  %v15728_v22 = vpack.c.bf16 %v2801_v1, %v2793_v0  ;;  %v2809_v54 = vld [vmem:[#allocation10 + $0x320] sm:$0xff] }
 0x685   :  { %3043 = vmatprep.mubr.f32.mxu1 %v17686_v19  ;;  %3114 = vmatprep.mubr.f32.mxu0 %v17686_v19  ;;  %17741 = vst [vmem:[#allocation44_spill] sm:$0xff] %v15718_v8  ;;  %v2817_v14 = vld [vmem:[#allocation10 + $0x360] sm:$0xff] }
 0x686   :  { %v15740_v0 = vpack.c.bf16 %v2817_v14, %v2809_v54 }
 0x687   :  { %12047 = vmatpush1.bf16.msra.mxu1 %v15678_v44  ;;  %12079 = vmatpush1.bf16.msra.mxu0 %v15680_v51  ;;  %v2788_v51 = vld [vmem:[#allocation10 + $0x278] sm:$0xff] }
 0x688   :  { %12049 = vmatprep.subr.bf16.mxu1 %v15684_v21  ;;  %12081 = vmatprep.subr.bf16.mxu0 %v15686_v29  ;;  %v15712_v10 = vpack.c.bf16 %v2788_v51, %v2780_v20  ;;  %v2794_v29 = vld [vmem:[#allocation10 + $0x2a8] sm:$0xff]  ;;  %v2796_v21 = vld [vmem:[#allocation10 + $0x2b8] sm:$0xff]  ;;  %v2803_v20 = vld [vmem:[#allocation10 + $0x2f0] sm:$0xff] }
 0x689   :  { %v15730_v46 = vpack.c.bf16 %v2803_v20, %v2795_v48  ;;  %v2825_v48 = vld [vmem:[#allocation10 + $0x3a0] sm:$0xff]  ;;  %v2835_v20 = vld [vmem:[#allocation10 + $0x3f0] sm:$0xff] }
 0x68a   :  { %17739 = vst [vmem:[#allocation42_spill] sm:$0xff] %v15712_v10 }
 0x68b   :  { %12051 = vmatpush1.bf16.msra.mxu1 %v15692_v38  ;;  %12083 = vmatpush1.bf16.msra.mxu0 %v15694_v49  ;;  %v2802_v38 = vld [vmem:[#allocation10 + $0x2e8] sm:$0xff]  ;;  %v2804_v49 = vld [vmem:[#allocation10 + $0x2f8] sm:$0xff] }
 0x68c   :  { %12053 = vmatprep.subr.bf16.mxu1 %v15698_v9  ;;  %12085 = vmatprep.subr.bf16.mxu0 %v15700_v30  ;;  %v15722_v51 = vpack.c.bf16 %v2802_v38, %v2794_v29  ;;  %v15724_v6 = vpack.c.bf16 %v2804_v49, %v2796_v21  ;;  %v2810_v30 = vld [vmem:[#allocation10 + $0x328] sm:$0xff]  ;;  %v2812_v9 = vld [vmem:[#allocation10 + $0x338] sm:$0xff]  ;;  %v2811_v38 = vld [vmem:[#allocation10 + $0x330] sm:$0xff] }
 0x68d   :  { %v2819_v49 = vld [vmem:[#allocation10 + $0x370] sm:$0xff] }
 0x68e   :  { %v15742_v1 = vpack.c.bf16 %v2819_v49, %v2811_v38 }
 0x68f   :  { %12055 = vmatpush1.bf16.msra.mxu1 %v15704_v24  ;;  %12087 = vmatpush1.bf16.msra.mxu0 %v15706_v7  ;;  %v2818_v24 = vld [vmem:[#allocation10 + $0x368] sm:$0xff]  ;;  %v2820_v7 = vld [vmem:[#allocation10 + $0x378] sm:$0xff] }
 0x690   :  { %12057 = vmatprep.subr.bf16.mxu1 %v15710_v60  ;;  %12089 = vmatprep.subr.bf16.mxu0 %v15712_v10  ;;  %v15734_v21 = vpack.c.bf16 %v2818_v24, %v2810_v30  ;;  %v15736_v29 = vpack.c.bf16 %v2820_v7, %v2812_v9  ;;  %v2826_v10 = vld [vmem:[#allocation10 + $0x3a8] sm:$0xff]  ;;  %v2828_v60 = vld [vmem:[#allocation10 + $0x3b8] sm:$0xff]  ;;  %v2833_v24 = vld [vmem:[#allocation10 + $0x3e0] sm:$0xff] }
 0x691   :  { %v2827_v7 = vld [vmem:[#allocation10 + $0x3b0] sm:$0xff]  ;;  %v15752_v54 = vpack.c.bf16 %v2833_v24, %v2825_v48 }
 0x692   :  { %v15754_v14 = vpack.c.bf16 %v2835_v20, %v2827_v7 }
 0x693   :  { %12059 = vmatpush1.bf16.msra.mxu1 %v15716_v50  ;;  %12091 = vmatpush1.bf16.msra.mxu0 %v15718_v8  ;;  %v2834_v50 = vld [vmem:[#allocation10 + $0x3e8] sm:$0xff]  ;;  %v2836_v8 = vld [vmem:[#allocation10 + $0x3f8] sm:$0xff] }
 0x694   :  { %12061 = vmatprep.subr.bf16.mxu1 %v15722_v51  ;;  %12093 = vmatprep.subr.bf16.mxu0 %v15724_v6  ;;  %v15746_v9 = vpack.c.bf16 %v2834_v50, %v2826_v10  ;;  %v15748_v30 = vpack.c.bf16 %v2836_v8, %v2828_v60 }
 0x697   :  { %12063 = vmatpush1.bf16.msra.mxu1 %v15728_v22  ;;  %12095 = vmatpush1.bf16.msra.mxu0 %v15730_v46 }
 0x698   :  { %12065 = vmatprep.subr.bf16.mxu1 %v15734_v21  ;;  %12097 = vmatprep.subr.bf16.mxu0 %v15736_v29 }
 0x69b   :  { %12067 = vmatpush1.bf16.msra.mxu1 %v15740_v0  ;;  %12099 = vmatpush1.bf16.msra.mxu0 %v15742_v1 }
 0x69c   :  { %12069 = vmatprep.subr.bf16.mxu1 %v15746_v9  ;;  %12101 = vmatprep.subr.bf16.mxu0 %v15748_v30 }
 0x69f   :  { %12071 = vmatpush1.bf16.msra.mxu1 %v15752_v54  ;;  %12103 = vmatpush1.bf16.msra.mxu0 %v15754_v14 }
 0x6a0   :  { %12105 = vmatprep.subr.bf16.mxu1 %v15557_v36  ;;  %12137 = vmatprep.subr.bf16.mxu0 %v15559_v32  ;;  %v3121_v32 = vld [vmem:[#allocation2 + $0x40] sm:$0x3] }
 0x6a2   :  { %3044 = vmatmul.mubr.f32.vlgmr.msra.gmra.mrb[26].mxu1 %v15667_v25  ;;  %3115 = vmatmul.mubr.f32.vlgmr.msra.gmra.mrb[28].mxu0 %v15667_v25 }
 0x6a3   :  { %12107 = vmatpush1.bf16.msra.mxu1 %v15561_v42  ;;  %12139 = vmatpush1.bf16.msra.mxu0 %v15564_v35  ;;  %v3123_v35 = vld [vmem:[#allocation2 + $0x50] sm:$0x3] }
 0x6a4   :  { %12109 = vmatprep.subr.bf16.mxu1 %v15568_v12  ;;  %12141 = vmatprep.subr.bf16.mxu0 %v15570_v27 }
 0x6a5   :  { %3392 = vmatprep.mubr.f32.mxu1 %v17686_v19  ;;  %3463 = vmatprep.mubr.f32.mxu0 %v17686_v19 }
 0x6a7   :  { %12111 = vmatpush1.bf16.msra.mxu1 %v15573_v18  ;;  %12143 = vmatpush1.bf16.msra.mxu0 %v15577_v45  ;;  %v3122_v45 = vld [vmem:[#allocation2 + $0x48] sm:$0x3] }
 0x6a8   :  { %12113 = vmatprep.subr.bf16.mxu1 %v15579_v33  ;;  %12145 = vmatprep.subr.bf16.mxu0 %v15581_v53  ;;  %v3124_v53 = vld [vmem:[#allocation2 + $0x58] sm:$0x3] }
 0x6ab   :  { %12115 = vmatpush1.bf16.msra.mxu1 %v15584_v52  ;;  %12147 = vmatpush1.bf16.msra.mxu0 %v15588_v59 }
 0x6ac   :  { %12117 = vmatprep.subr.bf16.mxu1 %v15590_v3  ;;  %12149 = vmatprep.subr.bf16.mxu0 %v15593_v37 }
 0x6af   :  { %12119 = vmatpush1.bf16.msra.mxu1 %v15596_v56  ;;  %12151 = vmatpush1.bf16.msra.mxu0 %v15600_v5 }
 0x6b0   :  { %12121 = vmatprep.subr.bf16.mxu1 %v15602_v39  ;;  %12153 = vmatprep.subr.bf16.mxu0 %v15605_v31 }
 0x6b3   :  { %12123 = vmatpush1.bf16.msra.mxu1 %v15608_v40  ;;  %12155 = vmatpush1.bf16.msra.mxu0 %v15612_v41 }
 0x6b4   :  { %12125 = vmatprep.subr.bf16.mxu1 %v15614_v55  ;;  %12157 = vmatprep.subr.bf16.mxu0 %v15617_v43  ;;  %v3139_v55 = vld [vmem:[#allocation2 + $0x20] sm:$0xc0]  ;;  %v3141_v43 = vld [vmem:[#allocation2 + $0x30] sm:$0xc0] }
 0x6b7   :  { %12127 = vmatpush1.bf16.msra.mxu1 %v15620_v28  ;;  %12159 = vmatpush1.bf16.msra.mxu0 %v15624_v58 }
 0x6b8   :  { %12129 = vmatprep.subr.bf16.mxu1 %v15626_v57  ;;  %12161 = vmatprep.subr.bf16.mxu0 %v15629_v34 }
 0x6bb   :  { %12131 = vmatpush1.bf16.msra.mxu1 %v15632_v15  ;;  %12163 = vmatpush1.bf16.msra.mxu0 %v15636_v4  ;;  %v3140_v15 = vld [vmem:[#allocation2 + $0x28] sm:$0xc0]  ;;  %v3142_v4 = vld [vmem:[#allocation2 + $0x38] sm:$0xc0] }
 0x6bc   :  { %12133 = vmatprep.subr.bf16.mxu1 %v15638_v13  ;;  %12165 = vmatprep.subr.bf16.mxu0 %v15641_v11 }
 0x6bf   :  { %12135 = vmatpush1.bf16.msra.mxu1 %v15644_v23  ;;  %12167 = vmatpush1.bf16.msra.mxu0 %v15648_v47 }
 0x6c0   :  { %12169 = vmatprep.subr.bf16.mxu1 %v15650_v61  ;;  %12201 = vmatprep.subr.bf16.mxu0 %v15653_v17 }
 0x755   :  { %v2903_v36 = vpop.f32.mrb[24].mxu1  ;;  %v2974_v42 = vpop.f32.mrb[26].mxu0 }
 0x756   :  { %v3125_v12 = vadd.f32 %v3121_v32, %v2903_v36  ;;  %v3127_v27 = vadd.f32 %v3123_v35, %v2974_v42  ;;  %v2905_v18 = vpop.f32.mrb[25].mxu1  ;;  %v2976_v33 = vpop.f32.mrb[27].mxu0 }
 0x757   :  { %v3126_v52 = vadd.f32 %v3122_v45, %v2905_v18  ;;  %v3128_v59 = vadd.f32 %v3124_v53, %v2976_v33  ;;  %v17743_v18 = vld [vmem:[#allocation28_spill] sm:$0xff]  ;;  %v17744_v45 = vld [vmem:[#allocation29_spill] sm:$0xff]  ;;  %v17750_v53 = vld [vmem:[#allocation35_spill] sm:$0xff] }
 0x758   :  { %v17747_v33 = vld [vmem:[#allocation32_spill] sm:$0xff] }
 0x759   :  { %v3133_v3 = vcombine.low %v3125_v12, %v3126_v52  ;;  %v3134_v37 = vcombine.low %v3127_v27, %v3128_v59  ;;  %v17751_v52 = vld [vmem:[#allocation36_spill] sm:$0xff]  ;;  %v17753_v59 = vld [vmem:[#allocation43_spill] sm:$0xff] }
 0x75b   :  { %3137 = vst [vmem:[#allocation5] sm:$0x33] %v3133_v3  ;;  %3138 = vst [vmem:[#allocation5 + $0x8] sm:$0x33] %v3134_v37  ;;  %v17754_v3 = vld [vmem:[#allocation44_spill] sm:$0xff] }
 0x775   :  { %v3045_v56 = vpop.f32.mrb[26].mxu1  ;;  %v3116_v5 = vpop.f32.mrb[28].mxu0 }
 0x776   :  { %v3147_v39 = vrot.slane %v3045_v56, 4  ;;  %v3149_v31 = vrot.slane %v3116_v5, 4  ;;  %v3047_v40 = vpop.f32.mrb[27].mxu1  ;;  %v3118_v41 = vpop.f32.mrb[29].mxu0  ;;  %v3734_v56 = vld [vmem:[#allocation10 + $0xc8] sm:$0xff]  ;;  %v3728_v5 = vld [vmem:[#allocation10 + $0x98] sm:$0xff] }
 0x777   :  { %v3148_v28 = vrot.slane %v3047_v40, 4  ;;  %v3150_v58 = vrot.slane %v3118_v41, 4  ;;  %v3725_v41 = vld [vmem:[#allocation10 + $0x80] sm:$0xff] }
 0x778   :  { %v3155_v57 = vadd.f32 %v3147_v39, %v3139_v55  ;;  %v3157_v34 = vadd.f32 %v3149_v31, %v3141_v43  ;;  %v3736_v39 = vld [vmem:[#allocation10 + $0xd8] sm:$0xff]  ;;  %v3733_v55 = vld [vmem:[#allocation10 + $0xc0] sm:$0xff]  ;;  %v3727_v43 = vld [vmem:[#allocation10 + $0x90] sm:$0xff] }
 0x779   :  { %v3156_v13 = vadd.f32 %v3148_v28, %v3140_v15  ;;  %v3158_v11 = vadd.f32 %v3150_v58, %v3142_v4  ;;  %v15849_v40 = vpack.c.bf16 %v3736_v39, %v3728_v5  ;;  %v15852_v28 = vpack.c.bf16 %v3733_v55, %v3725_v41  ;;  %v3735_v58 = vld [vmem:[#allocation10 + $0xd0] sm:$0xff]  ;;  %v3808_v5 = vld [vmem:[#allocation10 + $0x318] sm:$0xff] }
 0x77a   :  { %v15856_v15 = vpack.c.bf16 %v3735_v58, %v3727_v43  ;;  %v3816_v39 = vld [vmem:[#allocation10 + $0x358] sm:$0xff]  ;;  %v3805_v58 = vld [vmem:[#allocation10 + $0x300] sm:$0xff] }
 0x77b   :  { %v3163_v23 = vcombine.high %v3155_v57, %v3156_v13  ;;  %v3164_v47 = vcombine.high %v3157_v34, %v3158_v11  ;;  %v3742_v57 = vld [vmem:[#allocation10 + $0x108] sm:$0xff]  ;;  %v3744_v13 = vld [vmem:[#allocation10 + $0x118] sm:$0xff] }
 0x77c   :  { %v3750_v34 = vld [vmem:[#allocation10 + $0x148] sm:$0xff]  ;;  %v3752_v11 = vld [vmem:[#allocation10 + $0x158] sm:$0xff] }
 0x77d   :  { %3167 = vst [vmem:[#allocation5] sm:$0xcc] %v3163_v23  ;;  %3168 = vst [vmem:[#allocation5 + $0x8] sm:$0xcc] %v3164_v47  ;;  %v15858_v4 = vpack.c.bf16 %v3750_v34, %v3742_v57  ;;  %v3741_v23 = vld [vmem:[#allocation10 + $0x100] sm:$0xff]  ;;  %v15860_v47 = vpack.c.bf16 %v3752_v11, %v3744_v13  ;;  %v3807_v34 = vld [vmem:[#allocation10 + $0x310] sm:$0xff]  ;;  %v15908_v13 = vpack.c.bf16 %v3816_v39, %v3808_v5 }
 0x77e   :  { %v3813_v57 = vld [vmem:[#allocation10 + $0x340] sm:$0xff]  ;;  %v3815_v11 = vld [vmem:[#allocation10 + $0x350] sm:$0xff] }
 0x784   :  { %v3169_v61 = vld [vmem:[#allocation5] sm:$0xff]  ;;  %v3170_v25 = vld [vmem:[#allocation5 + $0x8] sm:$0xff] }
 0x785   :  { %v11243_v17 = vmul.f32 -1.442695, %v3169_v61  ;;  %v11244_v60 = vmul.f32 -1.442695, %v3170_v25  ;;  %v3184_v8 = vrot.slane %v3170_v25, 4  ;;  %v3749_v61 = vld [vmem:[#allocation10 + $0x140] sm:$0xff] }
 0x786   :  { %v3751_v25 = vld [vmem:[#allocation10 + $0x150] sm:$0xff] }
 0x787   :  { %14459 = vpow2.f32 %v11243_v17  ;;  %v3743_v17 = vld [vmem:[#allocation10 + $0x110] sm:$0xff] }
 0x788   :  { %14461 = vpow2.f32 %v11244_v60  ;;  %v15863_v60 = vpack.c.bf16 %v3749_v61, %v3741_v23  ;;  %v3822_v23 = vld [vmem:[#allocation10 + $0x388] sm:$0xff] }
 0x789   :  { %v3830_v61 = vld [vmem:[#allocation10 + $0x3c8] sm:$0xff] }
 0x791   :  { %v14460_v10 = vpop.eup %14459 }
 0x792   :  { %v3177_v50 = vadd.f32 1.0, %v14460_v10  ;;  %v14462_v38 = vpop.eup %14461  ;;  %v3758_v10 = vld [vmem:[#allocation10 + $0x188] sm:$0xff] }
 0x793   :  { %v3178_v7 = vadd.f32 1.0, %v14462_v38  ;;  %v15867_v38 = vpack.c.bf16 %v3751_v25, %v3743_v17  ;;  %v3824_v17 = vld [vmem:[#allocation10 + $0x398] sm:$0xff] }
 0x794   :  { %14463 = vrcp.f32 %v3177_v50  ;;  %v3766_v50 = vld [vmem:[#allocation10 + $0x1c8] sm:$0xff]  ;;  %v3832_v25 = vld [vmem:[#allocation10 + $0x3d8] sm:$0xff] }
 0x795   :  { %14465 = vtanh.f32 %v3184_v8  ;;  %v3760_v8 = vld [vmem:[#allocation10 + $0x198] sm:$0xff] }
 0x796   :  { %14467 = vrcp.f32 %v3178_v7  ;;  %v3765_v7 = vld [vmem:[#allocation10 + $0x1c0] sm:$0xff] }
 0x79e   :  { %v14464_v49 = vpop.eup %14463 }
 0x79f   :  { %v3188_v48 = vrot.slane %v14464_v49, 4  ;;  %v14466_v24 = vpop.eup %14465 }
 0x7a0   :  { %v3191_v36 = vmul.f32 %v14466_v24, %v14464_v49  ;;  %v14468_v42 = vpop.eup %14467  ;;  %v15869_v49 = vpack.c.bf16 %v3766_v50, %v3758_v10  ;;  %v3757_v24 = vld [vmem:[#allocation10 + $0x180] sm:$0xff]  ;;  %v15911_v10 = vpack.c.bf16 %v3813_v57, %v3805_v58  ;;  %v15915_v50 = vpack.c.bf16 %v3815_v11, %v3807_v34  ;;  %v3613_v58 = vld [vmem:[#allocation2 + $0x48] sm:$0xc]  ;;  %v3615_v57 = vld [vmem:[#allocation2 + $0x58] sm:$0xc] }
 0x7a1   :  { %v3190_v20 = vmul.f32 %v3188_v48, %v15660_v2  ;;  %v17742_v2 = vld [vmem:[#allocation27_spill] sm:$0xff]  ;;  %v3768_v48 = vld [vmem:[#allocation10 + $0x1d8] sm:$0xff] }
 0x7a3   :  { %v15799_v32 = vadd.f32 %v3191_v36, %v3190_v20  ;;  %v15872_v20 = vpack.c.bf16 %v3768_v48, %v3760_v8  ;;  %v3759_v36 = vld [vmem:[#allocation10 + $0x190] sm:$0xff]  ;;  %v15917_v8 = vpack.c.bf16 %v3830_v61, %v3822_v23  ;;  %v3821_v48 = vld [vmem:[#allocation10 + $0x380] sm:$0xff] }
 0x7a5   :  { %14469 = vtanh.f32 %v15799_v32 }
 0x7af   :  { %v14470_v35 = vpop.eup %14469 }
 0x7b0   :  { %v3194_v12 = vmul.f32 %v14470_v35, %v14468_v42  ;;  %v3767_v42 = vld [vmem:[#allocation10 + $0x1d0] sm:$0xff]  ;;  %v3774_v35 = vld [vmem:[#allocation10 + $0x208] sm:$0xff] }
 0x7b2   :  { %3195 = vst [vmem:[#allocation3 + $0x10] sm:$0x3] %v3194_v12  ;;  %v3197_v27 = vcombine.low %v3194_v12, %v3194_v12  ;;  %3393 = vmatmul.mubr.f32.vlgmr.msra.gmra.mrb[28].mxu1 %v3194_v12  ;;  %3464 = vmatmul.mubr.f32.vlgmr.msra.gmra.mrb[30].mxu0 %v3194_v12 }
 0x7b3   :  { %12171 = vmatpush1.bf16.msra.mxu1 %v15663_v62  ;;  %12203 = vmatpush1.bf16.msra.mxu0 %v15665_v63  ;;  %v17745_v62 = vld [vmem:[#allocation30_spill] sm:$0xff]  ;;  %v17746_v63 = vld [vmem:[#allocation31_spill] sm:$0xff] }
 0x7b4   :  { %3199 = vst [vmem:[#allocation3 + $0x8] sm:$0xc0] %v3197_v27  ;;  %12173 = vmatprep.subr.bf16.mxu1 %v15669_v26  ;;  %12205 = vmatprep.subr.bf16.mxu0 %v15671_v16  ;;  %v17748_v26 = vld [vmem:[#allocation33_spill] sm:$0xff]  ;;  %v17749_v16 = vld [vmem:[#allocation34_spill] sm:$0xff] }
 0x7b5   :  { %3534 = vmatprep.mubr.f32.mxu1 %v17686_v19  ;;  %3605 = vmatprep.mubr.f32.mxu0 %v17686_v19  ;;  %v3776_v27 = vld [vmem:[#allocation10 + $0x218] sm:$0xff] }
 0x7b7   :  { %12175 = vmatpush1.bf16.msra.mxu1 %v15678_v44  ;;  %12207 = vmatpush1.bf16.msra.mxu0 %v17742_v2  ;;  %v17752_v44 = vld [vmem:[#allocation42_spill] sm:$0xff] }
 0x7b8   :  { %12177 = vmatprep.subr.bf16.mxu1 %v17743_v18  ;;  %12209 = vmatprep.subr.bf16.mxu0 %v17744_v45  ;;  %v3784_v2 = vld [vmem:[#allocation10 + $0x258] sm:$0xff]  ;;  %v15875_v18 = vpack.c.bf16 %v3765_v7, %v3757_v24  ;;  %v15879_v45 = vpack.c.bf16 %v3767_v42, %v3759_v36  ;;  %v3829_v24 = vld [vmem:[#allocation10 + $0x3c0] sm:$0xff]  ;;  %v3823_v7 = vld [vmem:[#allocation10 + $0x390] sm:$0xff]  ;;  %v15920_v36 = vpack.c.bf16 %v3832_v25, %v3824_v17 }
 0x7b9   :  { %v3831_v42 = vld [vmem:[#allocation10 + $0x3d0] sm:$0xff] }
 0x7bb   :  { %12179 = vmatpush1.bf16.msra.mxu1 %v17745_v62  ;;  %12211 = vmatpush1.bf16.msra.mxu0 %v17746_v63  ;;  %v3773_v63 = vld [vmem:[#allocation10 + $0x200] sm:$0xff] }
 0x7bc   :  { %12181 = vmatprep.subr.bf16.mxu1 %v17747_v33  ;;  %12213 = vmatprep.subr.bf16.mxu0 %v17748_v26  ;;  %v3781_v33 = vld [vmem:[#allocation10 + $0x240] sm:$0xff]  ;;  %v3775_v26 = vld [vmem:[#allocation10 + $0x210] sm:$0xff] }
 0x7bf   :  { %12183 = vmatpush1.bf16.msra.mxu1 %v17749_v16  ;;  %12215 = vmatpush1.bf16.msra.mxu0 %v17750_v53  ;;  %v15884_v16 = vpack.c.bf16 %v3784_v2, %v3776_v27  ;;  %v3783_v53 = vld [vmem:[#allocation10 + $0x250] sm:$0xff]  ;;  %v3716_v27 = vld [vmem:[#allocation10 + $0x38] sm:$0xff] }
 0x7c0   :  { %12185 = vmatprep.subr.bf16.mxu1 %v17751_v52  ;;  %12217 = vmatprep.subr.bf16.mxu0 %v17752_v44  ;;  %v3790_v52 = vld [vmem:[#allocation10 + $0x288] sm:$0xff]  ;;  %v3724_v2 = vld [vmem:[#allocation10 + $0x78] sm:$0xff] }
 0x7c1   :  { %v3798_v44 = vld [vmem:[#allocation10 + $0x2c8] sm:$0xff] }
 0x7c3   :  { %12187 = vmatpush1.bf16.msra.mxu1 %v17753_v59  ;;  %12219 = vmatpush1.bf16.msra.mxu0 %v17754_v3  ;;  %v3792_v59 = vld [vmem:[#allocation10 + $0x298] sm:$0xff] }
 0x7c4   :  { %12189 = vmatprep.subr.bf16.mxu1 %v15722_v51  ;;  %12221 = vmatprep.subr.bf16.mxu0 %v15724_v6  ;;  %v3710_v51 = vld [vmem:[#allocation10 + $0x8] sm:$0xff]  ;;  %v3800_v3 = vld [vmem:[#allocation10 + $0x2d8] sm:$0xff] }
 0x7c5   :  { %v3718_v6 = vld [vmem:[#allocation10 + $0x48] sm:$0xff] }
 0x7c7   :  { %12191 = vmatpush1.bf16.msra.mxu1 %v15728_v22  ;;  %12223 = vmatpush1.bf16.msra.mxu0 %v15730_v46  ;;  %v3712_v22 = vld [vmem:[#allocation10 + $0x18] sm:$0xff]  ;;  %v15836_v46 = vpack.c.bf16 %v3718_v6, %v3710_v51  ;;  %v15887_v51 = vpack.c.bf16 %v3781_v33, %v3773_v63  ;;  %v15891_v6 = vpack.c.bf16 %v3783_v53, %v3775_v26 }
 0x7c8   :  { %12193 = vmatprep.subr.bf16.mxu1 %v15734_v21  ;;  %12225 = vmatprep.subr.bf16.mxu0 %v15736_v29  ;;  %v3720_v21 = vld [vmem:[#allocation10 + $0x58] sm:$0xff]  ;;  %v3709_v29 = vld [vmem:[#allocation10] sm:$0xff]  ;;  %v15923_v63 = vpack.c.bf16 %v3829_v24, %v3821_v48  ;;  %v15927_v33 = vpack.c.bf16 %v3831_v42, %v3823_v7  ;;  %v15932_v53 = vpack.c.bf16 %v3724_v2, %v3716_v27  ;;  %v3646_v27 = vld [vmem:[#allocation2 + $0x20] sm:$0x30] }
 0x7c9   :  { %v3648_v2 = vld [vmem:[#allocation2 + $0x30] sm:$0x30] }
 0x7cb   :  { %12195 = vmatpush1.bf16.msra.mxu1 %v15740_v0  ;;  %12227 = vmatpush1.bf16.msra.mxu0 %v15742_v1  ;;  %v3717_v0 = vld [vmem:[#allocation10 + $0x40] sm:$0xff]  ;;  %v15838_v1 = vpack.c.bf16 %v3720_v21, %v3712_v22  ;;  %v15893_v22 = vpack.c.bf16 %v3798_v44, %v3790_v52 }
 0x7cc   :  { %12197 = vmatprep.subr.bf16.mxu1 %v15746_v9  ;;  %12229 = vmatprep.subr.bf16.mxu0 %v15748_v30  ;;  %v15840_v9 = vpack.c.bf16 %v3717_v0, %v3709_v29  ;;  %v3711_v30 = vld [vmem:[#allocation10 + $0x10] sm:$0xff]  ;;  %v3789_v21 = vld [vmem:[#allocation10 + $0x280] sm:$0xff] }
 0x7cd   :  { %v3797_v29 = vld [vmem:[#allocation10 + $0x2c0] sm:$0xff]  ;;  %v3791_v0 = vld [vmem:[#allocation10 + $0x290] sm:$0xff] }
 0x7ce   :  { %v15899_v41 = vpack.c.bf16 %v3797_v29, %v3789_v21 }
 0x7cf   :  { %12199 = vmatpush1.bf16.msra.mxu1 %v15752_v54  ;;  %12231 = vmatpush1.bf16.msra.mxu0 %v15754_v14  ;;  %v3719_v54 = vld [vmem:[#allocation10 + $0x50] sm:$0xff]  ;;  %v3726_v14 = vld [vmem:[#allocation10 + $0x88] sm:$0xff] }
 0x7d0   :  { %12233 = vmatprep.subr.bf16.mxu1 %v15836_v46  ;;  %v15843_v37 = vpack.c.bf16 %v3719_v54, %v3711_v30  ;;  %12265 = vmatprep.subr.bf16.mxu0 %v15838_v1  ;;  %v15847_v31 = vpack.c.bf16 %v3734_v56, %v3726_v14  ;;  %v15896_v30 = vpack.c.bf16 %v3800_v3, %v3792_v59  ;;  %v3799_v54 = vld [vmem:[#allocation10 + $0x2d0] sm:$0xff]  ;;  %v3806_v14 = vld [vmem:[#allocation10 + $0x308] sm:$0xff] }
 0x7d1   :  { %v3814_v56 = vld [vmem:[#allocation10 + $0x348] sm:$0xff]  ;;  %v15903_v55 = vpack.c.bf16 %v3799_v54, %v3791_v0  ;;  %v3612_v0 = vld [vmem:[#allocation2 + $0x40] sm:$0xc]  ;;  %v3614_v54 = vld [vmem:[#allocation2 + $0x50] sm:$0xc] }
 0x7d2   :  { %3535 = vmatmul.mubr.f32.vlgmr.msra.gmra.mrb[30].mxu1 %v3194_v12  ;;  %3606 = vmatmul.mubr.f32.vlgmr.msra.gmra.mrb[32].mxu0 %v3194_v12  ;;  %v3782_v12 = vld [vmem:[#allocation10 + $0x248] sm:$0xff]  ;;  %v15905_v43 = vpack.c.bf16 %v3814_v56, %v3806_v14 }
 0x7d3   :  { %3901 = vmatprep.mubr.f32.mxu1 %v17686_v19  ;;  %3972 = vmatprep.mubr.f32.mxu0 %v17686_v19  ;;  %v15881_v62 = vpack.c.bf16 %v3782_v12, %v3774_v35  ;;  %v3714_v35 = vld [vmem:[#allocation10 + $0x28] sm:$0xff] }
 0x7d4   :  { %12235 = vmatpush1.bf16.msra.mxu1 %v15840_v9  ;;  %12267 = vmatpush1.bf16.msra.mxu0 %v15843_v37  ;;  %v3722_v12 = vld [vmem:[#allocation10 + $0x68] sm:$0xff] }
 0x7d5   :  { %12237 = vmatprep.subr.bf16.mxu1 %v15847_v31  ;;  %12269 = vmatprep.subr.bf16.mxu0 %v15849_v40  ;;  %v15929_v26 = vpack.c.bf16 %v3722_v12, %v3714_v35 }
 0x7d8   :  { %12239 = vmatpush1.bf16.msra.mxu1 %v15852_v28  ;;  %12271 = vmatpush1.bf16.msra.mxu0 %v15856_v15 }
 0x7d9   :  { %12241 = vmatprep.subr.bf16.mxu1 %v15858_v4  ;;  %12273 = vmatprep.subr.bf16.mxu0 %v15860_v47 }
 0x7dc   :  { %12243 = vmatpush1.bf16.msra.mxu1 %v15863_v60  ;;  %12275 = vmatpush1.bf16.msra.mxu0 %v15867_v38 }
 0x7dd   :  { %12245 = vmatprep.subr.bf16.mxu1 %v15869_v49  ;;  %12277 = vmatprep.subr.bf16.mxu0 %v15872_v20 }
 0x7e0   :  { %12247 = vmatpush1.bf16.msra.mxu1 %v15875_v18  ;;  %12279 = vmatpush1.bf16.msra.mxu0 %v15879_v45 }
 0x7e1   :  { %12249 = vmatprep.subr.bf16.mxu1 %v15881_v62  ;;  %12281 = vmatprep.subr.bf16.mxu0 %v15884_v16 }
 0x7e4   :  { %12251 = vmatpush1.bf16.msra.mxu1 %v15887_v51  ;;  %12283 = vmatpush1.bf16.msra.mxu0 %v15891_v6 }
 0x7e5   :  { %12253 = vmatprep.subr.bf16.mxu1 %v15893_v22  ;;  %12285 = vmatprep.subr.bf16.mxu0 %v15896_v30 }
 0x7e8   :  { %12255 = vmatpush1.bf16.msra.mxu1 %v15899_v41  ;;  %12287 = vmatpush1.bf16.msra.mxu0 %v15903_v55 }
 0x7e9   :  { %12257 = vmatprep.subr.bf16.mxu1 %v15905_v43  ;;  %12289 = vmatprep.subr.bf16.mxu0 %v15908_v13 }
 0x7ec   :  { %12259 = vmatpush1.bf16.msra.mxu1 %v15911_v10  ;;  %12291 = vmatpush1.bf16.msra.mxu0 %v15915_v50 }
 0x7ed   :  { %12261 = vmatprep.subr.bf16.mxu1 %v15917_v8  ;;  %12293 = vmatprep.subr.bf16.mxu0 %v15920_v36 }
 0x7f0   :  { %12263 = vmatpush1.bf16.msra.mxu1 %v15923_v63  ;;  %12295 = vmatpush1.bf16.msra.mxu0 %v15927_v33 }
 0x7f1   :  { %12297 = vmatprep.subr.bf16.mxu1 %v15929_v26  ;;  %12329 = vmatprep.subr.bf16.mxu0 %v15932_v53 }
 0x885   :  { %v3394_v52 = vpop.f32.mrb[28].mxu1  ;;  %v3465_v44 = vpop.f32.mrb[30].mxu0 }
 0x886   :  { %v3620_v59 = vrot.slane %v3394_v52, 6  ;;  %v3622_v3 = vrot.slane %v3465_v44, 6  ;;  %v3396_v21 = vpop.f32.mrb[29].mxu1  ;;  %v3467_v29 = vpop.f32.mrb[31].mxu0 }
 0x887   :  { %v3621_v14 = vrot.slane %v3396_v21, 6  ;;  %v3623_v56 = vrot.slane %v3467_v29, 6  ;;  %v3647_v21 = vld [vmem:[#allocation2 + $0x28] sm:$0x30]  ;;  %v3649_v29 = vld [vmem:[#allocation2 + $0x38] sm:$0x30] }
 0x888   :  { %v3628_v5 = vadd.f32 %v3620_v59, %v3612_v0  ;;  %v3630_v39 = vadd.f32 %v3622_v3, %v3614_v54 }
 0x889   :  { %v3629_v34 = vadd.f32 %v3621_v14, %v3613_v58  ;;  %v3631_v11 = vadd.f32 %v3623_v56, %v3615_v57 }
 0x88b   :  { %v3636_v23 = vcombine.low %v3628_v5, %v3629_v34  ;;  %v3637_v61 = vcombine.low %v3630_v39, %v3631_v11 }
 0x88d   :  { %v11245_v17 = vrot.slane %v3636_v23, 10  ;;  %v11246_v25 = vrot.slane %v3637_v61, 10 }
 0x88f   :  { %3644 = vst [vmem:[#allocation5] sm:$0x33] %v11245_v17  ;;  %3645 = vst [vmem:[#allocation5 + $0x8] sm:$0x33] %v11246_v25 }
 0x8a5   :  { %v3536_v48 = vpop.f32.mrb[30].mxu1  ;;  %v3607_v24 = vpop.f32.mrb[32].mxu0 }
 0x8a6   :  { %v3654_v7 = vrot.slane %v3536_v48, 6  ;;  %v3656_v42 = vrot.slane %v3607_v24, 6  ;;  %v3538_v35 = vpop.f32.mrb[31].mxu1  ;;  %v3609_v12 = vpop.f32.mrb[33].mxu0 }
 0x8a7   :  { %v3655_v52 = vrot.slane %v3538_v35, 6  ;;  %v3657_v44 = vrot.slane %v3609_v12, 6 }
 0x8a8   :  { %v3662_v59 = vadd.f32 %v3654_v7, %v3646_v27  ;;  %v3664_v3 = vadd.f32 %v3656_v42, %v3648_v2  ;;  %v3713_v2 = vld [vmem:[#allocation10 + $0x20] sm:$0xff] }
 0x8a9   :  { %v3663_v0 = vadd.f32 %v3655_v52, %v3647_v21  ;;  %v3665_v54 = vadd.f32 %v3657_v44, %v3649_v29  ;;  %v3721_v52 = vld [vmem:[#allocation10 + $0x60] sm:$0xff]  ;;  %v3715_v44 = vld [vmem:[#allocation10 + $0x30] sm:$0xff]  ;;  %v3738_v21 = vld [vmem:[#allocation10 + $0xe8] sm:$0xff] }
 0x8aa   :  { %v3732_v29 = vld [vmem:[#allocation10 + $0xb8] sm:$0xff] }
 0x8ab   :  { %v3670_v14 = vcombine.high %v3662_v59, %v3663_v0  ;;  %v3671_v56 = vcombine.high %v3664_v3, %v3665_v54  ;;  %v3723_v59 = vld [vmem:[#allocation10 + $0x70] sm:$0xff]  ;;  %v3730_v3 = vld [vmem:[#allocation10 + $0xa8] sm:$0xff]  ;;  %v3740_v0 = vld [vmem:[#allocation10 + $0xf8] sm:$0xff] }
 0x8ad   :  { %v3672_v5 = vrot.slane %v3670_v14, 6  ;;  %v3673_v39 = vrot.slane %v3671_v56, 6  ;;  %v15942_v56 = vpack.c.bf16 %v3721_v52, %v3713_v2 }
 0x8af   :  { %3676 = vst [vmem:[#allocation5] sm:$0xcc] %v3672_v5  ;;  %3677 = vst [vmem:[#allocation5 + $0x8] sm:$0xcc] %v3673_v39  ;;  %v15944_v5 = vpack.c.bf16 %v3723_v59, %v3715_v44  ;;  %v3737_v39 = vld [vmem:[#allocation10 + $0xe0] sm:$0xff]  ;;  %v3747_v44 = vld [vmem:[#allocation10 + $0x130] sm:$0xff] }
 0x8b0   :  { %v3755_v59 = vld [vmem:[#allocation10 + $0x170] sm:$0xff] }
 0x8b6   :  { %v3678_v58 = vld [vmem:[#allocation5] sm:$0xff]  ;;  %v3679_v34 = vld [vmem:[#allocation5 + $0x8] sm:$0xff] }
 0x8b7   :  { %v11247_v57 = vmul.f32 -1.442695, %v3678_v58  ;;  %v11248_v11 = vmul.f32 -1.442695, %v3679_v34  ;;  %v3693_v17 = vrot.slane %v3679_v34, 4  ;;  %v15950_v34 = vpack.c.bf16 %v3740_v0, %v3732_v29  ;;  %v3764_v29 = vld [vmem:[#allocation10 + $0x1b8] sm:$0xff] }
 0x8b8   :  { %v3772_v0 = vld [vmem:[#allocation10 + $0x1f8] sm:$0xff] }
 0x8b9   :  { %14471 = vpow2.f32 %v11247_v57  ;;  %v15948_v57 = vpack.c.bf16 %v3738_v21, %v3730_v3  ;;  %v3762_v3 = vld [vmem:[#allocation10 + $0x1a8] sm:$0xff] }
 0x8ba   :  { %14473 = vpow2.f32 %v11248_v11  ;;  %v3731_v11 = vld [vmem:[#allocation10 + $0xb0] sm:$0xff]  ;;  %v3770_v21 = vld [vmem:[#allocation10 + $0x1e8] sm:$0xff] }
 0x8c3   :  { %v14472_v23 = vpop.eup %14471 }
 0x8c4   :  { %v3686_v61 = vadd.f32 1.0, %v14472_v23  ;;  %v14474_v25 = vpop.eup %14473  ;;  %v3739_v23 = vld [vmem:[#allocation10 + $0xf0] sm:$0xff] }
 0x8c5   :  { %v3687_v42 = vadd.f32 1.0, %v14474_v25  ;;  %v3748_v25 = vld [vmem:[#allocation10 + $0x138] sm:$0xff] }
 0x8c6   :  { %14475 = vrcp.f32 %v3686_v61  ;;  %v3746_v61 = vld [vmem:[#allocation10 + $0x128] sm:$0xff] }
 0x8c7   :  { %14477 = vtanh.f32 %v3693_v17  ;;  %v3754_v17 = vld [vmem:[#allocation10 + $0x168] sm:$0xff] }
 0x8c8   :  { %14479 = vrcp.f32 %v3687_v42  ;;  %v15959_v42 = vpack.c.bf16 %v3739_v23, %v3731_v11  ;;  %v15963_v2 = vpack.c.bf16 %v3754_v17, %v3746_v61  ;;  %v15977_v11 = vpack.c.bf16 %v3770_v21, %v3762_v3  ;;  %v3763_v61 = vld [vmem:[#allocation10 + $0x1b0] sm:$0xff] }
 0x8c9   :  { %v15979_v23 = vpack.c.bf16 %v3772_v0, %v3764_v29  ;;  %v3771_v17 = vld [vmem:[#allocation10 + $0x1f0] sm:$0xff] }
 0x8ca   :  { %17755 = vst [vmem:[#allocation27_spill] sm:$0xff] %v15959_v42  ;;  %17756 = vst [vmem:[#allocation28_spill] sm:$0xff] %v15963_v2  ;;  %v3779_v29 = vld [vmem:[#allocation10 + $0x230] sm:$0xff] }
 0x8cb   :  { %17760 = vst [vmem:[#allocation32_spill] sm:$0xff] %v15977_v11  ;;  %17761 = vst [vmem:[#allocation33_spill] sm:$0xff] %v15979_v23  ;;  %v3787_v0 = vld [vmem:[#allocation10 + $0x270] sm:$0xff] }
 0x8d0   :  { %v14476_v48 = vpop.eup %14475 }
 0x8d1   :  { %v3697_v24 = vrot.slane %v14476_v48, 4  ;;  %v14478_v7 = vpop.eup %14477 }
 0x8d2   :  { %v3700_v12 = vmul.f32 %v14478_v7, %v14476_v48  ;;  %v14480_v54 = vpop.eup %14479  ;;  %v3756_v48 = vld [vmem:[#allocation10 + $0x178] sm:$0xff] }
 0x8d3   :  { %v3699_v35 = vmul.f32 %v3697_v24, %v15799_v32  ;;  %v3729_v32 = vld [vmem:[#allocation10 + $0xa0] sm:$0xff]  ;;  %v15965_v52 = vpack.c.bf16 %v3756_v48, %v3748_v25  ;;  %v3778_v25 = vld [vmem:[#allocation10 + $0x228] sm:$0xff] }
 0x8d4   :  { %v15957_v7 = vpack.c.bf16 %v3737_v39, %v3729_v32  ;;  %v3761_v32 = vld [vmem:[#allocation10 + $0x1a0] sm:$0xff]  ;;  %v3786_v48 = vld [vmem:[#allocation10 + $0x268] sm:$0xff] }
 0x8d5   :  { %v15939_v27 = vadd.f32 %v3700_v12, %v3699_v35  ;;  %v3745_v35 = vld [vmem:[#allocation10 + $0x120] sm:$0xff]  ;;  %17757 = vst [vmem:[#allocation29_spill] sm:$0xff] %v15965_v52  ;;  %v15989_v3 = vpack.c.bf16 %v3786_v48, %v3778_v25  ;;  %v3795_v48 = vld [vmem:[#allocation10 + $0x2b0] sm:$0xff] }
 0x8d6   :  { %v3753_v12 = vld [vmem:[#allocation10 + $0x160] sm:$0xff] }
 0x8d7   :  { %14481 = vtanh.f32 %v15939_v27  ;;  %v3769_v39 = vld [vmem:[#allocation10 + $0x1e0] sm:$0xff]  ;;  %17764 = vst [vmem:[#allocation36_spill] sm:$0xff] %v15989_v3 }
 0x8e1   :  { %v14482_v14 = vpop.eup %14481 }
 0x8e2   :  { %v15946_v58 = vmul.f32 %v14482_v14, %v14480_v54  ;;  %v15971_v54 = vpack.c.bf16 %v3753_v12, %v3745_v35  ;;  %v15973_v14 = vpack.c.bf16 %v3755_v59, %v3747_v44  ;;  %v15983_v35 = vpack.c.bf16 %v3769_v39, %v3761_v32  ;;  %v3777_v44 = vld [vmem:[#allocation10 + $0x220] sm:$0xff] }
 0x8e3   :  { %v15985_v12 = vpack.c.bf16 %v3771_v17, %v3763_v61  ;;  %v3785_v59 = vld [vmem:[#allocation10 + $0x260] sm:$0xff]  ;;  %v15997_v39 = vpack.c.bf16 %v3787_v0, %v3779_v29 }
 0x8e4   :  { %v3705_v24 = vrot.slane %v15946_v58, 6  ;;  %3902 = vmatmul.mubr.f32.vlgmr.msra.gmra.mrb[32].mxu1 %v15946_v58  ;;  %3973 = vmatmul.mubr.f32.vlgmr.msra.gmra.mrb[34].mxu0 %v15946_v58  ;;  %17758 = vst [vmem:[#allocation30_spill] sm:$0xff] %v15971_v54  ;;  %17759 = vst [vmem:[#allocation31_spill] sm:$0xff] %v15973_v14  ;;  %v15995_v32 = vpack.c.bf16 %v3785_v59, %v3777_v44  ;;  %v3793_v61 = vld [vmem:[#allocation10 + $0x2a0] sm:$0xff] }
 0x8e5   :  { %12299 = vmatpush1.bf16.msra.mxu1 %v15942_v56  ;;  %12331 = vmatpush1.bf16.msra.mxu0 %v15944_v5  ;;  %17762 = vst [vmem:[#allocation34_spill] sm:$0xff] %v15983_v35  ;;  %17763 = vst [vmem:[#allocation35_spill] sm:$0xff] %v15985_v12  ;;  %v3801_v17 = vld [vmem:[#allocation10 + $0x2e0] sm:$0xff] }
 0x8e6   :  { %3707 = vst [vmem:[#allocation3 + $0x10] ss:$-4 sps:$4 sm:$0x3c] %v3705_v24   ;;  %12301 = vmatprep.subr.bf16.mxu1 %v15948_v57  ;;  %12333 = vmatprep.subr.bf16.mxu0 %v15950_v34  ;;  %v3780_v24 = vld [vmem:[#allocation10 + $0x238] sm:$0xff]  ;;  %17766 = vst [vmem:[#allocation43_spill] sm:$0xff] %v15995_v32  ;;  %v16007_v44 = vpack.c.bf16 %v3801_v17, %v3793_v61  ;;  %v3809_v29 = vld [vmem:[#allocation10 + $0x320] sm:$0xff] }
 0x8e7   :  { %4043 = vmatprep.mubr.f32.mxu1 %v17686_v19  ;;  %4114 = vmatprep.mubr.f32.mxu0 %v17686_v19  ;;  %17767 = vst [vmem:[#allocation44_spill] sm:$0xff] %v15997_v39  ;;  %v3817_v0 = vld [vmem:[#allocation10 + $0x360] sm:$0xff] }
 0x8e8   :  { %v16019_v61 = vpack.c.bf16 %v3817_v0, %v3809_v29 }
 0x8e9   :  { %12303 = vmatpush1.bf16.msra.mxu1 %v15957_v7  ;;  %12335 = vmatpush1.bf16.msra.mxu0 %v15959_v42  ;;  %v3788_v42 = vld [vmem:[#allocation10 + $0x278] sm:$0xff] }
 0x8ea   :  { %12305 = vmatprep.subr.bf16.mxu1 %v15963_v2  ;;  %12337 = vmatprep.subr.bf16.mxu0 %v15965_v52  ;;  %v15991_v21 = vpack.c.bf16 %v3788_v42, %v3780_v24  ;;  %v3794_v52 = vld [vmem:[#allocation10 + $0x2a8] sm:$0xff]  ;;  %v3796_v2 = vld [vmem:[#allocation10 + $0x2b8] sm:$0xff]  ;;  %v3803_v24 = vld [vmem:[#allocation10 + $0x2f0] sm:$0xff] }
 0x8eb   :  { %v16009_v59 = vpack.c.bf16 %v3803_v24, %v3795_v48  ;;  %v3825_v48 = vld [vmem:[#allocation10 + $0x3a0] sm:$0xff]  ;;  %v3835_v24 = vld [vmem:[#allocation10 + $0x3f0] sm:$0xff] }
 0x8ec   :  { %17765 = vst [vmem:[#allocation42_spill] sm:$0xff] %v15991_v21 }
 0x8ed   :  { %12307 = vmatpush1.bf16.msra.mxu1 %v15971_v54  ;;  %12339 = vmatpush1.bf16.msra.mxu0 %v15973_v14  ;;  %v3802_v54 = vld [vmem:[#allocation10 + $0x2e8] sm:$0xff]  ;;  %v3804_v14 = vld [vmem:[#allocation10 + $0x2f8] sm:$0xff] }
 0x8ee   :  { %12309 = vmatprep.subr.bf16.mxu1 %v15977_v11  ;;  %12341 = vmatprep.subr.bf16.mxu0 %v15979_v23  ;;  %v16001_v42 = vpack.c.bf16 %v3802_v54, %v3794_v52  ;;  %v16003_v25 = vpack.c.bf16 %v3804_v14, %v3796_v2  ;;  %v3810_v23 = vld [vmem:[#allocation10 + $0x328] sm:$0xff]  ;;  %v3812_v11 = vld [vmem:[#allocation10 + $0x338] sm:$0xff]  ;;  %v3811_v54 = vld [vmem:[#allocation10 + $0x330] sm:$0xff] }
 0x8ef   :  { %v3819_v14 = vld [vmem:[#allocation10 + $0x370] sm:$0xff] }
 0x8f0   :  { %v16021_v17 = vpack.c.bf16 %v3819_v14, %v3811_v54 }
 0x8f1   :  { %12311 = vmatpush1.bf16.msra.mxu1 %v15983_v35  ;;  %12343 = vmatpush1.bf16.msra.mxu0 %v15985_v12  ;;  %v3818_v35 = vld [vmem:[#allocation10 + $0x368] sm:$0xff]  ;;  %v3820_v12 = vld [vmem:[#allocation10 + $0x378] sm:$0xff] }
 0x8f2   :  { %12313 = vmatprep.subr.bf16.mxu1 %v15989_v3  ;;  %12345 = vmatprep.subr.bf16.mxu0 %v15991_v21  ;;  %v16013_v2 = vpack.c.bf16 %v3818_v35, %v3810_v23  ;;  %v16015_v52 = vpack.c.bf16 %v3820_v12, %v3812_v11  ;;  %v3826_v21 = vld [vmem:[#allocation10 + $0x3a8] sm:$0xff]  ;;  %v3828_v3 = vld [vmem:[#allocation10 + $0x3b8] sm:$0xff]  ;;  %v3833_v35 = vld [vmem:[#allocation10 + $0x3e0] sm:$0xff] }
 0x8f3   :  { %v3827_v12 = vld [vmem:[#allocation10 + $0x3b0] sm:$0xff]  ;;  %v16031_v29 = vpack.c.bf16 %v3833_v35, %v3825_v48 }
 0x8f4   :  { %v16033_v0 = vpack.c.bf16 %v3835_v24, %v3827_v12 }
 0x8f5   :  { %12315 = vmatpush1.bf16.msra.mxu1 %v15995_v32  ;;  %12347 = vmatpush1.bf16.msra.mxu0 %v15997_v39  ;;  %v3834_v32 = vld [vmem:[#allocation10 + $0x3e8] sm:$0xff]  ;;  %v3836_v39 = vld [vmem:[#allocation10 + $0x3f8] sm:$0xff] }
 0x8f6   :  { %12317 = vmatprep.subr.bf16.mxu1 %v16001_v42  ;;  %12349 = vmatprep.subr.bf16.mxu0 %v16003_v25  ;;  %v16025_v11 = vpack.c.bf16 %v3834_v32, %v3826_v21  ;;  %v16027_v23 = vpack.c.bf16 %v3836_v39, %v3828_v3 }
 0x8f9   :  { %12319 = vmatpush1.bf16.msra.mxu1 %v16007_v44  ;;  %12351 = vmatpush1.bf16.msra.mxu0 %v16009_v59 }
 0x8fa   :  { %12321 = vmatprep.subr.bf16.mxu1 %v16013_v2  ;;  %12353 = vmatprep.subr.bf16.mxu0 %v16015_v52 }
 0x8fd   :  { %12323 = vmatpush1.bf16.msra.mxu1 %v16019_v61  ;;  %12355 = vmatpush1.bf16.msra.mxu0 %v16021_v17 }
 0x8fe   :  { %12325 = vmatprep.subr.bf16.mxu1 %v16025_v11  ;;  %12357 = vmatprep.subr.bf16.mxu0 %v16027_v23 }
 0x901   :  { %12327 = vmatpush1.bf16.msra.mxu1 %v16031_v29  ;;  %12359 = vmatpush1.bf16.msra.mxu0 %v16033_v0 }
 0x902   :  { %12361 = vmatprep.subr.bf16.mxu1 %v15836_v46  ;;  %12393 = vmatprep.subr.bf16.mxu0 %v15838_v1 }
 0x904   :  { %4044 = vmatmul.mubr.f32.vlgmr.msra.gmra.mrb[34].mxu1 %v15946_v58  ;;  %4115 = vmatmul.mubr.f32.vlgmr.msra.gmra.mrb[36].mxu0 %v15946_v58 }
 0x905   :  { %12363 = vmatpush1.bf16.msra.mxu1 %v15840_v9  ;;  %12395 = vmatpush1.bf16.msra.mxu0 %v15843_v37 }
 0x906   :  { %12365 = vmatprep.subr.bf16.mxu1 %v15847_v31  ;;  %12397 = vmatprep.subr.bf16.mxu0 %v15849_v40 }
 0x907   :  { %4392 = vmatprep.mubr.f32.mxu1 %v17686_v19  ;;  %4463 = vmatprep.mubr.f32.mxu0 %v17686_v19 }
 0x909   :  { %12367 = vmatpush1.bf16.msra.mxu1 %v15852_v28  ;;  %12399 = vmatpush1.bf16.msra.mxu0 %v15856_v15  ;;  %v4121_v28 = vld [vmem:[#allocation2 + $0x40] sm:$0x30]  ;;  %v4123_v15 = vld [vmem:[#allocation2 + $0x50] sm:$0x30] }
 0x90a   :  { %12369 = vmatprep.subr.bf16.mxu1 %v15858_v4  ;;  %12401 = vmatprep.subr.bf16.mxu0 %v15860_v47 }
 0x90d   :  { %12371 = vmatpush1.bf16.msra.mxu1 %v15863_v60  ;;  %12403 = vmatpush1.bf16.msra.mxu0 %v15867_v38 }
 0x90e   :  { %12373 = vmatprep.subr.bf16.mxu1 %v15869_v49  ;;  %12405 = vmatprep.subr.bf16.mxu0 %v15872_v20  ;;  %v4122_v49 = vld [vmem:[#allocation2 + $0x48] sm:$0x30]  ;;  %v4124_v20 = vld [vmem:[#allocation2 + $0x58] sm:$0x30] }
 0x911   :  { %12375 = vmatpush1.bf16.msra.mxu1 %v15875_v18  ;;  %12407 = vmatpush1.bf16.msra.mxu0 %v15879_v45 }
 0x912   :  { %12377 = vmatprep.subr.bf16.mxu1 %v15881_v62  ;;  %12409 = vmatprep.subr.bf16.mxu0 %v15884_v16 }
 0x915   :  { %12379 = vmatpush1.bf16.msra.mxu1 %v15887_v51  ;;  %12411 = vmatpush1.bf16.msra.mxu0 %v15891_v6  ;;  %v4151_v6 = vld [vmem:[#allocation2 + $0x20] sm:$0xc] }
 0x916   :  { %12381 = vmatprep.subr.bf16.mxu1 %v15893_v22  ;;  %12413 = vmatprep.subr.bf16.mxu0 %v15896_v30  ;;  %v4153_v30 = vld [vmem:[#allocation2 + $0x30] sm:$0xc] }
 0x919   :  { %12383 = vmatpush1.bf16.msra.mxu1 %v15899_v41  ;;  %12415 = vmatpush1.bf16.msra.mxu0 %v15903_v55 }
 0x91a   :  { %12385 = vmatprep.subr.bf16.mxu1 %v15905_v43  ;;  %12417 = vmatprep.subr.bf16.mxu0 %v15908_v13  ;;  %v4152_v13 = vld [vmem:[#allocation2 + $0x28] sm:$0xc] }
 0x91d   :  { %12387 = vmatpush1.bf16.msra.mxu1 %v15911_v10  ;;  %12419 = vmatpush1.bf16.msra.mxu0 %v15915_v50  ;;  %v4154_v50 = vld [vmem:[#allocation2 + $0x38] sm:$0xc] }
 0x91e   :  { %12389 = vmatprep.subr.bf16.mxu1 %v15917_v8  ;;  %12421 = vmatprep.subr.bf16.mxu0 %v15920_v36 }
 0x921   :  { %12391 = vmatpush1.bf16.msra.mxu1 %v15923_v63  ;;  %12423 = vmatpush1.bf16.msra.mxu0 %v15927_v33 }
 0x922   :  { %12425 = vmatprep.subr.bf16.mxu1 %v15929_v26  ;;  %12457 = vmatprep.subr.bf16.mxu0 %v15932_v53 }
 0x9b7   :  { %v3903_v46 = vpop.f32.mrb[32].mxu1  ;;  %v3974_v1 = vpop.f32.mrb[34].mxu0 }
 0x9b8   :  { %v4129_v9 = vrot.slane %v3903_v46, 4  ;;  %v4131_v37 = vrot.slane %v3974_v1, 4  ;;  %v3905_v31 = vpop.f32.mrb[33].mxu1  ;;  %v3976_v40 = vpop.f32.mrb[35].mxu0 }
 0x9b9   :  { %v4130_v4 = vrot.slane %v3905_v31, 4  ;;  %v4132_v47 = vrot.slane %v3976_v40, 4 }
 0x9ba   :  { %v4137_v60 = vadd.f32 %v4129_v9, %v4121_v28  ;;  %v4139_v38 = vadd.f32 %v4131_v37, %v4123_v15  ;;  %v17769_v28 = vld [vmem:[#allocation28_spill] sm:$0xff]  ;;  %v17770_v15 = vld [vmem:[#allocation29_spill] sm:$0xff] }
 0x9bb   :  { %v4138_v18 = vadd.f32 %v4130_v4, %v4122_v49  ;;  %v4140_v45 = vadd.f32 %v4132_v47, %v4124_v20  ;;  %v17773_v4 = vld [vmem:[#allocation32_spill] sm:$0xff]  ;;  %v17776_v47 = vld [vmem:[#allocation35_spill] sm:$0xff]  ;;  %v4612_v20 = vld [vmem:[#allocation2 + $0x40] sm:$0xc0] }
 0x9bc   :  { %v17780_v49 = vld [vmem:[#allocation44_spill] sm:$0xff] }
 0x9bd   :  { %v4145_v62 = vcombine.high %v4137_v60, %v4138_v18  ;;  %v4146_v16 = vcombine.high %v4139_v38, %v4140_v45  ;;  %v17777_v60 = vld [vmem:[#allocation36_spill] sm:$0xff]  ;;  %v17779_v38 = vld [vmem:[#allocation43_spill] sm:$0xff] }
 0x9bf   :  { %4149 = vst [vmem:[#allocation5] sm:$0x33] %v4145_v62  ;;  %4150 = vst [vmem:[#allocation5 + $0x8] sm:$0x33] %v4146_v16  ;;  %v4613_v62 = vld [vmem:[#allocation2 + $0x48] sm:$0xc0] }
 0x9d7   :  { %v4045_v51 = vpop.f32.mrb[34].mxu1  ;;  %v4116_v22 = vpop.f32.mrb[36].mxu0 }
 0x9d8   :  { %v4155_v41 = vadd.f32 %v4151_v6, %v4045_v51  ;;  %v4157_v55 = vadd.f32 %v4153_v30, %v4116_v22  ;;  %v4047_v43 = vpop.f32.mrb[35].mxu1  ;;  %v4118_v10 = vpop.f32.mrb[37].mxu0 }
 0x9d9   :  { %v4156_v8 = vadd.f32 %v4152_v13, %v4047_v43  ;;  %v4158_v36 = vadd.f32 %v4154_v50, %v4118_v10  ;;  %v4646_v50 = vld [vmem:[#allocation2 + $0x20] sm:$0x3] }
 0x9db   :  { %v4163_v63 = vcombine.low %v4155_v41, %v4156_v8  ;;  %v4164_v33 = vcombine.low %v4157_v55, %v4158_v36  ;;  %v4648_v8 = vld [vmem:[#allocation2 + $0x30] sm:$0x3] }
 0x9dd   :  { %4167 = vst [vmem:[#allocation5] sm:$0xcc] %v4163_v63  ;;  %4168 = vst [vmem:[#allocation5 + $0x8] sm:$0xcc] %v4164_v33 }
 0x9e4   :  { %v4169_v26 = vld [vmem:[#allocation5] sm:$0xff]  ;;  %v4170_v58 = vld [vmem:[#allocation5 + $0x8] sm:$0xff] }
 0x9e5   :  { %v11249_v53 = vmul.f32 -1.442695, %v4169_v26  ;;  %v11250_v3 = vmul.f32 -1.442695, %v4170_v58  ;;  %v4184_v39 = vrot.slane %v4170_v58, 4 }
 0x9e6   :  { %v4649_v58 = vld [vmem:[#allocation2 + $0x38] sm:$0x3] }
 0x9e7   :  { %14483 = vpow2.f32 %v11249_v53  ;;  %v4647_v53 = vld [vmem:[#allocation2 + $0x28] sm:$0x3] }
 0x9e8   :  { %14485 = vpow2.f32 %v11250_v3 }
 0x9f1   :  { %v14484_v21 = vpop.eup %14483 }
 0x9f2   :  { %v4177_v32 = vadd.f32 1.0, %v14484_v21  ;;  %v14486_v54 = vpop.eup %14485 }
 0x9f3   :  { %v4178_v12 = vadd.f32 1.0, %v14486_v54 }
 0x9f4   :  { %14487 = vrcp.f32 %v4177_v32 }
 0x9f5   :  { %14489 = vtanh.f32 %v4184_v39 }
 0x9f6   :  { %14491 = vrcp.f32 %v4178_v12 }
 0x9fe   :  { %v14488_v14 = vpop.eup %14487 }
 0x9ff   :  { %v4188_v48 = vrot.slane %v14488_v14, 4  ;;  %v14490_v35 = vpop.eup %14489 }
 0xa00   :  { %v4191_v46 = vmul.f32 %v14490_v35, %v14488_v14  ;;  %v14492_v9 = vpop.eup %14491 }
 0xa01   :  { %v4190_v24 = vmul.f32 %v4188_v48, %v15939_v27  ;;  %v17768_v27 = vld [vmem:[#allocation27_spill] sm:$0xff] }
 0xa03   :  { %v16078_v1 = vadd.f32 %v4191_v46, %v4190_v24 }
 0xa05   :  { %14493 = vtanh.f32 %v16078_v1 }
 0xa0f   :  { %v14494_v37 = vpop.eup %14493 }
 0xa10   :  { %v4194_v31 = vmul.f32 %v14494_v37, %v14492_v9 }
 0xa12   :  { %v4196_v40 = vcombine.low %v4194_v31, %v4194_v31  ;;  %4199 = vst [vmem:[#allocation3 + $0x8] sm:$0xc] %v4194_v31  ;;  %4393 = vmatmul.mubr.f32.vlgmr.msra.gmra.mrb[36].mxu1 %v4194_v31  ;;  %4464 = vmatmul.mubr.f32.vlgmr.msra.gmra.mrb[38].mxu0 %v4194_v31 }
 0xa13   :  { %12427 = vmatpush1.bf16.msra.mxu1 %v15942_v56  ;;  %12459 = vmatpush1.bf16.msra.mxu0 %v15944_v5  ;;  %v17771_v56 = vld [vmem:[#allocation30_spill] sm:$0xff]  ;;  %v17772_v5 = vld [vmem:[#allocation31_spill] sm:$0xff] }
 0xa14   :  { %4198 = vst [vmem:[#allocation3 + $0x10] sm:$0x30] %v4196_v40  ;;  %12429 = vmatprep.subr.bf16.mxu1 %v15948_v57  ;;  %12461 = vmatprep.subr.bf16.mxu0 %v15950_v34  ;;  %v17774_v57 = vld [vmem:[#allocation33_spill] sm:$0xff]  ;;  %v17775_v34 = vld [vmem:[#allocation34_spill] sm:$0xff] }
 0xa15   :  { %4534 = vmatprep.mubr.f32.mxu1 %v17686_v19  ;;  %4605 = vmatprep.mubr.f32.mxu0 %v17686_v19 }
 0xa17   :  { %12431 = vmatpush1.bf16.msra.mxu1 %v15957_v7  ;;  %12463 = vmatpush1.bf16.msra.mxu0 %v17768_v27  ;;  %v17778_v7 = vld [vmem:[#allocation42_spill] sm:$0xff] }
 0xa18   :  { %12433 = vmatprep.subr.bf16.mxu1 %v17769_v28  ;;  %12465 = vmatprep.subr.bf16.mxu0 %v17770_v15 }
 0xa1b   :  { %12435 = vmatpush1.bf16.msra.mxu1 %v17771_v56  ;;  %12467 = vmatpush1.bf16.msra.mxu0 %v17772_v5 }
 0xa1c   :  { %12437 = vmatprep.subr.bf16.mxu1 %v17773_v4  ;;  %12469 = vmatprep.subr.bf16.mxu0 %v17774_v57 }
 0xa1f   :  { %12439 = vmatpush1.bf16.msra.mxu1 %v17775_v34  ;;  %12471 = vmatpush1.bf16.msra.mxu0 %v17776_v47 }
 0xa20   :  { %12441 = vmatprep.subr.bf16.mxu1 %v17777_v60  ;;  %12473 = vmatprep.subr.bf16.mxu0 %v17778_v7 }
 0xa23   :  { %12443 = vmatpush1.bf16.msra.mxu1 %v17779_v38  ;;  %12475 = vmatpush1.bf16.msra.mxu0 %v17780_v49 }
 0xa24   :  { %12445 = vmatprep.subr.bf16.mxu1 %v16001_v42  ;;  %12477 = vmatprep.subr.bf16.mxu0 %v16003_v25 }
 0xa27   :  { %12447 = vmatpush1.bf16.msra.mxu1 %v16007_v44  ;;  %12479 = vmatpush1.bf16.msra.mxu0 %v16009_v59 }
 0xa28   :  { %12449 = vmatprep.subr.bf16.mxu1 %v16013_v2  ;;  %12481 = vmatprep.subr.bf16.mxu0 %v16015_v52 }
 0xa2b   :  { %12451 = vmatpush1.bf16.msra.mxu1 %v16019_v61  ;;  %12483 = vmatpush1.bf16.msra.mxu0 %v16021_v17  ;;  %v4614_v61 = vld [vmem:[#allocation2 + $0x50] sm:$0xc0] }
 0xa2c   :  { %12453 = vmatprep.subr.bf16.mxu1 %v16025_v11  ;;  %12485 = vmatprep.subr.bf16.mxu0 %v16027_v23  ;;  %v4615_v23 = vld [vmem:[#allocation2 + $0x58] sm:$0xc0] }
 0xa2f   :  { %12455 = vmatpush1.bf16.msra.mxu1 %v16031_v29  ;;  %12487 = vmatpush1.bf16.msra.mxu0 %v16033_v0 }
 0xa32   :  { %4535 = vmatmul.mubr.f32.vlgmr.msra.gmra.mrb[38].mxu1 %v4194_v31  ;;  %4606 = vmatmul.mubr.f32.vlgmr.msra.gmra.mrb[40].mxu0 %v4194_v31 }
 0xae5   :  { %v4394_v42 = vpop.f32.mrb[36].mxu1  ;;  %v4465_v25 = vpop.f32.mrb[38].mxu0 }
 0xae6   :  { %v4620_v44 = vrot.slane %v4394_v42, 2  ;;  %v4622_v59 = vrot.slane %v4465_v25, 2  ;;  %v4396_v2 = vpop.f32.mrb[37].mxu1  ;;  %v4467_v52 = vpop.f32.mrb[39].mxu0 }
 0xae7   :  { %v4621_v18 = vrot.slane %v4396_v2, 2  ;;  %v4623_v17 = vrot.slane %v4467_v52, 2 }
 0xae8   :  { %v4628_v45 = vadd.f32 %v4620_v44, %v4612_v20  ;;  %v4630_v11 = vadd.f32 %v4622_v59, %v4614_v61 }
 0xae9   :  { %v4629_v16 = vadd.f32 %v4621_v18, %v4613_v62  ;;  %v4631_v29 = vadd.f32 %v4623_v17, %v4615_v23 }
 0xaeb   :  { %v4636_v51 = vcombine.high %v4628_v45, %v4629_v16  ;;  %v4637_v0 = vcombine.high %v4630_v11, %v4631_v29 }
 0xaed   :  { %v11251_v6 = vrot.slane %v4636_v51, 10  ;;  %v11252_v22 = vrot.slane %v4637_v0, 10 }
 0xaef   :  { %4644 = vst [vmem:[#allocation5] sm:$0x33] %v11251_v6  ;;  %4645 = vst [vmem:[#allocation5 + $0x8] sm:$0x33] %v11252_v22 }
 0xb05   :  { %v4536_v30 = vpop.f32.mrb[38].mxu1  ;;  %v4607_v41 = vpop.f32.mrb[40].mxu0 }
 0xb06   :  { %v4654_v55 = vrot.slane %v4536_v30, 2  ;;  %v4656_v43 = vrot.slane %v4607_v41, 2  ;;  %v4538_v13 = vpop.f32.mrb[39].mxu1  ;;  %v4609_v10 = vpop.f32.mrb[41].mxu0 }
 0xb07   :  { %v4655_v36 = vrot.slane %v4538_v13, 2  ;;  %v4657_v63 = vrot.slane %v4609_v10, 2 }
 0xb08   :  { %v4662_v33 = vadd.f32 %v4654_v55, %v4646_v50  ;;  %v4664_v26 = vadd.f32 %v4656_v43, %v4648_v8 }
 0xb09   :  { %v4663_v3 = vadd.f32 %v4655_v36, %v4647_v53  ;;  %v4665_v21 = vadd.f32 %v4657_v63, %v4649_v58 }
 0xb0b   :  { %v4670_v32 = vcombine.low %v4662_v33, %v4663_v3  ;;  %v4671_v39 = vcombine.low %v4664_v26, %v4665_v21 }
 0xb0d   :  { %v4672_v54 = vrot.slane %v4670_v32, 6  ;;  %v4673_v14 = vrot.slane %v4671_v39, 6 }
 0xb0f   :  { %4676 = vst [vmem:[#allocation5] sm:$0xcc] %v4672_v54  ;;  %4677 = vst [vmem:[#allocation5 + $0x8] sm:$0xcc] %v4673_v14 }
 0xb16   :  { %v4678_v48 = vld [vmem:[#allocation5] sm:$0xff]  ;;  %v4679_v12 = vld [vmem:[#allocation5 + $0x8] sm:$0xff] }
 0xb17   :  { %v11253_v35 = vmul.f32 -1.442695, %v4678_v48  ;;  %v11254_v24 = vmul.f32 -1.442695, %v4679_v12  ;;  %v4693_v37 = vrot.slane %v4679_v12, 4 }
 0xb19   :  { %14495 = vpow2.f32 %v11253_v35 }
 0xb1a   :  { %14497 = vpow2.f32 %v11254_v24 }
 0xb23   :  { %v14496_v46 = vpop.eup %14495 }
 0xb24   :  { %v4686_v9 = vadd.f32 1.0, %v14496_v46  ;;  %v14498_v31 = vpop.eup %14497 }
 0xb25   :  { %v4687_v15 = vadd.f32 1.0, %v14498_v31 }
 0xb26   :  { %14499 = vrcp.f32 %v4686_v9 }
 0xb27   :  { %14501 = vtanh.f32 %v4693_v37 }
 0xb28   :  { %14503 = vrcp.f32 %v4687_v15 }
 0xb30   :  { %v14500_v40 = vpop.eup %14499 }
 0xb31   :  { %v4697_v27 = vrot.slane %v14500_v40, 4  ;;  %v14502_v28 = vpop.eup %14501 }
 0xb32   :  { %v4700_v5 = vmul.f32 %v14502_v28, %v14500_v40  ;;  %v14504_v57 = vpop.eup %14503 }
 0xb33   :  { %v4699_v56 = vmul.f32 %v4697_v27, %v16078_v1 }
 0xb35   :  { %v4701_v4 = vadd.f32 %v4700_v5, %v4699_v56 }
 0xb37   :  { %14505 = vtanh.f32 %v4701_v4 }
 0xb41   :  { %v14506_v34 = vpop.eup %14505 }
 0xb42   :  { %v4703_v47 = vmul.f32 %v14506_v34, %v14504_v57 }
 0xb44   :  { %v4705_v60 = vrot.slane %v4703_v47, 2 }
 0xb46   :  { %4707 = vst [vmem:[#allocation3 + $0x8] ss:$12 sps:$4 sm:$0xc3] %v4705_v60  }
 0xb47   :  { %14671 = dma.done.wait [#allocation9], 16384 }
 0xb48   :  { %14672 = vsyncadd [#allocation9], 4294950912 }
 0xb49   :  { %14673 = dma.done.wait [#allocation9 + $0x1], 16384 }
 0xb4a   :  { %14674 = vsyncadd [#allocation9 + $0x1], 4294950912  ;;  %v4722_v7 = vld [vmem:[#allocation6 + $0x8] sm:$0xff]  ;;  %v4724_v38 = vld [vmem:[#allocation6 + $0x18] sm:$0xff] }
 0xb4b   :  { %v4721_v49 = vld [vmem:[#allocation6] sm:$0xff]  ;;  %12489 = vmatprep.subr.bf16.mxu1 %v4722_v7  ;;  %12553 = vmatprep.subr.bf16.mxu0 %v4724_v38  ;;  %v4723_v42 = vld [vmem:[#allocation6 + $0x10] sm:$0xff]  ;;  %v4730_v1 = vld [vmem:[#allocation6 + $0x48] sm:$0xff] }
 0xb4c   :  { %v4732_v25 = vld [vmem:[#allocation6 + $0x58] sm:$0xff]  ;;  %12491 = vmatpush1.bf16.msra.mxu1 %v4721_v49  ;;  %12555 = vmatpush1.bf16.msra.mxu0 %v4723_v42  ;;  %v4729_v44 = vld [vmem:[#allocation6 + $0x40] sm:$0xff]  ;;  %v4731_v59 = vld [vmem:[#allocation6 + $0x50] sm:$0xff] }
 0xb4d   :  { %12493 = vmatprep.subr.bf16.mxu1 %v4730_v1  ;;  %12557 = vmatprep.subr.bf16.mxu0 %v4732_v25  ;;  %v4738_v2 = vld [vmem:[#allocation6 + $0x88] sm:$0xff]  ;;  %v4740_v52 = vld [vmem:[#allocation6 + $0x98] sm:$0xff]  ;;  %v4737_v20 = vld [vmem:[#allocation6 + $0x80] sm:$0xff] }
 0xb4e   :  { %v4739_v61 = vld [vmem:[#allocation6 + $0x90] sm:$0xff]  ;;  %v4746_v18 = vld [vmem:[#allocation6 + $0xc8] sm:$0xff]  ;;  %v4748_v17 = vld [vmem:[#allocation6 + $0xd8] sm:$0xff] }
 0xb4f   :  { %v4745_v45 = vld [vmem:[#allocation6 + $0xc0] sm:$0xff]  ;;  %v4747_v11 = vld [vmem:[#allocation6 + $0xd0] sm:$0xff]  ;;  %v4754_v62 = vld [vmem:[#allocation6 + $0x108] sm:$0xff] }
 0xb50   :  { %12495 = vmatpush1.bf16.msra.mxu1 %v4729_v44  ;;  %12559 = vmatpush1.bf16.msra.mxu0 %v4731_v59  ;;  %v4756_v23 = vld [vmem:[#allocation6 + $0x118] sm:$0xff]  ;;  %v4753_v16 = vld [vmem:[#allocation6 + $0x100] sm:$0xff]  ;;  %v4755_v29 = vld [vmem:[#allocation6 + $0x110] sm:$0xff] }
 0xb51   :  { %12497 = vmatprep.subr.bf16.mxu1 %v4738_v2  ;;  %12561 = vmatprep.subr.bf16.mxu0 %v4740_v52  ;;  %v4762_v51 = vld [vmem:[#allocation6 + $0x148] sm:$0xff]  ;;  %v4764_v0 = vld [vmem:[#allocation6 + $0x158] sm:$0xff]  ;;  %v4761_v6 = vld [vmem:[#allocation6 + $0x140] sm:$0xff] }
 0xb52   :  { %v4763_v22 = vld [vmem:[#allocation6 + $0x150] sm:$0xff]  ;;  %v4770_v30 = vld [vmem:[#allocation6 + $0x188] sm:$0xff]  ;;  %v4772_v41 = vld [vmem:[#allocation6 + $0x198] sm:$0xff] }
 0xb53   :  { %v16114_v55 = vld [vmem:[#allocation3 + $0x8] sm:$0xff]  ;;  %v4769_v43 = vld [vmem:[#allocation6 + $0x180] sm:$0xff]  ;;  %v4771_v13 = vld [vmem:[#allocation6 + $0x190] sm:$0xff] }
 0xb54   :  { %12499 = vmatpush1.bf16.msra.mxu1 %v4737_v20  ;;  %12563 = vmatpush1.bf16.msra.mxu0 %v4739_v61  ;;  %v4778_v10 = vld [vmem:[#allocation6 + $0x1c8] sm:$0xff]  ;;  %v4780_v50 = vld [vmem:[#allocation6 + $0x1d8] sm:$0xff]  ;;  %v4777_v8 = vld [vmem:[#allocation6 + $0x1c0] sm:$0xff] }
 0xb55   :  { %12501 = vmatprep.subr.bf16.mxu1 %v4746_v18  ;;  %12565 = vmatprep.subr.bf16.mxu0 %v4748_v17  ;;  %v4779_v36 = vld [vmem:[#allocation6 + $0x1d0] sm:$0xff]  ;;  %v4786_v63 = vld [vmem:[#allocation6 + $0x208] sm:$0xff]  ;;  %v4788_v33 = vld [vmem:[#allocation6 + $0x218] sm:$0xff] }
 0xb56   :  { %5211 = vmatprep.mubr.f32.mxu1 %v16114_v55  ;;  %5288 = vmatprep.mubr.f32.mxu0 %v16114_v55  ;;  %v4785_v26 = vld [vmem:[#allocation6 + $0x200] sm:$0xff]  ;;  %v4787_v53 = vld [vmem:[#allocation6 + $0x210] sm:$0xff]  ;;  %v4794_v58 = vld [vmem:[#allocation6 + $0x248] sm:$0xff] }
 0xb57   :  { %v4796_v3 = vld [vmem:[#allocation6 + $0x258] sm:$0xff]  ;;  %v4793_v21 = vld [vmem:[#allocation6 + $0x240] sm:$0xff]  ;;  %v4795_v32 = vld [vmem:[#allocation6 + $0x250] sm:$0xff] }
 0xb58   :  { %12503 = vmatpush1.bf16.msra.mxu1 %v4745_v45  ;;  %12567 = vmatpush1.bf16.msra.mxu0 %v4747_v11  ;;  %v4802_v39 = vld [vmem:[#allocation6 + $0x288] sm:$0xff]  ;;  %v4804_v54 = vld [vmem:[#allocation6 + $0x298] sm:$0xff]  ;;  %v4801_v14 = vld [vmem:[#allocation6 + $0x280] sm:$0xff] }
 0xb59   :  { %12505 = vmatprep.subr.bf16.mxu1 %v4754_v62  ;;  %12569 = vmatprep.subr.bf16.mxu0 %v4756_v23  ;;  %v4803_v48 = vld [vmem:[#allocation6 + $0x290] sm:$0xff]  ;;  %v4810_v35 = vld [vmem:[#allocation6 + $0x2c8] sm:$0xff]  ;;  %v4812_v12 = vld [vmem:[#allocation6 + $0x2d8] sm:$0xff] }
 0xb5a   :  { %v4809_v24 = vld [vmem:[#allocation6 + $0x2c0] sm:$0xff]  ;;  %v4811_v46 = vld [vmem:[#allocation6 + $0x2d0] sm:$0xff]  ;;  %v4818_v9 = vld [vmem:[#allocation6 + $0x308] sm:$0xff] }
 0xb5b   :  { %v4820_v37 = vld [vmem:[#allocation6 + $0x318] sm:$0xff]  ;;  %v4817_v31 = vld [vmem:[#allocation6 + $0x300] sm:$0xff]  ;;  %v4819_v40 = vld [vmem:[#allocation6 + $0x310] sm:$0xff] }
 0xb5c   :  { %12507 = vmatpush1.bf16.msra.mxu1 %v4753_v16  ;;  %12571 = vmatpush1.bf16.msra.mxu0 %v4755_v29  ;;  %v4826_v27 = vld [vmem:[#allocation6 + $0x348] sm:$0xff]  ;;  %v4828_v28 = vld [vmem:[#allocation6 + $0x358] sm:$0xff]  ;;  %v4825_v15 = vld [vmem:[#allocation6 + $0x340] sm:$0xff] }
 0xb5d   :  { %12509 = vmatprep.subr.bf16.mxu1 %v4762_v51  ;;  %12573 = vmatprep.subr.bf16.mxu0 %v4764_v0  ;;  %v4827_v56 = vld [vmem:[#allocation6 + $0x350] sm:$0xff]  ;;  %v4834_v5 = vld [vmem:[#allocation6 + $0x388] sm:$0xff]  ;;  %v4836_v4 = vld [vmem:[#allocation6 + $0x398] sm:$0xff] }
 0xb5e   :  { %v4833_v57 = vld [vmem:[#allocation6 + $0x380] sm:$0xff]  ;;  %v4835_v34 = vld [vmem:[#allocation6 + $0x390] sm:$0xff]  ;;  %v4842_v47 = vld [vmem:[#allocation6 + $0x3c8] sm:$0xff] }
 0xb5f   :  { %v4844_v60 = vld [vmem:[#allocation6 + $0x3d8] sm:$0xff]  ;;  %v4841_v7 = vld [vmem:[#allocation6 + $0x3c0] sm:$0xff]  ;;  %v4843_v38 = vld [vmem:[#allocation6 + $0x3d0] sm:$0xff] }
 0xb60   :  { %12511 = vmatpush1.bf16.msra.mxu1 %v4761_v6  ;;  %12575 = vmatpush1.bf16.msra.mxu0 %v4763_v22  ;;  %v4726_v49 = vld [vmem:[#allocation6 + $0x28] sm:$0xff]  ;;  %v4728_v42 = vld [vmem:[#allocation6 + $0x38] sm:$0xff]  ;;  %v16118_v1 = vld [vmem:[#allocation3] sm:$0xff] }
 0xb61   :  { %12513 = vmatprep.subr.bf16.mxu1 %v4770_v30  ;;  %12577 = vmatprep.subr.bf16.mxu0 %v4772_v41  ;;  %v4725_v25 = vld [vmem:[#allocation6 + $0x20] sm:$0xff]  ;;  %v4727_v44 = vld [vmem:[#allocation6 + $0x30] sm:$0xff]  ;;  %v4734_v59 = vld [vmem:[#allocation6 + $0x68] sm:$0xff] }
 0xb62   :  { %v4736_v2 = vld [vmem:[#allocation6 + $0x78] sm:$0xff]  ;;  %v16122_v52 = vld [vmem:[#allocation3 + $0x18] sm:$0xff]  ;;  %v16124_v20 = vld [vmem:[#allocation3 + $0x10] sm:$0xff] }
 0xb63   :  { %v4733_v61 = vld [vmem:[#allocation6 + $0x60] sm:$0xff]  ;;  %v4735_v18 = vld [vmem:[#allocation6 + $0x70] sm:$0xff]  ;;  %v4742_v17 = vld [vmem:[#allocation6 + $0xa8] sm:$0xff] }
 0xb64   :  { %12515 = vmatpush1.bf16.msra.mxu1 %v4769_v43  ;;  %12579 = vmatpush1.bf16.msra.mxu0 %v4771_v13  ;;  %v4744_v45 = vld [vmem:[#allocation6 + $0xb8] sm:$0xff]  ;;  %v4741_v11 = vld [vmem:[#allocation6 + $0xa0] sm:$0xff]  ;;  %v4743_v62 = vld [vmem:[#allocation6 + $0xb0] sm:$0xff] }
 0xb65   :  { %12517 = vmatprep.subr.bf16.mxu1 %v4778_v10  ;;  %12581 = vmatprep.subr.bf16.mxu0 %v4780_v50  ;;  %v4750_v23 = vld [vmem:[#allocation6 + $0xe8] sm:$0xff]  ;;  %v4752_v16 = vld [vmem:[#allocation6 + $0xf8] sm:$0xff]  ;;  %v4749_v29 = vld [vmem:[#allocation6 + $0xe0] sm:$0xff] }
 0xb66   :  { %v4751_v51 = vld [vmem:[#allocation6 + $0xf0] sm:$0xff]  ;;  %v4758_v0 = vld [vmem:[#allocation6 + $0x128] sm:$0xff]  ;;  %v4760_v6 = vld [vmem:[#allocation6 + $0x138] sm:$0xff] }
 0xb67   :  { %v4757_v22 = vld [vmem:[#allocation6 + $0x120] sm:$0xff]  ;;  %v4759_v30 = vld [vmem:[#allocation6 + $0x130] sm:$0xff]  ;;  %v4766_v41 = vld [vmem:[#allocation6 + $0x168] sm:$0xff] }
 0xb68   :  { %12519 = vmatpush1.bf16.msra.mxu1 %v4777_v8  ;;  %12583 = vmatpush1.bf16.msra.mxu0 %v4779_v36  ;;  %v4768_v43 = vld [vmem:[#allocation6 + $0x178] sm:$0xff]  ;;  %v4767_v13 = vld [vmem:[#allocation6 + $0x170] sm:$0xff]  ;;  %v4774_v10 = vld [vmem:[#allocation6 + $0x1a8] sm:$0xff] }
 0xb69   :  { %12521 = vmatprep.subr.bf16.mxu1 %v4786_v63  ;;  %12585 = vmatprep.subr.bf16.mxu0 %v4788_v33  ;;  %v4776_v50 = vld [vmem:[#allocation6 + $0x1b8] sm:$0xff]  ;;  %v4773_v8 = vld [vmem:[#allocation6 + $0x1a0] sm:$0xff]  ;;  %v4775_v36 = vld [vmem:[#allocation6 + $0x1b0] sm:$0xff] }
 0xb6a   :  { %v4782_v63 = vld [vmem:[#allocation6 + $0x1e8] sm:$0xff]  ;;  %v4784_v33 = vld [vmem:[#allocation6 + $0x1f8] sm:$0xff] }
 0xb6c   :  { %12523 = vmatpush1.bf16.msra.mxu1 %v4785_v26  ;;  %12587 = vmatpush1.bf16.msra.mxu0 %v4787_v53  ;;  %v4781_v26 = vld [vmem:[#allocation6 + $0x1e0] sm:$0xff]  ;;  %v4783_v53 = vld [vmem:[#allocation6 + $0x1f0] sm:$0xff] }
 0xb6d   :  { %12525 = vmatprep.subr.bf16.mxu1 %v4794_v58  ;;  %12589 = vmatprep.subr.bf16.mxu0 %v4796_v3  ;;  %v4790_v58 = vld [vmem:[#allocation6 + $0x228] sm:$0xff]  ;;  %v4792_v3 = vld [vmem:[#allocation6 + $0x238] sm:$0xff] }
 0xb70   :  { %12527 = vmatpush1.bf16.msra.mxu1 %v4793_v21  ;;  %12591 = vmatpush1.bf16.msra.mxu0 %v4795_v32  ;;  %v4789_v21 = vld [vmem:[#allocation6 + $0x220] sm:$0xff]  ;;  %v4791_v32 = vld [vmem:[#allocation6 + $0x230] sm:$0xff] }
 0xb71   :  { %12529 = vmatprep.subr.bf16.mxu1 %v4802_v39  ;;  %12593 = vmatprep.subr.bf16.mxu0 %v4804_v54  ;;  %v4798_v39 = vld [vmem:[#allocation6 + $0x268] sm:$0xff]  ;;  %v4800_v54 = vld [vmem:[#allocation6 + $0x278] sm:$0xff] }
 0xb74   :  { %12531 = vmatpush1.bf16.msra.mxu1 %v4801_v14  ;;  %12595 = vmatpush1.bf16.msra.mxu0 %v4803_v48  ;;  %v4797_v14 = vld [vmem:[#allocation6 + $0x260] sm:$0xff]  ;;  %v4799_v48 = vld [vmem:[#allocation6 + $0x270] sm:$0xff] }
 0xb75   :  { %12533 = vmatprep.subr.bf16.mxu1 %v4810_v35  ;;  %12597 = vmatprep.subr.bf16.mxu0 %v4812_v12  ;;  %v4806_v35 = vld [vmem:[#allocation6 + $0x2a8] sm:$0xff]  ;;  %v4808_v12 = vld [vmem:[#allocation6 + $0x2b8] sm:$0xff] }
 0xb78   :  { %12535 = vmatpush1.bf16.msra.mxu1 %v4809_v24  ;;  %12599 = vmatpush1.bf16.msra.mxu0 %v4811_v46  ;;  %v4805_v24 = vld [vmem:[#allocation6 + $0x2a0] sm:$0xff]  ;;  %v4807_v46 = vld [vmem:[#allocation6 + $0x2b0] sm:$0xff] }
 0xb79   :  { %12537 = vmatprep.subr.bf16.mxu1 %v4818_v9  ;;  %12601 = vmatprep.subr.bf16.mxu0 %v4820_v37  ;;  %v4814_v9 = vld [vmem:[#allocation6 + $0x2e8] sm:$0xff]  ;;  %v4816_v37 = vld [vmem:[#allocation6 + $0x2f8] sm:$0xff] }
 0xb7c   :  { %12539 = vmatpush1.bf16.msra.mxu1 %v4817_v31  ;;  %12603 = vmatpush1.bf16.msra.mxu0 %v4819_v40  ;;  %v4813_v31 = vld [vmem:[#allocation6 + $0x2e0] sm:$0xff]  ;;  %v4815_v40 = vld [vmem:[#allocation6 + $0x2f0] sm:$0xff] }
 0xb7d   :  { %12541 = vmatprep.subr.bf16.mxu1 %v4826_v27  ;;  %12605 = vmatprep.subr.bf16.mxu0 %v4828_v28  ;;  %v4822_v27 = vld [vmem:[#allocation6 + $0x328] sm:$0xff]  ;;  %v4824_v28 = vld [vmem:[#allocation6 + $0x338] sm:$0xff] }
 0xb80   :  { %12543 = vmatpush1.bf16.msra.mxu1 %v4825_v15  ;;  %12607 = vmatpush1.bf16.msra.mxu0 %v4827_v56  ;;  %v4821_v15 = vld [vmem:[#allocation6 + $0x320] sm:$0xff]  ;;  %v4823_v56 = vld [vmem:[#allocation6 + $0x330] sm:$0xff] }
 0xb81   :  { %12545 = vmatprep.subr.bf16.mxu1 %v4834_v5  ;;  %12609 = vmatprep.subr.bf16.mxu0 %v4836_v4  ;;  %v4830_v5 = vld [vmem:[#allocation6 + $0x368] sm:$0xff]  ;;  %v4832_v4 = vld [vmem:[#allocation6 + $0x378] sm:$0xff] }
 0xb84   :  { %12547 = vmatpush1.bf16.msra.mxu1 %v4833_v57  ;;  %12611 = vmatpush1.bf16.msra.mxu0 %v4835_v34  ;;  %v4829_v57 = vld [vmem:[#allocation6 + $0x360] sm:$0xff]  ;;  %v4831_v34 = vld [vmem:[#allocation6 + $0x370] sm:$0xff] }
 0xb85   :  { %12549 = vmatprep.subr.bf16.mxu1 %v4842_v47  ;;  %12613 = vmatprep.subr.bf16.mxu0 %v4844_v60  ;;  %v4838_v47 = vld [vmem:[#allocation6 + $0x3a8] sm:$0xff]  ;;  %v4840_v60 = vld [vmem:[#allocation6 + $0x3b8] sm:$0xff] }
 0xb88   :  { %12551 = vmatpush1.bf16.msra.mxu1 %v4841_v7  ;;  %12615 = vmatpush1.bf16.msra.mxu0 %v4843_v38  ;;  %v4837_v7 = vld [vmem:[#allocation6 + $0x3a0] sm:$0xff]  ;;  %v4839_v38 = vld [vmem:[#allocation6 + $0x3b0] sm:$0xff] }
 0xb89   :  { %12617 = vmatprep.subr.bf16.mxu1 %v4726_v49  ;;  %12681 = vmatprep.subr.bf16.mxu0 %v4728_v42  ;;  %v4846_v49 = vld [vmem:[#allocation6 + $0x3e8] sm:$0xff]  ;;  %v4848_v42 = vld [vmem:[#allocation6 + $0x3f8] sm:$0xff] }
 0xb8b   :  { %5212 = vmatmul.mubr.f32.vlgmr.msra.gmra.mrb[40].mxu1 %v16118_v1  ;;  %5289 = vmatmul.mubr.f32.vlgmr.msra.gmra.mrb[42].mxu0 %v16118_v1 }
 0xb8c   :  { %12619 = vmatpush1.bf16.msra.mxu1 %v4725_v25  ;;  %12683 = vmatpush1.bf16.msra.mxu0 %v4727_v44  ;;  %v5472_v25 = vld [vmem:[#allocation7 + $0x8] sm:$0xff] }
 0xb8d   :  { %12621 = vmatprep.subr.bf16.mxu1 %v4734_v59  ;;  %12685 = vmatprep.subr.bf16.mxu0 %v4736_v2  ;;  %v5480_v44 = vld [vmem:[#allocation7 + $0x48] sm:$0xff]  ;;  %v5474_v59 = vld [vmem:[#allocation7 + $0x18] sm:$0xff] }
 0xb8e   :  { %5217 = vmatprep.mubr.f32.mxu1 %v16122_v52  ;;  %5294 = vmatprep.mubr.f32.mxu0 %v16122_v52  ;;  %v5482_v2 = vld [vmem:[#allocation7 + $0x58] sm:$0xff] }
 0xb8f   :  { %5218 = vmatmul.mubr.f32.gmra.mrb[42].mxu1 %v16124_v20  ;;  %5295 = vmatmul.mubr.f32.gmra.mrb[44].mxu0 %v16124_v20 }
 0xb90   :  { %12623 = vmatpush1.bf16.msra.mxu1 %v4733_v61  ;;  %12687 = vmatpush1.bf16.msra.mxu0 %v4735_v18  ;;  %v4845_v61 = vld [vmem:[#allocation6 + $0x3e0] sm:$0xff]  ;;  %v4847_v18 = vld [vmem:[#allocation6 + $0x3f0] sm:$0xff] }
 0xb91   :  { %12625 = vmatprep.subr.bf16.mxu1 %v4742_v17  ;;  %12689 = vmatprep.subr.bf16.mxu0 %v4744_v45  ;;  %v5471_v17 = vld [vmem:[#allocation7] sm:$0xff] }
 0xb92   :  { %5365 = vmatprep.mubr.f32.mxu1 %v16114_v55  ;;  %5442 = vmatprep.mubr.f32.mxu0 %v16114_v55  ;;  %v4765_v55 = vld [vmem:[#allocation6 + $0x160] sm:$0xff] }
 0xb93   :  { %v5479_v45 = vld [vmem:[#allocation7 + $0x40] sm:$0xff] }
 0xb94   :  { %12627 = vmatpush1.bf16.msra.mxu1 %v4741_v11  ;;  %12691 = vmatpush1.bf16.msra.mxu0 %v4743_v62  ;;  %v16132_v11 = vpack.c.bf16 %v5480_v44, %v5472_v25  ;;  %v16134_v62 = vpack.c.bf16 %v5482_v2, %v5474_v59  ;;  %v5562_v25 = vld [vmem:[#allocation7 + $0x2d8] sm:$0xff]  ;;  %v5551_v2 = vld [vmem:[#allocation7 + $0x280] sm:$0xff] }
 0xb95   :  { %12629 = vmatprep.subr.bf16.mxu1 %v4750_v23  ;;  %12693 = vmatprep.subr.bf16.mxu0 %v4752_v16  ;;  %v5473_v23 = vld [vmem:[#allocation7 + $0x10] sm:$0xff] }
 0xb96   :  { %v5481_v16 = vld [vmem:[#allocation7 + $0x50] sm:$0xff] }
 0xb98   :  { %12631 = vmatpush1.bf16.msra.mxu1 %v4749_v29  ;;  %12695 = vmatpush1.bf16.msra.mxu0 %v4751_v51  ;;  %v5488_v29 = vld [vmem:[#allocation7 + $0x88] sm:$0xff] }
 0xb99   :  { %12633 = vmatprep.subr.bf16.mxu1 %v4758_v0  ;;  %12697 = vmatprep.subr.bf16.mxu0 %v4760_v6  ;;  %v5496_v51 = vld [vmem:[#allocation7 + $0xc8] sm:$0xff]  ;;  %v5490_v0 = vld [vmem:[#allocation7 + $0x98] sm:$0xff] }
 0xb9a   :  { %v5498_v6 = vld [vmem:[#allocation7 + $0xd8] sm:$0xff] }
 0xb9c   :  { %12635 = vmatpush1.bf16.msra.mxu1 %v4757_v22  ;;  %12699 = vmatpush1.bf16.msra.mxu0 %v4759_v30  ;;  %v16136_v22 = vpack.c.bf16 %v5479_v45, %v5471_v17  ;;  %v16138_v30 = vpack.c.bf16 %v5481_v16, %v5473_v23  ;;  %v5553_v45 = vld [vmem:[#allocation7 + $0x290] sm:$0xff]  ;;  %v5568_v16 = vld [vmem:[#allocation7 + $0x308] sm:$0xff] }
 0xb9d   :  { %12637 = vmatprep.subr.bf16.mxu1 %v4766_v41  ;;  %12701 = vmatprep.subr.bf16.mxu0 %v4768_v43  ;;  %v5487_v41 = vld [vmem:[#allocation7 + $0x80] sm:$0xff]  ;;  %v5561_v23 = vld [vmem:[#allocation7 + $0x2d0] sm:$0xff] }
 0xb9e   :  { %v5495_v43 = vld [vmem:[#allocation7 + $0xc0] sm:$0xff] }
 0xba0   :  { %12639 = vmatpush1.bf16.msra.mxu1 %v4765_v55  ;;  %12703 = vmatpush1.bf16.msra.mxu0 %v4767_v13  ;;  %v16142_v55 = vpack.c.bf16 %v5496_v51, %v5488_v29  ;;  %v16144_v13 = vpack.c.bf16 %v5498_v6, %v5490_v0  ;;  %v5576_v29 = vld [vmem:[#allocation7 + $0x348] sm:$0xff]  ;;  %v5570_v51 = vld [vmem:[#allocation7 + $0x318] sm:$0xff] }
 0xba1   :  { %12641 = vmatprep.subr.bf16.mxu1 %v4774_v10  ;;  %12705 = vmatprep.subr.bf16.mxu0 %v4776_v50  ;;  %v5489_v10 = vld [vmem:[#allocation7 + $0x90] sm:$0xff]  ;;  %v5578_v0 = vld [vmem:[#allocation7 + $0x358] sm:$0xff] }
 0xba2   :  { %v5497_v50 = vld [vmem:[#allocation7 + $0xd0] sm:$0xff] }
 0xba4   :  { %12643 = vmatpush1.bf16.msra.mxu1 %v4773_v8  ;;  %12707 = vmatpush1.bf16.msra.mxu0 %v4775_v36  ;;  %v5504_v8 = vld [vmem:[#allocation7 + $0x108] sm:$0xff] }
 0xba5   :  { %12645 = vmatprep.subr.bf16.mxu1 %v4782_v63  ;;  %12709 = vmatprep.subr.bf16.mxu0 %v4784_v33  ;;  %v5512_v36 = vld [vmem:[#allocation7 + $0x148] sm:$0xff]  ;;  %v5506_v63 = vld [vmem:[#allocation7 + $0x118] sm:$0xff] }
 0xba6   :  { %v5514_v33 = vld [vmem:[#allocation7 + $0x158] sm:$0xff] }
 0xba8   :  { %12647 = vmatpush1.bf16.msra.mxu1 %v4781_v26  ;;  %12711 = vmatpush1.bf16.msra.mxu0 %v4783_v53  ;;  %v16150_v26 = vpack.c.bf16 %v5495_v43, %v5487_v41  ;;  %v16152_v53 = vpack.c.bf16 %v5497_v50, %v5489_v10  ;;  %v16206_v41 = vpack.c.bf16 %v5561_v23, %v5553_v45  ;;  %v5567_v43 = vld [vmem:[#allocation7 + $0x300] sm:$0xff]  ;;  %v5502_v45 = vld [vmem:[#allocation7 + $0xf8] sm:$0xff] }
 0xba9   :  { %12649 = vmatprep.subr.bf16.mxu1 %v4790_v58  ;;  %12713 = vmatprep.subr.bf16.mxu0 %v4792_v3  ;;  %v5503_v58 = vld [vmem:[#allocation7 + $0x100] sm:$0xff]  ;;  %v16210_v50 = vpack.c.bf16 %v5576_v29, %v5568_v16 }
 0xbaa   :  { %v5511_v3 = vld [vmem:[#allocation7 + $0x140] sm:$0xff] }
 0xbab   :  { %v5575_v10 = vld [vmem:[#allocation7 + $0x340] sm:$0xff] }
 0xbac   :  { %12651 = vmatpush1.bf16.msra.mxu1 %v4789_v21  ;;  %12715 = vmatpush1.bf16.msra.mxu0 %v4791_v32  ;;  %v16156_v21 = vpack.c.bf16 %v5512_v36, %v5504_v8  ;;  %v16158_v32 = vpack.c.bf16 %v5514_v33, %v5506_v63  ;;  %v16212_v8 = vpack.c.bf16 %v5578_v0, %v5570_v51  ;;  %v5569_v36 = vld [vmem:[#allocation7 + $0x310] sm:$0xff]  ;;  %v5584_v33 = vld [vmem:[#allocation7 + $0x388] sm:$0xff]  ;;  %v5491_v29 = vld [vmem:[#allocation7 + $0xa0] sm:$0xff] }
 0xbad   :  { %12653 = vmatprep.subr.bf16.mxu1 %v4798_v39  ;;  %12717 = vmatprep.subr.bf16.mxu0 %v4800_v54  ;;  %v5505_v39 = vld [vmem:[#allocation7 + $0x110] sm:$0xff]  ;;  %v5520_v54 = vld [vmem:[#allocation7 + $0x188] sm:$0xff]  ;;  %v5499_v51 = vld [vmem:[#allocation7 + $0xe0] sm:$0xff] }
 0xbae   :  { %v5577_v63 = vld [vmem:[#allocation7 + $0x350] sm:$0xff] }
 0xbb0   :  { %12655 = vmatpush1.bf16.msra.mxu1 %v4797_v14  ;;  %12719 = vmatpush1.bf16.msra.mxu0 %v4799_v48  ;;  %v5528_v14 = vld [vmem:[#allocation7 + $0x1c8] sm:$0xff]  ;;  %v5522_v48 = vld [vmem:[#allocation7 + $0x198] sm:$0xff] }
 0xbb1   :  { %12657 = vmatprep.subr.bf16.mxu1 %v4806_v35  ;;  %12721 = vmatprep.subr.bf16.mxu0 %v4808_v12  ;;  %v5530_v35 = vld [vmem:[#allocation7 + $0x1d8] sm:$0xff]  ;;  %v16166_v12 = vpack.c.bf16 %v5511_v3, %v5503_v58  ;;  %v5592_v58 = vld [vmem:[#allocation7 + $0x3c8] sm:$0xff] }
 0xbb2   :  { %v5586_v3 = vld [vmem:[#allocation7 + $0x398] sm:$0xff] }
 0xbb4   :  { %12659 = vmatpush1.bf16.msra.mxu1 %v4805_v24  ;;  %12723 = vmatpush1.bf16.msra.mxu0 %v4807_v46  ;;  %v5519_v46 = vld [vmem:[#allocation7 + $0x180] sm:$0xff] }
 0xbb5   :  { %12661 = vmatprep.subr.bf16.mxu1 %v4814_v9  ;;  %12725 = vmatprep.subr.bf16.mxu0 %v4816_v37  ;;  %v5527_v9 = vld [vmem:[#allocation7 + $0x1c0] sm:$0xff]  ;;  %v16172_v37 = vpack.c.bf16 %v5528_v14, %v5520_v54  ;;  %v16218_v54 = vpack.c.bf16 %v5577_v63, %v5569_v36  ;;  %v5501_v36 = vld [vmem:[#allocation7 + $0xf0] sm:$0xff]  ;;  %v5508_v63 = vld [vmem:[#allocation7 + $0x128] sm:$0xff] }
 0xbb6   :  { %v5583_v14 = vld [vmem:[#allocation7 + $0x380] sm:$0xff] }
 0xbb8   :  { %12663 = vmatpush1.bf16.msra.mxu1 %v4813_v31  ;;  %12727 = vmatpush1.bf16.msra.mxu0 %v4815_v40  ;;  %v5521_v31 = vld [vmem:[#allocation7 + $0x190] sm:$0xff]  ;;  %v5536_v40 = vld [vmem:[#allocation7 + $0x208] sm:$0xff] }
 0xbb9   :  { %12665 = vmatprep.subr.bf16.mxu1 %v4822_v27  ;;  %12729 = vmatprep.subr.bf16.mxu0 %v4824_v28  ;;  %v5544_v27 = vld [vmem:[#allocation7 + $0x248] sm:$0xff]  ;;  %v5538_v28 = vld [vmem:[#allocation7 + $0x218] sm:$0xff] }
 0xbbc   :  { %12667 = vmatpush1.bf16.msra.mxu1 %v4821_v15  ;;  %12731 = vmatpush1.bf16.msra.mxu0 %v4823_v56  ;;  %v5546_v15 = vld [vmem:[#allocation7 + $0x258] sm:$0xff]  ;;  %v16180_v56 = vpack.c.bf16 %v5527_v9, %v5519_v46  ;;  %v5585_v9 = vld [vmem:[#allocation7 + $0x390] sm:$0xff] }
 0xbbd   :  { %12669 = vmatprep.subr.bf16.mxu1 %v4830_v5  ;;  %12733 = vmatprep.subr.bf16.mxu0 %v4832_v4  ;;  %v5535_v4 = vld [vmem:[#allocation7 + $0x200] sm:$0xff] }
 0xbc0   :  { %12671 = vmatpush1.bf16.msra.mxu1 %v4829_v57  ;;  %12735 = vmatpush1.bf16.msra.mxu0 %v4831_v34  ;;  %v5543_v57 = vld [vmem:[#allocation7 + $0x240] sm:$0xff]  ;;  %v16186_v34 = vpack.c.bf16 %v5544_v27, %v5536_v40  ;;  %v5484_v40 = vld [vmem:[#allocation7 + $0x68] sm:$0xff]  ;;  %v5478_v27 = vld [vmem:[#allocation7 + $0x38] sm:$0xff] }
 0xbc1   :  { %12673 = vmatprep.subr.bf16.mxu1 %v4838_v47  ;;  %12737 = vmatprep.subr.bf16.mxu0 %v4840_v60  ;;  %v16188_v47 = vpack.c.bf16 %v5546_v15, %v5538_v28  ;;  %v5537_v60 = vld [vmem:[#allocation7 + $0x210] sm:$0xff]  ;;  %v16192_v44 = vpack.c.bf16 %v5543_v57, %v5535_v4  ;;  %v5486_v28 = vld [vmem:[#allocation7 + $0x78] sm:$0xff]  ;;  %v5475_v57 = vld [vmem:[#allocation7 + $0x20] sm:$0xff] }
 0xbc4   :  { %12675 = vmatpush1.bf16.msra.mxu1 %v4837_v7  ;;  %12739 = vmatpush1.bf16.msra.mxu0 %v4839_v38  ;;  %v5545_v7 = vld [vmem:[#allocation7 + $0x250] sm:$0xff]  ;;  %v5552_v38 = vld [vmem:[#allocation7 + $0x288] sm:$0xff] }
 0xbc5   :  { %12677 = vmatprep.subr.bf16.mxu1 %v4846_v49  ;;  %12741 = vmatprep.subr.bf16.mxu0 %v4848_v42  ;;  %v5560_v49 = vld [vmem:[#allocation7 + $0x2c8] sm:$0xff]  ;;  %v5554_v42 = vld [vmem:[#allocation7 + $0x298] sm:$0xff]  ;;  %v16194_v59 = vpack.c.bf16 %v5545_v7, %v5537_v60  ;;  %v5483_v60 = vld [vmem:[#allocation7 + $0x60] sm:$0xff] }
 0xbc6   :  { %v16200_v17 = vpack.c.bf16 %v5562_v25, %v5554_v42  ;;  %v5485_v42 = vld [vmem:[#allocation7 + $0x70] sm:$0xff]  ;;  %v5492_v25 = vld [vmem:[#allocation7 + $0xa8] sm:$0xff]  ;;  %v16240_v23 = vpack.c.bf16 %v5483_v60, %v5475_v57  ;;  %v5526_v60 = vld [vmem:[#allocation7 + $0x1b8] sm:$0xff] }
 0xbc7   :  { %v5532_v57 = vld [vmem:[#allocation7 + $0x1e8] sm:$0xff] }
 0xbc8   :  { %12679 = vmatpush1.bf16.msra.mxu1 %v4845_v61  ;;  %12743 = vmatpush1.bf16.msra.mxu0 %v4847_v18  ;;  %v5559_v61 = vld [vmem:[#allocation7 + $0x2c0] sm:$0xff]  ;;  %v16198_v18 = vpack.c.bf16 %v5560_v49, %v5552_v38  ;;  %v16236_v38 = vpack.c.bf16 %v5486_v28, %v5478_v27  ;;  %v5477_v49 = vld [vmem:[#allocation7 + $0x30] sm:$0xff]  ;;  %v5524_v28 = vld [vmem:[#allocation7 + $0x1a8] sm:$0xff] }
 0xbc9   :  { %12745 = vmatprep.subr.bf16.mxu1 %v16132_v11  ;;  %12777 = vmatprep.subr.bf16.mxu0 %v16134_v62  ;;  %v16204_v6 = vpack.c.bf16 %v5559_v61, %v5551_v2  ;;  %v5500_v2 = vld [vmem:[#allocation7 + $0xe8] sm:$0xff]  ;;  %v5494_v61 = vld [vmem:[#allocation7 + $0xb8] sm:$0xff]  ;;  %v16242_v16 = vpack.c.bf16 %v5485_v42, %v5477_v49  ;;  %v5517_v27 = vld [vmem:[#allocation7 + $0x170] sm:$0xff] }
 0xbca   :  { %v16246_v0 = vpack.c.bf16 %v5500_v2, %v5492_v25  ;;  %v5534_v49 = vld [vmem:[#allocation7 + $0x1f8] sm:$0xff]  ;;  %v5523_v2 = vld [vmem:[#allocation7 + $0x1a0] sm:$0xff] }
 0xbcb   :  { %5366 = vmatmul.mubr.f32.vlgmr.msra.gmra.mrb[44].mxu1 %v16118_v1  ;;  %5443 = vmatmul.mubr.f32.vlgmr.msra.gmra.mrb[46].mxu0 %v16118_v1  ;;  %v5513_v1 = vld [vmem:[#allocation7 + $0x150] sm:$0xff] }
 0xbcc   :  { %12747 = vmatpush1.bf16.msra.mxu1 %v16136_v22  ;;  %12779 = vmatpush1.bf16.msra.mxu0 %v16138_v30  ;;  %v16168_v24 = vpack.c.bf16 %v5513_v1, %v5505_v39  ;;  %v5594_v39 = vld [vmem:[#allocation7 + $0x3d8] sm:$0xff]  ;;  %v16216_v1 = vpack.c.bf16 %v5575_v10, %v5567_v43  ;;  %v16248_v43 = vpack.c.bf16 %v5502_v45, %v5494_v61  ;;  %v5493_v10 = vld [vmem:[#allocation7 + $0xb0] sm:$0xff]  ;;  %v5531_v61 = vld [vmem:[#allocation7 + $0x1e0] sm:$0xff] }
 0xbcd   :  { %12749 = vmatprep.subr.bf16.mxu1 %v16142_v55  ;;  %12781 = vmatprep.subr.bf16.mxu0 %v16144_v13  ;;  %v16224_v46 = vpack.c.bf16 %v5594_v39, %v5586_v3  ;;  %v5518_v3 = vld [vmem:[#allocation7 + $0x178] sm:$0xff]  ;;  %v16254_v39 = vpack.c.bf16 %v5499_v51, %v5491_v29  ;;  %v16274_v45 = vpack.c.bf16 %v5532_v57, %v5524_v28  ;;  %v5525_v51 = vld [vmem:[#allocation7 + $0x1b0] sm:$0xff] }
 0xbce   :  { %5371 = vmatprep.mubr.f32.mxu1 %v16122_v52  ;;  %5448 = vmatprep.mubr.f32.mxu0 %v16122_v52  ;;  %v16174_v52 = vpack.c.bf16 %v5530_v35, %v5522_v48  ;;  %v5591_v48 = vld [vmem:[#allocation7 + $0x3c0] sm:$0xff]  ;;  %v16222_v35 = vpack.c.bf16 %v5592_v58, %v5584_v33  ;;  %v5516_v33 = vld [vmem:[#allocation7 + $0x168] sm:$0xff]  ;;  %v5510_v58 = vld [vmem:[#allocation7 + $0x138] sm:$0xff]  ;;  %v16276_v29 = vpack.c.bf16 %v5534_v49, %v5526_v60 }
 0xbcf   :  { %5372 = vmatmul.mubr.f32.gmra.mrb[46].mxu1 %v16124_v20  ;;  %5449 = vmatmul.mubr.f32.gmra.mrb[48].mxu0 %v16124_v20  ;;  %v5529_v20 = vld [vmem:[#allocation7 + $0x1d0] sm:$0xff]  ;;  %v16228_v15 = vpack.c.bf16 %v5591_v48, %v5583_v14  ;;  %v16256_v14 = vpack.c.bf16 %v5501_v36, %v5493_v10  ;;  %v5507_v48 = vld [vmem:[#allocation7 + $0x120] sm:$0xff]  ;;  %17784 = vst [vmem:[#allocation30_spill] sm:$0xff] %v16274_v45  ;;  %v5540_v36 = vld [vmem:[#allocation7 + $0x228] sm:$0xff] }
 0xbd0   :  { %12751 = vmatpush1.bf16.msra.mxu1 %v16150_v26  ;;  %12783 = vmatpush1.bf16.msra.mxu0 %v16152_v53  ;;  %v16182_v5 = vpack.c.bf16 %v5529_v20, %v5521_v31  ;;  %v5593_v31 = vld [vmem:[#allocation7 + $0x3d0] sm:$0xff]  ;;  %v5476_v20 = vld [vmem:[#allocation7 + $0x28] sm:$0xff]  ;;  %17785 = vst [vmem:[#allocation31_spill] sm:$0xff] %v16276_v29 }
 0xbd1   :  { %12753 = vmatprep.subr.bf16.mxu1 %v16156_v21  ;;  %12785 = vmatprep.subr.bf16.mxu0 %v16158_v32  ;;  %v16230_v4 = vpack.c.bf16 %v5593_v31, %v5585_v9  ;;  %v16234_v7 = vpack.c.bf16 %v5484_v40, %v5476_v20  ;;  %v5515_v9 = vld [vmem:[#allocation7 + $0x160] sm:$0xff]  ;;  %v16260_v31 = vpack.c.bf16 %v5516_v33, %v5508_v63  ;;  %v5509_v40 = vld [vmem:[#allocation7 + $0x130] sm:$0xff]  ;;  %v5548_v63 = vld [vmem:[#allocation7 + $0x268] sm:$0xff] }
 0xbd2   :  { %5663 = vmatprep.mubr.f32.mxu1 %v17686_v19  ;;  %5734 = vmatprep.mubr.f32.mxu0 %v17686_v19  ;;  %v16262_v20 = vpack.c.bf16 %v5518_v3, %v5510_v58  ;;  %v16268_v42 = vpack.c.bf16 %v5515_v9, %v5507_v48  ;;  %v16270_v25 = vpack.c.bf16 %v5517_v27, %v5509_v40  ;;  %v5533_v10 = vld [vmem:[#allocation7 + $0x1f0] sm:$0xff]  ;;  %v5542_v33 = vld [vmem:[#allocation7 + $0x238] sm:$0xff]  ;;  %v5539_v9 = vld [vmem:[#allocation7 + $0x220] sm:$0xff] }
 0xbd3   :  { %v5550_v58 = vld [vmem:[#allocation7 + $0x278] sm:$0xff]  ;;  %v16280_v3 = vpack.c.bf16 %v5531_v61, %v5523_v2  ;;  %v16282_v48 = vpack.c.bf16 %v5533_v10, %v5525_v51  ;;  %v5547_v40 = vld [vmem:[#allocation7 + $0x260] sm:$0xff]  ;;  %v16286_v27 = vpack.c.bf16 %v5548_v63, %v5540_v36  ;;  %v5541_v57 = vld [vmem:[#allocation7 + $0x230] sm:$0xff] }
 0xbd4   :  { %12755 = vmatpush1.bf16.msra.mxu1 %v16166_v12  ;;  %12787 = vmatpush1.bf16.msra.mxu0 %v16168_v24  ;;  %17781 = vst [vmem:[#allocation27_spill] sm:$0xff] %v16262_v20  ;;  %17782 = vst [vmem:[#allocation28_spill] sm:$0xff] %v16268_v42  ;;  %v16288_v28 = vpack.c.bf16 %v5550_v58, %v5542_v33  ;;  %v5549_v60 = vld [vmem:[#allocation7 + $0x270] sm:$0xff]  ;;  %v5556_v49 = vld [vmem:[#allocation7 + $0x2a8] sm:$0xff]  ;;  %v16292_v2 = vpack.c.bf16 %v5547_v40, %v5539_v9 }
 0xbd5   :  { %12757 = vmatprep.subr.bf16.mxu1 %v16172_v37  ;;  %12789 = vmatprep.subr.bf16.mxu0 %v16174_v52  ;;  %17783 = vst [vmem:[#allocation29_spill] sm:$0xff] %v16270_v25  ;;  %17786 = vst [vmem:[#allocation32_spill] sm:$0xff] %v16280_v3  ;;  %v16294_v61 = vpack.c.bf16 %v5549_v60, %v5541_v57  ;;  %v5555_v51 = vld [vmem:[#allocation7 + $0x2a0] sm:$0xff]  ;;  %v5557_v33 = vld [vmem:[#allocation7 + $0x2b0] sm:$0xff] }
 0xbd6   :  { %17787 = vst [vmem:[#allocation33_spill] sm:$0xff] %v16282_v48  ;;  %17788 = vst [vmem:[#allocation34_spill] sm:$0xff] %v16286_v27  ;;  %v5563_v10 = vld [vmem:[#allocation7 + $0x2e0] sm:$0xff]  ;;  %v5565_v58 = vld [vmem:[#allocation7 + $0x2f0] sm:$0xff] }
 0xbd7   :  { %17789 = vst [vmem:[#allocation35_spill] sm:$0xff] %v16288_v28  ;;  %17790 = vst [vmem:[#allocation36_spill] sm:$0xff] %v16292_v2  ;;  %v16304_v9 = vpack.c.bf16 %v5563_v10, %v5555_v51  ;;  %v16306_v40 = vpack.c.bf16 %v5565_v58, %v5557_v33  ;;  %v5571_v57 = vld [vmem:[#allocation7 + $0x320] sm:$0xff]  ;;  %v5597_v58 = vld [vmem:[#allocation7 + $0x3f0] sm:$0xff] }
 0xbd8   :  { %12759 = vmatpush1.bf16.msra.mxu1 %v16180_v56  ;;  %12791 = vmatpush1.bf16.msra.mxu0 %v16182_v5  ;;  %17791 = vst [vmem:[#allocation42_spill] sm:$0xff] %v16294_v61  ;;  %v5579_v60 = vld [vmem:[#allocation7 + $0x360] sm:$0xff] }
 0xbd9   :  { %12761 = vmatprep.subr.bf16.mxu1 %v16186_v34  ;;  %12793 = vmatprep.subr.bf16.mxu0 %v16188_v47  ;;  %v16316_v51 = vpack.c.bf16 %v5579_v60, %v5571_v57  ;;  %v5587_v33 = vld [vmem:[#allocation7 + $0x3a0] sm:$0xff] }
 0xbdc   :  { %12763 = vmatpush1.bf16.msra.mxu1 %v16192_v44  ;;  %12795 = vmatpush1.bf16.msra.mxu0 %v16194_v59 }
 0xbdd   :  { %12765 = vmatprep.subr.bf16.mxu1 %v16198_v18  ;;  %12797 = vmatprep.subr.bf16.mxu0 %v16200_v17 }
 0xbe0   :  { %12767 = vmatpush1.bf16.msra.mxu1 %v16204_v6  ;;  %12799 = vmatpush1.bf16.msra.mxu0 %v16206_v41 }
 0xbe1   :  { %12769 = vmatprep.subr.bf16.mxu1 %v16210_v50  ;;  %12801 = vmatprep.subr.bf16.mxu0 %v16212_v8 }
 0xbe4   :  { %12771 = vmatpush1.bf16.msra.mxu1 %v16216_v1  ;;  %12803 = vmatpush1.bf16.msra.mxu0 %v16218_v54 }
 0xbe5   :  { %12773 = vmatprep.subr.bf16.mxu1 %v16222_v35  ;;  %12805 = vmatprep.subr.bf16.mxu0 %v16224_v46 }
 0xbe8   :  { %12775 = vmatpush1.bf16.msra.mxu1 %v16228_v15  ;;  %12807 = vmatpush1.bf16.msra.mxu0 %v16230_v4 }
 0xbe9   :  { %12809 = vmatprep.subr.bf16.mxu1 %v16234_v7  ;;  %12841 = vmatprep.subr.bf16.mxu0 %v16236_v38 }
 0xbeb   :  { %5664 = vmatmul.mubr.f32.vlgmr.msra.gmra.mrb[48].mxu1 %v17686_v19  ;;  %5735 = vmatmul.mubr.f32.vlgmr.msra.gmra.mrb[50].mxu0 %v17686_v19 }
 0xbec   :  { %12811 = vmatpush1.bf16.msra.mxu1 %v16240_v23  ;;  %12843 = vmatpush1.bf16.msra.mxu0 %v16242_v16 }
 0xbed   :  { %12813 = vmatprep.subr.bf16.mxu1 %v16246_v0  ;;  %12845 = vmatprep.subr.bf16.mxu0 %v16248_v43 }
 0xbee   :  { %5805 = vmatprep.mubr.f32.mxu1 %v17686_v19  ;;  %5876 = vmatprep.mubr.f32.mxu0 %v17686_v19 }
 0xbf0   :  { %12815 = vmatpush1.bf16.msra.mxu1 %v16254_v39  ;;  %12847 = vmatpush1.bf16.msra.mxu0 %v16256_v14 }
 0xbf1   :  { %12817 = vmatprep.subr.bf16.mxu1 %v16260_v31  ;;  %12849 = vmatprep.subr.bf16.mxu0 %v16262_v20  ;;  %v5558_v20 = vld [vmem:[#allocation7 + $0x2b8] sm:$0xff] }
 0xbf4   :  { %12819 = vmatpush1.bf16.msra.mxu1 %v16268_v42  ;;  %12851 = vmatpush1.bf16.msra.mxu0 %v16270_v25  ;;  %v5564_v42 = vld [vmem:[#allocation7 + $0x2e8] sm:$0xff]  ;;  %v5566_v25 = vld [vmem:[#allocation7 + $0x2f8] sm:$0xff] }
 0xbf5   :  { %12821 = vmatprep.subr.bf16.mxu1 %v16274_v45  ;;  %12853 = vmatprep.subr.bf16.mxu0 %v16276_v29  ;;  %v16298_v36 = vpack.c.bf16 %v5564_v42, %v5556_v49  ;;  %v16300_v63 = vpack.c.bf16 %v5566_v25, %v5558_v20  ;;  %v5572_v29 = vld [vmem:[#allocation7 + $0x328] sm:$0xff]  ;;  %v5574_v45 = vld [vmem:[#allocation7 + $0x338] sm:$0xff]  ;;  %v5573_v25 = vld [vmem:[#allocation7 + $0x330] sm:$0xff] }
 0xbf6   :  { %v5581_v49 = vld [vmem:[#allocation7 + $0x370] sm:$0xff] }
 0xbf7   :  { %v16318_v10 = vpack.c.bf16 %v5581_v49, %v5573_v25 }
 0xbf8   :  { %12823 = vmatpush1.bf16.msra.mxu1 %v16280_v3  ;;  %12855 = vmatpush1.bf16.msra.mxu0 %v16282_v48  ;;  %v5580_v3 = vld [vmem:[#allocation7 + $0x368] sm:$0xff]  ;;  %v5582_v48 = vld [vmem:[#allocation7 + $0x378] sm:$0xff] }
 0xbf9   :  { %12825 = vmatprep.subr.bf16.mxu1 %v16286_v27  ;;  %12857 = vmatprep.subr.bf16.mxu0 %v16288_v28  ;;  %v16310_v20 = vpack.c.bf16 %v5580_v3, %v5572_v29  ;;  %v16312_v42 = vpack.c.bf16 %v5582_v48, %v5574_v45  ;;  %v5588_v28 = vld [vmem:[#allocation7 + $0x3a8] sm:$0xff]  ;;  %v5590_v27 = vld [vmem:[#allocation7 + $0x3b8] sm:$0xff]  ;;  %v5595_v3 = vld [vmem:[#allocation7 + $0x3e0] sm:$0xff] }
 0xbfa   :  { %v5589_v48 = vld [vmem:[#allocation7 + $0x3b0] sm:$0xff]  ;;  %v16328_v57 = vpack.c.bf16 %v5595_v3, %v5587_v33 }
 0xbfb   :  { %v16330_v60 = vpack.c.bf16 %v5597_v58, %v5589_v48 }
 0xbfc   :  { %12827 = vmatpush1.bf16.msra.mxu1 %v16292_v2  ;;  %12859 = vmatpush1.bf16.msra.mxu0 %v16294_v61  ;;  %v5596_v2 = vld [vmem:[#allocation7 + $0x3e8] sm:$0xff]  ;;  %v5598_v61 = vld [vmem:[#allocation7 + $0x3f8] sm:$0xff] }
 0xbfd   :  { %12829 = vmatprep.subr.bf16.mxu1 %v16298_v36  ;;  %12861 = vmatprep.subr.bf16.mxu0 %v16300_v63  ;;  %v16322_v45 = vpack.c.bf16 %v5596_v2, %v5588_v28  ;;  %v16324_v29 = vpack.c.bf16 %v5598_v61, %v5590_v27 }
 0xc00   :  { %12831 = vmatpush1.bf16.msra.mxu1 %v16304_v9  ;;  %12863 = vmatpush1.bf16.msra.mxu0 %v16306_v40 }
 0xc01   :  { %12833 = vmatprep.subr.bf16.mxu1 %v16310_v20  ;;  %12865 = vmatprep.subr.bf16.mxu0 %v16312_v42 }
 0xc04   :  { %12835 = vmatpush1.bf16.msra.mxu1 %v16316_v51  ;;  %12867 = vmatpush1.bf16.msra.mxu0 %v16318_v10 }
 0xc05   :  { %12837 = vmatprep.subr.bf16.mxu1 %v16322_v45  ;;  %12869 = vmatprep.subr.bf16.mxu0 %v16324_v29 }
 0xc08   :  { %12839 = vmatpush1.bf16.msra.mxu1 %v16328_v57  ;;  %12871 = vmatpush1.bf16.msra.mxu0 %v16330_v60 }
 0xc09   :  { %12873 = vmatprep.subr.bf16.mxu1 %v16132_v11  ;;  %12905 = vmatprep.subr.bf16.mxu0 %v16134_v62  ;;  %v5105_v11 = vld [vmem:[%s17553_s7] sm:$0xff]  ;;  %v17792_v62 = vld [vmem:[#allocation38_spill] sm:$0xff] }
 0xc0b   :  { %5806 = vmatmul.mubr.f32.vlgmr.msra.gmra.mrb[50].mxu1 %v17686_v19  ;;  %5877 = vmatmul.mubr.f32.vlgmr.msra.gmra.mrb[52].mxu0 %v17686_v19 }
 0xc0c   :  { %12875 = vmatpush1.bf16.msra.mxu1 %v16136_v22  ;;  %12907 = vmatpush1.bf16.msra.mxu0 %v16138_v30  ;;  %v5110_v22 = vrot.slane %v5105_v11, %v17792_v62  ;;  %v17793_v30 = vld [vmem:[#allocation39_spill] sm:$0xff] }
 0xc0d   :  { %12877 = vmatprep.subr.bf16.mxu1 %v16142_v55  ;;  %12909 = vmatprep.subr.bf16.mxu0 %v16144_v13  ;;  %v5118_v55 = vrot.slane %v5105_v11, %v17793_v30  ;;  %v17794_v13 = vld [vmem:[#allocation40_spill] sm:$0xff]  ;;  %v6542_v30 = vld [vmem:[#allocation7 + $0x238] sm:$0xff] }
 0xc0e   :  { %6154 = vmatprep.mubr.f32.mxu1 %v17686_v19  ;;  %6225 = vmatprep.mubr.f32.mxu0 %v17686_v19  ;;  %v6540_v62 = vld [vmem:[#allocation7 + $0x228] sm:$0xff] }
 0xc10   :  { %12879 = vmatpush1.bf16.msra.mxu1 %v16150_v26  ;;  %12911 = vmatpush1.bf16.msra.mxu0 %v16152_v53  ;;  %v5114_v26 = vrot.slane %v5105_v11, %v17794_v13  ;;  %v17795_v53 = vld [vmem:[#allocation41_spill] sm:$0xff] }
 0xc11   :  { %12881 = vmatprep.subr.bf16.mxu1 %v16156_v21  ;;  %12913 = vmatprep.subr.bf16.mxu0 %v16158_v32  ;;  %v5122_v21 = vrot.slane %v5105_v11, %v17795_v53  ;;  %v6526_v13 = vld [vmem:[#allocation7 + $0x1b8] sm:$0xff]  ;;  %v6548_v53 = vld [vmem:[#allocation7 + $0x268] sm:$0xff] }
 0xc14   :  { %12883 = vmatpush1.bf16.msra.mxu1 %v16166_v12  ;;  %12915 = vmatpush1.bf16.msra.mxu0 %v16168_v24 }
 0xc15   :  { %12885 = vmatprep.subr.bf16.mxu1 %v16172_v37  ;;  %12917 = vmatprep.subr.bf16.mxu0 %v16174_v52 }
 0xc18   :  { %12887 = vmatpush1.bf16.msra.mxu1 %v16180_v56  ;;  %12919 = vmatpush1.bf16.msra.mxu0 %v16182_v5 }
 0xc19   :  { %12889 = vmatprep.subr.bf16.mxu1 %v16186_v34  ;;  %12921 = vmatprep.subr.bf16.mxu0 %v16188_v47 }
 0xc1c   :  { %12891 = vmatpush1.bf16.msra.mxu1 %v16192_v44  ;;  %12923 = vmatpush1.bf16.msra.mxu0 %v16194_v59 }
 0xc1d   :  { %12893 = vmatprep.subr.bf16.mxu1 %v16198_v18  ;;  %12925 = vmatprep.subr.bf16.mxu0 %v16200_v17 }
 0xc20   :  { %12895 = vmatpush1.bf16.msra.mxu1 %v16204_v6  ;;  %12927 = vmatpush1.bf16.msra.mxu0 %v16206_v41 }
 0xc21   :  { %12897 = vmatprep.subr.bf16.mxu1 %v16210_v50  ;;  %12929 = vmatprep.subr.bf16.mxu0 %v16212_v8  ;;  %v17796_v8 = vld [vmem:[#allocation37_spill] sm:$0xff] }
 0xc24   :  { %12899 = vmatpush1.bf16.msra.mxu1 %v16216_v1  ;;  %12931 = vmatpush1.bf16.msra.mxu0 %v16218_v54  ;;  %v17797_v1 = vsub.s32 4, %v17796_v8 }
 0xc25   :  { %12901 = vmatprep.subr.bf16.mxu1 %v16222_v35  ;;  %12933 = vmatprep.subr.bf16.mxu0 %v16224_v46  ;;  %v17798_v35 = vsub.s32 6, %v17796_v8 }
 0xc26   :  { %v5126_v54 = vrot.slane %v5105_v11, %v17797_v1 }
 0xc27   :  { %v5134_v46 = vrot.slane %v5105_v11, %v17798_v35 }
 0xc28   :  { %12903 = vmatpush1.bf16.msra.mxu1 %v16228_v15  ;;  %12935 = vmatpush1.bf16.msra.mxu0 %v16230_v4  ;;  %v17799_v15 = vsub.s32 5, %v17796_v8 }
 0xc29   :  { %12937 = vmatprep.subr.bf16.mxu1 %v16234_v7  ;;  %12969 = vmatprep.subr.bf16.mxu0 %v16236_v38  ;;  %v17800_v7 = vsub.s32 7, %v17796_v8 }
 0xc2a   :  { %v5130_v4 = vrot.slane %v5105_v11, %v17799_v15 }
 0xc2b   :  { %v5138_v38 = vrot.slane %v5105_v11, %v17800_v7 }
 0xc5e   :  { %v5213_v32 = vpop.f32.mrb[40].mxu1  ;;  %v5290_v12 = vpop.f32.mrb[42].mxu0 }
 0xc5f   :  { %v5214_v24 = vadd.f32 %v5213_v32, %v5110_v22  ;;  %v5215_v37 = vpop.f32.mrb[41].mxu1  ;;  %v5291_v52 = vadd.f32 %v5290_v12, %v5118_v55  ;;  %v5292_v56 = vpop.f32.mrb[43].mxu0 }
 0xc60   :  { %v5216_v5 = vadd.f32 %v5215_v37, %v5114_v26  ;;  %v5293_v34 = vadd.f32 %v5292_v56, %v5122_v21 }
 0xc61   :  { %5455 = vst [vmem:[#allocation2] sm:$0xff] %v5214_v24  ;;  %5457 = vst [vmem:[#allocation2 + $0x10] sm:$0xff] %v5291_v52 }
 0xc62   :  { %5456 = vst [vmem:[#allocation2 + $0x8] sm:$0xff] %v5216_v5  ;;  %5458 = vst [vmem:[#allocation2 + $0x18] sm:$0xff] %v5293_v34  ;;  %v5219_v47 = vpop.f32.mrb[42].mxu1  ;;  %v5296_v44 = vpop.f32.mrb[44].mxu0 }
 0xc63   :  { %v5220_v59 = vadd.f32 %v5219_v47, %v5110_v22  ;;  %v5221_v18 = vpop.f32.mrb[43].mxu1  ;;  %v5297_v17 = vadd.f32 %v5296_v44, %v5118_v55  ;;  %v5298_v6 = vpop.f32.mrb[45].mxu0 }
 0xc64   :  { %v5222_v41 = vadd.f32 %v5221_v18, %v5114_v26  ;;  %v5299_v50 = vadd.f32 %v5298_v6, %v5122_v21 }
 0xc65   :  { %5463 = vst [vmem:[#allocation2 + $0x40] sm:$0xff] %v5220_v59  ;;  %5465 = vst [vmem:[#allocation2 + $0x50] sm:$0xff] %v5297_v17 }
 0xc66   :  { %5464 = vst [vmem:[#allocation2 + $0x48] sm:$0xff] %v5222_v41  ;;  %5466 = vst [vmem:[#allocation2 + $0x58] sm:$0xff] %v5299_v50 }
 0xc68   :  { %v5883_v24 = vld [vmem:[#allocation2] sm:$0x3]  ;;  %v5885_v52 = vld [vmem:[#allocation2 + $0x10] sm:$0x3] }
 0xc69   :  { %v5884_v47 = vld [vmem:[#allocation2 + $0x8] sm:$0x3]  ;;  %v5886_v59 = vld [vmem:[#allocation2 + $0x18] sm:$0x3] }
 0xc9e   :  { %v5367_v27 = vpop.f32.mrb[44].mxu1  ;;  %v5444_v28 = vpop.f32.mrb[46].mxu0 }
 0xc9f   :  { %v5368_v2 = vadd.f32 %v5367_v27, %v5126_v54  ;;  %v5369_v61 = vpop.f32.mrb[45].mxu1  ;;  %v5445_v25 = vadd.f32 %v5444_v28, %v5134_v46  ;;  %v5446_v49 = vpop.f32.mrb[47].mxu0 }
 0xca0   :  { %v5370_v33 = vadd.f32 %v5369_v61, %v5130_v4  ;;  %v5447_v3 = vadd.f32 %v5446_v49, %v5138_v38 }
 0xca1   :  { %5459 = vst [vmem:[#allocation2 + $0x20] sm:$0xff] %v5368_v2  ;;  %5461 = vst [vmem:[#allocation2 + $0x30] sm:$0xff] %v5445_v25 }
 0xca2   :  { %5460 = vst [vmem:[#allocation2 + $0x28] sm:$0xff] %v5370_v33  ;;  %5462 = vst [vmem:[#allocation2 + $0x38] sm:$0xff] %v5447_v3  ;;  %v5373_v48 = vpop.f32.mrb[46].mxu1  ;;  %v5450_v58 = vpop.f32.mrb[48].mxu0 }
 0xca3   :  { %v5374_v22 = vadd.f32 %v5373_v48, %v5126_v54  ;;  %v5375_v55 = vpop.f32.mrb[47].mxu1  ;;  %v5451_v26 = vadd.f32 %v5450_v58, %v5134_v46  ;;  %v5452_v21 = vpop.f32.mrb[49].mxu0 }
 0xca4   :  { %v5376_v32 = vadd.f32 %v5375_v55, %v5130_v4  ;;  %v5453_v11 = vadd.f32 %v5452_v21, %v5138_v38 }
 0xca5   :  { %5467 = vst [vmem:[#allocation2 + $0x60] sm:$0xff] %v5374_v22  ;;  %5469 = vst [vmem:[#allocation2 + $0x70] sm:$0xff] %v5451_v26 }
 0xca6   :  { %5468 = vst [vmem:[#allocation2 + $0x68] sm:$0xff] %v5376_v32  ;;  %5470 = vst [vmem:[#allocation2 + $0x78] sm:$0xff] %v5453_v11 }
 0xcac   :  { %v5901_v15 = vld [vmem:[#allocation2 + $0x60] sm:$0xc0]  ;;  %v5903_v4 = vld [vmem:[#allocation2 + $0x70] sm:$0xc0] }
 0xcad   :  { %v5902_v2 = vld [vmem:[#allocation2 + $0x68] sm:$0xc0]  ;;  %v5904_v61 = vld [vmem:[#allocation2 + $0x78] sm:$0xc0] }
 0xcbe   :  { %v5665_v12 = vpop.f32.mrb[48].mxu1  ;;  %v5736_v37 = vpop.f32.mrb[50].mxu0 }
 0xcbf   :  { %v5887_v56 = vadd.f32 %v5883_v24, %v5665_v12  ;;  %v5889_v5 = vadd.f32 %v5885_v52, %v5736_v37  ;;  %v5667_v34 = vpop.f32.mrb[49].mxu1  ;;  %v5738_v44 = vpop.f32.mrb[51].mxu0 }
 0xcc0   :  { %v5888_v18 = vadd.f32 %v5884_v47, %v5667_v34  ;;  %v5890_v17 = vadd.f32 %v5886_v59, %v5738_v44 }
 0xcc2   :  { %v5895_v6 = vcombine.low %v5887_v56, %v5888_v18  ;;  %v5896_v41 = vcombine.low %v5889_v5, %v5890_v17  ;;  %v17801_v17 = vld [vmem:[#allocation27_spill] sm:$0xff] }
 0xcc4   :  { %5899 = vst [vmem:[#allocation5] sm:$0x33] %v5895_v6  ;;  %5900 = vst [vmem:[#allocation5 + $0x8] sm:$0x33] %v5896_v41  ;;  %v17804_v6 = vld [vmem:[#allocation30_spill] sm:$0xff]  ;;  %v17807_v41 = vld [vmem:[#allocation33_spill] sm:$0xff] }
 0xcde   :  { %v5807_v50 = vpop.f32.mrb[50].mxu1  ;;  %v5878_v8 = vpop.f32.mrb[52].mxu0 }
 0xcdf   :  { %v5909_v1 = vrot.slane %v5807_v50, 4  ;;  %v5911_v54 = vrot.slane %v5878_v8, 4  ;;  %v5809_v35 = vpop.f32.mrb[51].mxu1  ;;  %v5880_v46 = vpop.f32.mrb[53].mxu0  ;;  %v17808_v50 = vld [vmem:[#allocation34_spill] sm:$0xff] }
 0xce0   :  { %v5910_v7 = vrot.slane %v5809_v35, 4  ;;  %v5912_v38 = vrot.slane %v5880_v46, 4  ;;  %v6498_v35 = vld [vmem:[#allocation7 + $0xd8] sm:$0xff] }
 0xce1   :  { %v5917_v27 = vadd.f32 %v5909_v1, %v5901_v15  ;;  %v5919_v28 = vadd.f32 %v5911_v54, %v5903_v4  ;;  %v6496_v1 = vld [vmem:[#allocation7 + $0xc8] sm:$0xff]  ;;  %v6490_v54 = vld [vmem:[#allocation7 + $0x98] sm:$0xff]  ;;  %v6487_v4 = vld [vmem:[#allocation7 + $0x80] sm:$0xff] }
 0xce2   :  { %v5918_v25 = vadd.f32 %v5910_v7, %v5902_v2  ;;  %v5920_v49 = vadd.f32 %v5912_v38, %v5904_v61  ;;  %v16439_v15 = vpack.c.bf16 %v6498_v35, %v6490_v54  ;;  %v6495_v7 = vld [vmem:[#allocation7 + $0xc0] sm:$0xff]  ;;  %v6489_v38 = vld [vmem:[#allocation7 + $0x90] sm:$0xff]  ;;  %v6504_v2 = vld [vmem:[#allocation7 + $0x108] sm:$0xff] }
 0xce3   :  { %v6512_v61 = vld [vmem:[#allocation7 + $0x148] sm:$0xff]  ;;  %v6561_v35 = vld [vmem:[#allocation7 + $0x2d0] sm:$0xff] }
 0xce4   :  { %v5925_v33 = vcombine.high %v5917_v27, %v5918_v25  ;;  %v5926_v3 = vcombine.high %v5919_v28, %v5920_v49  ;;  %v16442_v27 = vpack.c.bf16 %v6495_v7, %v6487_v4  ;;  %v6497_v28 = vld [vmem:[#allocation7 + $0xd0] sm:$0xff]  ;;  %v16448_v49 = vpack.c.bf16 %v6512_v61, %v6504_v2  ;;  %v6568_v4 = vld [vmem:[#allocation7 + $0x308] sm:$0xff] }
 0xce5   :  { %v16446_v25 = vpack.c.bf16 %v6497_v28, %v6489_v38  ;;  %v6576_v7 = vld [vmem:[#allocation7 + $0x348] sm:$0xff]  ;;  %v6570_v38 = vld [vmem:[#allocation7 + $0x318] sm:$0xff] }
 0xce6   :  { %5929 = vst [vmem:[#allocation5] sm:$0xcc] %v5925_v33  ;;  %5930 = vst [vmem:[#allocation5 + $0x8] sm:$0xcc] %v5926_v3  ;;  %v6506_v33 = vld [vmem:[#allocation7 + $0x118] sm:$0xff] }
 0xce7   :  { %v6514_v3 = vld [vmem:[#allocation7 + $0x158] sm:$0xff] }
 0xce8   :  { %v6578_v28 = vld [vmem:[#allocation7 + $0x358] sm:$0xff] }
 0xced   :  { %v5931_v48 = vld [vmem:[#allocation5] sm:$0xff]  ;;  %v5932_v22 = vld [vmem:[#allocation5 + $0x8] sm:$0xff] }
 0xcee   :  { %v11255_v58 = vmul.f32 -1.442695, %v5931_v48  ;;  %v11256_v55 = vmul.f32 -1.442695, %v5932_v22  ;;  %v5946_v32 = vrot.slane %v5932_v22, 4  ;;  %v6503_v48 = vld [vmem:[#allocation7 + $0x100] sm:$0xff] }
 0xcef   :  { %v6511_v22 = vld [vmem:[#allocation7 + $0x140] sm:$0xff] }
 0xcf0   :  { %14507 = vpow2.f32 %v11255_v58  ;;  %v16450_v58 = vpack.c.bf16 %v6514_v3, %v6506_v33  ;;  %v16495_v33 = vpack.c.bf16 %v6576_v7, %v6568_v4  ;;  %v6567_v3 = vld [vmem:[#allocation7 + $0x300] sm:$0xff] }
 0xcf1   :  { %14509 = vpow2.f32 %v11256_v55  ;;  %v6505_v55 = vld [vmem:[#allocation7 + $0x110] sm:$0xff] }
 0xcfa   :  { %v14508_v26 = vpop.eup %14507 }
 0xcfb   :  { %v5939_v21 = vadd.f32 1.0, %v14508_v26  ;;  %v14510_v11 = vpop.eup %14509  ;;  %v6513_v26 = vld [vmem:[#allocation7 + $0x150] sm:$0xff] }
 0xcfc   :  { %v5940_v52 = vadd.f32 1.0, %v14510_v11  ;;  %v6528_v11 = vld [vmem:[#allocation7 + $0x1c8] sm:$0xff] }
 0xcfd   :  { %14511 = vrcp.f32 %v5939_v21  ;;  %v16453_v21 = vpack.c.bf16 %v6511_v22, %v6503_v48  ;;  %v6575_v48 = vld [vmem:[#allocation7 + $0x340] sm:$0xff]  ;;  %v6569_v22 = vld [vmem:[#allocation7 + $0x310] sm:$0xff] }
 0xcfe   :  { %14513 = vtanh.f32 %v5946_v32  ;;  %v6520_v32 = vld [vmem:[#allocation7 + $0x188] sm:$0xff] }
 0xcff   :  { %14515 = vrcp.f32 %v5940_v52  ;;  %v6530_v52 = vld [vmem:[#allocation7 + $0x1d8] sm:$0xff] }
 0xd07   :  { %v14512_v12 = vpop.eup %14511 }
 0xd08   :  { %v5950_v24 = vrot.slane %v14512_v12, 4  ;;  %v14514_v37 = vpop.eup %14513 }
 0xd09   :  { %v5953_v5 = vmul.f32 %v14514_v37, %v14512_v12  ;;  %v14516_v47 = vpop.eup %14515  ;;  %v6522_v12 = vld [vmem:[#allocation7 + $0x198] sm:$0xff]  ;;  %v16459_v37 = vpack.c.bf16 %v6528_v11, %v6520_v32  ;;  %v6584_v32 = vld [vmem:[#allocation7 + $0x388] sm:$0xff] }
 0xd0a   :  { %v5952_v56 = vmul.f32 0.0, %v5950_v24  ;;  %v16457_v24 = vpack.c.bf16 %v6513_v26, %v6505_v55  ;;  %v16498_v55 = vpack.c.bf16 %v6578_v28, %v6570_v38  ;;  %v6577_v26 = vld [vmem:[#allocation7 + $0x350] sm:$0xff]  ;;  %v6592_v11 = vld [vmem:[#allocation7 + $0x3c8] sm:$0xff]  ;;  %v6376_v28 = vld [vmem:[#allocation2 + $0x10] sm:$0xc] }
 0xd0b   :  { %v6374_v38 = vld [vmem:[#allocation2] sm:$0xc] }
 0xd0c   :  { %v16389_v34 = vadd.f32 %v5953_v5, %v5952_v56  ;;  %v6519_v56 = vld [vmem:[#allocation7 + $0x180] sm:$0xff] }
 0xd0d   :  { %v6527_v5 = vld [vmem:[#allocation7 + $0x1c0] sm:$0xff] }
 0xd0e   :  { %14517 = vtanh.f32 %v16389_v34 }
 0xd18   :  { %v14518_v44 = vpop.eup %14517 }
 0xd19   :  { %v5956_v59 = vmul.f32 %v14518_v44, %v14516_v47  ;;  %v16462_v47 = vpack.c.bf16 %v6530_v52, %v6522_v12  ;;  %v6521_v44 = vld [vmem:[#allocation7 + $0x190] sm:$0xff]  ;;  %v6586_v12 = vld [vmem:[#allocation7 + $0x398] sm:$0xff] }
 0xd1a   :  { %v6594_v52 = vld [vmem:[#allocation7 + $0x3d8] sm:$0xff] }
 0xd1b   :  { %5957 = vst [vmem:[#allocation4] sm:$0x3] %v5956_v59  ;;  %v5959_v18 = vcombine.low %v5956_v59, %v5956_v59  ;;  %6155 = vmatmul.mubr.f32.vlgmr.msra.gmra.mrb[52].mxu1 %v5956_v59  ;;  %6226 = vmatmul.mubr.f32.vlgmr.msra.gmra.mrb[54].mxu0 %v5956_v59 }
 0xd1c   :  { %12939 = vmatpush1.bf16.msra.mxu1 %v16240_v23  ;;  %12971 = vmatpush1.bf16.msra.mxu0 %v16242_v16  ;;  %v17802_v23 = vld [vmem:[#allocation28_spill] sm:$0xff]  ;;  %v17803_v16 = vld [vmem:[#allocation29_spill] sm:$0xff] }
 0xd1d   :  { %5961 = vst [vmem:[#allocation4 + $0x18] sm:$0xc0] %v5959_v18  ;;  %12941 = vmatprep.subr.bf16.mxu1 %v16246_v0  ;;  %12973 = vmatprep.subr.bf16.mxu0 %v16248_v43  ;;  %v17805_v0 = vld [vmem:[#allocation31_spill] sm:$0xff]  ;;  %v17806_v43 = vld [vmem:[#allocation32_spill] sm:$0xff] }
 0xd1e   :  { %6296 = vmatprep.mubr.f32.mxu1 %v17686_v19  ;;  %6367 = vmatprep.mubr.f32.mxu0 %v17686_v19  ;;  %v6536_v18 = vld [vmem:[#allocation7 + $0x208] sm:$0xff] }
 0xd20   :  { %12943 = vmatpush1.bf16.msra.mxu1 %v16254_v39  ;;  %12975 = vmatpush1.bf16.msra.mxu0 %v16256_v14  ;;  %v17809_v39 = vld [vmem:[#allocation35_spill] sm:$0xff]  ;;  %v17810_v14 = vld [vmem:[#allocation36_spill] sm:$0xff] }
 0xd21   :  { %12945 = vmatprep.subr.bf16.mxu1 %v16260_v31  ;;  %12977 = vmatprep.subr.bf16.mxu0 %v17801_v17  ;;  %v17811_v31 = vld [vmem:[#allocation42_spill] sm:$0xff]  ;;  %v6544_v17 = vld [vmem:[#allocation7 + $0x248] sm:$0xff] }
 0xd24   :  { %12947 = vmatpush1.bf16.msra.mxu1 %v17802_v23  ;;  %12979 = vmatpush1.bf16.msra.mxu0 %v17803_v16  ;;  %v6538_v23 = vld [vmem:[#allocation7 + $0x218] sm:$0xff] }
 0xd25   :  { %12949 = vmatprep.subr.bf16.mxu1 %v17804_v6  ;;  %12981 = vmatprep.subr.bf16.mxu0 %v17805_v0  ;;  %v6546_v16 = vld [vmem:[#allocation7 + $0x258] sm:$0xff]  ;;  %v16465_v6 = vpack.c.bf16 %v6527_v5, %v6519_v56  ;;  %v16501_v56 = vpack.c.bf16 %v6575_v48, %v6567_v3  ;;  %v16505_v5 = vpack.c.bf16 %v6577_v26, %v6569_v22 }
 0xd28   :  { %12951 = vmatpush1.bf16.msra.mxu1 %v17806_v43  ;;  %12983 = vmatpush1.bf16.msra.mxu0 %v17807_v41  ;;  %v16471_v43 = vpack.c.bf16 %v6544_v17, %v6536_v18  ;;  %v6535_v41 = vld [vmem:[#allocation7 + $0x200] sm:$0xff]  ;;  %v6585_v17 = vld [vmem:[#allocation7 + $0x390] sm:$0xff] }
 0xd29   :  { %12953 = vmatprep.subr.bf16.mxu1 %v17808_v50  ;;  %12985 = vmatprep.subr.bf16.mxu0 %v17809_v39  ;;  %v6543_v50 = vld [vmem:[#allocation7 + $0x240] sm:$0xff]  ;;  %v6537_v39 = vld [vmem:[#allocation7 + $0x210] sm:$0xff] }
 0xd2a   :  { %v6591_v18 = vld [vmem:[#allocation7 + $0x3c0] sm:$0xff] }
 0xd2c   :  { %12955 = vmatpush1.bf16.msra.mxu1 %v17810_v14  ;;  %12987 = vmatpush1.bf16.msra.mxu0 %v17811_v31  ;;  %v16474_v14 = vpack.c.bf16 %v6546_v16, %v6538_v23  ;;  %v6545_v31 = vld [vmem:[#allocation7 + $0x250] sm:$0xff]  ;;  %v16510_v23 = vpack.c.bf16 %v6594_v52, %v6586_v12 }
 0xd2d   :  { %12957 = vmatprep.subr.bf16.mxu1 %v16298_v36  ;;  %12989 = vmatprep.subr.bf16.mxu0 %v16300_v63  ;;  %v6472_v36 = vld [vmem:[#allocation7 + $0x8] sm:$0xff]  ;;  %v6593_v16 = vld [vmem:[#allocation7 + $0x3d0] sm:$0xff] }
 0xd2e   :  { %v6480_v63 = vld [vmem:[#allocation7 + $0x48] sm:$0xff] }
 0xd30   :  { %12959 = vmatpush1.bf16.msra.mxu1 %v16304_v9  ;;  %12991 = vmatpush1.bf16.msra.mxu0 %v16306_v40  ;;  %v6474_v9 = vld [vmem:[#allocation7 + $0x18] sm:$0xff]  ;;  %v16426_v40 = vpack.c.bf16 %v6480_v63, %v6472_v36  ;;  %v6552_v36 = vld [vmem:[#allocation7 + $0x288] sm:$0xff] }
 0xd31   :  { %12961 = vmatprep.subr.bf16.mxu1 %v16310_v20  ;;  %12993 = vmatprep.subr.bf16.mxu0 %v16312_v42  ;;  %v6482_v20 = vld [vmem:[#allocation7 + $0x58] sm:$0xff]  ;;  %v6471_v42 = vld [vmem:[#allocation7] sm:$0xff]  ;;  %v6560_v63 = vld [vmem:[#allocation7 + $0x2c8] sm:$0xff] }
 0xd34   :  { %12963 = vmatpush1.bf16.msra.mxu1 %v16316_v51  ;;  %12995 = vmatpush1.bf16.msra.mxu0 %v16318_v10  ;;  %v6479_v51 = vld [vmem:[#allocation7 + $0x40] sm:$0xff]  ;;  %v16428_v10 = vpack.c.bf16 %v6482_v20, %v6474_v9  ;;  %v6554_v9 = vld [vmem:[#allocation7 + $0x298] sm:$0xff] }
 0xd35   :  { %12965 = vmatprep.subr.bf16.mxu1 %v16322_v45  ;;  %12997 = vmatprep.subr.bf16.mxu0 %v16324_v29  ;;  %v16430_v45 = vpack.c.bf16 %v6479_v51, %v6471_v42  ;;  %v6473_v29 = vld [vmem:[#allocation7 + $0x10] sm:$0xff]  ;;  %v6562_v20 = vld [vmem:[#allocation7 + $0x2d8] sm:$0xff]  ;;  %v16477_v42 = vpack.c.bf16 %v6543_v50, %v6535_v41  ;;  %v16481_v51 = vpack.c.bf16 %v6545_v31, %v6537_v39  ;;  %v6476_v41 = vld [vmem:[#allocation7 + $0x28] sm:$0xff] }
 0xd36   :  { %v16486_v54 = vpack.c.bf16 %v6562_v20, %v6554_v9  ;;  %v6484_v50 = vld [vmem:[#allocation7 + $0x68] sm:$0xff]  ;;  %v6478_v39 = vld [vmem:[#allocation7 + $0x38] sm:$0xff] }
 0xd37   :  { %v6486_v31 = vld [vmem:[#allocation7 + $0x78] sm:$0xff]  ;;  %v16519_v9 = vpack.c.bf16 %v6484_v50, %v6476_v41 }
 0xd38   :  { %12967 = vmatpush1.bf16.msra.mxu1 %v16328_v57  ;;  %12999 = vmatpush1.bf16.msra.mxu0 %v16330_v60  ;;  %v6481_v57 = vld [vmem:[#allocation7 + $0x50] sm:$0xff]  ;;  %v6488_v60 = vld [vmem:[#allocation7 + $0x88] sm:$0xff]  ;;  %v16522_v20 = vpack.c.bf16 %v6486_v31, %v6478_v39 }
 0xd39   :  { %13001 = vmatprep.subr.bf16.mxu1 %v16426_v40  ;;  %v16433_v8 = vpack.c.bf16 %v6481_v57, %v6473_v29  ;;  %13033 = vmatprep.subr.bf16.mxu0 %v16428_v10  ;;  %v16437_v46 = vpack.c.bf16 %v6496_v1, %v6488_v60  ;;  %v16483_v29 = vpack.c.bf16 %v6560_v63, %v6552_v36  ;;  %v6551_v57 = vld [vmem:[#allocation7 + $0x280] sm:$0xff]  ;;  %v6553_v1 = vld [vmem:[#allocation7 + $0x290] sm:$0xff] }
 0xd3a   :  { %v6559_v60 = vld [vmem:[#allocation7 + $0x2c0] sm:$0xff]  ;;  %v16493_v61 = vpack.c.bf16 %v6561_v35, %v6553_v1  ;;  %v16517_v63 = vpack.c.bf16 %v6593_v16, %v6585_v17 }
 0xd3b   :  { %6297 = vmatmul.mubr.f32.vlgmr.msra.gmra.mrb[54].mxu1 %v5956_v59  ;;  %6368 = vmatmul.mubr.f32.vlgmr.msra.gmra.mrb[56].mxu0 %v5956_v59  ;;  %v6529_v59 = vld [vmem:[#allocation7 + $0x1d0] sm:$0xff]  ;;  %v16489_v2 = vpack.c.bf16 %v6559_v60, %v6551_v57 }
 0xd3c   :  { %6663 = vmatprep.mubr.f32.mxu1 %v17686_v19  ;;  %6734 = vmatprep.mubr.f32.mxu0 %v17686_v19  ;;  %v16469_v0 = vpack.c.bf16 %v6529_v59, %v6521_v44  ;;  %v16507_v44 = vpack.c.bf16 %v6592_v11, %v6584_v32  ;;  %v6583_v59 = vld [vmem:[#allocation7 + $0x380] sm:$0xff]  ;;  %v6375_v32 = vld [vmem:[#allocation2 + $0x8] sm:$0xc]  ;;  %v6377_v11 = vld [vmem:[#allocation2 + $0x18] sm:$0xc] }
 0xd3d   :  { %13003 = vmatpush1.bf16.msra.mxu1 %v16430_v45  ;;  %13035 = vmatpush1.bf16.msra.mxu0 %v16433_v8  ;;  %v16513_v36 = vpack.c.bf16 %v6591_v18, %v6583_v59 }
 0xd3e   :  { %13005 = vmatprep.subr.bf16.mxu1 %v16437_v46  ;;  %13037 = vmatprep.subr.bf16.mxu0 %v16439_v15 }
 0xd41   :  { %13007 = vmatpush1.bf16.msra.mxu1 %v16442_v27  ;;  %13039 = vmatpush1.bf16.msra.mxu0 %v16446_v25 }
 0xd42   :  { %13009 = vmatprep.subr.bf16.mxu1 %v16448_v49  ;;  %13041 = vmatprep.subr.bf16.mxu0 %v16450_v58 }
 0xd45   :  { %13011 = vmatpush1.bf16.msra.mxu1 %v16453_v21  ;;  %13043 = vmatpush1.bf16.msra.mxu0 %v16457_v24 }
 0xd46   :  { %13013 = vmatprep.subr.bf16.mxu1 %v16459_v37  ;;  %13045 = vmatprep.subr.bf16.mxu0 %v16462_v47 }
 0xd49   :  { %13015 = vmatpush1.bf16.msra.mxu1 %v16465_v6  ;;  %13047 = vmatpush1.bf16.msra.mxu0 %v16469_v0 }
 0xd4a   :  { %13017 = vmatprep.subr.bf16.mxu1 %v16471_v43  ;;  %13049 = vmatprep.subr.bf16.mxu0 %v16474_v14 }
 0xd4d   :  { %13019 = vmatpush1.bf16.msra.mxu1 %v16477_v42  ;;  %13051 = vmatpush1.bf16.msra.mxu0 %v16481_v51 }
 0xd4e   :  { %13021 = vmatprep.subr.bf16.mxu1 %v16483_v29  ;;  %13053 = vmatprep.subr.bf16.mxu0 %v16486_v54 }
 0xd51   :  { %13023 = vmatpush1.bf16.msra.mxu1 %v16489_v2  ;;  %13055 = vmatpush1.bf16.msra.mxu0 %v16493_v61 }
 0xd52   :  { %13025 = vmatprep.subr.bf16.mxu1 %v16495_v33  ;;  %13057 = vmatprep.subr.bf16.mxu0 %v16498_v55 }
 0xd55   :  { %13027 = vmatpush1.bf16.msra.mxu1 %v16501_v56  ;;  %13059 = vmatpush1.bf16.msra.mxu0 %v16505_v5 }
 0xd56   :  { %13029 = vmatprep.subr.bf16.mxu1 %v16507_v44  ;;  %13061 = vmatprep.subr.bf16.mxu0 %v16510_v23 }
 0xd59   :  { %13031 = vmatpush1.bf16.msra.mxu1 %v16513_v36  ;;  %13063 = vmatpush1.bf16.msra.mxu0 %v16517_v63 }
 0xd5a   :  { %13065 = vmatprep.subr.bf16.mxu1 %v16519_v9  ;;  %13097 = vmatprep.subr.bf16.mxu0 %v16522_v20 }
 0xdee   :  { %v6156_v57 = vpop.f32.mrb[52].mxu1  ;;  %v6227_v60 = vpop.f32.mrb[54].mxu0 }
 0xdef   :  { %v6382_v1 = vrot.slane %v6156_v57, 6  ;;  %v6384_v35 = vrot.slane %v6227_v60, 6  ;;  %v6158_v4 = vpop.f32.mrb[53].mxu1  ;;  %v6229_v7 = vpop.f32.mrb[55].mxu0 }
 0xdf0   :  { %v6383_v3 = vrot.slane %v6158_v4, 6  ;;  %v6385_v48 = vrot.slane %v6229_v7, 6  ;;  %v6408_v4 = vld [vmem:[#allocation2 + $0x60] sm:$0x30]  ;;  %v6410_v7 = vld [vmem:[#allocation2 + $0x70] sm:$0x30] }
 0xdf1   :  { %v6390_v22 = vadd.f32 %v6382_v1, %v6374_v38  ;;  %v6392_v26 = vadd.f32 %v6384_v35, %v6376_v28 }
 0xdf2   :  { %v6391_v12 = vadd.f32 %v6383_v3, %v6375_v32  ;;  %v6393_v52 = vadd.f32 %v6385_v48, %v6377_v11  ;;  %v6409_v3 = vld [vmem:[#allocation2 + $0x68] sm:$0x30]  ;;  %v6411_v48 = vld [vmem:[#allocation2 + $0x78] sm:$0x30] }
 0xdf4   :  { %v6398_v59 = vcombine.low %v6390_v22, %v6391_v12  ;;  %v6399_v18 = vcombine.low %v6392_v26, %v6393_v52 }
 0xdf6   :  { %v11257_v17 = vrot.slane %v6398_v59, 10  ;;  %v11258_v16 = vrot.slane %v6399_v18, 10 }
 0xdf8   :  { %6406 = vst [vmem:[#allocation5] sm:$0x33] %v11257_v17  ;;  %6407 = vst [vmem:[#allocation5 + $0x8] sm:$0x33] %v11258_v16 }
 0xe0e   :  { %v6298_v41 = vpop.f32.mrb[54].mxu1  ;;  %v6369_v50 = vpop.f32.mrb[56].mxu0 }
 0xe0f   :  { %v6416_v39 = vrot.slane %v6298_v41, 6  ;;  %v6418_v31 = vrot.slane %v6369_v50, 6  ;;  %v6300_v57 = vpop.f32.mrb[55].mxu1  ;;  %v6371_v60 = vpop.f32.mrb[57].mxu0 }
 0xe10   :  { %v6417_v1 = vrot.slane %v6300_v57, 6  ;;  %v6419_v35 = vrot.slane %v6371_v60, 6 }
 0xe11   :  { %v6424_v38 = vadd.f32 %v6416_v39, %v6408_v4  ;;  %v6426_v28 = vadd.f32 %v6418_v31, %v6410_v7 }
 0xe12   :  { %v6425_v22 = vadd.f32 %v6417_v1, %v6409_v3  ;;  %v6427_v26 = vadd.f32 %v6419_v35, %v6411_v48  ;;  %v6483_v3 = vld [vmem:[#allocation7 + $0x60] sm:$0xff]  ;;  %v6477_v48 = vld [vmem:[#allocation7 + $0x30] sm:$0xff] }
 0xe14   :  { %v6432_v32 = vcombine.high %v6424_v38, %v6425_v22  ;;  %v6433_v11 = vcombine.high %v6426_v28, %v6427_v26  ;;  %v6475_v28 = vld [vmem:[#allocation7 + $0x20] sm:$0xff]  ;;  %v6485_v22 = vld [vmem:[#allocation7 + $0x70] sm:$0xff]  ;;  %v6492_v26 = vld [vmem:[#allocation7 + $0xa8] sm:$0xff] }
 0xe16   :  { %v6434_v12 = vrot.slane %v6432_v32, 6  ;;  %v6435_v52 = vrot.slane %v6433_v11, 6  ;;  %v6500_v32 = vld [vmem:[#allocation7 + $0xe8] sm:$0xff]  ;;  %v6494_v11 = vld [vmem:[#allocation7 + $0xb8] sm:$0xff] }
 0xe18   :  { %6438 = vst [vmem:[#allocation5] sm:$0xcc] %v6434_v12  ;;  %6439 = vst [vmem:[#allocation5 + $0x8] sm:$0xcc] %v6435_v52  ;;  %v6502_v12 = vld [vmem:[#allocation7 + $0xf8] sm:$0xff] }
 0xe1f   :  { %v6440_v59 = vld [vmem:[#allocation5] sm:$0xff]  ;;  %v6441_v17 = vld [vmem:[#allocation5 + $0x8] sm:$0xff] }
 0xe20   :  { %v11259_v18 = vmul.f32 -1.442695, %v6440_v59  ;;  %v11260_v16 = vmul.f32 -1.442695, %v6441_v17  ;;  %v6455_v57 = vrot.slane %v6441_v17, 4  ;;  %v16534_v17 = vpack.c.bf16 %v6485_v22, %v6477_v48  ;;  %v6507_v48 = vld [vmem:[#allocation7 + $0x120] sm:$0xff] }
 0xe21   :  { %v6515_v22 = vld [vmem:[#allocation7 + $0x160] sm:$0xff] }
 0xe22   :  { %14519 = vpow2.f32 %v11259_v18  ;;  %v16532_v18 = vpack.c.bf16 %v6483_v3, %v6475_v28 }
 0xe23   :  { %14521 = vpow2.f32 %v11260_v16  ;;  %v6499_v16 = vld [vmem:[#allocation7 + $0xe0] sm:$0xff] }
 0xe2c   :  { %v14520_v41 = vpop.eup %14519 }
 0xe2d   :  { %v6448_v50 = vadd.f32 1.0, %v14520_v41  ;;  %v14522_v39 = vpop.eup %14521 }
 0xe2e   :  { %v6449_v7 = vadd.f32 1.0, %v14522_v39  ;;  %v6493_v39 = vld [vmem:[#allocation7 + $0xb0] sm:$0xff] }
 0xe2f   :  { %14523 = vrcp.f32 %v6448_v50  ;;  %v16538_v50 = vpack.c.bf16 %v6500_v32, %v6492_v26 }
 0xe30   :  { %14525 = vtanh.f32 %v6455_v57  ;;  %v16540_v57 = vpack.c.bf16 %v6502_v12, %v6494_v11  ;;  %v6509_v11 = vld [vmem:[#allocation7 + $0x130] sm:$0xff] }
 0xe31   :  { %14527 = vrcp.f32 %v6449_v7  ;;  %v6510_v7 = vld [vmem:[#allocation7 + $0x138] sm:$0xff]  ;;  %v6517_v12 = vld [vmem:[#allocation7 + $0x170] sm:$0xff] }
 0xe39   :  { %v14524_v31 = vpop.eup %14523 }
 0xe3a   :  { %v6459_v60 = vrot.slane %v14524_v31, 4  ;;  %v14526_v4 = vpop.eup %14525 }
 0xe3b   :  { %v6462_v35 = vmul.f32 %v14526_v4, %v14524_v31  ;;  %v14528_v52 = vpop.eup %14527  ;;  %v6501_v31 = vld [vmem:[#allocation7 + $0xf0] sm:$0xff]  ;;  %v6516_v4 = vld [vmem:[#allocation7 + $0x168] sm:$0xff] }
 0xe3c   :  { %v6461_v1 = vmul.f32 %v6459_v60, %v16389_v34  ;;  %v6491_v34 = vld [vmem:[#allocation7 + $0xa0] sm:$0xff]  ;;  %v6508_v60 = vld [vmem:[#allocation7 + $0x128] sm:$0xff]  ;;  %v16549_v3 = vpack.c.bf16 %v6501_v31, %v6493_v39  ;;  %v16563_v39 = vpack.c.bf16 %v6517_v12, %v6509_v11 }
 0xe3d   :  { %v16547_v28 = vpack.c.bf16 %v6499_v16, %v6491_v34  ;;  %v16553_v26 = vpack.c.bf16 %v6516_v4, %v6508_v60  ;;  %v6534_v34 = vld [vmem:[#allocation7 + $0x1f8] sm:$0xff]  ;;  %v16561_v16 = vpack.c.bf16 %v6515_v22, %v6507_v48  ;;  %v6523_v31 = vld [vmem:[#allocation7 + $0x1a0] sm:$0xff] }
 0xe3e   :  { %v16529_v38 = vadd.f32 %v6462_v35, %v6461_v1  ;;  %v6518_v1 = vld [vmem:[#allocation7 + $0x178] sm:$0xff]  ;;  %17812 = vst [vmem:[#allocation43_spill] sm:$0xff] %v16549_v3  ;;  %17816 = vst [vmem:[#allocation28_spill] sm:$0xff] %v16563_v39  ;;  %v6531_v60 = vld [vmem:[#allocation7 + $0x1e0] sm:$0xff] }
 0xe3f   :  { %17813 = vst [vmem:[#allocation44_spill] sm:$0xff] %v16553_v26  ;;  %v16555_v32 = vpack.c.bf16 %v6518_v1, %v6510_v7  ;;  %17815 = vst [vmem:[#allocation27_spill] sm:$0xff] %v16561_v16  ;;  %v16569_v7 = vpack.c.bf16 %v6534_v34, %v6526_v13  ;;  %v6525_v1 = vld [vmem:[#allocation7 + $0x1b0] sm:$0xff]  ;;  %v16573_v48 = vpack.c.bf16 %v6531_v60, %v6523_v31  ;;  %v6539_v11 = vld [vmem:[#allocation7 + $0x220] sm:$0xff] }
 0xe40   :  { %14529 = vtanh.f32 %v16529_v38  ;;  %v6547_v12 = vld [vmem:[#allocation7 + $0x260] sm:$0xff]  ;;  %v16579_v13 = vpack.c.bf16 %v6548_v53, %v6540_v62  ;;  %v6549_v34 = vld [vmem:[#allocation7 + $0x270] sm:$0xff] }
 0xe41   :  { %17814 = vst [vmem:[#allocation37_spill] sm:$0xff] %v16555_v32  ;;  %17818 = vst [vmem:[#allocation30_spill] sm:$0xff] %v16569_v7  ;;  %v16585_v31 = vpack.c.bf16 %v6547_v12, %v6539_v11  ;;  %v6557_v53 = vld [vmem:[#allocation7 + $0x2b0] sm:$0xff] }
 0xe42   :  { %17819 = vst [vmem:[#allocation31_spill] sm:$0xff] %v16573_v48  ;;  %17821 = vst [vmem:[#allocation33_spill] sm:$0xff] %v16579_v13 }
 0xe43   :  { %17823 = vst [vmem:[#allocation35_spill] sm:$0xff] %v16585_v31 }
 0xe4a   :  { %v14530_v59 = vpop.eup %14529 }
 0xe4b   :  { %v16536_v41 = vmul.f32 %v14530_v59, %v14528_v52  ;;  %v6524_v52 = vld [vmem:[#allocation7 + $0x1a8] sm:$0xff] }
 0xe4c   :  { %v6532_v59 = vld [vmem:[#allocation7 + $0x1e8] sm:$0xff] }
 0xe4d   :  { %v6467_v35 = vrot.slane %v16536_v41, 6  ;;  %6664 = vmatmul.mubr.f32.vlgmr.msra.gmra.mrb[56].mxu1 %v16536_v41  ;;  %6735 = vmatmul.mubr.f32.vlgmr.msra.gmra.mrb[58].mxu0 %v16536_v41  ;;  %v16567_v4 = vpack.c.bf16 %v6532_v59, %v6524_v52  ;;  %v6541_v59 = vld [vmem:[#allocation7 + $0x230] sm:$0xff] }
 0xe4e   :  { %13067 = vmatpush1.bf16.msra.mxu1 %v16532_v18  ;;  %13099 = vmatpush1.bf16.msra.mxu0 %v16534_v17  ;;  %v16587_v60 = vpack.c.bf16 %v6549_v34, %v6541_v59  ;;  %v6571_v59 = vld [vmem:[#allocation7 + $0x320] sm:$0xff] }
 0xe4f   :  { %6469 = vst [vmem:[#allocation4] ss:$28 sps:$4 sm:$0x3c] %v6467_v35   ;;  %13069 = vmatprep.subr.bf16.mxu1 %v16538_v50  ;;  %13101 = vmatprep.subr.bf16.mxu0 %v16540_v57  ;;  %17817 = vst [vmem:[#allocation29_spill] sm:$0xff] %v16567_v4  ;;  %v6533_v35 = vld [vmem:[#allocation7 + $0x1f0] sm:$0xff]  ;;  %v6579_v34 = vld [vmem:[#allocation7 + $0x360] sm:$0xff] }
 0xe50   :  { %6805 = vmatprep.mubr.f32.mxu1 %v17686_v19  ;;  %6876 = vmatprep.mubr.f32.mxu0 %v17686_v19  ;;  %v16575_v22 = vpack.c.bf16 %v6533_v35, %v6525_v1  ;;  %17824 = vst [vmem:[#allocation36_spill] sm:$0xff] %v16587_v60  ;;  %v6555_v1 = vld [vmem:[#allocation7 + $0x2a0] sm:$0xff] }
 0xe51   :  { %v6563_v35 = vld [vmem:[#allocation7 + $0x2e0] sm:$0xff] }
 0xe52   :  { %13071 = vmatpush1.bf16.msra.mxu1 %v16547_v28  ;;  %13103 = vmatpush1.bf16.msra.mxu0 %v16549_v3  ;;  %v6550_v3 = vld [vmem:[#allocation7 + $0x278] sm:$0xff]  ;;  %17820 = vst [vmem:[#allocation32_spill] sm:$0xff] %v16575_v22  ;;  %v16597_v11 = vpack.c.bf16 %v6563_v35, %v6555_v1  ;;  %v16609_v1 = vpack.c.bf16 %v6579_v34, %v6571_v59 }
 0xe53   :  { %13073 = vmatprep.subr.bf16.mxu1 %v16553_v26  ;;  %13105 = vmatprep.subr.bf16.mxu0 %v16555_v32  ;;  %v16581_v52 = vpack.c.bf16 %v6550_v3, %v6542_v30  ;;  %v6556_v32 = vld [vmem:[#allocation7 + $0x2a8] sm:$0xff]  ;;  %v6558_v26 = vld [vmem:[#allocation7 + $0x2b8] sm:$0xff]  ;;  %v6565_v3 = vld [vmem:[#allocation7 + $0x2f0] sm:$0xff] }
 0xe54   :  { %v16599_v12 = vpack.c.bf16 %v6565_v3, %v6557_v53  ;;  %v6587_v53 = vld [vmem:[#allocation7 + $0x3a0] sm:$0xff]  ;;  %v6597_v3 = vld [vmem:[#allocation7 + $0x3f0] sm:$0xff] }
 0xe55   :  { %17822 = vst [vmem:[#allocation34_spill] sm:$0xff] %v16581_v52 }
 0xe56   :  { %13075 = vmatpush1.bf16.msra.mxu1 %v16561_v16  ;;  %13107 = vmatpush1.bf16.msra.mxu0 %v16563_v39  ;;  %v6564_v16 = vld [vmem:[#allocation7 + $0x2e8] sm:$0xff]  ;;  %v6566_v39 = vld [vmem:[#allocation7 + $0x2f8] sm:$0xff] }
 0xe57   :  { %13077 = vmatprep.subr.bf16.mxu1 %v16567_v4  ;;  %13109 = vmatprep.subr.bf16.mxu0 %v16569_v7  ;;  %v16591_v62 = vpack.c.bf16 %v6564_v16, %v6556_v32  ;;  %v16593_v30 = vpack.c.bf16 %v6566_v39, %v6558_v26  ;;  %v6572_v7 = vld [vmem:[#allocation7 + $0x328] sm:$0xff]  ;;  %v6574_v4 = vld [vmem:[#allocation7 + $0x338] sm:$0xff]  ;;  %v6573_v16 = vld [vmem:[#allocation7 + $0x330] sm:$0xff] }
 0xe58   :  { %v6581_v39 = vld [vmem:[#allocation7 + $0x370] sm:$0xff] }
 0xe59   :  { %v16611_v35 = vpack.c.bf16 %v6581_v39, %v6573_v16 }
 0xe5a   :  { %13079 = vmatpush1.bf16.msra.mxu1 %v16573_v48  ;;  %13111 = vmatpush1.bf16.msra.mxu0 %v16575_v22  ;;  %v6580_v48 = vld [vmem:[#allocation7 + $0x368] sm:$0xff]  ;;  %v6582_v22 = vld [vmem:[#allocation7 + $0x378] sm:$0xff] }
 0xe5b   :  { %13081 = vmatprep.subr.bf16.mxu1 %v16579_v13  ;;  %13113 = vmatprep.subr.bf16.mxu0 %v16581_v52  ;;  %v16603_v26 = vpack.c.bf16 %v6580_v48, %v6572_v7  ;;  %v16605_v32 = vpack.c.bf16 %v6582_v22, %v6574_v4  ;;  %v6588_v52 = vld [vmem:[#allocation7 + $0x3a8] sm:$0xff]  ;;  %v6590_v13 = vld [vmem:[#allocation7 + $0x3b8] sm:$0xff]  ;;  %v6595_v48 = vld [vmem:[#allocation7 + $0x3e0] sm:$0xff] }
 0xe5c   :  { %v6589_v22 = vld [vmem:[#allocation7 + $0x3b0] sm:$0xff]  ;;  %v16621_v59 = vpack.c.bf16 %v6595_v48, %v6587_v53 }
 0xe5d   :  { %v16623_v34 = vpack.c.bf16 %v6597_v3, %v6589_v22 }
 0xe5e   :  { %13083 = vmatpush1.bf16.msra.mxu1 %v16585_v31  ;;  %13115 = vmatpush1.bf16.msra.mxu0 %v16587_v60  ;;  %v6596_v31 = vld [vmem:[#allocation7 + $0x3e8] sm:$0xff]  ;;  %v6598_v60 = vld [vmem:[#allocation7 + $0x3f8] sm:$0xff] }
 0xe5f   :  { %13085 = vmatprep.subr.bf16.mxu1 %v16591_v62  ;;  %13117 = vmatprep.subr.bf16.mxu0 %v16593_v30  ;;  %v16615_v4 = vpack.c.bf16 %v6596_v31, %v6588_v52  ;;  %v16617_v7 = vpack.c.bf16 %v6598_v60, %v6590_v13 }
 0xe62   :  { %13087 = vmatpush1.bf16.msra.mxu1 %v16597_v11  ;;  %13119 = vmatpush1.bf16.msra.mxu0 %v16599_v12 }
 0xe63   :  { %13089 = vmatprep.subr.bf16.mxu1 %v16603_v26  ;;  %13121 = vmatprep.subr.bf16.mxu0 %v16605_v32 }
 0xe66   :  { %13091 = vmatpush1.bf16.msra.mxu1 %v16609_v1  ;;  %13123 = vmatpush1.bf16.msra.mxu0 %v16611_v35 }
 0xe67   :  { %13093 = vmatprep.subr.bf16.mxu1 %v16615_v4  ;;  %13125 = vmatprep.subr.bf16.mxu0 %v16617_v7 }
 0xe6a   :  { %13095 = vmatpush1.bf16.msra.mxu1 %v16621_v59  ;;  %13127 = vmatpush1.bf16.msra.mxu0 %v16623_v34 }
 0xe6b   :  { %13129 = vmatprep.subr.bf16.mxu1 %v16426_v40  ;;  %13161 = vmatprep.subr.bf16.mxu0 %v16428_v10 }
 0xe6d   :  { %6806 = vmatmul.mubr.f32.vlgmr.msra.gmra.mrb[58].mxu1 %v16536_v41  ;;  %6877 = vmatmul.mubr.f32.vlgmr.msra.gmra.mrb[60].mxu0 %v16536_v41 }
 0xe6e   :  { %13131 = vmatpush1.bf16.msra.mxu1 %v16430_v45  ;;  %13163 = vmatpush1.bf16.msra.mxu0 %v16433_v8 }
 0xe6f   :  { %13133 = vmatprep.subr.bf16.mxu1 %v16437_v46  ;;  %13165 = vmatprep.subr.bf16.mxu0 %v16439_v15 }
 0xe70   :  { %7154 = vmatprep.mubr.f32.mxu1 %v17686_v19  ;;  %7225 = vmatprep.mubr.f32.mxu0 %v17686_v19 }
 0xe72   :  { %13135 = vmatpush1.bf16.msra.mxu1 %v16442_v27  ;;  %13167 = vmatpush1.bf16.msra.mxu0 %v16446_v25  ;;  %v6883_v27 = vld [vmem:[#allocation2] sm:$0x30]  ;;  %v6885_v25 = vld [vmem:[#allocation2 + $0x10] sm:$0x30] }
 0xe73   :  { %13137 = vmatprep.subr.bf16.mxu1 %v16448_v49  ;;  %13169 = vmatprep.subr.bf16.mxu0 %v16450_v58 }
 0xe76   :  { %13139 = vmatpush1.bf16.msra.mxu1 %v16453_v21  ;;  %13171 = vmatpush1.bf16.msra.mxu0 %v16457_v24 }
 0xe77   :  { %13141 = vmatprep.subr.bf16.mxu1 %v16459_v37  ;;  %13173 = vmatprep.subr.bf16.mxu0 %v16462_v47  ;;  %v6884_v37 = vld [vmem:[#allocation2 + $0x8] sm:$0x30]  ;;  %v6886_v47 = vld [vmem:[#allocation2 + $0x18] sm:$0x30] }
 0xe7a   :  { %13143 = vmatpush1.bf16.msra.mxu1 %v16465_v6  ;;  %13175 = vmatpush1.bf16.msra.mxu0 %v16469_v0 }
 0xe7b   :  { %13145 = vmatprep.subr.bf16.mxu1 %v16471_v43  ;;  %13177 = vmatprep.subr.bf16.mxu0 %v16474_v14 }
 0xe7e   :  { %13147 = vmatpush1.bf16.msra.mxu1 %v16477_v42  ;;  %13179 = vmatpush1.bf16.msra.mxu0 %v16481_v51  ;;  %v6913_v51 = vld [vmem:[#allocation2 + $0x60] sm:$0xc] }
 0xe7f   :  { %13149 = vmatprep.subr.bf16.mxu1 %v16483_v29  ;;  %13181 = vmatprep.subr.bf16.mxu0 %v16486_v54  ;;  %v6915_v54 = vld [vmem:[#allocation2 + $0x70] sm:$0xc] }
 0xe82   :  { %13151 = vmatpush1.bf16.msra.mxu1 %v16489_v2  ;;  %13183 = vmatpush1.bf16.msra.mxu0 %v16493_v61 }
 0xe83   :  { %13153 = vmatprep.subr.bf16.mxu1 %v16495_v33  ;;  %13185 = vmatprep.subr.bf16.mxu0 %v16498_v55  ;;  %v6914_v55 = vld [vmem:[#allocation2 + $0x68] sm:$0xc] }
 0xe86   :  { %13155 = vmatpush1.bf16.msra.mxu1 %v16501_v56  ;;  %13187 = vmatpush1.bf16.msra.mxu0 %v16505_v5  ;;  %v6916_v5 = vld [vmem:[#allocation2 + $0x78] sm:$0xc] }
 0xe87   :  { %13157 = vmatprep.subr.bf16.mxu1 %v16507_v44  ;;  %13189 = vmatprep.subr.bf16.mxu0 %v16510_v23 }
 0xe8a   :  { %13159 = vmatpush1.bf16.msra.mxu1 %v16513_v36  ;;  %13191 = vmatpush1.bf16.msra.mxu0 %v16517_v63 }
 0xe8b   :  { %13193 = vmatprep.subr.bf16.mxu1 %v16519_v9  ;;  %13225 = vmatprep.subr.bf16.mxu0 %v16522_v20 }
 0xf20   :  { %v6665_v40 = vpop.f32.mrb[56].mxu1  ;;  %v6736_v10 = vpop.f32.mrb[58].mxu0 }
 0xf21   :  { %v6891_v45 = vrot.slane %v6665_v40, 4  ;;  %v6893_v8 = vrot.slane %v6736_v10, 4  ;;  %v6667_v46 = vpop.f32.mrb[57].mxu1  ;;  %v6738_v15 = vpop.f32.mrb[59].mxu0 }
 0xf22   :  { %v6892_v49 = vrot.slane %v6667_v46, 4  ;;  %v6894_v58 = vrot.slane %v6738_v15, 4 }
 0xf23   :  { %v6899_v21 = vadd.f32 %v6891_v45, %v6883_v27  ;;  %v6901_v24 = vadd.f32 %v6893_v8, %v6885_v25  ;;  %v17826_v27 = vld [vmem:[#allocation44_spill] sm:$0xff]  ;;  %v17827_v25 = vld [vmem:[#allocation37_spill] sm:$0xff] }
 0xf24   :  { %v6900_v6 = vadd.f32 %v6892_v49, %v6884_v37  ;;  %v6902_v0 = vadd.f32 %v6894_v58, %v6886_v47  ;;  %v17830_v49 = vld [vmem:[#allocation29_spill] sm:$0xff]  ;;  %v17833_v58 = vld [vmem:[#allocation32_spill] sm:$0xff] }
 0xf25   :  { %v17837_v37 = vld [vmem:[#allocation36_spill] sm:$0xff] }
 0xf26   :  { %v6907_v43 = vcombine.high %v6899_v21, %v6900_v6  ;;  %v6908_v14 = vcombine.high %v6901_v24, %v6902_v0  ;;  %v17834_v21 = vld [vmem:[#allocation33_spill] sm:$0xff]  ;;  %v17836_v24 = vld [vmem:[#allocation35_spill] sm:$0xff] }
 0xf27   :  { %v7496_v6 = vld [vmem:[#allocation7 + $0xc8] sm:$0xff]  ;;  %v7490_v0 = vld [vmem:[#allocation7 + $0x98] sm:$0xff] }
 0xf28   :  { %6911 = vst [vmem:[#allocation5] sm:$0x33] %v6907_v43  ;;  %6912 = vst [vmem:[#allocation5 + $0x8] sm:$0x33] %v6908_v14  ;;  %v7498_v43 = vld [vmem:[#allocation7 + $0xd8] sm:$0xff] }
 0xf40   :  { %v6807_v42 = vpop.f32.mrb[58].mxu1  ;;  %v6878_v29 = vpop.f32.mrb[60].mxu0 }
 0xf41   :  { %v6917_v2 = vadd.f32 %v6913_v51, %v6807_v42  ;;  %v6919_v61 = vadd.f32 %v6915_v54, %v6878_v29  ;;  %v6809_v33 = vpop.f32.mrb[59].mxu1  ;;  %v6880_v56 = vpop.f32.mrb[61].mxu0  ;;  %v16718_v42 = vpack.c.bf16 %v7498_v43, %v7490_v0  ;;  %v7487_v51 = vld [vmem:[#allocation7 + $0x80] sm:$0xff]  ;;  %v7489_v54 = vld [vmem:[#allocation7 + $0x90] sm:$0xff]  ;;  %v7570_v0 = vld [vmem:[#allocation7 + $0x318] sm:$0xff] }
 0xf42   :  { %v6918_v44 = vadd.f32 %v6914_v55, %v6809_v33  ;;  %v6920_v23 = vadd.f32 %v6916_v5, %v6880_v56  ;;  %v7495_v29 = vld [vmem:[#allocation7 + $0xc0] sm:$0xff]  ;;  %v7504_v33 = vld [vmem:[#allocation7 + $0x108] sm:$0xff]  ;;  %v7578_v43 = vld [vmem:[#allocation7 + $0x358] sm:$0xff] }
 0xf43   :  { %v7512_v55 = vld [vmem:[#allocation7 + $0x148] sm:$0xff] }
 0xf44   :  { %v6925_v36 = vcombine.low %v6917_v2, %v6918_v44  ;;  %v6926_v63 = vcombine.low %v6919_v61, %v6920_v23  ;;  %v16721_v2 = vpack.c.bf16 %v7495_v29, %v7487_v51  ;;  %v7497_v61 = vld [vmem:[#allocation7 + $0xd0] sm:$0xff]  ;;  %v16727_v5 = vpack.c.bf16 %v7512_v55, %v7504_v33  ;;  %v7506_v44 = vld [vmem:[#allocation7 + $0x118] sm:$0xff]  ;;  %v7575_v33 = vld [vmem:[#allocation7 + $0x340] sm:$0xff] }
 0xf45   :  { %v16725_v56 = vpack.c.bf16 %v7497_v61, %v7489_v54  ;;  %v7514_v23 = vld [vmem:[#allocation7 + $0x158] sm:$0xff]  ;;  %v7567_v61 = vld [vmem:[#allocation7 + $0x300] sm:$0xff]  ;;  %v7569_v55 = vld [vmem:[#allocation7 + $0x310] sm:$0xff] }
 0xf46   :  { %6929 = vst [vmem:[#allocation5] sm:$0xcc] %v6925_v36  ;;  %6930 = vst [vmem:[#allocation5 + $0x8] sm:$0xcc] %v6926_v63  ;;  %v7503_v36 = vld [vmem:[#allocation7 + $0x100] sm:$0xff]  ;;  %v16729_v63 = vpack.c.bf16 %v7514_v23, %v7506_v44  ;;  %v16777_v44 = vpack.c.bf16 %v7578_v43, %v7570_v0  ;;  %v7577_v23 = vld [vmem:[#allocation7 + $0x350] sm:$0xff] }
 0xf4d   :  { %v6931_v9 = vld [vmem:[#allocation5] sm:$0xff]  ;;  %v6932_v41 = vld [vmem:[#allocation5 + $0x8] sm:$0xff] }
 0xf4e   :  { %v11261_v20 = vmul.f32 -1.442695, %v6931_v9  ;;  %v11262_v13 = vmul.f32 -1.442695, %v6932_v41  ;;  %v6946_v60 = vrot.slane %v6932_v41, 4  ;;  %v7511_v9 = vld [vmem:[#allocation7 + $0x140] sm:$0xff] }
 0xf4f   :  { %v7513_v41 = vld [vmem:[#allocation7 + $0x150] sm:$0xff] }
 0xf50   :  { %14531 = vpow2.f32 %v11261_v20  ;;  %v7505_v20 = vld [vmem:[#allocation7 + $0x110] sm:$0xff] }
 0xf51   :  { %14533 = vpow2.f32 %v11262_v13  ;;  %v16732_v13 = vpack.c.bf16 %v7511_v9, %v7503_v36  ;;  %v7584_v36 = vld [vmem:[#allocation7 + $0x388] sm:$0xff] }
 0xf52   :  { %v7592_v9 = vld [vmem:[#allocation7 + $0x3c8] sm:$0xff] }
 0xf5a   :  { %v14532_v52 = vpop.eup %14531 }
 0xf5b   :  { %v6939_v31 = vadd.f32 1.0, %v14532_v52  ;;  %v14534_v16 = vpop.eup %14533  ;;  %v7520_v52 = vld [vmem:[#allocation7 + $0x188] sm:$0xff] }
 0xf5c   :  { %v6940_v22 = vadd.f32 1.0, %v14534_v16  ;;  %v16736_v16 = vpack.c.bf16 %v7513_v41, %v7505_v20  ;;  %v7586_v20 = vld [vmem:[#allocation7 + $0x398] sm:$0xff] }
 0xf5d   :  { %14535 = vrcp.f32 %v6939_v31  ;;  %v7528_v31 = vld [vmem:[#allocation7 + $0x1c8] sm:$0xff]  ;;  %v7594_v41 = vld [vmem:[#allocation7 + $0x3d8] sm:$0xff] }
 0xf5e   :  { %14537 = vtanh.f32 %v6946_v60  ;;  %v7522_v60 = vld [vmem:[#allocation7 + $0x198] sm:$0xff] }
 0xf5f   :  { %14539 = vrcp.f32 %v6940_v22  ;;  %v7527_v22 = vld [vmem:[#allocation7 + $0x1c0] sm:$0xff] }
 0xf67   :  { %v14536_v39 = vpop.eup %14535 }
 0xf68   :  { %v6950_v53 = vrot.slane %v14536_v39, 4  ;;  %v14538_v48 = vpop.eup %14537 }
 0xf69   :  { %v6953_v40 = vmul.f32 %v14538_v48, %v14536_v39  ;;  %v14540_v45 = vpop.eup %14539  ;;  %v16738_v39 = vpack.c.bf16 %v7528_v31, %v7520_v52  ;;  %v7519_v48 = vld [vmem:[#allocation7 + $0x180] sm:$0xff]  ;;  %v16780_v52 = vpack.c.bf16 %v7575_v33, %v7567_v61  ;;  %v16784_v31 = vpack.c.bf16 %v7577_v23, %v7569_v55  ;;  %v7375_v61 = vld [vmem:[#allocation2 + $0x8] sm:$0xc0]  ;;  %v7377_v33 = vld [vmem:[#allocation2 + $0x18] sm:$0xc0] }
 0xf6a   :  { %v6952_v3 = vmul.f32 %v6950_v53, %v16529_v38  ;;  %v17825_v38 = vld [vmem:[#allocation43_spill] sm:$0xff]  ;;  %v7530_v53 = vld [vmem:[#allocation7 + $0x1d8] sm:$0xff] }
 0xf6c   :  { %v16668_v10 = vadd.f32 %v6953_v40, %v6952_v3  ;;  %v16741_v3 = vpack.c.bf16 %v7530_v53, %v7522_v60  ;;  %v7521_v40 = vld [vmem:[#allocation7 + $0x190] sm:$0xff]  ;;  %v16786_v60 = vpack.c.bf16 %v7592_v9, %v7584_v36  ;;  %v7583_v53 = vld [vmem:[#allocation7 + $0x380] sm:$0xff] }
 0xf6e   :  { %14541 = vtanh.f32 %v16668_v10 }
 0xf78   :  { %v14542_v8 = vpop.eup %14541 }
 0xf79   :  { %v6956_v46 = vmul.f32 %v14542_v8, %v14540_v45  ;;  %v7529_v45 = vld [vmem:[#allocation7 + $0x1d0] sm:$0xff]  ;;  %v7536_v8 = vld [vmem:[#allocation7 + $0x208] sm:$0xff] }
 0xf7b   :  { %v6958_v15 = vcombine.low %v6956_v46, %v6956_v46  ;;  %6961 = vst [vmem:[#allocation4 + $0x18] sm:$0xc] %v6956_v46  ;;  %7155 = vmatmul.mubr.f32.vlgmr.msra.gmra.mrb[60].mxu1 %v6956_v46  ;;  %7226 = vmatmul.mubr.f32.vlgmr.msra.gmra.mrb[62].mxu0 %v6956_v46 }
 0xf7c   :  { %13195 = vmatpush1.bf16.msra.mxu1 %v16532_v18  ;;  %13227 = vmatpush1.bf16.msra.mxu0 %v16534_v17  ;;  %v17828_v18 = vld [vmem:[#allocation27_spill] sm:$0xff]  ;;  %v17829_v17 = vld [vmem:[#allocation28_spill] sm:$0xff] }
 0xf7d   :  { %6960 = vst [vmem:[#allocation4] sm:$0x30] %v6958_v15  ;;  %13197 = vmatprep.subr.bf16.mxu1 %v16538_v50  ;;  %13229 = vmatprep.subr.bf16.mxu0 %v16540_v57  ;;  %v17831_v50 = vld [vmem:[#allocation30_spill] sm:$0xff]  ;;  %v17832_v57 = vld [vmem:[#allocation31_spill] sm:$0xff] }
 0xf7e   :  { %7296 = vmatprep.mubr.f32.mxu1 %v17686_v19  ;;  %7367 = vmatprep.mubr.f32.mxu0 %v17686_v19  ;;  %v7538_v15 = vld [vmem:[#allocation7 + $0x218] sm:$0xff] }
 0xf80   :  { %13199 = vmatpush1.bf16.msra.mxu1 %v16547_v28  ;;  %13231 = vmatpush1.bf16.msra.mxu0 %v17825_v38  ;;  %v17835_v28 = vld [vmem:[#allocation34_spill] sm:$0xff] }
 0xf81   :  { %13201 = vmatprep.subr.bf16.mxu1 %v17826_v27  ;;  %13233 = vmatprep.subr.bf16.mxu0 %v17827_v25  ;;  %v7546_v38 = vld [vmem:[#allocation7 + $0x258] sm:$0xff]  ;;  %v16744_v27 = vpack.c.bf16 %v7527_v22, %v7519_v48  ;;  %v16748_v25 = vpack.c.bf16 %v7529_v45, %v7521_v40  ;;  %v7591_v48 = vld [vmem:[#allocation7 + $0x3c0] sm:$0xff]  ;;  %v7585_v22 = vld [vmem:[#allocation7 + $0x390] sm:$0xff]  ;;  %v16789_v40 = vpack.c.bf16 %v7594_v41, %v7586_v20 }
 0xf82   :  { %v7593_v45 = vld [vmem:[#allocation7 + $0x3d0] sm:$0xff] }
 0xf84   :  { %13203 = vmatpush1.bf16.msra.mxu1 %v17828_v18  ;;  %13235 = vmatpush1.bf16.msra.mxu0 %v17829_v17  ;;  %v7535_v17 = vld [vmem:[#allocation7 + $0x200] sm:$0xff] }
 0xf85   :  { %13205 = vmatprep.subr.bf16.mxu1 %v17830_v49  ;;  %13237 = vmatprep.subr.bf16.mxu0 %v17831_v50  ;;  %v7543_v49 = vld [vmem:[#allocation7 + $0x240] sm:$0xff]  ;;  %v7537_v50 = vld [vmem:[#allocation7 + $0x210] sm:$0xff] }
 0xf88   :  { %13207 = vmatpush1.bf16.msra.mxu1 %v17832_v57  ;;  %13239 = vmatpush1.bf16.msra.mxu0 %v17833_v58  ;;  %v16753_v57 = vpack.c.bf16 %v7546_v38, %v7538_v15  ;;  %v7545_v58 = vld [vmem:[#allocation7 + $0x250] sm:$0xff]  ;;  %v7478_v15 = vld [vmem:[#allocation7 + $0x38] sm:$0xff] }
 0xf89   :  { %13209 = vmatprep.subr.bf16.mxu1 %v17834_v21  ;;  %13241 = vmatprep.subr.bf16.mxu0 %v17835_v28  ;;  %v7552_v21 = vld [vmem:[#allocation7 + $0x288] sm:$0xff]  ;;  %v7486_v38 = vld [vmem:[#allocation7 + $0x78] sm:$0xff] }
 0xf8a   :  { %v7560_v28 = vld [vmem:[#allocation7 + $0x2c8] sm:$0xff] }
 0xf8c   :  { %13211 = vmatpush1.bf16.msra.mxu1 %v17836_v24  ;;  %13243 = vmatpush1.bf16.msra.mxu0 %v17837_v37  ;;  %v7554_v24 = vld [vmem:[#allocation7 + $0x298] sm:$0xff] }
 0xf8d   :  { %13213 = vmatprep.subr.bf16.mxu1 %v16591_v62  ;;  %13245 = vmatprep.subr.bf16.mxu0 %v16593_v30  ;;  %v7472_v62 = vld [vmem:[#allocation7 + $0x8] sm:$0xff]  ;;  %v7562_v37 = vld [vmem:[#allocation7 + $0x2d8] sm:$0xff] }
 0xf8e   :  { %v7480_v30 = vld [vmem:[#allocation7 + $0x48] sm:$0xff] }
 0xf90   :  { %13215 = vmatpush1.bf16.msra.mxu1 %v16597_v11  ;;  %13247 = vmatpush1.bf16.msra.mxu0 %v16599_v12  ;;  %v7474_v11 = vld [vmem:[#allocation7 + $0x18] sm:$0xff]  ;;  %v16705_v12 = vpack.c.bf16 %v7480_v30, %v7472_v62  ;;  %v16756_v62 = vpack.c.bf16 %v7543_v49, %v7535_v17  ;;  %v16760_v30 = vpack.c.bf16 %v7545_v58, %v7537_v50 }
 0xf91   :  { %13217 = vmatprep.subr.bf16.mxu1 %v16603_v26  ;;  %13249 = vmatprep.subr.bf16.mxu0 %v16605_v32  ;;  %v7482_v26 = vld [vmem:[#allocation7 + $0x58] sm:$0xff]  ;;  %v7471_v32 = vld [vmem:[#allocation7] sm:$0xff]  ;;  %v16792_v17 = vpack.c.bf16 %v7591_v48, %v7583_v53  ;;  %v16796_v49 = vpack.c.bf16 %v7593_v45, %v7585_v22  ;;  %v16801_v58 = vpack.c.bf16 %v7486_v38, %v7478_v15  ;;  %v7408_v15 = vld [vmem:[#allocation2 + $0x60] sm:$0x3] }
 0xf92   :  { %v7410_v38 = vld [vmem:[#allocation2 + $0x70] sm:$0x3] }
 0xf94   :  { %13219 = vmatpush1.bf16.msra.mxu1 %v16609_v1  ;;  %13251 = vmatpush1.bf16.msra.mxu0 %v16611_v35  ;;  %v7479_v1 = vld [vmem:[#allocation7 + $0x40] sm:$0xff]  ;;  %v16707_v35 = vpack.c.bf16 %v7482_v26, %v7474_v11  ;;  %v16762_v11 = vpack.c.bf16 %v7560_v28, %v7552_v21 }
 0xf95   :  { %13221 = vmatprep.subr.bf16.mxu1 %v16615_v4  ;;  %13253 = vmatprep.subr.bf16.mxu0 %v16617_v7  ;;  %v16709_v4 = vpack.c.bf16 %v7479_v1, %v7471_v32  ;;  %v7473_v7 = vld [vmem:[#allocation7 + $0x10] sm:$0xff]  ;;  %v7551_v26 = vld [vmem:[#allocation7 + $0x280] sm:$0xff] }
 0xf96   :  { %v7559_v32 = vld [vmem:[#allocation7 + $0x2c0] sm:$0xff]  ;;  %v7553_v1 = vld [vmem:[#allocation7 + $0x290] sm:$0xff] }
 0xf97   :  { %v16768_v51 = vpack.c.bf16 %v7559_v32, %v7551_v26 }
 0xf98   :  { %13223 = vmatpush1.bf16.msra.mxu1 %v16621_v59  ;;  %13255 = vmatpush1.bf16.msra.mxu0 %v16623_v34  ;;  %v7481_v59 = vld [vmem:[#allocation7 + $0x50] sm:$0xff]  ;;  %v7488_v34 = vld [vmem:[#allocation7 + $0x88] sm:$0xff] }
 0xf99   :  { %13257 = vmatprep.subr.bf16.mxu1 %v16705_v12  ;;  %v16712_v47 = vpack.c.bf16 %v7481_v59, %v7473_v7  ;;  %13289 = vmatprep.subr.bf16.mxu0 %v16707_v35  ;;  %v16716_v14 = vpack.c.bf16 %v7496_v6, %v7488_v34  ;;  %v16765_v7 = vpack.c.bf16 %v7562_v37, %v7554_v24  ;;  %v7561_v59 = vld [vmem:[#allocation7 + $0x2d0] sm:$0xff]  ;;  %v7568_v34 = vld [vmem:[#allocation7 + $0x308] sm:$0xff] }
 0xf9a   :  { %v7576_v6 = vld [vmem:[#allocation7 + $0x348] sm:$0xff]  ;;  %v16772_v29 = vpack.c.bf16 %v7561_v59, %v7553_v1  ;;  %v7374_v1 = vld [vmem:[#allocation2] sm:$0xc0]  ;;  %v7376_v59 = vld [vmem:[#allocation2 + $0x10] sm:$0xc0] }
 0xf9b   :  { %7297 = vmatmul.mubr.f32.vlgmr.msra.gmra.mrb[62].mxu1 %v6956_v46  ;;  %7368 = vmatmul.mubr.f32.vlgmr.msra.gmra.mrb[64].mxu0 %v6956_v46  ;;  %v7544_v46 = vld [vmem:[#allocation7 + $0x248] sm:$0xff]  ;;  %v16774_v54 = vpack.c.bf16 %v7576_v6, %v7568_v34 }
 0xf9c   :  { %7663 = vmatprep.mubr.f32.mxu1 %v17686_v19  ;;  %7734 = vmatprep.mubr.f32.mxu0 %v17686_v19  ;;  %v16750_v18 = vpack.c.bf16 %v7544_v46, %v7536_v8  ;;  %v7476_v8 = vld [vmem:[#allocation7 + $0x28] sm:$0xff] }
 0xf9d   :  { %13259 = vmatpush1.bf16.msra.mxu1 %v16709_v4  ;;  %13291 = vmatpush1.bf16.msra.mxu0 %v16712_v47  ;;  %v7484_v46 = vld [vmem:[#allocation7 + $0x68] sm:$0xff] }
 0xf9e   :  { %13261 = vmatprep.subr.bf16.mxu1 %v16716_v14  ;;  %13293 = vmatprep.subr.bf16.mxu0 %v16718_v42  ;;  %v16798_v50 = vpack.c.bf16 %v7484_v46, %v7476_v8 }
 0xfa1   :  { %13263 = vmatpush1.bf16.msra.mxu1 %v16721_v2  ;;  %13295 = vmatpush1.bf16.msra.mxu0 %v16725_v56 }
 0xfa2   :  { %13265 = vmatprep.subr.bf16.mxu1 %v16727_v5  ;;  %13297 = vmatprep.subr.bf16.mxu0 %v16729_v63 }
 0xfa5   :  { %13267 = vmatpush1.bf16.msra.mxu1 %v16732_v13  ;;  %13299 = vmatpush1.bf16.msra.mxu0 %v16736_v16 }
 0xfa6   :  { %13269 = vmatprep.subr.bf16.mxu1 %v16738_v39  ;;  %13301 = vmatprep.subr.bf16.mxu0 %v16741_v3 }
 0xfa9   :  { %13271 = vmatpush1.bf16.msra.mxu1 %v16744_v27  ;;  %13303 = vmatpush1.bf16.msra.mxu0 %v16748_v25 }
 0xfaa   :  { %13273 = vmatprep.subr.bf16.mxu1 %v16750_v18  ;;  %13305 = vmatprep.subr.bf16.mxu0 %v16753_v57 }
 0xfad   :  { %13275 = vmatpush1.bf16.msra.mxu1 %v16756_v62  ;;  %13307 = vmatpush1.bf16.msra.mxu0 %v16760_v30 }
 0xfae   :  { %13277 = vmatprep.subr.bf16.mxu1 %v16762_v11  ;;  %13309 = vmatprep.subr.bf16.mxu0 %v16765_v7 }
 0xfb1   :  { %13279 = vmatpush1.bf16.msra.mxu1 %v16768_v51  ;;  %13311 = vmatpush1.bf16.msra.mxu0 %v16772_v29 }
 0xfb2   :  { %13281 = vmatprep.subr.bf16.mxu1 %v16774_v54  ;;  %13313 = vmatprep.subr.bf16.mxu0 %v16777_v44 }
 0xfb5   :  { %13283 = vmatpush1.bf16.msra.mxu1 %v16780_v52  ;;  %13315 = vmatpush1.bf16.msra.mxu0 %v16784_v31 }
 0xfb6   :  { %13285 = vmatprep.subr.bf16.mxu1 %v16786_v60  ;;  %13317 = vmatprep.subr.bf16.mxu0 %v16789_v40 }
 0xfb9   :  { %13287 = vmatpush1.bf16.msra.mxu1 %v16792_v17  ;;  %13319 = vmatpush1.bf16.msra.mxu0 %v16796_v49 }
 0xfba   :  { %13321 = vmatprep.subr.bf16.mxu1 %v16798_v50  ;;  %13353 = vmatprep.subr.bf16.mxu0 %v16801_v58 }
0x104e   :  { %v7156_v21 = vpop.f32.mrb[60].mxu1  ;;  %v7227_v28 = vpop.f32.mrb[62].mxu0 }
0x104f   :  { %v7382_v24 = vrot.slane %v7156_v21, 2  ;;  %v7384_v37 = vrot.slane %v7227_v28, 2  ;;  %v7158_v26 = vpop.f32.mrb[61].mxu1  ;;  %v7229_v32 = vpop.f32.mrb[63].mxu0 }
0x1050   :  { %v7383_v34 = vrot.slane %v7158_v26, 2  ;;  %v7385_v6 = vrot.slane %v7229_v32, 2  ;;  %v7409_v26 = vld [vmem:[#allocation2 + $0x68] sm:$0x3]  ;;  %v7411_v32 = vld [vmem:[#allocation2 + $0x78] sm:$0x3] }
0x1051   :  { %v7390_v0 = vadd.f32 %v7382_v24, %v7374_v1  ;;  %v7392_v43 = vadd.f32 %v7384_v37, %v7376_v59 }
0x1052   :  { %v7391_v55 = vadd.f32 %v7383_v34, %v7375_v61  ;;  %v7393_v23 = vadd.f32 %v7385_v6, %v7377_v33 }
0x1054   :  { %v7398_v36 = vcombine.high %v7390_v0, %v7391_v55  ;;  %v7399_v9 = vcombine.high %v7392_v43, %v7393_v23 }
0x1056   :  { %v11263_v20 = vrot.slane %v7398_v36, 10  ;;  %v11264_v41 = vrot.slane %v7399_v9, 10 }
0x1058   :  { %7406 = vst [vmem:[#allocation5] sm:$0x33] %v11263_v20  ;;  %7407 = vst [vmem:[#allocation5 + $0x8] sm:$0x33] %v11264_v41 }
0x106e   :  { %v7298_v53 = vpop.f32.mrb[62].mxu1  ;;  %v7369_v48 = vpop.f32.mrb[64].mxu0 }
0x106f   :  { %v7416_v22 = vrot.slane %v7298_v53, 2  ;;  %v7418_v45 = vrot.slane %v7369_v48, 2  ;;  %v7300_v8 = vpop.f32.mrb[63].mxu1  ;;  %v7371_v46 = vpop.f32.mrb[65].mxu0 }
0x1070   :  { %v7417_v21 = vrot.slane %v7300_v8, 2  ;;  %v7419_v28 = vrot.slane %v7371_v46, 2 }
0x1071   :  { %v7424_v24 = vadd.f32 %v7416_v22, %v7408_v15  ;;  %v7426_v37 = vadd.f32 %v7418_v45, %v7410_v38  ;;  %v7475_v38 = vld [vmem:[#allocation7 + $0x20] sm:$0xff] }
0x1072   :  { %v7425_v1 = vadd.f32 %v7417_v21, %v7409_v26  ;;  %v7427_v59 = vadd.f32 %v7419_v28, %v7411_v32  ;;  %v7483_v21 = vld [vmem:[#allocation7 + $0x60] sm:$0xff]  ;;  %v7477_v28 = vld [vmem:[#allocation7 + $0x30] sm:$0xff]  ;;  %v7500_v26 = vld [vmem:[#allocation7 + $0xe8] sm:$0xff] }
0x1073   :  { %v7494_v32 = vld [vmem:[#allocation7 + $0xb8] sm:$0xff] }
0x1074   :  { %v7432_v34 = vcombine.low %v7424_v24, %v7425_v1  ;;  %v7433_v6 = vcombine.low %v7426_v37, %v7427_v59  ;;  %v7485_v24 = vld [vmem:[#allocation7 + $0x70] sm:$0xff]  ;;  %v7492_v37 = vld [vmem:[#allocation7 + $0xa8] sm:$0xff]  ;;  %v7502_v1 = vld [vmem:[#allocation7 + $0xf8] sm:$0xff] }
0x1076   :  { %v7434_v0 = vrot.slane %v7432_v34, 6  ;;  %v7435_v43 = vrot.slane %v7433_v6, 6  ;;  %v16811_v6 = vpack.c.bf16 %v7483_v21, %v7475_v38 }
0x1078   :  { %7438 = vst [vmem:[#allocation5] sm:$0xcc] %v7434_v0  ;;  %7439 = vst [vmem:[#allocation5 + $0x8] sm:$0xcc] %v7435_v43  ;;  %v16813_v0 = vpack.c.bf16 %v7485_v24, %v7477_v28  ;;  %v7499_v43 = vld [vmem:[#allocation7 + $0xe0] sm:$0xff]  ;;  %v7509_v28 = vld [vmem:[#allocation7 + $0x130] sm:$0xff] }
0x1079   :  { %v7517_v24 = vld [vmem:[#allocation7 + $0x170] sm:$0xff] }
0x107f   :  { %v7440_v61 = vld [vmem:[#allocation5] sm:$0xff]  ;;  %v7441_v55 = vld [vmem:[#allocation5 + $0x8] sm:$0xff] }
0x1080   :  { %v11265_v33 = vmul.f32 -1.442695, %v7440_v61  ;;  %v11266_v23 = vmul.f32 -1.442695, %v7441_v55  ;;  %v7455_v20 = vrot.slane %v7441_v55, 4  ;;  %v16819_v55 = vpack.c.bf16 %v7502_v1, %v7494_v32  ;;  %v7526_v32 = vld [vmem:[#allocation7 + $0x1b8] sm:$0xff] }
0x1081   :  { %v7534_v1 = vld [vmem:[#allocation7 + $0x1f8] sm:$0xff] }
0x1082   :  { %14543 = vpow2.f32 %v11265_v33  ;;  %v16817_v33 = vpack.c.bf16 %v7500_v26, %v7492_v37  ;;  %v7524_v37 = vld [vmem:[#allocation7 + $0x1a8] sm:$0xff] }
0x1083   :  { %14545 = vpow2.f32 %v11266_v23  ;;  %v7493_v23 = vld [vmem:[#allocation7 + $0xb0] sm:$0xff]  ;;  %v7532_v26 = vld [vmem:[#allocation7 + $0x1e8] sm:$0xff] }
0x108c   :  { %v14544_v36 = vpop.eup %14543 }
0x108d   :  { %v7448_v9 = vadd.f32 1.0, %v14544_v36  ;;  %v14546_v41 = vpop.eup %14545  ;;  %v7501_v36 = vld [vmem:[#allocation7 + $0xf0] sm:$0xff] }
0x108e   :  { %v7449_v45 = vadd.f32 1.0, %v14546_v41  ;;  %v7510_v41 = vld [vmem:[#allocation7 + $0x138] sm:$0xff] }
0x108f   :  { %14547 = vrcp.f32 %v7448_v9  ;;  %v7508_v9 = vld [vmem:[#allocation7 + $0x128] sm:$0xff] }
0x1090   :  { %14549 = vtanh.f32 %v7455_v20  ;;  %v7516_v20 = vld [vmem:[#allocation7 + $0x168] sm:$0xff] }
0x1091   :  { %14551 = vrcp.f32 %v7449_v45  ;;  %v16828_v45 = vpack.c.bf16 %v7501_v36, %v7493_v23  ;;  %v16832_v38 = vpack.c.bf16 %v7516_v20, %v7508_v9  ;;  %v16846_v23 = vpack.c.bf16 %v7532_v26, %v7524_v37  ;;  %v7525_v9 = vld [vmem:[#allocation7 + $0x1b0] sm:$0xff] }
0x1092   :  { %v16848_v36 = vpack.c.bf16 %v7534_v1, %v7526_v32  ;;  %v7533_v20 = vld [vmem:[#allocation7 + $0x1f0] sm:$0xff] }
0x1093   :  { %17838 = vst [vmem:[#allocation42_spill] sm:$0xff] %v16828_v45  ;;  %17839 = vst [vmem:[#allocation43_spill] sm:$0xff] %v16832_v38  ;;  %v7541_v32 = vld [vmem:[#allocation7 + $0x230] sm:$0xff] }
0x1094   :  { %17843 = vst [vmem:[#allocation28_spill] sm:$0xff] %v16846_v23  ;;  %17844 = vst [vmem:[#allocation29_spill] sm:$0xff] %v16848_v36  ;;  %v7549_v1 = vld [vmem:[#allocation7 + $0x270] sm:$0xff] }
0x1099   :  { %v14548_v53 = vpop.eup %14547 }
0x109a   :  { %v7459_v48 = vrot.slane %v14548_v53, 4  ;;  %v14550_v22 = vpop.eup %14549 }
0x109b   :  { %v7462_v46 = vmul.f32 %v14550_v22, %v14548_v53  ;;  %v14552_v59 = vpop.eup %14551  ;;  %v7518_v53 = vld [vmem:[#allocation7 + $0x178] sm:$0xff] }
0x109c   :  { %v7461_v8 = vmul.f32 %v7459_v48, %v16668_v10  ;;  %v7491_v10 = vld [vmem:[#allocation7 + $0xa0] sm:$0xff]  ;;  %v16834_v21 = vpack.c.bf16 %v7518_v53, %v7510_v41  ;;  %v7540_v41 = vld [vmem:[#allocation7 + $0x228] sm:$0xff] }
0x109d   :  { %v16826_v22 = vpack.c.bf16 %v7499_v43, %v7491_v10  ;;  %v7523_v10 = vld [vmem:[#allocation7 + $0x1a0] sm:$0xff]  ;;  %v7548_v53 = vld [vmem:[#allocation7 + $0x268] sm:$0xff] }
0x109e   :  { %v16808_v15 = vadd.f32 %v7462_v46, %v7461_v8  ;;  %v7507_v8 = vld [vmem:[#allocation7 + $0x120] sm:$0xff]  ;;  %17840 = vst [vmem:[#allocation44_spill] sm:$0xff] %v16834_v21  ;;  %v16858_v37 = vpack.c.bf16 %v7548_v53, %v7540_v41  ;;  %v7557_v53 = vld [vmem:[#allocation7 + $0x2b0] sm:$0xff] }
0x109f   :  { %v7515_v46 = vld [vmem:[#allocation7 + $0x160] sm:$0xff] }
0x10a0   :  { %14553 = vtanh.f32 %v16808_v15  ;;  %v7531_v43 = vld [vmem:[#allocation7 + $0x1e0] sm:$0xff]  ;;  %17847 = vst [vmem:[#allocation32_spill] sm:$0xff] %v16858_v37 }
0x10aa   :  { %v14554_v34 = vpop.eup %14553 }
0x10ab   :  { %v16815_v61 = vmul.f32 %v14554_v34, %v14552_v59  ;;  %v16840_v59 = vpack.c.bf16 %v7515_v46, %v7507_v8  ;;  %v16842_v34 = vpack.c.bf16 %v7517_v24, %v7509_v28  ;;  %v16852_v8 = vpack.c.bf16 %v7531_v43, %v7523_v10  ;;  %v7539_v28 = vld [vmem:[#allocation7 + $0x220] sm:$0xff] }
0x10ac   :  { %v16854_v46 = vpack.c.bf16 %v7533_v20, %v7525_v9  ;;  %v7547_v24 = vld [vmem:[#allocation7 + $0x260] sm:$0xff]  ;;  %v16866_v43 = vpack.c.bf16 %v7549_v1, %v7541_v32 }
0x10ad   :  { %v7467_v48 = vrot.slane %v16815_v61, 2  ;;  %7664 = vmatmul.mubr.f32.vlgmr.msra.gmra.mrb[64].mxu1 %v16815_v61  ;;  %7735 = vmatmul.mubr.f32.vlgmr.msra.gmra.mrb[66].mxu0 %v16815_v61  ;;  %17841 = vst [vmem:[#allocation37_spill] sm:$0xff] %v16840_v59  ;;  %17842 = vst [vmem:[#allocation27_spill] sm:$0xff] %v16842_v34  ;;  %v16864_v10 = vpack.c.bf16 %v7547_v24, %v7539_v28  ;;  %v7555_v9 = vld [vmem:[#allocation7 + $0x2a0] sm:$0xff] }
0x10ae   :  { %13323 = vmatpush1.bf16.msra.mxu1 %v16811_v6  ;;  %13355 = vmatpush1.bf16.msra.mxu0 %v16813_v0  ;;  %17845 = vst [vmem:[#allocation30_spill] sm:$0xff] %v16852_v8  ;;  %17846 = vst [vmem:[#allocation31_spill] sm:$0xff] %v16854_v46  ;;  %v7563_v20 = vld [vmem:[#allocation7 + $0x2e0] sm:$0xff] }
0x10af   :  { %7469 = vst [vmem:[#allocation4 + $0x18] ss:$-20 sps:$4 sm:$0xc3] %v7467_v48   ;;  %13325 = vmatprep.subr.bf16.mxu1 %v16817_v33  ;;  %13357 = vmatprep.subr.bf16.mxu0 %v16819_v55  ;;  %v7542_v48 = vld [vmem:[#allocation7 + $0x238] sm:$0xff]  ;;  %17849 = vst [vmem:[#allocation34_spill] sm:$0xff] %v16864_v10  ;;  %v16876_v28 = vpack.c.bf16 %v7563_v20, %v7555_v9  ;;  %v7571_v32 = vld [vmem:[#allocation7 + $0x320] sm:$0xff] }
0x10b0   :  { %7805 = vmatprep.mubr.f32.mxu1 %v17686_v19  ;;  %7876 = vmatprep.mubr.f32.mxu0 %v17686_v19  ;;  %17850 = vst [vmem:[#allocation35_spill] sm:$0xff] %v16866_v43  ;;  %v7579_v1 = vld [vmem:[#allocation7 + $0x360] sm:$0xff] }
0x10b1   :  { %v16888_v9 = vpack.c.bf16 %v7579_v1, %v7571_v32 }
0x10b2   :  { %13327 = vmatpush1.bf16.msra.mxu1 %v16826_v22  ;;  %13359 = vmatpush1.bf16.msra.mxu0 %v16828_v45  ;;  %v7550_v45 = vld [vmem:[#allocation7 + $0x278] sm:$0xff] }
0x10b3   :  { %13329 = vmatprep.subr.bf16.mxu1 %v16832_v38  ;;  %13361 = vmatprep.subr.bf16.mxu0 %v16834_v21  ;;  %v16860_v26 = vpack.c.bf16 %v7550_v45, %v7542_v48  ;;  %v7556_v21 = vld [vmem:[#allocation7 + $0x2a8] sm:$0xff]  ;;  %v7558_v38 = vld [vmem:[#allocation7 + $0x2b8] sm:$0xff]  ;;  %v7565_v48 = vld [vmem:[#allocation7 + $0x2f0] sm:$0xff] }
0x10b4   :  { %v16878_v24 = vpack.c.bf16 %v7565_v48, %v7557_v53  ;;  %v7587_v53 = vld [vmem:[#allocation7 + $0x3a0] sm:$0xff]  ;;  %v7597_v48 = vld [vmem:[#allocation7 + $0x3f0] sm:$0xff] }
0x10b5   :  { %17848 = vst [vmem:[#allocation33_spill] sm:$0xff] %v16860_v26 }
0x10b6   :  { %13331 = vmatpush1.bf16.msra.mxu1 %v16840_v59  ;;  %13363 = vmatpush1.bf16.msra.mxu0 %v16842_v34  ;;  %v7564_v59 = vld [vmem:[#allocation7 + $0x2e8] sm:$0xff]  ;;  %v7566_v34 = vld [vmem:[#allocation7 + $0x2f8] sm:$0xff] }
0x10b7   :  { %13333 = vmatprep.subr.bf16.mxu1 %v16846_v23  ;;  %13365 = vmatprep.subr.bf16.mxu0 %v16848_v36  ;;  %v16870_v45 = vpack.c.bf16 %v7564_v59, %v7556_v21  ;;  %v16872_v41 = vpack.c.bf16 %v7566_v34, %v7558_v38  ;;  %v7572_v36 = vld [vmem:[#allocation7 + $0x328] sm:$0xff]  ;;  %v7574_v23 = vld [vmem:[#allocation7 + $0x338] sm:$0xff]  ;;  %v7573_v59 = vld [vmem:[#allocation7 + $0x330] sm:$0xff] }
0x10b8   :  { %v7581_v34 = vld [vmem:[#allocation7 + $0x370] sm:$0xff] }
0x10b9   :  { %v16890_v20 = vpack.c.bf16 %v7581_v34, %v7573_v59 }
0x10ba   :  { %13335 = vmatpush1.bf16.msra.mxu1 %v16852_v8  ;;  %13367 = vmatpush1.bf16.msra.mxu0 %v16854_v46  ;;  %v7580_v8 = vld [vmem:[#allocation7 + $0x368] sm:$0xff]  ;;  %v7582_v46 = vld [vmem:[#allocation7 + $0x378] sm:$0xff] }
0x10bb   :  { %13337 = vmatprep.subr.bf16.mxu1 %v16858_v37  ;;  %13369 = vmatprep.subr.bf16.mxu0 %v16860_v26  ;;  %v16882_v38 = vpack.c.bf16 %v7580_v8, %v7572_v36  ;;  %v16884_v21 = vpack.c.bf16 %v7582_v46, %v7574_v23  ;;  %v7588_v26 = vld [vmem:[#allocation7 + $0x3a8] sm:$0xff]  ;;  %v7590_v37 = vld [vmem:[#allocation7 + $0x3b8] sm:$0xff]  ;;  %v7595_v8 = vld [vmem:[#allocation7 + $0x3e0] sm:$0xff] }
0x10bc   :  { %v7589_v46 = vld [vmem:[#allocation7 + $0x3b0] sm:$0xff]  ;;  %v16900_v32 = vpack.c.bf16 %v7595_v8, %v7587_v53 }
0x10bd   :  { %v16902_v1 = vpack.c.bf16 %v7597_v48, %v7589_v46 }
0x10be   :  { %13339 = vmatpush1.bf16.msra.mxu1 %v16864_v10  ;;  %13371 = vmatpush1.bf16.msra.mxu0 %v16866_v43  ;;  %v7596_v10 = vld [vmem:[#allocation7 + $0x3e8] sm:$0xff]  ;;  %v7598_v43 = vld [vmem:[#allocation7 + $0x3f8] sm:$0xff] }
0x10bf   :  { %13341 = vmatprep.subr.bf16.mxu1 %v16870_v45  ;;  %13373 = vmatprep.subr.bf16.mxu0 %v16872_v41  ;;  %v16894_v23 = vpack.c.bf16 %v7596_v10, %v7588_v26  ;;  %v16896_v36 = vpack.c.bf16 %v7598_v43, %v7590_v37 }
0x10c2   :  { %13343 = vmatpush1.bf16.msra.mxu1 %v16876_v28  ;;  %13375 = vmatpush1.bf16.msra.mxu0 %v16878_v24 }
0x10c3   :  { %13345 = vmatprep.subr.bf16.mxu1 %v16882_v38  ;;  %13377 = vmatprep.subr.bf16.mxu0 %v16884_v21 }
0x10c6   :  { %13347 = vmatpush1.bf16.msra.mxu1 %v16888_v9  ;;  %13379 = vmatpush1.bf16.msra.mxu0 %v16890_v20 }
0x10c7   :  { %13349 = vmatprep.subr.bf16.mxu1 %v16894_v23  ;;  %13381 = vmatprep.subr.bf16.mxu0 %v16896_v36 }
0x10ca   :  { %13351 = vmatpush1.bf16.msra.mxu1 %v16900_v32  ;;  %13383 = vmatpush1.bf16.msra.mxu0 %v16902_v1 }
0x10cb   :  { %13385 = vmatprep.subr.bf16.mxu1 %v16705_v12  ;;  %13417 = vmatprep.subr.bf16.mxu0 %v16707_v35  ;;  %v7883_v35 = vld [vmem:[#allocation2 + $0x40] sm:$0x3] }
0x10cd   :  { %7806 = vmatmul.mubr.f32.vlgmr.msra.gmra.mrb[66].mxu1 %v16815_v61  ;;  %7877 = vmatmul.mubr.f32.vlgmr.msra.gmra.mrb[68].mxu0 %v16815_v61 }
0x10ce   :  { %13387 = vmatpush1.bf16.msra.mxu1 %v16709_v4  ;;  %13419 = vmatpush1.bf16.msra.mxu0 %v16712_v47  ;;  %v7885_v47 = vld [vmem:[#allocation2 + $0x50] sm:$0x3] }
0x10cf   :  { %13389 = vmatprep.subr.bf16.mxu1 %v16716_v14  ;;  %13421 = vmatprep.subr.bf16.mxu0 %v16718_v42 }
0x10d0   :  { %8154 = vmatprep.mubr.f32.mxu1 %v17686_v19  ;;  %8225 = vmatprep.mubr.f32.mxu0 %v17686_v19 }
0x10d2   :  { %13391 = vmatpush1.bf16.msra.mxu1 %v16721_v2  ;;  %13423 = vmatpush1.bf16.msra.mxu0 %v16725_v56  ;;  %v7884_v56 = vld [vmem:[#allocation2 + $0x48] sm:$0x3] }
0x10d3   :  { %13393 = vmatprep.subr.bf16.mxu1 %v16727_v5  ;;  %13425 = vmatprep.subr.bf16.mxu0 %v16729_v63  ;;  %v7886_v63 = vld [vmem:[#allocation2 + $0x58] sm:$0x3] }
0x10d6   :  { %13395 = vmatpush1.bf16.msra.mxu1 %v16732_v13  ;;  %13427 = vmatpush1.bf16.msra.mxu0 %v16736_v16 }
0x10d7   :  { %13397 = vmatprep.subr.bf16.mxu1 %v16738_v39  ;;  %13429 = vmatprep.subr.bf16.mxu0 %v16741_v3 }
0x10da   :  { %13399 = vmatpush1.bf16.msra.mxu1 %v16744_v27  ;;  %13431 = vmatpush1.bf16.msra.mxu0 %v16748_v25 }
0x10db   :  { %13401 = vmatprep.subr.bf16.mxu1 %v16750_v18  ;;  %13433 = vmatprep.subr.bf16.mxu0 %v16753_v57 }
0x10de   :  { %13403 = vmatpush1.bf16.msra.mxu1 %v16756_v62  ;;  %13435 = vmatpush1.bf16.msra.mxu0 %v16760_v30 }
0x10df   :  { %13405 = vmatprep.subr.bf16.mxu1 %v16762_v11  ;;  %13437 = vmatprep.subr.bf16.mxu0 %v16765_v7  ;;  %v7901_v11 = vld [vmem:[#allocation2 + $0x20] sm:$0xc0]  ;;  %v7903_v7 = vld [vmem:[#allocation2 + $0x30] sm:$0xc0] }
0x10e2   :  { %13407 = vmatpush1.bf16.msra.mxu1 %v16768_v51  ;;  %13439 = vmatpush1.bf16.msra.mxu0 %v16772_v29 }
0x10e3   :  { %13409 = vmatprep.subr.bf16.mxu1 %v16774_v54  ;;  %13441 = vmatprep.subr.bf16.mxu0 %v16777_v44 }
0x10e6   :  { %13411 = vmatpush1.bf16.msra.mxu1 %v16780_v52  ;;  %13443 = vmatpush1.bf16.msra.mxu0 %v16784_v31  ;;  %v7902_v52 = vld [vmem:[#allocation2 + $0x28] sm:$0xc0]  ;;  %v7904_v31 = vld [vmem:[#allocation2 + $0x38] sm:$0xc0] }
0x10e7   :  { %13413 = vmatprep.subr.bf16.mxu1 %v16786_v60  ;;  %13445 = vmatprep.subr.bf16.mxu0 %v16789_v40 }
0x10ea   :  { %13415 = vmatpush1.bf16.msra.mxu1 %v16792_v17  ;;  %13447 = vmatpush1.bf16.msra.mxu0 %v16796_v49 }
0x10eb   :  { %13449 = vmatprep.subr.bf16.mxu1 %v16798_v50  ;;  %13481 = vmatprep.subr.bf16.mxu0 %v16801_v58 }
0x1180   :  { %v7665_v12 = vpop.f32.mrb[64].mxu1  ;;  %v7736_v4 = vpop.f32.mrb[66].mxu0 }
0x1181   :  { %v7887_v14 = vadd.f32 %v7883_v35, %v7665_v12  ;;  %v7889_v42 = vadd.f32 %v7885_v47, %v7736_v4  ;;  %v7667_v2 = vpop.f32.mrb[65].mxu1  ;;  %v7738_v5 = vpop.f32.mrb[67].mxu0 }
0x1182   :  { %v7888_v13 = vadd.f32 %v7884_v56, %v7667_v2  ;;  %v7890_v16 = vadd.f32 %v7886_v63, %v7738_v5  ;;  %v17852_v2 = vld [vmem:[#allocation43_spill] sm:$0xff]  ;;  %v17853_v56 = vld [vmem:[#allocation44_spill] sm:$0xff] }
0x1183   :  { %v17856_v5 = vld [vmem:[#allocation28_spill] sm:$0xff]  ;;  %v17859_v63 = vld [vmem:[#allocation31_spill] sm:$0xff] }
0x1184   :  { %v7895_v39 = vcombine.low %v7887_v14, %v7888_v13  ;;  %v7896_v3 = vcombine.low %v7889_v42, %v7890_v16  ;;  %v17860_v13 = vld [vmem:[#allocation32_spill] sm:$0xff]  ;;  %v17862_v16 = vld [vmem:[#allocation34_spill] sm:$0xff] }
0x1186   :  { %7899 = vst [vmem:[#allocation5] sm:$0x33] %v7895_v39  ;;  %7900 = vst [vmem:[#allocation5 + $0x8] sm:$0x33] %v7896_v3  ;;  %v17863_v39 = vld [vmem:[#allocation35_spill] sm:$0xff] }
0x11a0   :  { %v7807_v27 = vpop.f32.mrb[66].mxu1  ;;  %v7878_v25 = vpop.f32.mrb[68].mxu0 }
0x11a1   :  { %v7909_v18 = vrot.slane %v7807_v27, 4  ;;  %v7911_v57 = vrot.slane %v7878_v25, 4  ;;  %v7809_v62 = vpop.f32.mrb[67].mxu1  ;;  %v7880_v30 = vpop.f32.mrb[69].mxu0  ;;  %v8496_v27 = vld [vmem:[#allocation7 + $0xc8] sm:$0xff]  ;;  %v8490_v25 = vld [vmem:[#allocation7 + $0x98] sm:$0xff] }
0x11a2   :  { %v7910_v51 = vrot.slane %v7809_v62, 4  ;;  %v7912_v29 = vrot.slane %v7880_v30, 4  ;;  %v8487_v30 = vld [vmem:[#allocation7 + $0x80] sm:$0xff] }
0x11a3   :  { %v7917_v54 = vadd.f32 %v7909_v18, %v7901_v11  ;;  %v7919_v44 = vadd.f32 %v7911_v57, %v7903_v7  ;;  %v8498_v18 = vld [vmem:[#allocation7 + $0xd8] sm:$0xff]  ;;  %v8495_v11 = vld [vmem:[#allocation7 + $0xc0] sm:$0xff]  ;;  %v8489_v7 = vld [vmem:[#allocation7 + $0x90] sm:$0xff] }
0x11a4   :  { %v7918_v60 = vadd.f32 %v7910_v51, %v7902_v52  ;;  %v7920_v40 = vadd.f32 %v7912_v29, %v7904_v31  ;;  %v16997_v62 = vpack.c.bf16 %v8498_v18, %v8490_v25  ;;  %v17000_v51 = vpack.c.bf16 %v8495_v11, %v8487_v30  ;;  %v8497_v29 = vld [vmem:[#allocation7 + $0xd0] sm:$0xff]  ;;  %v8570_v25 = vld [vmem:[#allocation7 + $0x318] sm:$0xff] }
0x11a5   :  { %v17004_v52 = vpack.c.bf16 %v8497_v29, %v8489_v7  ;;  %v8578_v18 = vld [vmem:[#allocation7 + $0x358] sm:$0xff]  ;;  %v8567_v29 = vld [vmem:[#allocation7 + $0x300] sm:$0xff] }
0x11a6   :  { %v7925_v17 = vcombine.high %v7917_v54, %v7918_v60  ;;  %v7926_v49 = vcombine.high %v7919_v44, %v7920_v40  ;;  %v8504_v54 = vld [vmem:[#allocation7 + $0x108] sm:$0xff]  ;;  %v8506_v60 = vld [vmem:[#allocation7 + $0x118] sm:$0xff] }
0x11a7   :  { %v8512_v44 = vld [vmem:[#allocation7 + $0x148] sm:$0xff]  ;;  %v8514_v40 = vld [vmem:[#allocation7 + $0x158] sm:$0xff] }
0x11a8   :  { %7929 = vst [vmem:[#allocation5] sm:$0xcc] %v7925_v17  ;;  %7930 = vst [vmem:[#allocation5 + $0x8] sm:$0xcc] %v7926_v49  ;;  %v17006_v31 = vpack.c.bf16 %v8512_v44, %v8504_v54  ;;  %v8503_v17 = vld [vmem:[#allocation7 + $0x100] sm:$0xff]  ;;  %v17008_v49 = vpack.c.bf16 %v8514_v40, %v8506_v60  ;;  %v8569_v44 = vld [vmem:[#allocation7 + $0x310] sm:$0xff]  ;;  %v17056_v60 = vpack.c.bf16 %v8578_v18, %v8570_v25 }
0x11a9   :  { %v8575_v54 = vld [vmem:[#allocation7 + $0x340] sm:$0xff]  ;;  %v8577_v40 = vld [vmem:[#allocation7 + $0x350] sm:$0xff] }
0x11af   :  { %v7931_v50 = vld [vmem:[#allocation5] sm:$0xff]  ;;  %v7932_v61 = vld [vmem:[#allocation5 + $0x8] sm:$0xff] }
0x11b0   :  { %v11267_v58 = vmul.f32 -1.442695, %v7931_v50  ;;  %v11268_v37 = vmul.f32 -1.442695, %v7932_v61  ;;  %v7946_v43 = vrot.slane %v7932_v61, 4  ;;  %v8511_v50 = vld [vmem:[#allocation7 + $0x140] sm:$0xff] }
0x11b1   :  { %v8513_v61 = vld [vmem:[#allocation7 + $0x150] sm:$0xff] }
0x11b2   :  { %14555 = vpow2.f32 %v11267_v58  ;;  %v8505_v58 = vld [vmem:[#allocation7 + $0x110] sm:$0xff] }
0x11b3   :  { %14557 = vpow2.f32 %v11268_v37  ;;  %v17011_v37 = vpack.c.bf16 %v8511_v50, %v8503_v17  ;;  %v8584_v17 = vld [vmem:[#allocation7 + $0x388] sm:$0xff] }
0x11b4   :  { %v8592_v50 = vld [vmem:[#allocation7 + $0x3c8] sm:$0xff] }
0x11bc   :  { %v14556_v26 = vpop.eup %14555 }
0x11bd   :  { %v7939_v10 = vadd.f32 1.0, %v14556_v26  ;;  %v14558_v59 = vpop.eup %14557  ;;  %v8520_v26 = vld [vmem:[#allocation7 + $0x188] sm:$0xff] }
0x11be   :  { %v7940_v46 = vadd.f32 1.0, %v14558_v59  ;;  %v17015_v59 = vpack.c.bf16 %v8513_v61, %v8505_v58  ;;  %v8586_v58 = vld [vmem:[#allocation7 + $0x398] sm:$0xff] }
0x11bf   :  { %14559 = vrcp.f32 %v7939_v10  ;;  %v8528_v10 = vld [vmem:[#allocation7 + $0x1c8] sm:$0xff]  ;;  %v8594_v61 = vld [vmem:[#allocation7 + $0x3d8] sm:$0xff] }
0x11c0   :  { %14561 = vtanh.f32 %v7946_v43  ;;  %v8522_v43 = vld [vmem:[#allocation7 + $0x198] sm:$0xff] }
0x11c1   :  { %14563 = vrcp.f32 %v7940_v46  ;;  %v8527_v46 = vld [vmem:[#allocation7 + $0x1c0] sm:$0xff] }
0x11c9   :  { %v14560_v34 = vpop.eup %14559 }
0x11ca   :  { %v7950_v53 = vrot.slane %v14560_v34, 4  ;;  %v14562_v8 = vpop.eup %14561 }
0x11cb   :  { %v7953_v12 = vmul.f32 %v14562_v8, %v14560_v34  ;;  %v14564_v4 = vpop.eup %14563  ;;  %v17017_v34 = vpack.c.bf16 %v8528_v10, %v8520_v26  ;;  %v8519_v8 = vld [vmem:[#allocation7 + $0x180] sm:$0xff]  ;;  %v17059_v26 = vpack.c.bf16 %v8575_v54, %v8567_v29  ;;  %v17063_v10 = vpack.c.bf16 %v8577_v40, %v8569_v44  ;;  %v8375_v29 = vld [vmem:[#allocation2 + $0x48] sm:$0xc]  ;;  %v8377_v54 = vld [vmem:[#allocation2 + $0x58] sm:$0xc] }
0x11cc   :  { %v7952_v48 = vmul.f32 %v7950_v53, %v16808_v15  ;;  %v17851_v15 = vld [vmem:[#allocation42_spill] sm:$0xff] }
0x11cd   :  { %v8530_v53 = vld [vmem:[#allocation7 + $0x1d8] sm:$0xff] }
0x11ce   :  { %v16947_v35 = vadd.f32 %v7953_v12, %v7952_v48  ;;  %v17020_v48 = vpack.c.bf16 %v8530_v53, %v8522_v43  ;;  %v8521_v12 = vld [vmem:[#allocation7 + $0x190] sm:$0xff]  ;;  %v17065_v43 = vpack.c.bf16 %v8592_v50, %v8584_v17  ;;  %v8583_v53 = vld [vmem:[#allocation7 + $0x380] sm:$0xff] }
0x11d0   :  { %14565 = vtanh.f32 %v16947_v35 }
0x11da   :  { %v14566_v47 = vpop.eup %14565 }
0x11db   :  { %v7956_v14 = vmul.f32 %v14566_v47, %v14564_v4  ;;  %v8529_v4 = vld [vmem:[#allocation7 + $0x1d0] sm:$0xff]  ;;  %v8536_v47 = vld [vmem:[#allocation7 + $0x208] sm:$0xff] }
0x11dd   :  { %7957 = vst [vmem:[#allocation4 + $0x10] sm:$0x3] %v7956_v14  ;;  %v7959_v42 = vcombine.low %v7956_v14, %v7956_v14  ;;  %8155 = vmatmul.mubr.f32.vlgmr.msra.gmra.mrb[68].mxu1 %v7956_v14  ;;  %8226 = vmatmul.mubr.f32.vlgmr.msra.gmra.mrb[70].mxu0 %v7956_v14 }
0x11de   :  { %13451 = vmatpush1.bf16.msra.mxu1 %v16811_v6  ;;  %13483 = vmatpush1.bf16.msra.mxu0 %v16813_v0  ;;  %v17854_v6 = vld [vmem:[#allocation37_spill] sm:$0xff]  ;;  %v17855_v0 = vld [vmem:[#allocation27_spill] sm:$0xff] }
0x11df   :  { %7961 = vst [vmem:[#allocation4 + $0x8] sm:$0xc0] %v7959_v42  ;;  %13453 = vmatprep.subr.bf16.mxu1 %v16817_v33  ;;  %13485 = vmatprep.subr.bf16.mxu0 %v16819_v55  ;;  %v17857_v33 = vld [vmem:[#allocation29_spill] sm:$0xff]  ;;  %v17858_v55 = vld [vmem:[#allocation30_spill] sm:$0xff] }
0x11e0   :  { %8296 = vmatprep.mubr.f32.mxu1 %v17686_v19  ;;  %8367 = vmatprep.mubr.f32.mxu0 %v17686_v19  ;;  %v8538_v42 = vld [vmem:[#allocation7 + $0x218] sm:$0xff] }
0x11e2   :  { %13455 = vmatpush1.bf16.msra.mxu1 %v16826_v22  ;;  %13487 = vmatpush1.bf16.msra.mxu0 %v17851_v15  ;;  %v17861_v22 = vld [vmem:[#allocation33_spill] sm:$0xff] }
0x11e3   :  { %13457 = vmatprep.subr.bf16.mxu1 %v17852_v2  ;;  %13489 = vmatprep.subr.bf16.mxu0 %v17853_v56  ;;  %v8546_v15 = vld [vmem:[#allocation7 + $0x258] sm:$0xff]  ;;  %v17023_v2 = vpack.c.bf16 %v8527_v46, %v8519_v8  ;;  %v17027_v56 = vpack.c.bf16 %v8529_v4, %v8521_v12  ;;  %v8591_v8 = vld [vmem:[#allocation7 + $0x3c0] sm:$0xff]  ;;  %v8585_v46 = vld [vmem:[#allocation7 + $0x390] sm:$0xff]  ;;  %v17068_v12 = vpack.c.bf16 %v8594_v61, %v8586_v58 }
0x11e4   :  { %v8593_v4 = vld [vmem:[#allocation7 + $0x3d0] sm:$0xff] }
0x11e6   :  { %13459 = vmatpush1.bf16.msra.mxu1 %v17854_v6  ;;  %13491 = vmatpush1.bf16.msra.mxu0 %v17855_v0  ;;  %v8535_v0 = vld [vmem:[#allocation7 + $0x200] sm:$0xff] }
0x11e7   :  { %13461 = vmatprep.subr.bf16.mxu1 %v17856_v5  ;;  %13493 = vmatprep.subr.bf16.mxu0 %v17857_v33  ;;  %v8543_v5 = vld [vmem:[#allocation7 + $0x240] sm:$0xff]  ;;  %v8537_v33 = vld [vmem:[#allocation7 + $0x210] sm:$0xff] }
0x11ea   :  { %13463 = vmatpush1.bf16.msra.mxu1 %v17858_v55  ;;  %13495 = vmatpush1.bf16.msra.mxu0 %v17859_v63  ;;  %v17032_v55 = vpack.c.bf16 %v8546_v15, %v8538_v42  ;;  %v8545_v63 = vld [vmem:[#allocation7 + $0x250] sm:$0xff]  ;;  %v8478_v42 = vld [vmem:[#allocation7 + $0x38] sm:$0xff] }
0x11eb   :  { %13465 = vmatprep.subr.bf16.mxu1 %v17860_v13  ;;  %13497 = vmatprep.subr.bf16.mxu0 %v17861_v22  ;;  %v8552_v13 = vld [vmem:[#allocation7 + $0x288] sm:$0xff]  ;;  %v8486_v15 = vld [vmem:[#allocation7 + $0x78] sm:$0xff] }
0x11ec   :  { %v8560_v22 = vld [vmem:[#allocation7 + $0x2c8] sm:$0xff] }
0x11ee   :  { %13467 = vmatpush1.bf16.msra.mxu1 %v17862_v16  ;;  %13499 = vmatpush1.bf16.msra.mxu0 %v17863_v39  ;;  %v8554_v16 = vld [vmem:[#allocation7 + $0x298] sm:$0xff] }
0x11ef   :  { %13469 = vmatprep.subr.bf16.mxu1 %v16870_v45  ;;  %13501 = vmatprep.subr.bf16.mxu0 %v16872_v41  ;;  %v8472_v45 = vld [vmem:[#allocation7 + $0x8] sm:$0xff]  ;;  %v8562_v39 = vld [vmem:[#allocation7 + $0x2d8] sm:$0xff] }
0x11f0   :  { %v8480_v41 = vld [vmem:[#allocation7 + $0x48] sm:$0xff] }
0x11f2   :  { %13471 = vmatpush1.bf16.msra.mxu1 %v16876_v28  ;;  %13503 = vmatpush1.bf16.msra.mxu0 %v16878_v24  ;;  %v8474_v28 = vld [vmem:[#allocation7 + $0x18] sm:$0xff]  ;;  %v16984_v24 = vpack.c.bf16 %v8480_v41, %v8472_v45  ;;  %v17035_v45 = vpack.c.bf16 %v8543_v5, %v8535_v0  ;;  %v17039_v41 = vpack.c.bf16 %v8545_v63, %v8537_v33 }
0x11f3   :  { %13473 = vmatprep.subr.bf16.mxu1 %v16882_v38  ;;  %13505 = vmatprep.subr.bf16.mxu0 %v16884_v21  ;;  %v8482_v38 = vld [vmem:[#allocation7 + $0x58] sm:$0xff]  ;;  %v8471_v21 = vld [vmem:[#allocation7] sm:$0xff]  ;;  %v17071_v0 = vpack.c.bf16 %v8591_v8, %v8583_v53  ;;  %v17075_v5 = vpack.c.bf16 %v8593_v4, %v8585_v46  ;;  %v17080_v63 = vpack.c.bf16 %v8486_v15, %v8478_v42  ;;  %v8408_v42 = vld [vmem:[#allocation2 + $0x20] sm:$0x30] }
0x11f4   :  { %v8410_v15 = vld [vmem:[#allocation2 + $0x30] sm:$0x30] }
0x11f6   :  { %13475 = vmatpush1.bf16.msra.mxu1 %v16888_v9  ;;  %13507 = vmatpush1.bf16.msra.mxu0 %v16890_v20  ;;  %v8479_v9 = vld [vmem:[#allocation7 + $0x40] sm:$0xff]  ;;  %v16986_v20 = vpack.c.bf16 %v8482_v38, %v8474_v28  ;;  %v17041_v28 = vpack.c.bf16 %v8560_v22, %v8552_v13 }
0x11f7   :  { %13477 = vmatprep.subr.bf16.mxu1 %v16894_v23  ;;  %13509 = vmatprep.subr.bf16.mxu0 %v16896_v36  ;;  %v16988_v23 = vpack.c.bf16 %v8479_v9, %v8471_v21  ;;  %v8473_v36 = vld [vmem:[#allocation7 + $0x10] sm:$0xff]  ;;  %v8551_v38 = vld [vmem:[#allocation7 + $0x280] sm:$0xff] }
0x11f8   :  { %v8559_v21 = vld [vmem:[#allocation7 + $0x2c0] sm:$0xff]  ;;  %v8553_v9 = vld [vmem:[#allocation7 + $0x290] sm:$0xff] }
0x11f9   :  { %v17047_v30 = vpack.c.bf16 %v8559_v21, %v8551_v38 }
0x11fa   :  { %13479 = vmatpush1.bf16.msra.mxu1 %v16900_v32  ;;  %13511 = vmatpush1.bf16.msra.mxu0 %v16902_v1  ;;  %v8481_v32 = vld [vmem:[#allocation7 + $0x50] sm:$0xff]  ;;  %v8488_v1 = vld [vmem:[#allocation7 + $0x88] sm:$0xff] }
0x11fb   :  { %13513 = vmatprep.subr.bf16.mxu1 %v16984_v24  ;;  %v16991_v3 = vpack.c.bf16 %v8481_v32, %v8473_v36  ;;  %13545 = vmatprep.subr.bf16.mxu0 %v16986_v20  ;;  %v16995_v57 = vpack.c.bf16 %v8496_v27, %v8488_v1  ;;  %v17044_v36 = vpack.c.bf16 %v8562_v39, %v8554_v16  ;;  %v8561_v32 = vld [vmem:[#allocation7 + $0x2d0] sm:$0xff]  ;;  %v8568_v1 = vld [vmem:[#allocation7 + $0x308] sm:$0xff] }
0x11fc   :  { %v8576_v27 = vld [vmem:[#allocation7 + $0x348] sm:$0xff]  ;;  %v17051_v11 = vpack.c.bf16 %v8561_v32, %v8553_v9  ;;  %v8374_v9 = vld [vmem:[#allocation2 + $0x40] sm:$0xc]  ;;  %v8376_v32 = vld [vmem:[#allocation2 + $0x50] sm:$0xc] }
0x11fd   :  { %8297 = vmatmul.mubr.f32.vlgmr.msra.gmra.mrb[70].mxu1 %v7956_v14  ;;  %8368 = vmatmul.mubr.f32.vlgmr.msra.gmra.mrb[72].mxu0 %v7956_v14  ;;  %v8544_v14 = vld [vmem:[#allocation7 + $0x248] sm:$0xff]  ;;  %v17053_v7 = vpack.c.bf16 %v8576_v27, %v8568_v1 }
0x11fe   :  { %8663 = vmatprep.mubr.f32.mxu1 %v17686_v19  ;;  %8734 = vmatprep.mubr.f32.mxu0 %v17686_v19  ;;  %v17029_v6 = vpack.c.bf16 %v8544_v14, %v8536_v47  ;;  %v8476_v47 = vld [vmem:[#allocation7 + $0x28] sm:$0xff] }
0x11ff   :  { %13515 = vmatpush1.bf16.msra.mxu1 %v16988_v23  ;;  %13547 = vmatpush1.bf16.msra.mxu0 %v16991_v3  ;;  %v8484_v14 = vld [vmem:[#allocation7 + $0x68] sm:$0xff] }
0x1200   :  { %13517 = vmatprep.subr.bf16.mxu1 %v16995_v57  ;;  %13549 = vmatprep.subr.bf16.mxu0 %v16997_v62  ;;  %v17077_v33 = vpack.c.bf16 %v8484_v14, %v8476_v47 }
0x1203   :  { %13519 = vmatpush1.bf16.msra.mxu1 %v17000_v51  ;;  %13551 = vmatpush1.bf16.msra.mxu0 %v17004_v52 }
0x1204   :  { %13521 = vmatprep.subr.bf16.mxu1 %v17006_v31  ;;  %13553 = vmatprep.subr.bf16.mxu0 %v17008_v49 }
0x1207   :  { %13523 = vmatpush1.bf16.msra.mxu1 %v17011_v37  ;;  %13555 = vmatpush1.bf16.msra.mxu0 %v17015_v59 }
0x1208   :  { %13525 = vmatprep.subr.bf16.mxu1 %v17017_v34  ;;  %13557 = vmatprep.subr.bf16.mxu0 %v17020_v48 }
0x120b   :  { %13527 = vmatpush1.bf16.msra.mxu1 %v17023_v2  ;;  %13559 = vmatpush1.bf16.msra.mxu0 %v17027_v56 }
0x120c   :  { %13529 = vmatprep.subr.bf16.mxu1 %v17029_v6  ;;  %13561 = vmatprep.subr.bf16.mxu0 %v17032_v55 }
0x120f   :  { %13531 = vmatpush1.bf16.msra.mxu1 %v17035_v45  ;;  %13563 = vmatpush1.bf16.msra.mxu0 %v17039_v41 }
0x1210   :  { %13533 = vmatprep.subr.bf16.mxu1 %v17041_v28  ;;  %13565 = vmatprep.subr.bf16.mxu0 %v17044_v36 }
0x1213   :  { %13535 = vmatpush1.bf16.msra.mxu1 %v17047_v30  ;;  %13567 = vmatpush1.bf16.msra.mxu0 %v17051_v11 }
0x1214   :  { %13537 = vmatprep.subr.bf16.mxu1 %v17053_v7  ;;  %13569 = vmatprep.subr.bf16.mxu0 %v17056_v60 }
0x1217   :  { %13539 = vmatpush1.bf16.msra.mxu1 %v17059_v26  ;;  %13571 = vmatpush1.bf16.msra.mxu0 %v17063_v10 }
0x1218   :  { %13541 = vmatprep.subr.bf16.mxu1 %v17065_v43  ;;  %13573 = vmatprep.subr.bf16.mxu0 %v17068_v12 }
0x121b   :  { %13543 = vmatpush1.bf16.msra.mxu1 %v17071_v0  ;;  %13575 = vmatpush1.bf16.msra.mxu0 %v17075_v5 }
0x121c   :  { %13577 = vmatprep.subr.bf16.mxu1 %v17077_v33  ;;  %13609 = vmatprep.subr.bf16.mxu0 %v17080_v63 }
0x12b0   :  { %v8156_v13 = vpop.f32.mrb[68].mxu1  ;;  %v8227_v22 = vpop.f32.mrb[70].mxu0 }
0x12b1   :  { %v8382_v16 = vrot.slane %v8156_v13, 6  ;;  %v8384_v39 = vrot.slane %v8227_v22, 6  ;;  %v8158_v38 = vpop.f32.mrb[69].mxu1  ;;  %v8229_v21 = vpop.f32.mrb[71].mxu0 }
0x12b2   :  { %v8383_v1 = vrot.slane %v8158_v38, 6  ;;  %v8385_v27 = vrot.slane %v8229_v21, 6  ;;  %v8409_v38 = vld [vmem:[#allocation2 + $0x28] sm:$0x30]  ;;  %v8411_v21 = vld [vmem:[#allocation2 + $0x38] sm:$0x30] }
0x12b3   :  { %v8390_v25 = vadd.f32 %v8382_v16, %v8374_v9  ;;  %v8392_v18 = vadd.f32 %v8384_v39, %v8376_v32 }
0x12b4   :  { %v8391_v44 = vadd.f32 %v8383_v1, %v8375_v29  ;;  %v8393_v40 = vadd.f32 %v8385_v27, %v8377_v54 }
0x12b6   :  { %v8398_v17 = vcombine.low %v8390_v25, %v8391_v44  ;;  %v8399_v50 = vcombine.low %v8392_v18, %v8393_v40 }
0x12b8   :  { %v11269_v58 = vrot.slane %v8398_v17, 10  ;;  %v11270_v61 = vrot.slane %v8399_v50, 10 }
0x12ba   :  { %8406 = vst [vmem:[#allocation5] sm:$0x33] %v11269_v58  ;;  %8407 = vst [vmem:[#allocation5 + $0x8] sm:$0x33] %v11270_v61 }
0x12d0   :  { %v8298_v53 = vpop.f32.mrb[70].mxu1  ;;  %v8369_v8 = vpop.f32.mrb[72].mxu0 }
0x12d1   :  { %v8416_v46 = vrot.slane %v8298_v53, 6  ;;  %v8418_v4 = vrot.slane %v8369_v8, 6  ;;  %v8300_v47 = vpop.f32.mrb[71].mxu1  ;;  %v8371_v14 = vpop.f32.mrb[73].mxu0 }
0x12d2   :  { %v8417_v13 = vrot.slane %v8300_v47, 6  ;;  %v8419_v22 = vrot.slane %v8371_v14, 6 }
0x12d3   :  { %v8424_v16 = vadd.f32 %v8416_v46, %v8408_v42  ;;  %v8426_v39 = vadd.f32 %v8418_v4, %v8410_v15  ;;  %v8475_v15 = vld [vmem:[#allocation7 + $0x20] sm:$0xff] }
0x12d4   :  { %v8425_v9 = vadd.f32 %v8417_v13, %v8409_v38  ;;  %v8427_v32 = vadd.f32 %v8419_v22, %v8411_v21  ;;  %v8483_v13 = vld [vmem:[#allocation7 + $0x60] sm:$0xff]  ;;  %v8477_v22 = vld [vmem:[#allocation7 + $0x30] sm:$0xff]  ;;  %v8500_v38 = vld [vmem:[#allocation7 + $0xe8] sm:$0xff] }
0x12d5   :  { %v8494_v21 = vld [vmem:[#allocation7 + $0xb8] sm:$0xff] }
0x12d6   :  { %v8432_v1 = vcombine.high %v8424_v16, %v8425_v9  ;;  %v8433_v27 = vcombine.high %v8426_v39, %v8427_v32  ;;  %v8485_v16 = vld [vmem:[#allocation7 + $0x70] sm:$0xff]  ;;  %v8492_v39 = vld [vmem:[#allocation7 + $0xa8] sm:$0xff]  ;;  %v8502_v9 = vld [vmem:[#allocation7 + $0xf8] sm:$0xff] }
0x12d8   :  { %v8434_v25 = vrot.slane %v8432_v1, 6  ;;  %v8435_v18 = vrot.slane %v8433_v27, 6  ;;  %v17090_v27 = vpack.c.bf16 %v8483_v13, %v8475_v15 }
0x12da   :  { %8438 = vst [vmem:[#allocation5] sm:$0xcc] %v8434_v25  ;;  %8439 = vst [vmem:[#allocation5 + $0x8] sm:$0xcc] %v8435_v18  ;;  %v17092_v25 = vpack.c.bf16 %v8485_v16, %v8477_v22  ;;  %v8499_v18 = vld [vmem:[#allocation7 + $0xe0] sm:$0xff]  ;;  %v8509_v22 = vld [vmem:[#allocation7 + $0x130] sm:$0xff] }
0x12db   :  { %v8517_v16 = vld [vmem:[#allocation7 + $0x170] sm:$0xff] }
0x12e1   :  { %v8440_v29 = vld [vmem:[#allocation5] sm:$0xff]  ;;  %v8441_v44 = vld [vmem:[#allocation5 + $0x8] sm:$0xff] }
0x12e2   :  { %v11271_v54 = vmul.f32 -1.442695, %v8440_v29  ;;  %v11272_v40 = vmul.f32 -1.442695, %v8441_v44  ;;  %v8455_v58 = vrot.slane %v8441_v44, 4  ;;  %v17098_v44 = vpack.c.bf16 %v8502_v9, %v8494_v21  ;;  %v8526_v21 = vld [vmem:[#allocation7 + $0x1b8] sm:$0xff] }
0x12e3   :  { %v8534_v9 = vld [vmem:[#allocation7 + $0x1f8] sm:$0xff] }
0x12e4   :  { %14567 = vpow2.f32 %v11271_v54  ;;  %v17096_v54 = vpack.c.bf16 %v8500_v38, %v8492_v39  ;;  %v8524_v39 = vld [vmem:[#allocation7 + $0x1a8] sm:$0xff] }
0x12e5   :  { %14569 = vpow2.f32 %v11272_v40  ;;  %v8493_v40 = vld [vmem:[#allocation7 + $0xb0] sm:$0xff]  ;;  %v8532_v38 = vld [vmem:[#allocation7 + $0x1e8] sm:$0xff] }
0x12ee   :  { %v14568_v17 = vpop.eup %14567 }
0x12ef   :  { %v8448_v50 = vadd.f32 1.0, %v14568_v17  ;;  %v14570_v61 = vpop.eup %14569  ;;  %v8501_v17 = vld [vmem:[#allocation7 + $0xf0] sm:$0xff] }
0x12f0   :  { %v8449_v4 = vadd.f32 1.0, %v14570_v61  ;;  %v8510_v61 = vld [vmem:[#allocation7 + $0x138] sm:$0xff] }
0x12f1   :  { %14571 = vrcp.f32 %v8448_v50  ;;  %v8508_v50 = vld [vmem:[#allocation7 + $0x128] sm:$0xff] }
0x12f2   :  { %14573 = vtanh.f32 %v8455_v58  ;;  %v8516_v58 = vld [vmem:[#allocation7 + $0x168] sm:$0xff] }
0x12f3   :  { %14575 = vrcp.f32 %v8449_v4  ;;  %v17107_v4 = vpack.c.bf16 %v8501_v17, %v8493_v40  ;;  %v17111_v15 = vpack.c.bf16 %v8516_v58, %v8508_v50  ;;  %v17125_v40 = vpack.c.bf16 %v8532_v38, %v8524_v39  ;;  %v8525_v50 = vld [vmem:[#allocation7 + $0x1b0] sm:$0xff] }
0x12f4   :  { %v17127_v17 = vpack.c.bf16 %v8534_v9, %v8526_v21  ;;  %v8533_v58 = vld [vmem:[#allocation7 + $0x1f0] sm:$0xff] }
0x12f5   :  { %17864 = vst [vmem:[#allocation36_spill] sm:$0xff] %v17107_v4  ;;  %17865 = vst [vmem:[#allocation42_spill] sm:$0xff] %v17111_v15  ;;  %v8541_v21 = vld [vmem:[#allocation7 + $0x230] sm:$0xff] }
0x12f6   :  { %17869 = vst [vmem:[#allocation27_spill] sm:$0xff] %v17125_v40  ;;  %17870 = vst [vmem:[#allocation28_spill] sm:$0xff] %v17127_v17  ;;  %v8549_v9 = vld [vmem:[#allocation7 + $0x270] sm:$0xff] }
0x12fb   :  { %v14572_v53 = vpop.eup %14571 }
0x12fc   :  { %v8459_v8 = vrot.slane %v14572_v53, 4  ;;  %v14574_v46 = vpop.eup %14573 }
0x12fd   :  { %v8462_v14 = vmul.f32 %v14574_v46, %v14572_v53  ;;  %v14576_v32 = vpop.eup %14575  ;;  %v8518_v53 = vld [vmem:[#allocation7 + $0x178] sm:$0xff] }
0x12fe   :  { %v8461_v47 = vmul.f32 %v8459_v8, %v16947_v35  ;;  %v8491_v35 = vld [vmem:[#allocation7 + $0xa0] sm:$0xff]  ;;  %v17113_v13 = vpack.c.bf16 %v8518_v53, %v8510_v61  ;;  %v8540_v61 = vld [vmem:[#allocation7 + $0x228] sm:$0xff] }
0x12ff   :  { %v17105_v46 = vpack.c.bf16 %v8499_v18, %v8491_v35  ;;  %v8523_v35 = vld [vmem:[#allocation7 + $0x1a0] sm:$0xff]  ;;  %v8548_v53 = vld [vmem:[#allocation7 + $0x268] sm:$0xff] }
0x1300   :  { %v17087_v42 = vadd.f32 %v8462_v14, %v8461_v47  ;;  %v8507_v47 = vld [vmem:[#allocation7 + $0x120] sm:$0xff]  ;;  %17866 = vst [vmem:[#allocation43_spill] sm:$0xff] %v17113_v13  ;;  %v17137_v39 = vpack.c.bf16 %v8548_v53, %v8540_v61  ;;  %v8557_v53 = vld [vmem:[#allocation7 + $0x2b0] sm:$0xff] }
0x1301   :  { %v8515_v14 = vld [vmem:[#allocation7 + $0x160] sm:$0xff] }
0x1302   :  { %14577 = vtanh.f32 %v17087_v42  ;;  %v8531_v18 = vld [vmem:[#allocation7 + $0x1e0] sm:$0xff]  ;;  %17873 = vst [vmem:[#allocation31_spill] sm:$0xff] %v17137_v39 }
0x130c   :  { %v14578_v1 = vpop.eup %14577 }
0x130d   :  { %v17094_v29 = vmul.f32 %v14578_v1, %v14576_v32  ;;  %v17119_v32 = vpack.c.bf16 %v8515_v14, %v8507_v47  ;;  %v17121_v1 = vpack.c.bf16 %v8517_v16, %v8509_v22  ;;  %v17131_v47 = vpack.c.bf16 %v8531_v18, %v8523_v35  ;;  %v8539_v22 = vld [vmem:[#allocation7 + $0x220] sm:$0xff] }
0x130e   :  { %v17133_v14 = vpack.c.bf16 %v8533_v58, %v8525_v50  ;;  %v8547_v16 = vld [vmem:[#allocation7 + $0x260] sm:$0xff]  ;;  %v17145_v18 = vpack.c.bf16 %v8549_v9, %v8541_v21 }
0x130f   :  { %v8467_v8 = vrot.slane %v17094_v29, 6  ;;  %8664 = vmatmul.mubr.f32.vlgmr.msra.gmra.mrb[72].mxu1 %v17094_v29  ;;  %8735 = vmatmul.mubr.f32.vlgmr.msra.gmra.mrb[74].mxu0 %v17094_v29  ;;  %17867 = vst [vmem:[#allocation44_spill] sm:$0xff] %v17119_v32  ;;  %17868 = vst [vmem:[#allocation37_spill] sm:$0xff] %v17121_v1  ;;  %v17143_v35 = vpack.c.bf16 %v8547_v16, %v8539_v22  ;;  %v8555_v50 = vld [vmem:[#allocation7 + $0x2a0] sm:$0xff] }
0x1310   :  { %13579 = vmatpush1.bf16.msra.mxu1 %v17090_v27  ;;  %13611 = vmatpush1.bf16.msra.mxu0 %v17092_v25  ;;  %17871 = vst [vmem:[#allocation29_spill] sm:$0xff] %v17131_v47  ;;  %17872 = vst [vmem:[#allocation30_spill] sm:$0xff] %v17133_v14  ;;  %v8563_v58 = vld [vmem:[#allocation7 + $0x2e0] sm:$0xff] }
0x1311   :  { %8469 = vst [vmem:[#allocation4 + $0x10] ss:$-4 sps:$4 sm:$0x3c] %v8467_v8   ;;  %13581 = vmatprep.subr.bf16.mxu1 %v17096_v54  ;;  %13613 = vmatprep.subr.bf16.mxu0 %v17098_v44  ;;  %v8542_v8 = vld [vmem:[#allocation7 + $0x238] sm:$0xff]  ;;  %17875 = vst [vmem:[#allocation33_spill] sm:$0xff] %v17143_v35  ;;  %v17155_v22 = vpack.c.bf16 %v8563_v58, %v8555_v50  ;;  %v8571_v21 = vld [vmem:[#allocation7 + $0x320] sm:$0xff] }
0x1312   :  { %8805 = vmatprep.mubr.f32.mxu1 %v17686_v19  ;;  %8876 = vmatprep.mubr.f32.mxu0 %v17686_v19  ;;  %17876 = vst [vmem:[#allocation34_spill] sm:$0xff] %v17145_v18  ;;  %v8579_v9 = vld [vmem:[#allocation7 + $0x360] sm:$0xff] }
0x1313   :  { %v17167_v50 = vpack.c.bf16 %v8579_v9, %v8571_v21 }
0x1314   :  { %13583 = vmatpush1.bf16.msra.mxu1 %v17105_v46  ;;  %13615 = vmatpush1.bf16.msra.mxu0 %v17107_v4  ;;  %v8550_v4 = vld [vmem:[#allocation7 + $0x278] sm:$0xff] }
0x1315   :  { %13585 = vmatprep.subr.bf16.mxu1 %v17111_v15  ;;  %13617 = vmatprep.subr.bf16.mxu0 %v17113_v13  ;;  %v17139_v38 = vpack.c.bf16 %v8550_v4, %v8542_v8  ;;  %v8556_v13 = vld [vmem:[#allocation7 + $0x2a8] sm:$0xff]  ;;  %v8558_v15 = vld [vmem:[#allocation7 + $0x2b8] sm:$0xff]  ;;  %v8565_v8 = vld [vmem:[#allocation7 + $0x2f0] sm:$0xff] }
0x1316   :  { %v17157_v16 = vpack.c.bf16 %v8565_v8, %v8557_v53  ;;  %v8587_v53 = vld [vmem:[#allocation7 + $0x3a0] sm:$0xff]  ;;  %v8597_v8 = vld [vmem:[#allocation7 + $0x3f0] sm:$0xff] }
0x1317   :  { %17874 = vst [vmem:[#allocation32_spill] sm:$0xff] %v17139_v38 }
0x1318   :  { %13587 = vmatpush1.bf16.msra.mxu1 %v17119_v32  ;;  %13619 = vmatpush1.bf16.msra.mxu0 %v17121_v1  ;;  %v8564_v32 = vld [vmem:[#allocation7 + $0x2e8] sm:$0xff]  ;;  %v8566_v1 = vld [vmem:[#allocation7 + $0x2f8] sm:$0xff] }
0x1319   :  { %13589 = vmatprep.subr.bf16.mxu1 %v17125_v40  ;;  %13621 = vmatprep.subr.bf16.mxu0 %v17127_v17  ;;  %v17149_v4 = vpack.c.bf16 %v8564_v32, %v8556_v13  ;;  %v17151_v61 = vpack.c.bf16 %v8566_v1, %v8558_v15  ;;  %v8572_v17 = vld [vmem:[#allocation7 + $0x328] sm:$0xff]  ;;  %v8574_v40 = vld [vmem:[#allocation7 + $0x338] sm:$0xff]  ;;  %v8573_v32 = vld [vmem:[#allocation7 + $0x330] sm:$0xff] }
0x131a   :  { %v8581_v1 = vld [vmem:[#allocation7 + $0x370] sm:$0xff] }
0x131b   :  { %v17169_v58 = vpack.c.bf16 %v8581_v1, %v8573_v32 }
0x131c   :  { %13591 = vmatpush1.bf16.msra.mxu1 %v17131_v47  ;;  %13623 = vmatpush1.bf16.msra.mxu0 %v17133_v14  ;;  %v8580_v47 = vld [vmem:[#allocation7 + $0x368] sm:$0xff]  ;;  %v8582_v14 = vld [vmem:[#allocation7 + $0x378] sm:$0xff] }
0x131d   :  { %13593 = vmatprep.subr.bf16.mxu1 %v17137_v39  ;;  %13625 = vmatprep.subr.bf16.mxu0 %v17139_v38  ;;  %v17161_v15 = vpack.c.bf16 %v8580_v47, %v8572_v17  ;;  %v17163_v13 = vpack.c.bf16 %v8582_v14, %v8574_v40  ;;  %v8588_v38 = vld [vmem:[#allocation7 + $0x3a8] sm:$0xff]  ;;  %v8590_v39 = vld [vmem:[#allocation7 + $0x3b8] sm:$0xff]  ;;  %v8595_v47 = vld [vmem:[#allocation7 + $0x3e0] sm:$0xff] }
0x131e   :  { %v8589_v14 = vld [vmem:[#allocation7 + $0x3b0] sm:$0xff]  ;;  %v17179_v21 = vpack.c.bf16 %v8595_v47, %v8587_v53 }
0x131f   :  { %v17181_v9 = vpack.c.bf16 %v8597_v8, %v8589_v14 }
0x1320   :  { %13595 = vmatpush1.bf16.msra.mxu1 %v17143_v35  ;;  %13627 = vmatpush1.bf16.msra.mxu0 %v17145_v18  ;;  %v8596_v35 = vld [vmem:[#allocation7 + $0x3e8] sm:$0xff]  ;;  %v8598_v18 = vld [vmem:[#allocation7 + $0x3f8] sm:$0xff] }
0x1321   :  { %13597 = vmatprep.subr.bf16.mxu1 %v17149_v4  ;;  %13629 = vmatprep.subr.bf16.mxu0 %v17151_v61  ;;  %v17173_v40 = vpack.c.bf16 %v8596_v35, %v8588_v38  ;;  %v17175_v17 = vpack.c.bf16 %v8598_v18, %v8590_v39 }
0x1324   :  { %13599 = vmatpush1.bf16.msra.mxu1 %v17155_v22  ;;  %13631 = vmatpush1.bf16.msra.mxu0 %v17157_v16 }
0x1325   :  { %13601 = vmatprep.subr.bf16.mxu1 %v17161_v15  ;;  %13633 = vmatprep.subr.bf16.mxu0 %v17163_v13 }
0x1328   :  { %13603 = vmatpush1.bf16.msra.mxu1 %v17167_v50  ;;  %13635 = vmatpush1.bf16.msra.mxu0 %v17169_v58 }
0x1329   :  { %13605 = vmatprep.subr.bf16.mxu1 %v17173_v40  ;;  %13637 = vmatprep.subr.bf16.mxu0 %v17175_v17 }
0x132c   :  { %13607 = vmatpush1.bf16.msra.mxu1 %v17179_v21  ;;  %13639 = vmatpush1.bf16.msra.mxu0 %v17181_v9 }
0x132d   :  { %13641 = vmatprep.subr.bf16.mxu1 %v16984_v24  ;;  %13673 = vmatprep.subr.bf16.mxu0 %v16986_v20 }
0x132f   :  { %8806 = vmatmul.mubr.f32.vlgmr.msra.gmra.mrb[74].mxu1 %v17094_v29  ;;  %8877 = vmatmul.mubr.f32.vlgmr.msra.gmra.mrb[76].mxu0 %v17094_v29 }
0x1330   :  { %13643 = vmatpush1.bf16.msra.mxu1 %v16988_v23  ;;  %13675 = vmatpush1.bf16.msra.mxu0 %v16991_v3 }
0x1331   :  { %13645 = vmatprep.subr.bf16.mxu1 %v16995_v57  ;;  %13677 = vmatprep.subr.bf16.mxu0 %v16997_v62 }
0x1332   :  { %9154 = vmatprep.mubr.f32.mxu1 %v17686_v19  ;;  %9225 = vmatprep.mubr.f32.mxu0 %v17686_v19 }
0x1334   :  { %13647 = vmatpush1.bf16.msra.mxu1 %v17000_v51  ;;  %13679 = vmatpush1.bf16.msra.mxu0 %v17004_v52  ;;  %v8883_v51 = vld [vmem:[#allocation2 + $0x40] sm:$0x30]  ;;  %v8885_v52 = vld [vmem:[#allocation2 + $0x50] sm:$0x30] }
0x1335   :  { %13649 = vmatprep.subr.bf16.mxu1 %v17006_v31  ;;  %13681 = vmatprep.subr.bf16.mxu0 %v17008_v49 }
0x1338   :  { %13651 = vmatpush1.bf16.msra.mxu1 %v17011_v37  ;;  %13683 = vmatpush1.bf16.msra.mxu0 %v17015_v59 }
0x1339   :  { %13653 = vmatprep.subr.bf16.mxu1 %v17017_v34  ;;  %13685 = vmatprep.subr.bf16.mxu0 %v17020_v48  ;;  %v8884_v34 = vld [vmem:[#allocation2 + $0x48] sm:$0x30]  ;;  %v8886_v48 = vld [vmem:[#allocation2 + $0x58] sm:$0x30] }
0x133c   :  { %13655 = vmatpush1.bf16.msra.mxu1 %v17023_v2  ;;  %13687 = vmatpush1.bf16.msra.mxu0 %v17027_v56 }
0x133d   :  { %13657 = vmatprep.subr.bf16.mxu1 %v17029_v6  ;;  %13689 = vmatprep.subr.bf16.mxu0 %v17032_v55 }
0x1340   :  { %13659 = vmatpush1.bf16.msra.mxu1 %v17035_v45  ;;  %13691 = vmatpush1.bf16.msra.mxu0 %v17039_v41  ;;  %v8913_v41 = vld [vmem:[#allocation2 + $0x20] sm:$0xc] }
0x1341   :  { %13661 = vmatprep.subr.bf16.mxu1 %v17041_v28  ;;  %13693 = vmatprep.subr.bf16.mxu0 %v17044_v36  ;;  %v8915_v36 = vld [vmem:[#allocation2 + $0x30] sm:$0xc] }
0x1344   :  { %13663 = vmatpush1.bf16.msra.mxu1 %v17047_v30  ;;  %13695 = vmatpush1.bf16.msra.mxu0 %v17051_v11 }
0x1345   :  { %13665 = vmatprep.subr.bf16.mxu1 %v17053_v7  ;;  %13697 = vmatprep.subr.bf16.mxu0 %v17056_v60  ;;  %v8914_v60 = vld [vmem:[#allocation2 + $0x28] sm:$0xc] }
0x1348   :  { %13667 = vmatpush1.bf16.msra.mxu1 %v17059_v26  ;;  %13699 = vmatpush1.bf16.msra.mxu0 %v17063_v10  ;;  %v8916_v10 = vld [vmem:[#allocation2 + $0x38] sm:$0xc] }
0x1349   :  { %13669 = vmatprep.subr.bf16.mxu1 %v17065_v43  ;;  %13701 = vmatprep.subr.bf16.mxu0 %v17068_v12 }
0x134c   :  { %13671 = vmatpush1.bf16.msra.mxu1 %v17071_v0  ;;  %13703 = vmatpush1.bf16.msra.mxu0 %v17075_v5 }
0x134d   :  { %13705 = vmatprep.subr.bf16.mxu1 %v17077_v33  ;;  %13737 = vmatprep.subr.bf16.mxu0 %v17080_v63 }
0x13e2   :  { %v8665_v24 = vpop.f32.mrb[72].mxu1  ;;  %v8736_v20 = vpop.f32.mrb[74].mxu0 }
0x13e3   :  { %v8891_v23 = vrot.slane %v8665_v24, 4  ;;  %v8893_v3 = vrot.slane %v8736_v20, 4  ;;  %v8667_v57 = vpop.f32.mrb[73].mxu1  ;;  %v8738_v62 = vpop.f32.mrb[75].mxu0 }
0x13e4   :  { %v8892_v31 = vrot.slane %v8667_v57, 4  ;;  %v8894_v49 = vrot.slane %v8738_v62, 4 }
0x13e5   :  { %v8899_v37 = vadd.f32 %v8891_v23, %v8883_v51  ;;  %v8901_v59 = vadd.f32 %v8893_v3, %v8885_v52  ;;  %v17878_v51 = vld [vmem:[#allocation42_spill] sm:$0xff]  ;;  %v17879_v52 = vld [vmem:[#allocation43_spill] sm:$0xff] }
0x13e6   :  { %v8900_v2 = vadd.f32 %v8892_v31, %v8884_v34  ;;  %v8902_v56 = vadd.f32 %v8894_v49, %v8886_v48  ;;  %v17882_v31 = vld [vmem:[#allocation27_spill] sm:$0xff]  ;;  %v17885_v49 = vld [vmem:[#allocation30_spill] sm:$0xff]  ;;  %v9374_v34 = vld [vmem:[#allocation2 + $0x40] sm:$0xc0] }
0x13e8   :  { %v8907_v6 = vcombine.high %v8899_v37, %v8900_v2  ;;  %v8908_v55 = vcombine.high %v8901_v59, %v8902_v56  ;;  %v17888_v37 = vld [vmem:[#allocation33_spill] sm:$0xff]  ;;  %v17889_v59 = vld [vmem:[#allocation34_spill] sm:$0xff] }
0x13e9   :  { %v9375_v56 = vld [vmem:[#allocation2 + $0x48] sm:$0xc0] }
0x13ea   :  { %8911 = vst [vmem:[#allocation5] sm:$0x33] %v8907_v6  ;;  %8912 = vst [vmem:[#allocation5 + $0x8] sm:$0x33] %v8908_v55 }
0x1402   :  { %v8807_v45 = vpop.f32.mrb[74].mxu1  ;;  %v8878_v28 = vpop.f32.mrb[76].mxu0 }
0x1403   :  { %v8917_v30 = vadd.f32 %v8913_v41, %v8807_v45  ;;  %v8919_v11 = vadd.f32 %v8915_v36, %v8878_v28  ;;  %v8809_v7 = vpop.f32.mrb[75].mxu1  ;;  %v8880_v26 = vpop.f32.mrb[77].mxu0 }
0x1404   :  { %v8918_v43 = vadd.f32 %v8914_v60, %v8809_v7  ;;  %v8920_v12 = vadd.f32 %v8916_v10, %v8880_v26  ;;  %v9408_v26 = vld [vmem:[#allocation2 + $0x20] sm:$0x3]  ;;  %v9410_v10 = vld [vmem:[#allocation2 + $0x30] sm:$0x3] }
0x1406   :  { %v8925_v0 = vcombine.low %v8917_v30, %v8918_v43  ;;  %v8926_v5 = vcombine.low %v8919_v11, %v8920_v12 }
0x1408   :  { %8929 = vst [vmem:[#allocation5] sm:$0xcc] %v8925_v0  ;;  %8930 = vst [vmem:[#allocation5 + $0x8] sm:$0xcc] %v8926_v5 }
0x140f   :  { %v8931_v33 = vld [vmem:[#allocation5] sm:$0xff]  ;;  %v8932_v29 = vld [vmem:[#allocation5 + $0x8] sm:$0xff] }
0x1410   :  { %v11273_v63 = vmul.f32 -1.442695, %v8931_v33  ;;  %v11274_v39 = vmul.f32 -1.442695, %v8932_v29  ;;  %v8946_v18 = vrot.slane %v8932_v29, 4 }
0x1411   :  { %v9409_v33 = vld [vmem:[#allocation2 + $0x28] sm:$0x3] }
0x1412   :  { %14579 = vpow2.f32 %v11273_v63  ;;  %v9411_v63 = vld [vmem:[#allocation2 + $0x38] sm:$0x3] }
0x1413   :  { %14581 = vpow2.f32 %v11274_v39 }
0x141c   :  { %v14580_v38 = vpop.eup %14579 }
0x141d   :  { %v8939_v35 = vadd.f32 1.0, %v14580_v38  ;;  %v14582_v32 = vpop.eup %14581 }
0x141e   :  { %v8940_v14 = vadd.f32 1.0, %v14582_v32 }
0x141f   :  { %14583 = vrcp.f32 %v8939_v35 }
0x1420   :  { %14585 = vtanh.f32 %v8946_v18 }
0x1421   :  { %14587 = vrcp.f32 %v8940_v14 }
0x1429   :  { %v14584_v1 = vpop.eup %14583 }
0x142a   :  { %v8950_v53 = vrot.slane %v14584_v1, 4  ;;  %v14586_v47 = vpop.eup %14585 }
0x142b   :  { %v8953_v24 = vmul.f32 %v14586_v47, %v14584_v1  ;;  %v14588_v23 = vpop.eup %14587 }
0x142c   :  { %v8952_v8 = vmul.f32 %v8950_v53, %v17087_v42  ;;  %v17877_v42 = vld [vmem:[#allocation36_spill] sm:$0xff] }
0x142e   :  { %v17226_v20 = vadd.f32 %v8953_v24, %v8952_v8 }
0x1430   :  { %14589 = vtanh.f32 %v17226_v20 }
0x143a   :  { %v14590_v3 = vpop.eup %14589 }
0x143b   :  { %v8956_v57 = vmul.f32 %v14590_v3, %v14588_v23 }
0x143d   :  { %v8958_v62 = vcombine.low %v8956_v57, %v8956_v57  ;;  %8961 = vst [vmem:[#allocation4 + $0x8] sm:$0xc] %v8956_v57  ;;  %9155 = vmatmul.mubr.f32.vlgmr.msra.gmra.mrb[76].mxu1 %v8956_v57  ;;  %9226 = vmatmul.mubr.f32.vlgmr.msra.gmra.mrb[78].mxu0 %v8956_v57 }
0x143e   :  { %13707 = vmatpush1.bf16.msra.mxu1 %v17090_v27  ;;  %13739 = vmatpush1.bf16.msra.mxu0 %v17092_v25  ;;  %v17880_v27 = vld [vmem:[#allocation44_spill] sm:$0xff]  ;;  %v17881_v25 = vld [vmem:[#allocation37_spill] sm:$0xff] }
0x143f   :  { %8960 = vst [vmem:[#allocation4 + $0x10] sm:$0x30] %v8958_v62  ;;  %13709 = vmatprep.subr.bf16.mxu1 %v17096_v54  ;;  %13741 = vmatprep.subr.bf16.mxu0 %v17098_v44  ;;  %v17883_v54 = vld [vmem:[#allocation28_spill] sm:$0xff]  ;;  %v17884_v44 = vld [vmem:[#allocation29_spill] sm:$0xff] }
0x1440   :  { %9296 = vmatprep.mubr.f32.mxu1 %v17686_v19  ;;  %9367 = vmatprep.mubr.f32.mxu0 %v17686_v19  ;;  %v17886_v19 = vld [vmem:[#allocation31_spill] sm:$0xff] }
0x1442   :  { %13711 = vmatpush1.bf16.msra.mxu1 %v17105_v46  ;;  %13743 = vmatpush1.bf16.msra.mxu0 %v17877_v42  ;;  %v17887_v46 = vld [vmem:[#allocation32_spill] sm:$0xff] }
0x1443   :  { %13713 = vmatprep.subr.bf16.mxu1 %v17878_v51  ;;  %13745 = vmatprep.subr.bf16.mxu0 %v17879_v52 }
0x1446   :  { %13715 = vmatpush1.bf16.msra.mxu1 %v17880_v27  ;;  %13747 = vmatpush1.bf16.msra.mxu0 %v17881_v25 }
0x1447   :  { %13717 = vmatprep.subr.bf16.mxu1 %v17882_v31  ;;  %13749 = vmatprep.subr.bf16.mxu0 %v17883_v54 }
0x144a   :  { %13719 = vmatpush1.bf16.msra.mxu1 %v17884_v44  ;;  %13751 = vmatpush1.bf16.msra.mxu0 %v17885_v49 }
0x144b   :  { %13721 = vmatprep.subr.bf16.mxu1 %v17886_v19  ;;  %13753 = vmatprep.subr.bf16.mxu0 %v17887_v46  ;;  %v9471_v19 = vld [vmem:[#allocation4] sm:$0xff]  ;;  %v9474_v46 = vld [vmem:[#allocation4 + $0x18] sm:$0xff] }
0x144e   :  { %13723 = vmatpush1.bf16.msra.mxu1 %v17888_v37  ;;  %13755 = vmatpush1.bf16.msra.mxu0 %v17889_v59 }
0x144f   :  { %13725 = vmatprep.subr.bf16.mxu1 %v17149_v4  ;;  %13757 = vmatprep.subr.bf16.mxu0 %v17151_v61 }
0x1452   :  { %13727 = vmatpush1.bf16.msra.mxu1 %v17155_v22  ;;  %13759 = vmatpush1.bf16.msra.mxu0 %v17157_v16 }
0x1453   :  { %13729 = vmatprep.subr.bf16.mxu1 %v17161_v15  ;;  %13761 = vmatprep.subr.bf16.mxu0 %v17163_v13 }
0x1456   :  { %13731 = vmatpush1.bf16.msra.mxu1 %v17167_v50  ;;  %13763 = vmatpush1.bf16.msra.mxu0 %v17169_v58  ;;  %v9376_v50 = vld [vmem:[#allocation2 + $0x50] sm:$0xc0] }
0x1457   :  { %13733 = vmatprep.subr.bf16.mxu1 %v17173_v40  ;;  %13765 = vmatprep.subr.bf16.mxu0 %v17175_v17  ;;  %v9377_v17 = vld [vmem:[#allocation2 + $0x58] sm:$0xc0] }
0x145a   :  { %13735 = vmatpush1.bf16.msra.mxu1 %v17179_v21  ;;  %13767 = vmatpush1.bf16.msra.mxu0 %v17181_v9 }
0x145d   :  { %9297 = vmatmul.mubr.f32.vlgmr.msra.gmra.mrb[78].mxu1 %v8956_v57  ;;  %9368 = vmatmul.mubr.f32.vlgmr.msra.gmra.mrb[80].mxu0 %v8956_v57 }
0x1510   :  { %v9156_v4 = vpop.f32.mrb[76].mxu1  ;;  %v9227_v61 = vpop.f32.mrb[78].mxu0 }
0x1511   :  { %v9382_v22 = vrot.slane %v9156_v4, 2  ;;  %v9384_v16 = vrot.slane %v9227_v61, 2  ;;  %v9158_v15 = vpop.f32.mrb[77].mxu1  ;;  %v9229_v13 = vpop.f32.mrb[79].mxu0 }
0x1512   :  { %v9383_v48 = vrot.slane %v9158_v15, 2  ;;  %v9385_v58 = vrot.slane %v9229_v13, 2 }
0x1513   :  { %v9390_v2 = vadd.f32 %v9382_v22, %v9374_v34  ;;  %v9392_v40 = vadd.f32 %v9384_v16, %v9376_v50 }
0x1514   :  { %v9391_v6 = vadd.f32 %v9383_v48, %v9375_v56  ;;  %v9393_v21 = vadd.f32 %v9385_v58, %v9377_v17  ;;  %v11279_v56 = vld [vmem:[%s17554_s8 + $0x1] ss:$2 sm:$0xf]  ;;  %v17890_v17 = vld [vmem:[#allocation39_spill] sm:$0xff] }
0x1516   :  { %v9398_v55 = vcombine.high %v9390_v2, %v9391_v6  ;;  %v9399_v9 = vcombine.high %v9392_v40, %v9393_v21  ;;  %v17891_v21 = vld [vmem:[#allocation41_spill] sm:$0xff] }
0x1518   :  { %v11275_v45 = vrot.slane %v9398_v55, 10  ;;  %v11276_v41 = vrot.slane %v9399_v9, 10 }
0x151a   :  { %9406 = vst [vmem:[#allocation5] sm:$0x33] %v11275_v45  ;;  %9407 = vst [vmem:[#allocation5 + $0x8] sm:$0x33] %v11276_v41 }
0x1530   :  { %v9298_v28 = vpop.f32.mrb[78].mxu1  ;;  %v9369_v36 = vpop.f32.mrb[80].mxu0 }
0x1531   :  { %v9416_v30 = vrot.slane %v9298_v28, 2  ;;  %v9418_v11 = vrot.slane %v9369_v36, 2  ;;  %v9300_v7 = vpop.f32.mrb[79].mxu1  ;;  %v9371_v60 = vpop.f32.mrb[81].mxu0  ;;  %v17892_v36 = vld [vmem:[#allocation38_spill] sm:$0xff] }
0x1532   :  { %v9417_v43 = vrot.slane %v9300_v7, 2  ;;  %v9419_v12 = vrot.slane %v9371_v60, 2  ;;  %v9553_v60 = vrot.slane %v11279_v56, %v17890_v17 }
0x1533   :  { %v9424_v0 = vadd.f32 %v9416_v30, %v9408_v26  ;;  %v9426_v5 = vadd.f32 %v9418_v11, %v9410_v10  ;;  %v17893_v11 = vld [vmem:[#allocation40_spill] sm:$0xff]  ;;  %v9557_v26 = vrot.slane %v11279_v56, %v17891_v21 }
0x1534   :  { %v9425_v29 = vadd.f32 %v9417_v43, %v9409_v33  ;;  %v9427_v39 = vadd.f32 %v9419_v12, %v9411_v63  ;;  %v9549_v33 = vrot.slane %v11279_v56, %v17893_v11 }
0x1536   :  { %v9432_v38 = vcombine.low %v9424_v0, %v9425_v29  ;;  %v9433_v35 = vcombine.low %v9426_v5, %v9427_v39  ;;  %v9545_v5 = vrot.slane %v11279_v56, %v17892_v36 }
0x1538   :  { %v9434_v18 = vrot.slane %v9432_v38, 6  ;;  %v9435_v32 = vrot.slane %v9433_v35, 6 }
0x153a   :  { %9438 = vst [vmem:[#allocation5] sm:$0xcc] %v9434_v18  ;;  %9439 = vst [vmem:[#allocation5 + $0x8] sm:$0xcc] %v9435_v32 }
0x1541   :  { %v9440_v1 = vld [vmem:[#allocation5] sm:$0xff]  ;;  %v9441_v47 = vld [vmem:[#allocation5 + $0x8] sm:$0xff] }
0x1542   :  { %v11277_v53 = vmul.f32 -1.442695, %v9440_v1  ;;  %v11278_v14 = vmul.f32 -1.442695, %v9441_v47  ;;  %v9455_v23 = vrot.slane %v9441_v47, 4 }
0x1544   :  { %14591 = vpow2.f32 %v11277_v53 }
0x1545   :  { %14593 = vpow2.f32 %v11278_v14 }
0x154e   :  { %v14592_v8 = vpop.eup %14591 }
0x154f   :  { %v9448_v24 = vadd.f32 1.0, %v14592_v8  ;;  %v14594_v3 = vpop.eup %14593 }
0x1550   :  { %v9449_v51 = vadd.f32 1.0, %v14594_v3 }
0x1551   :  { %14595 = vrcp.f32 %v9448_v24 }
0x1552   :  { %14597 = vtanh.f32 %v9455_v23 }
0x1553   :  { %14599 = vrcp.f32 %v9449_v51 }
0x155b   :  { %v14596_v57 = vpop.eup %14595 }
0x155c   :  { %v9459_v62 = vrot.slane %v14596_v57, 4  ;;  %v14598_v42 = vpop.eup %14597 }
0x155d   :  { %v9462_v27 = vmul.f32 %v14598_v42, %v14596_v57  ;;  %v14600_v31 = vpop.eup %14599 }
0x155e   :  { %v9461_v52 = vmul.f32 %v9459_v62, %v17226_v20  ;;  %v9513_v20 = vld [vmem:[%s17554_s8] ss:$2 sm:$0xf] }
0x155f   :  { %v9526_v6 = vrot.slane %v9513_v20, %v17890_v17  ;;  %v9530_v55 = vrot.slane %v9513_v20, %v17891_v21  ;;  %v9518_v30 = vrot.slane %v9513_v20, %v17892_v36  ;;  %v9522_v7 = vrot.slane %v9513_v20, %v17893_v11 }
0x1560   :  { %v9463_v25 = vadd.f32 %v9462_v27, %v9461_v52 }
0x1562   :  { %14601 = vtanh.f32 %v9463_v25 }
0x156c   :  { %v14602_v54 = vpop.eup %14601 }
0x156d   :  { %v9465_v44 = vmul.f32 %v14602_v54, %v14600_v31 }
0x156f   :  { %v9467_v49 = vrot.slane %v9465_v44, 2 }
0x1571   :  { %9469 = vst [vmem:[#allocation4 + $0x8] ss:$12 sps:$4 sm:$0xc3] %v9467_v49  }
0x1578   :  { %v9472_v37 = vld [vmem:[#allocation4 + $0x8] sm:$0xff]  ;;  %v9473_v59 = vld [vmem:[#allocation4 + $0x10] sm:$0xff] }
0x1579   :  { %v9475_v4 = vadd.f32 %v9473_v59, %v9471_v19  ;;  %v9476_v61 = vadd.f32 %v9474_v46, %v9472_v37  ;;  %v9477_v22 = vmax.f32 %v9471_v19, %v9473_v59  ;;  %v9478_v16 = vmax.f32 %v9472_v37, %v9474_v46 }
0x157b   :  { %v9481_v15 = vrot.slane %v9475_v4, 4  ;;  %v9482_v13 = vrot.slane %v9476_v61, 4  ;;  %v9489_v34 = vrot.slane %v9477_v22, 4  ;;  %v9490_v50 = vrot.slane %v9478_v16, 4 }
0x157d   :  { %v9485_v48 = vadd.f32 %v9481_v15, %v9475_v4  ;;  %v9486_v58 = vadd.f32 %v9482_v13, %v9476_v61  ;;  %v9493_v2 = vmax.f32 %v9477_v22, %v9489_v34  ;;  %v9494_v40 = vmax.f32 %v9478_v16, %v9490_v50 }
0x157f   :  { %v9497_v9 = vrot.slane %v9485_v48, 2  ;;  %v9498_v45 = vrot.slane %v9486_v58, 2  ;;  %v9505_v41 = vrot.slane %v9493_v2, 2  ;;  %v9506_v28 = vrot.slane %v9494_v40, 2 }
0x1581   :  { %v9501_v10 = vadd.f32 %v9497_v9, %v9485_v48  ;;  %v9502_v43 = vadd.f32 %v9498_v45, %v9486_v58  ;;  %v9509_v12 = vmax.f32 %v9493_v2, %v9505_v41  ;;  %v9510_v0 = vmax.f32 %v9494_v40, %v9506_v28 }
0x1583   :  { %v9511_v63 = vmul.f32 0.125, %v9501_v10  ;;  %v9512_v29 = vmul.f32 0.125, %v9502_v43  ;;  %v9537_v39 = vmul.f32 %v9526_v6, %v9509_v12  ;;  %v9538_v38 = vmul.f32 %v9530_v55, %v9510_v0 }
0x1585   :  { %v9535_v35 = vmul.f32 %v9518_v30, %v9511_v63  ;;  %v9536_v18 = vmul.f32 %v9522_v7, %v9512_v29  ;;  %v17276_v32 = vadd.f32 %v9553_v60, %v9537_v39  ;;  %v17278_v1 = vadd.f32 %v9557_v26, %v9538_v38 }
0x1587   :  { %v17280_v53 = vadd.f32 %v9545_v5, %v9535_v35  ;;  %v17282_v47 = vadd.f32 %v9549_v33, %v9536_v18 }
0x1588   :  { %14675 = dma.done.wait [#allocation9 + $0x2], 32768 }
0x1589   :  { %14676 = vsyncadd [#allocation9 + $0x2], 4294934528  ;;  %10424 = vmatprep.mubr.f32.mxu1 %v17282_v47  ;;  %10566 = vmatprep.mubr.f32.mxu0 %v17282_v47  ;;  %v9571_v14 = vld [vmem:[#allocation8 + $0x8] sm:$0xff]  ;;  %v9573_v8 = vld [vmem:[#allocation8 + $0x18] sm:$0xff]  ;;  %s14696_s0 = smov [#allocation13]   ;;  %vm11178_vm3 = vcmask 50176  }
0x158a   :  { %v9570_v24 = vld [vmem:[#allocation8] sm:$0xff]  ;;  %13769 = vmatprep.subr.bf16.mxu1 %v9571_v14  ;;  %13897 = vmatprep.subr.bf16.mxu0 %v9573_v8  ;;  %v9572_v23 = vld [vmem:[#allocation8 + $0x10] sm:$0xff]  ;;  %v9575_v3 = vld [vmem:[#allocation8 + $0x48] sm:$0xff]  ;;  %s11186_s26 = sshll.u32 %s14696_s0, 4  ;;  %s11187_s26 = int_to_ptr.vmem [resolvable:$true] %s11186_s26 }
0x158b   :  { %v9577_v57 = vld [vmem:[#allocation8 + $0x58] sm:$0xff]  ;;  %13771 = vmatpush1.bf16.msra.mxu1 %v9570_v24  ;;  %13899 = vmatpush1.bf16.msra.mxu0 %v9572_v23  ;;  %v9574_v62 = vld [vmem:[#allocation8 + $0x40] sm:$0xff]  ;;  %v9576_v42 = vld [vmem:[#allocation8 + $0x50] sm:$0xff]  ;;  %s14647_s30 = scalar_lea.vmem %s11187_s26, 32  ;;  %p14652_p3 = scmp.lt.s32.totalorder %s11187_s26, %s11187_s26 }
0x158c   :  { %13773 = vmatprep.subr.bf16.mxu1 %v9575_v3  ;;  %13901 = vmatprep.subr.bf16.mxu0 %v9577_v57  ;;  %v9579_v51 = vld [vmem:[#allocation8 + $0x88] sm:$0xff]  ;;  %v9581_v52 = vld [vmem:[#allocation8 + $0x98] sm:$0xff]  ;;  %v9578_v27 = vld [vmem:[#allocation8 + $0x80] sm:$0xff]  ;;  %p14648_p2 = scmp.ne.s32.totalorder %s11187_s26, %s14647_s30  ;;  %p14653_p4 = scmp.lt.s32.totalorder %s14647_s30, %s14647_s30 }
0x158d   :  { %v9580_v25 = vld [vmem:[#allocation8 + $0x90] sm:$0xff]  ;;  %v9583_v31 = vld [vmem:[#allocation8 + $0xc8] sm:$0xff]  ;;  %v9585_v54 = vld [vmem:[#allocation8 + $0xd8] sm:$0xff] }
0x158e   :  { %v9582_v44 = vld [vmem:[#allocation8 + $0xc0] sm:$0xff]  ;;  %v9584_v49 = vld [vmem:[#allocation8 + $0xd0] sm:$0xff]  ;;  %v9587_v19 = vld [vmem:[#allocation8 + $0x108] sm:$0xff]  ;;  %p14654_p5 = por %p14653_p4, %p14652_p3 }
0x158f   :  { %13775 = vmatpush1.bf16.msra.mxu1 %v9574_v62  ;;  %13903 = vmatpush1.bf16.msra.mxu0 %v9576_v42  ;;  %v9589_v46 = vld [vmem:[#allocation8 + $0x118] sm:$0xff]  ;;  %v9586_v37 = vld [vmem:[#allocation8 + $0x100] sm:$0xff]  ;;  %v9588_v59 = vld [vmem:[#allocation8 + $0x110] sm:$0xff] }
0x1590   :  { %13777 = vmatprep.subr.bf16.mxu1 %v9579_v51  ;;  %13905 = vmatprep.subr.bf16.mxu0 %v9581_v52  ;;  %v9591_v4 = vld [vmem:[#allocation8 + $0x148] sm:$0xff]  ;;  %v9593_v61 = vld [vmem:[#allocation8 + $0x158] sm:$0xff]  ;;  %v9590_v22 = vld [vmem:[#allocation8 + $0x140] sm:$0xff]  ;;  %p14655_p6 = pnand %p14654_p5, %p14648_p2 }
0x1591   :  { %v9592_v16 = vld [vmem:[#allocation8 + $0x150] sm:$0xff]  ;;  %v9595_v20 = vld [vmem:[#allocation8 + $0x188] sm:$0xff]  ;;  %v9597_v15 = vld [vmem:[#allocation8 + $0x198] sm:$0xff] }
0x1592   :  { %v9594_v13 = vld [vmem:[#allocation8 + $0x180] sm:$0xff]  ;;  %v9596_v34 = vld [vmem:[#allocation8 + $0x190] sm:$0xff]  ;;  %v9599_v50 = vld [vmem:[#allocation8 + $0x1c8] sm:$0xff] }
0x1593   :  { %13779 = vmatpush1.bf16.msra.mxu1 %v9578_v27  ;;  %13907 = vmatpush1.bf16.msra.mxu0 %v9580_v25  ;;  %v9601_v48 = vld [vmem:[#allocation8 + $0x1d8] sm:$0xff]  ;;  %v9598_v58 = vld [vmem:[#allocation8 + $0x1c0] sm:$0xff]  ;;  %v9600_v2 = vld [vmem:[#allocation8 + $0x1d0] sm:$0xff] }
0x1594   :  { %13781 = vmatprep.subr.bf16.mxu1 %v9583_v31  ;;  %13909 = vmatprep.subr.bf16.mxu0 %v9585_v54  ;;  %v9603_v40 = vld [vmem:[#allocation8 + $0x208] sm:$0xff]  ;;  %v9605_v56 = vld [vmem:[#allocation8 + $0x218] sm:$0xff]  ;;  %v9602_v6 = vld [vmem:[#allocation8 + $0x200] sm:$0xff] }
0x1595   :  { %v9604_v55 = vld [vmem:[#allocation8 + $0x210] sm:$0xff]  ;;  %v9607_v9 = vld [vmem:[#allocation8 + $0x248] sm:$0xff]  ;;  %v9609_v45 = vld [vmem:[#allocation8 + $0x258] sm:$0xff] }
0x1596   :  { %v9606_v41 = vld [vmem:[#allocation8 + $0x240] sm:$0xff]  ;;  %v9608_v28 = vld [vmem:[#allocation8 + $0x250] sm:$0xff]  ;;  %v9611_v30 = vld [vmem:[#allocation8 + $0x288] sm:$0xff] }
0x1597   :  { %13783 = vmatpush1.bf16.msra.mxu1 %v9582_v44  ;;  %13911 = vmatpush1.bf16.msra.mxu0 %v9584_v49  ;;  %v9613_v7 = vld [vmem:[#allocation8 + $0x298] sm:$0xff]  ;;  %v9610_v60 = vld [vmem:[#allocation8 + $0x280] sm:$0xff]  ;;  %v9612_v26 = vld [vmem:[#allocation8 + $0x290] sm:$0xff] }
0x1598   :  { %13785 = vmatprep.subr.bf16.mxu1 %v9587_v19  ;;  %13913 = vmatprep.subr.bf16.mxu0 %v9589_v46  ;;  %v9615_v10 = vld [vmem:[#allocation8 + $0x2c8] sm:$0xff]  ;;  %v9617_v43 = vld [vmem:[#allocation8 + $0x2d8] sm:$0xff]  ;;  %v9614_v12 = vld [vmem:[#allocation8 + $0x2c0] sm:$0xff] }
0x1599   :  { %v9616_v0 = vld [vmem:[#allocation8 + $0x2d0] sm:$0xff]  ;;  %v9619_v5 = vld [vmem:[#allocation8 + $0x308] sm:$0xff]  ;;  %v9621_v33 = vld [vmem:[#allocation8 + $0x318] sm:$0xff] }
0x159a   :  { %v9618_v63 = vld [vmem:[#allocation8 + $0x300] sm:$0xff]  ;;  %v9620_v29 = vld [vmem:[#allocation8 + $0x310] sm:$0xff]  ;;  %v9623_v39 = vld [vmem:[#allocation8 + $0x348] sm:$0xff] }
0x159b   :  { %13787 = vmatpush1.bf16.msra.mxu1 %v9586_v37  ;;  %13915 = vmatpush1.bf16.msra.mxu0 %v9588_v59  ;;  %v9625_v38 = vld [vmem:[#allocation8 + $0x358] sm:$0xff]  ;;  %v9622_v35 = vld [vmem:[#allocation8 + $0x340] sm:$0xff]  ;;  %v9624_v18 = vld [vmem:[#allocation8 + $0x350] sm:$0xff] }
0x159c   :  { %13789 = vmatprep.subr.bf16.mxu1 %v9591_v4  ;;  %13917 = vmatprep.subr.bf16.mxu0 %v9593_v61  ;;  %v9627_v14 = vld [vmem:[#allocation8 + $0x388] sm:$0xff]  ;;  %v9629_v8 = vld [vmem:[#allocation8 + $0x398] sm:$0xff]  ;;  %v9626_v24 = vld [vmem:[#allocation8 + $0x380] sm:$0xff] }
0x159d   :  { %v9628_v23 = vld [vmem:[#allocation8 + $0x390] sm:$0xff]  ;;  %v9631_v3 = vld [vmem:[#allocation8 + $0x3c8] sm:$0xff]  ;;  %v9633_v57 = vld [vmem:[#allocation8 + $0x3d8] sm:$0xff] }
0x159e   :  { %v9630_v62 = vld [vmem:[#allocation8 + $0x3c0] sm:$0xff]  ;;  %v9632_v42 = vld [vmem:[#allocation8 + $0x3d0] sm:$0xff]  ;;  %v9635_v51 = vld [vmem:[#allocation8 + $0x408] sm:$0xff] }
0x159f   :  { %13791 = vmatpush1.bf16.msra.mxu1 %v9590_v22  ;;  %13919 = vmatpush1.bf16.msra.mxu0 %v9592_v16  ;;  %v9637_v52 = vld [vmem:[#allocation8 + $0x418] sm:$0xff]  ;;  %v9634_v27 = vld [vmem:[#allocation8 + $0x400] sm:$0xff]  ;;  %v9636_v25 = vld [vmem:[#allocation8 + $0x410] sm:$0xff] }
0x15a0   :  { %13793 = vmatprep.subr.bf16.mxu1 %v9595_v20  ;;  %13921 = vmatprep.subr.bf16.mxu0 %v9597_v15  ;;  %v9639_v31 = vld [vmem:[#allocation8 + $0x448] sm:$0xff]  ;;  %v9641_v54 = vld [vmem:[#allocation8 + $0x458] sm:$0xff]  ;;  %v9638_v44 = vld [vmem:[#allocation8 + $0x440] sm:$0xff] }
0x15a1   :  { %v9640_v49 = vld [vmem:[#allocation8 + $0x450] sm:$0xff]  ;;  %v9643_v19 = vld [vmem:[#allocation8 + $0x488] sm:$0xff]  ;;  %v9645_v46 = vld [vmem:[#allocation8 + $0x498] sm:$0xff] }
0x15a2   :  { %v9642_v37 = vld [vmem:[#allocation8 + $0x480] sm:$0xff]  ;;  %v9644_v59 = vld [vmem:[#allocation8 + $0x490] sm:$0xff]  ;;  %v9647_v4 = vld [vmem:[#allocation8 + $0x4c8] sm:$0xff] }
0x15a3   :  { %13795 = vmatpush1.bf16.msra.mxu1 %v9594_v13  ;;  %13923 = vmatpush1.bf16.msra.mxu0 %v9596_v34  ;;  %v9649_v61 = vld [vmem:[#allocation8 + $0x4d8] sm:$0xff]  ;;  %v9646_v22 = vld [vmem:[#allocation8 + $0x4c0] sm:$0xff]  ;;  %v9648_v16 = vld [vmem:[#allocation8 + $0x4d0] sm:$0xff] }
0x15a4   :  { %13797 = vmatprep.subr.bf16.mxu1 %v9599_v50  ;;  %13925 = vmatprep.subr.bf16.mxu0 %v9601_v48  ;;  %v9651_v20 = vld [vmem:[#allocation8 + $0x508] sm:$0xff]  ;;  %v9653_v15 = vld [vmem:[#allocation8 + $0x518] sm:$0xff]  ;;  %v9650_v13 = vld [vmem:[#allocation8 + $0x500] sm:$0xff] }
0x15a5   :  { %v9652_v34 = vld [vmem:[#allocation8 + $0x510] sm:$0xff]  ;;  %v9655_v50 = vld [vmem:[#allocation8 + $0x548] sm:$0xff]  ;;  %v9657_v48 = vld [vmem:[#allocation8 + $0x558] sm:$0xff] }
0x15a7   :  { %13799 = vmatpush1.bf16.msra.mxu1 %v9598_v58  ;;  %13927 = vmatpush1.bf16.msra.mxu0 %v9600_v2  ;;  %v9654_v58 = vld [vmem:[#allocation8 + $0x540] sm:$0xff]  ;;  %v9656_v2 = vld [vmem:[#allocation8 + $0x550] sm:$0xff] }
0x15a8   :  { %13801 = vmatprep.subr.bf16.mxu1 %v9603_v40  ;;  %13929 = vmatprep.subr.bf16.mxu0 %v9605_v56  ;;  %v9659_v40 = vld [vmem:[#allocation8 + $0x588] sm:$0xff]  ;;  %v9661_v56 = vld [vmem:[#allocation8 + $0x598] sm:$0xff] }
0x15ab   :  { %13803 = vmatpush1.bf16.msra.mxu1 %v9602_v6  ;;  %13931 = vmatpush1.bf16.msra.mxu0 %v9604_v55  ;;  %v9658_v6 = vld [vmem:[#allocation8 + $0x580] sm:$0xff]  ;;  %v9660_v55 = vld [vmem:[#allocation8 + $0x590] sm:$0xff] }
0x15ac   :  { %13805 = vmatprep.subr.bf16.mxu1 %v9607_v9  ;;  %13933 = vmatprep.subr.bf16.mxu0 %v9609_v45  ;;  %v9663_v9 = vld [vmem:[#allocation8 + $0x5c8] sm:$0xff]  ;;  %v9665_v45 = vld [vmem:[#allocation8 + $0x5d8] sm:$0xff] }
0x15af   :  { %13807 = vmatpush1.bf16.msra.mxu1 %v9606_v41  ;;  %13935 = vmatpush1.bf16.msra.mxu0 %v9608_v28  ;;  %v9662_v41 = vld [vmem:[#allocation8 + $0x5c0] sm:$0xff]  ;;  %v9664_v28 = vld [vmem:[#allocation8 + $0x5d0] sm:$0xff] }
0x15b0   :  { %13809 = vmatprep.subr.bf16.mxu1 %v9611_v30  ;;  %13937 = vmatprep.subr.bf16.mxu0 %v9613_v7  ;;  %v9667_v30 = vld [vmem:[#allocation8 + $0x608] sm:$0xff]  ;;  %v9669_v7 = vld [vmem:[#allocation8 + $0x618] sm:$0xff] }
0x15b3   :  { %13811 = vmatpush1.bf16.msra.mxu1 %v9610_v60  ;;  %13939 = vmatpush1.bf16.msra.mxu0 %v9612_v26  ;;  %v9666_v60 = vld [vmem:[#allocation8 + $0x600] sm:$0xff]  ;;  %v9668_v26 = vld [vmem:[#allocation8 + $0x610] sm:$0xff] }
0x15b4   :  { %13813 = vmatprep.subr.bf16.mxu1 %v9615_v10  ;;  %13941 = vmatprep.subr.bf16.mxu0 %v9617_v43  ;;  %v9671_v10 = vld [vmem:[#allocation8 + $0x648] sm:$0xff]  ;;  %v9673_v43 = vld [vmem:[#allocation8 + $0x658] sm:$0xff] }
0x15b7   :  { %13815 = vmatpush1.bf16.msra.mxu1 %v9614_v12  ;;  %13943 = vmatpush1.bf16.msra.mxu0 %v9616_v0  ;;  %v9670_v12 = vld [vmem:[#allocation8 + $0x640] sm:$0xff]  ;;  %v9672_v0 = vld [vmem:[#allocation8 + $0x650] sm:$0xff] }
0x15b8   :  { %13817 = vmatprep.subr.bf16.mxu1 %v9619_v5  ;;  %13945 = vmatprep.subr.bf16.mxu0 %v9621_v33  ;;  %v9675_v5 = vld [vmem:[#allocation8 + $0x688] sm:$0xff]  ;;  %v9677_v33 = vld [vmem:[#allocation8 + $0x698] sm:$0xff] }
0x15bb   :  { %13819 = vmatpush1.bf16.msra.mxu1 %v9618_v63  ;;  %13947 = vmatpush1.bf16.msra.mxu0 %v9620_v29  ;;  %v9674_v63 = vld [vmem:[#allocation8 + $0x680] sm:$0xff]  ;;  %v9676_v29 = vld [vmem:[#allocation8 + $0x690] sm:$0xff] }
0x15bc   :  { %13821 = vmatprep.subr.bf16.mxu1 %v9623_v39  ;;  %13949 = vmatprep.subr.bf16.mxu0 %v9625_v38  ;;  %v9679_v39 = vld [vmem:[#allocation8 + $0x6c8] sm:$0xff]  ;;  %v9681_v38 = vld [vmem:[#allocation8 + $0x6d8] sm:$0xff] }
0x15bf   :  { %13823 = vmatpush1.bf16.msra.mxu1 %v9622_v35  ;;  %13951 = vmatpush1.bf16.msra.mxu0 %v9624_v18  ;;  %v9678_v35 = vld [vmem:[#allocation8 + $0x6c0] sm:$0xff]  ;;  %v9680_v18 = vld [vmem:[#allocation8 + $0x6d0] sm:$0xff] }
0x15c0   :  { %13825 = vmatprep.subr.bf16.mxu1 %v9627_v14  ;;  %13953 = vmatprep.subr.bf16.mxu0 %v9629_v8  ;;  %v9683_v14 = vld [vmem:[#allocation8 + $0x708] sm:$0xff]  ;;  %v9685_v8 = vld [vmem:[#allocation8 + $0x718] sm:$0xff] }
0x15c3   :  { %13827 = vmatpush1.bf16.msra.mxu1 %v9626_v24  ;;  %13955 = vmatpush1.bf16.msra.mxu0 %v9628_v23  ;;  %v9682_v24 = vld [vmem:[#allocation8 + $0x700] sm:$0xff]  ;;  %v9684_v23 = vld [vmem:[#allocation8 + $0x710] sm:$0xff] }
0x15c4   :  { %13829 = vmatprep.subr.bf16.mxu1 %v9631_v3  ;;  %13957 = vmatprep.subr.bf16.mxu0 %v9633_v57  ;;  %v9687_v3 = vld [vmem:[#allocation8 + $0x748] sm:$0xff]  ;;  %v9689_v57 = vld [vmem:[#allocation8 + $0x758] sm:$0xff] }
0x15c7   :  { %13831 = vmatpush1.bf16.msra.mxu1 %v9630_v62  ;;  %13959 = vmatpush1.bf16.msra.mxu0 %v9632_v42  ;;  %v9686_v62 = vld [vmem:[#allocation8 + $0x740] sm:$0xff]  ;;  %v9688_v42 = vld [vmem:[#allocation8 + $0x750] sm:$0xff] }
0x15c8   :  { %13833 = vmatprep.subr.bf16.mxu1 %v9635_v51  ;;  %13961 = vmatprep.subr.bf16.mxu0 %v9637_v52  ;;  %v9691_v51 = vld [vmem:[#allocation8 + $0x788] sm:$0xff]  ;;  %v9693_v52 = vld [vmem:[#allocation8 + $0x798] sm:$0xff] }
0x15ca   :  { %10425 = vmatmul.mubr.f32.vlgmr.msra.gmra.mrb[80].mxu1 %v17280_v53  ;;  %10567 = vmatmul.mubr.f32.vlgmr.msra.gmra.mrb[82].mxu0 %v17280_v53 }
0x15cb   :  { %13835 = vmatpush1.bf16.msra.mxu1 %v9634_v27  ;;  %13963 = vmatpush1.bf16.msra.mxu0 %v9636_v25  ;;  %v9690_v27 = vld [vmem:[#allocation8 + $0x780] sm:$0xff]  ;;  %v9692_v25 = vld [vmem:[#allocation8 + $0x790] sm:$0xff] }
0x15cc   :  { %13837 = vmatprep.subr.bf16.mxu1 %v9639_v31  ;;  %13965 = vmatprep.subr.bf16.mxu0 %v9641_v54  ;;  %v9695_v31 = vld [vmem:[#allocation8 + $0x7c8] sm:$0xff]  ;;  %v9697_v54 = vld [vmem:[#allocation8 + $0x7d8] sm:$0xff] }
0x15cd   :  { %10495 = vmatprep.mubr.f32.mxu1 %v17278_v1  ;;  %10637 = vmatprep.mubr.f32.mxu0 %v17278_v1 }
0x15cf   :  { %13839 = vmatpush1.bf16.msra.mxu1 %v9638_v44  ;;  %13967 = vmatpush1.bf16.msra.mxu0 %v9640_v49  ;;  %v9694_v44 = vld [vmem:[#allocation8 + $0x7c0] sm:$0xff]  ;;  %v9696_v49 = vld [vmem:[#allocation8 + $0x7d0] sm:$0xff] }
0x15d0   :  { %13841 = vmatprep.subr.bf16.mxu1 %v9643_v19  ;;  %13969 = vmatprep.subr.bf16.mxu0 %v9645_v46  ;;  %v9955_v19 = vld [vmem:[#allocation8 + $0x28] sm:$0xff]  ;;  %v9957_v46 = vld [vmem:[#allocation8 + $0x38] sm:$0xff] }
0x15d3   :  { %13843 = vmatpush1.bf16.msra.mxu1 %v9642_v37  ;;  %13971 = vmatpush1.bf16.msra.mxu0 %v9644_v59  ;;  %v9954_v37 = vld [vmem:[#allocation8 + $0x20] sm:$0xff]  ;;  %v9956_v59 = vld [vmem:[#allocation8 + $0x30] sm:$0xff] }
0x15d4   :  { %13845 = vmatprep.subr.bf16.mxu1 %v9647_v4  ;;  %13973 = vmatprep.subr.bf16.mxu0 %v9649_v61  ;;  %v9959_v4 = vld [vmem:[#allocation8 + $0x68] sm:$0xff]  ;;  %v9961_v61 = vld [vmem:[#allocation8 + $0x78] sm:$0xff] }
0x15d7   :  { %13847 = vmatpush1.bf16.msra.mxu1 %v9646_v22  ;;  %13975 = vmatpush1.bf16.msra.mxu0 %v9648_v16  ;;  %v9958_v22 = vld [vmem:[#allocation8 + $0x60] sm:$0xff]  ;;  %v9960_v16 = vld [vmem:[#allocation8 + $0x70] sm:$0xff] }
0x15d8   :  { %13849 = vmatprep.subr.bf16.mxu1 %v9651_v20  ;;  %13977 = vmatprep.subr.bf16.mxu0 %v9653_v15  ;;  %v9963_v20 = vld [vmem:[#allocation8 + $0xa8] sm:$0xff]  ;;  %v9965_v15 = vld [vmem:[#allocation8 + $0xb8] sm:$0xff] }
0x15db   :  { %13851 = vmatpush1.bf16.msra.mxu1 %v9650_v13  ;;  %13979 = vmatpush1.bf16.msra.mxu0 %v9652_v34  ;;  %v9962_v13 = vld [vmem:[#allocation8 + $0xa0] sm:$0xff]  ;;  %v9964_v34 = vld [vmem:[#allocation8 + $0xb0] sm:$0xff] }
0x15dc   :  { %13853 = vmatprep.subr.bf16.mxu1 %v9655_v50  ;;  %13981 = vmatprep.subr.bf16.mxu0 %v9657_v48  ;;  %v9967_v50 = vld [vmem:[#allocation8 + $0xe8] sm:$0xff]  ;;  %v9969_v48 = vld [vmem:[#allocation8 + $0xf8] sm:$0xff] }
0x15df   :  { %13855 = vmatpush1.bf16.msra.mxu1 %v9654_v58  ;;  %13983 = vmatpush1.bf16.msra.mxu0 %v9656_v2  ;;  %v9966_v58 = vld [vmem:[#allocation8 + $0xe0] sm:$0xff]  ;;  %v9968_v2 = vld [vmem:[#allocation8 + $0xf0] sm:$0xff] }
0x15e0   :  { %13857 = vmatprep.subr.bf16.mxu1 %v9659_v40  ;;  %13985 = vmatprep.subr.bf16.mxu0 %v9661_v56  ;;  %v9971_v40 = vld [vmem:[#allocation8 + $0x128] sm:$0xff]  ;;  %v9973_v56 = vld [vmem:[#allocation8 + $0x138] sm:$0xff] }
0x15e3   :  { %13859 = vmatpush1.bf16.msra.mxu1 %v9658_v6  ;;  %13987 = vmatpush1.bf16.msra.mxu0 %v9660_v55  ;;  %v9970_v6 = vld [vmem:[#allocation8 + $0x120] sm:$0xff]  ;;  %v9972_v55 = vld [vmem:[#allocation8 + $0x130] sm:$0xff] }
0x15e4   :  { %13861 = vmatprep.subr.bf16.mxu1 %v9663_v9  ;;  %13989 = vmatprep.subr.bf16.mxu0 %v9665_v45  ;;  %v9975_v9 = vld [vmem:[#allocation8 + $0x168] sm:$0xff]  ;;  %v9977_v45 = vld [vmem:[#allocation8 + $0x178] sm:$0xff] }
0x15e7   :  { %13863 = vmatpush1.bf16.msra.mxu1 %v9662_v41  ;;  %13991 = vmatpush1.bf16.msra.mxu0 %v9664_v28  ;;  %v9974_v41 = vld [vmem:[#allocation8 + $0x160] sm:$0xff]  ;;  %v9976_v28 = vld [vmem:[#allocation8 + $0x170] sm:$0xff] }
0x15e8   :  { %13865 = vmatprep.subr.bf16.mxu1 %v9667_v30  ;;  %13993 = vmatprep.subr.bf16.mxu0 %v9669_v7  ;;  %v9979_v30 = vld [vmem:[#allocation8 + $0x1a8] sm:$0xff]  ;;  %v9981_v7 = vld [vmem:[#allocation8 + $0x1b8] sm:$0xff] }
0x15eb   :  { %13867 = vmatpush1.bf16.msra.mxu1 %v9666_v60  ;;  %13995 = vmatpush1.bf16.msra.mxu0 %v9668_v26  ;;  %v9978_v60 = vld [vmem:[#allocation8 + $0x1a0] sm:$0xff]  ;;  %v9980_v26 = vld [vmem:[#allocation8 + $0x1b0] sm:$0xff] }
0x15ec   :  { %13869 = vmatprep.subr.bf16.mxu1 %v9671_v10  ;;  %13997 = vmatprep.subr.bf16.mxu0 %v9673_v43  ;;  %v9983_v10 = vld [vmem:[#allocation8 + $0x1e8] sm:$0xff]  ;;  %v9985_v43 = vld [vmem:[#allocation8 + $0x1f8] sm:$0xff] }
0x15ef   :  { %13871 = vmatpush1.bf16.msra.mxu1 %v9670_v12  ;;  %13999 = vmatpush1.bf16.msra.mxu0 %v9672_v0  ;;  %v9982_v12 = vld [vmem:[#allocation8 + $0x1e0] sm:$0xff]  ;;  %v9984_v0 = vld [vmem:[#allocation8 + $0x1f0] sm:$0xff] }
0x15f0   :  { %13873 = vmatprep.subr.bf16.mxu1 %v9675_v5  ;;  %14001 = vmatprep.subr.bf16.mxu0 %v9677_v33  ;;  %v9987_v5 = vld [vmem:[#allocation8 + $0x228] sm:$0xff]  ;;  %v9989_v33 = vld [vmem:[#allocation8 + $0x238] sm:$0xff] }
0x15f3   :  { %13875 = vmatpush1.bf16.msra.mxu1 %v9674_v63  ;;  %14003 = vmatpush1.bf16.msra.mxu0 %v9676_v29  ;;  %v9986_v63 = vld [vmem:[#allocation8 + $0x220] sm:$0xff]  ;;  %v9988_v29 = vld [vmem:[#allocation8 + $0x230] sm:$0xff] }
0x15f4   :  { %13877 = vmatprep.subr.bf16.mxu1 %v9679_v39  ;;  %14005 = vmatprep.subr.bf16.mxu0 %v9681_v38  ;;  %v9991_v39 = vld [vmem:[#allocation8 + $0x268] sm:$0xff]  ;;  %v9993_v38 = vld [vmem:[#allocation8 + $0x278] sm:$0xff] }
0x15f7   :  { %13879 = vmatpush1.bf16.msra.mxu1 %v9678_v35  ;;  %14007 = vmatpush1.bf16.msra.mxu0 %v9680_v18  ;;  %v9990_v35 = vld [vmem:[#allocation8 + $0x260] sm:$0xff]  ;;  %v9992_v18 = vld [vmem:[#allocation8 + $0x270] sm:$0xff] }
0x15f8   :  { %13881 = vmatprep.subr.bf16.mxu1 %v9683_v14  ;;  %14009 = vmatprep.subr.bf16.mxu0 %v9685_v8  ;;  %v9995_v14 = vld [vmem:[#allocation8 + $0x2a8] sm:$0xff]  ;;  %v9997_v8 = vld [vmem:[#allocation8 + $0x2b8] sm:$0xff] }
0x15fb   :  { %13883 = vmatpush1.bf16.msra.mxu1 %v9682_v24  ;;  %14011 = vmatpush1.bf16.msra.mxu0 %v9684_v23  ;;  %v9994_v24 = vld [vmem:[#allocation8 + $0x2a0] sm:$0xff]  ;;  %v9996_v23 = vld [vmem:[#allocation8 + $0x2b0] sm:$0xff] }
0x15fc   :  { %13885 = vmatprep.subr.bf16.mxu1 %v9687_v3  ;;  %14013 = vmatprep.subr.bf16.mxu0 %v9689_v57  ;;  %v9999_v3 = vld [vmem:[#allocation8 + $0x2e8] sm:$0xff]  ;;  %v10001_v57 = vld [vmem:[#allocation8 + $0x2f8] sm:$0xff] }
0x15ff   :  { %13887 = vmatpush1.bf16.msra.mxu1 %v9686_v62  ;;  %14015 = vmatpush1.bf16.msra.mxu0 %v9688_v42  ;;  %v9998_v62 = vld [vmem:[#allocation8 + $0x2e0] sm:$0xff]  ;;  %v10000_v42 = vld [vmem:[#allocation8 + $0x2f0] sm:$0xff] }
0x1600   :  { %13889 = vmatprep.subr.bf16.mxu1 %v9691_v51  ;;  %14017 = vmatprep.subr.bf16.mxu0 %v9693_v52  ;;  %v10003_v51 = vld [vmem:[#allocation8 + $0x328] sm:$0xff]  ;;  %v10005_v52 = vld [vmem:[#allocation8 + $0x338] sm:$0xff] }
0x1603   :  { %13891 = vmatpush1.bf16.msra.mxu1 %v9690_v27  ;;  %14019 = vmatpush1.bf16.msra.mxu0 %v9692_v25  ;;  %v10002_v27 = vld [vmem:[#allocation8 + $0x320] sm:$0xff]  ;;  %v10004_v25 = vld [vmem:[#allocation8 + $0x330] sm:$0xff] }
0x1604   :  { %13893 = vmatprep.subr.bf16.mxu1 %v9695_v31  ;;  %14021 = vmatprep.subr.bf16.mxu0 %v9697_v54  ;;  %v10007_v31 = vld [vmem:[#allocation8 + $0x368] sm:$0xff]  ;;  %v10009_v54 = vld [vmem:[#allocation8 + $0x378] sm:$0xff] }
0x1607   :  { %13895 = vmatpush1.bf16.msra.mxu1 %v9694_v44  ;;  %14023 = vmatpush1.bf16.msra.mxu0 %v9696_v49  ;;  %v10006_v44 = vld [vmem:[#allocation8 + $0x360] sm:$0xff]  ;;  %v10008_v49 = vld [vmem:[#allocation8 + $0x370] sm:$0xff] }
0x1608   :  { %14025 = vmatprep.subr.bf16.mxu1 %v9955_v19  ;;  %14153 = vmatprep.subr.bf16.mxu0 %v9957_v46  ;;  %v10011_v19 = vld [vmem:[#allocation8 + $0x3a8] sm:$0xff]  ;;  %v10013_v46 = vld [vmem:[#allocation8 + $0x3b8] sm:$0xff] }
0x160a   :  { %10496 = vmatmul.mubr.f32.vlgmr.msra.gmra.mrb[80].mxu1 %v17276_v32  ;;  %10638 = vmatmul.mubr.f32.vlgmr.msra.gmra.mrb[82].mxu0 %v17276_v32 }
0x160b   :  { %14027 = vmatpush1.bf16.msra.mxu1 %v9954_v37  ;;  %14155 = vmatpush1.bf16.msra.mxu0 %v9956_v59  ;;  %v10010_v37 = vld [vmem:[#allocation8 + $0x3a0] sm:$0xff]  ;;  %v10012_v59 = vld [vmem:[#allocation8 + $0x3b0] sm:$0xff] }
0x160c   :  { %14029 = vmatprep.subr.bf16.mxu1 %v9959_v4  ;;  %14157 = vmatprep.subr.bf16.mxu0 %v9961_v61  ;;  %v10015_v4 = vld [vmem:[#allocation8 + $0x3e8] sm:$0xff]  ;;  %v10017_v61 = vld [vmem:[#allocation8 + $0x3f8] sm:$0xff] }
0x160f   :  { %14031 = vmatpush1.bf16.msra.mxu1 %v9958_v22  ;;  %14159 = vmatpush1.bf16.msra.mxu0 %v9960_v16  ;;  %v10014_v22 = vld [vmem:[#allocation8 + $0x3e0] sm:$0xff]  ;;  %v10016_v16 = vld [vmem:[#allocation8 + $0x3f0] sm:$0xff] }
0x1610   :  { %14033 = vmatprep.subr.bf16.mxu1 %v9963_v20  ;;  %14161 = vmatprep.subr.bf16.mxu0 %v9965_v15  ;;  %v10019_v20 = vld [vmem:[#allocation8 + $0x428] sm:$0xff]  ;;  %v10021_v15 = vld [vmem:[#allocation8 + $0x438] sm:$0xff] }
0x1613   :  { %14035 = vmatpush1.bf16.msra.mxu1 %v9962_v13  ;;  %14163 = vmatpush1.bf16.msra.mxu0 %v9964_v34  ;;  %v17295_v13 = vld [vmem:[%s17556_s10] ss:$2 sm:$0xf] }
0x1614   :  { %14037 = vmatprep.subr.bf16.mxu1 %v9967_v50  ;;  %14165 = vmatprep.subr.bf16.mxu0 %v9969_v48  ;;  %v10343_v34 = vrot.slane %v17295_v13, %v17892_v36  ;;  %v10347_v50 = vrot.slane %v17295_v13, %v17893_v11  ;;  %v10355_v48 = vrot.slane %v17295_v13, %v17891_v21 }
0x1617   :  { %14039 = vmatpush1.bf16.msra.mxu1 %v9966_v58  ;;  %14167 = vmatpush1.bf16.msra.mxu0 %v9968_v2 }
0x1618   :  { %14041 = vmatprep.subr.bf16.mxu1 %v9971_v40  ;;  %14169 = vmatprep.subr.bf16.mxu0 %v9973_v56 }
0x161b   :  { %14043 = vmatpush1.bf16.msra.mxu1 %v9970_v6  ;;  %14171 = vmatpush1.bf16.msra.mxu0 %v9972_v55 }
0x161c   :  { %14045 = vmatprep.subr.bf16.mxu1 %v9975_v9  ;;  %14173 = vmatprep.subr.bf16.mxu0 %v9977_v45 }
0x161f   :  { %14047 = vmatpush1.bf16.msra.mxu1 %v9974_v41  ;;  %14175 = vmatpush1.bf16.msra.mxu0 %v9976_v28  ;;  %v10018_v28 = vld [vmem:[#allocation8 + $0x420] sm:$0xff] }
0x1620   :  { %14049 = vmatprep.subr.bf16.mxu1 %v9979_v30  ;;  %14177 = vmatprep.subr.bf16.mxu0 %v9981_v7  ;;  %v10020_v30 = vld [vmem:[#allocation8 + $0x430] sm:$0xff] }
0x1623   :  { %14051 = vmatpush1.bf16.msra.mxu1 %v9978_v60  ;;  %14179 = vmatpush1.bf16.msra.mxu0 %v9980_v26  ;;  %v10023_v60 = vld [vmem:[#allocation8 + $0x468] sm:$0xff]  ;;  %v10025_v26 = vld [vmem:[#allocation8 + $0x478] sm:$0xff] }
0x1624   :  { %14053 = vmatprep.subr.bf16.mxu1 %v9983_v10  ;;  %14181 = vmatprep.subr.bf16.mxu0 %v9985_v43  ;;  %v10022_v10 = vld [vmem:[#allocation8 + $0x460] sm:$0xff]  ;;  %v10024_v43 = vld [vmem:[#allocation8 + $0x470] sm:$0xff] }
0x1627   :  { %14055 = vmatpush1.bf16.msra.mxu1 %v9982_v12  ;;  %14183 = vmatpush1.bf16.msra.mxu0 %v9984_v0  ;;  %v10027_v12 = vld [vmem:[#allocation8 + $0x4a8] sm:$0xff]  ;;  %v10029_v0 = vld [vmem:[#allocation8 + $0x4b8] sm:$0xff] }
0x1628   :  { %14057 = vmatprep.subr.bf16.mxu1 %v9987_v5  ;;  %14185 = vmatprep.subr.bf16.mxu0 %v9989_v33  ;;  %v10026_v5 = vld [vmem:[#allocation8 + $0x4a0] sm:$0xff]  ;;  %v10028_v33 = vld [vmem:[#allocation8 + $0x4b0] sm:$0xff] }
0x162b   :  { %14059 = vmatpush1.bf16.msra.mxu1 %v9986_v63  ;;  %14187 = vmatpush1.bf16.msra.mxu0 %v9988_v29  ;;  %v10031_v63 = vld [vmem:[#allocation8 + $0x4e8] sm:$0xff]  ;;  %v10033_v29 = vld [vmem:[#allocation8 + $0x4f8] sm:$0xff] }
0x162c   :  { %14061 = vmatprep.subr.bf16.mxu1 %v9991_v39  ;;  %14189 = vmatprep.subr.bf16.mxu0 %v9993_v38  ;;  %v10030_v39 = vld [vmem:[#allocation8 + $0x4e0] sm:$0xff]  ;;  %v10032_v38 = vld [vmem:[#allocation8 + $0x4f0] sm:$0xff] }
0x162f   :  { %14063 = vmatpush1.bf16.msra.mxu1 %v9990_v35  ;;  %14191 = vmatpush1.bf16.msra.mxu0 %v9992_v18  ;;  %v10035_v35 = vld [vmem:[#allocation8 + $0x528] sm:$0xff]  ;;  %v10037_v18 = vld [vmem:[#allocation8 + $0x538] sm:$0xff] }
0x1630   :  { %14065 = vmatprep.subr.bf16.mxu1 %v9995_v14  ;;  %14193 = vmatprep.subr.bf16.mxu0 %v9997_v8  ;;  %v10034_v14 = vld [vmem:[#allocation8 + $0x520] sm:$0xff]  ;;  %v10036_v8 = vld [vmem:[#allocation8 + $0x530] sm:$0xff] }
0x1633   :  { %14067 = vmatpush1.bf16.msra.mxu1 %v9994_v24  ;;  %14195 = vmatpush1.bf16.msra.mxu0 %v9996_v23  ;;  %v10039_v24 = vld [vmem:[#allocation8 + $0x568] sm:$0xff]  ;;  %v10041_v23 = vld [vmem:[#allocation8 + $0x578] sm:$0xff] }
0x1634   :  { %14069 = vmatprep.subr.bf16.mxu1 %v9999_v3  ;;  %14197 = vmatprep.subr.bf16.mxu0 %v10001_v57  ;;  %v10038_v3 = vld [vmem:[#allocation8 + $0x560] sm:$0xff]  ;;  %v10040_v57 = vld [vmem:[#allocation8 + $0x570] sm:$0xff] }
0x1637   :  { %14071 = vmatpush1.bf16.msra.mxu1 %v9998_v62  ;;  %14199 = vmatpush1.bf16.msra.mxu0 %v10000_v42  ;;  %v10043_v62 = vld [vmem:[#allocation8 + $0x5a8] sm:$0xff]  ;;  %v10045_v42 = vld [vmem:[#allocation8 + $0x5b8] sm:$0xff] }
0x1638   :  { %14073 = vmatprep.subr.bf16.mxu1 %v10003_v51  ;;  %14201 = vmatprep.subr.bf16.mxu0 %v10005_v52  ;;  %v10042_v51 = vld [vmem:[#allocation8 + $0x5a0] sm:$0xff]  ;;  %v10044_v52 = vld [vmem:[#allocation8 + $0x5b0] sm:$0xff] }
0x163b   :  { %14075 = vmatpush1.bf16.msra.mxu1 %v10002_v27  ;;  %14203 = vmatpush1.bf16.msra.mxu0 %v10004_v25  ;;  %v10047_v27 = vld [vmem:[#allocation8 + $0x5e8] sm:$0xff]  ;;  %v10049_v25 = vld [vmem:[#allocation8 + $0x5f8] sm:$0xff] }
0x163c   :  { %14077 = vmatprep.subr.bf16.mxu1 %v10007_v31  ;;  %14205 = vmatprep.subr.bf16.mxu0 %v10009_v54  ;;  %v10046_v31 = vld [vmem:[#allocation8 + $0x5e0] sm:$0xff]  ;;  %v10048_v54 = vld [vmem:[#allocation8 + $0x5f0] sm:$0xff] }
0x163f   :  { %14079 = vmatpush1.bf16.msra.mxu1 %v10006_v44  ;;  %14207 = vmatpush1.bf16.msra.mxu0 %v10008_v49  ;;  %v10051_v44 = vld [vmem:[#allocation8 + $0x628] sm:$0xff]  ;;  %v10053_v49 = vld [vmem:[#allocation8 + $0x638] sm:$0xff] }
0x1640   :  { %14081 = vmatprep.subr.bf16.mxu1 %v10011_v19  ;;  %14209 = vmatprep.subr.bf16.mxu0 %v10013_v46  ;;  %v10050_v19 = vld [vmem:[#allocation8 + $0x620] sm:$0xff]  ;;  %v10052_v46 = vld [vmem:[#allocation8 + $0x630] sm:$0xff] }
0x1643   :  { %14083 = vmatpush1.bf16.msra.mxu1 %v10010_v37  ;;  %14211 = vmatpush1.bf16.msra.mxu0 %v10012_v59  ;;  %v10055_v37 = vld [vmem:[#allocation8 + $0x668] sm:$0xff]  ;;  %v10057_v59 = vld [vmem:[#allocation8 + $0x678] sm:$0xff] }
0x1644   :  { %14085 = vmatprep.subr.bf16.mxu1 %v10015_v4  ;;  %14213 = vmatprep.subr.bf16.mxu0 %v10017_v61  ;;  %v10054_v4 = vld [vmem:[#allocation8 + $0x660] sm:$0xff]  ;;  %v10056_v61 = vld [vmem:[#allocation8 + $0x670] sm:$0xff] }
0x1647   :  { %14087 = vmatpush1.bf16.msra.mxu1 %v10014_v22  ;;  %14215 = vmatpush1.bf16.msra.mxu0 %v10016_v16  ;;  %v10059_v22 = vld [vmem:[#allocation8 + $0x6a8] sm:$0xff]  ;;  %v10061_v16 = vld [vmem:[#allocation8 + $0x6b8] sm:$0xff] }
0x1648   :  { %14089 = vmatprep.subr.bf16.mxu1 %v10019_v20  ;;  %14217 = vmatprep.subr.bf16.mxu0 %v10021_v15  ;;  %v10058_v20 = vld [vmem:[#allocation8 + $0x6a0] sm:$0xff]  ;;  %v10060_v15 = vld [vmem:[#allocation8 + $0x6b0] sm:$0xff] }
0x16dd   :  { %v10497_v58 = vpop.f32.mrb[80].mxu1  ;;  %v17303_v2 = vpop.f32.mrb[82].mxu0 }
0x16de   :  { %v14344_v40 = vadd.f32 %v10497_v58, %v10343_v34  ;;  %v10499_v56 = vpop.f32.mrb[81].mxu1  ;;  %v10641_v6 = vpop.f32.mrb[83].mxu0  ;;  %v10063_v34 = vld [vmem:[#allocation8 + $0x6e8] sm:$0xff]  ;;  %v10064_v58 = vld [vmem:[#allocation8 + $0x6f0] sm:$0xff] }
0x16df   :  { %v14345_v55 = vadd.f32 %v10499_v56, %v10347_v50  ;;  %v14347_v9 = vadd.f32 %v10641_v6, %v10355_v48  ;;  %v10065_v50 = vld [vmem:[#allocation8 + $0x6f8] sm:$0xff]  ;;  %v10062_v48 = vld [vmem:[#allocation8 + $0x6e0] sm:$0xff] }
0x16e0   :  { %v17307_v41 = vmax.f32 %v14344_v40, 0.0  ;;  %v10067_v40 = vld [vmem:[#allocation8 + $0x728] sm:$0xff]  ;;  %v10069_v56 = vld [vmem:[#allocation8 + $0x738] sm:$0xff]  ;;  %v10066_v6 = vld [vmem:[#allocation8 + $0x720] sm:$0xff] }
0x16e1   :  { %v17305_v45 = vmax.f32 %v14345_v55, 0.0  ;;  %v17311_v7 = vmax.f32 %v14347_v9, 0.0  ;;  %v10068_v55 = vld [vmem:[#allocation8 + $0x730] sm:$0xff]  ;;  %v10071_v9 = vld [vmem:[#allocation8 + $0x768] sm:$0xff] }
0x16e3   :  { %10735 = vmatprep.mubr.f32.mxu1 %v17305_v45  ;;  %10877 = vmatprep.mubr.f32.mxu0 %v17305_v45 }
0x16e4   :  { %10736 = vmatmul.mubr.f32.vlgmr.msra.gmra.mrb[82].mxu1 %v17307_v41  ;;  %10878 = vmatmul.mubr.f32.vlgmr.msra.gmra.mrb[84].mxu0 %v17307_v41 }
0x16e5   :  { %14091 = vmatpush1.bf16.msra.mxu1 %v10018_v28  ;;  %14219 = vmatpush1.bf16.msra.mxu0 %v10020_v30  ;;  %v10073_v28 = vld [vmem:[#allocation8 + $0x778] sm:$0xff]  ;;  %v10070_v30 = vld [vmem:[#allocation8 + $0x760] sm:$0xff] }
0x16e6   :  { %10806 = vmatprep.mubr.f32.mxu1 %v17311_v7  ;;  %10948 = vmatprep.mubr.f32.mxu0 %v17311_v7 }
0x16e7   :  { %14093 = vmatprep.subr.bf16.mxu1 %v10023_v60  ;;  %14221 = vmatprep.subr.bf16.mxu0 %v10025_v26  ;;  %v10072_v60 = vld [vmem:[#allocation8 + $0x770] sm:$0xff]  ;;  %v10075_v26 = vld [vmem:[#allocation8 + $0x7a8] sm:$0xff] }
0x16e9   :  { %14095 = vmatpush1.bf16.msra.mxu1 %v10022_v10  ;;  %14223 = vmatpush1.bf16.msra.mxu0 %v10024_v43  ;;  %v10077_v10 = vld [vmem:[#allocation8 + $0x7b8] sm:$0xff]  ;;  %v10074_v43 = vld [vmem:[#allocation8 + $0x7a0] sm:$0xff] }
0x16ea   :  { %14097 = vmatprep.subr.bf16.mxu1 %v10027_v12  ;;  %14225 = vmatprep.subr.bf16.mxu0 %v10029_v0  ;;  %v10076_v12 = vld [vmem:[#allocation8 + $0x7b0] sm:$0xff]  ;;  %v10351_v0 = vrot.slane %v17295_v13, %v17890_v17  ;;  %v11016_v13 = vld [vmem:[%s17557_s11 + $0x188] sm:$0xff] }
0x16ed   :  { %14099 = vmatpush1.bf16.msra.mxu1 %v10026_v5  ;;  %14227 = vmatpush1.bf16.msra.mxu0 %v10028_v33  ;;  %v10079_v5 = vld [vmem:[#allocation8 + $0x7e8] sm:$0xff]  ;;  %v10081_v33 = vld [vmem:[#allocation8 + $0x7f8] sm:$0xff] }
0x16ee   :  { %14101 = vmatprep.subr.bf16.mxu1 %v10031_v63  ;;  %14229 = vmatprep.subr.bf16.mxu0 %v10033_v29  ;;  %v10983_v63 = vld [vmem:[%s17557_s11 + $0x80] sm:$0xff]  ;;  %v10984_v29 = vld [vmem:[%s17557_s11 + $0x88] sm:$0xff] }
0x16f1   :  { %14103 = vmatpush1.bf16.msra.mxu1 %v10030_v39  ;;  %14231 = vmatpush1.bf16.msra.mxu0 %v10032_v38  ;;  %v11015_v39 = vld [vmem:[%s17557_s11 + $0x180] sm:$0xff]  ;;  %v10078_v38 = vld [vmem:[#allocation8 + $0x7e0] sm:$0xff] }
0x16f2   :  { %14105 = vmatprep.subr.bf16.mxu1 %v10035_v35  ;;  %14233 = vmatprep.subr.bf16.mxu0 %v10037_v18  ;;  %v10080_v35 = vld [vmem:[#allocation8 + $0x7f0] sm:$0xff] }
0x16f3   :  { %v10967_v18 = vld [vmem:[%s17557_s11] sm:$0xff] }
0x16f5   :  { %14107 = vmatpush1.bf16.msra.mxu1 %v10034_v14  ;;  %14235 = vmatpush1.bf16.msra.mxu0 %v10036_v8  ;;  %v10968_v14 = vld [vmem:[%s17557_s11 + $0x8] sm:$0xff]  ;;  %v14346_v8 = vadd.f32 %v17303_v2, %v10351_v0  ;;  %v10986_v2 = vld [vmem:[%s17557_s11 + $0x98] sm:$0xff]  ;;  %v10991_v0 = vld [vmem:[%s17557_s11 + $0xc0] sm:$0xff] }
0x16f6   :  { %14109 = vmatprep.subr.bf16.mxu1 %v10039_v24  ;;  %14237 = vmatprep.subr.bf16.mxu0 %v10041_v23  ;;  %v14280_v24 = vpack.c.bf16 %v10984_v29, %v10983_v63  ;;  %v14312_v23 = vpack.c.bf16 %v11016_v13, %v11015_v39  ;;  %v11024_v63 = vld [vmem:[%s17557_s11 + $0x1c8] sm:$0xff]  ;;  %v10975_v13 = vld [vmem:[%s17557_s11 + $0x40] sm:$0xff] }
0x16f9   :  { %14111 = vmatpush1.bf16.msra.mxu1 %v10038_v3  ;;  %14239 = vmatpush1.bf16.msra.mxu0 %v10040_v57  ;;  %v10999_v3 = vld [vmem:[%s17557_s11 + $0x100] sm:$0xff]  ;;  %v11000_v57 = vld [vmem:[%s17557_s11 + $0x108] sm:$0xff] }
0x16fa   :  { %14113 = vmatprep.subr.bf16.mxu1 %v10043_v62  ;;  %14241 = vmatprep.subr.bf16.mxu0 %v10045_v42  ;;  %v10985_v62 = vld [vmem:[%s17557_s11 + $0x90] sm:$0xff] }
0x16fb   :  { %v11017_v42 = vld [vmem:[%s17557_s11 + $0x190] sm:$0xff] }
0x16fd   :  { %14115 = vmatpush1.bf16.msra.mxu1 %v10042_v51  ;;  %14243 = vmatpush1.bf16.msra.mxu0 %v10044_v52  ;;  %v11018_v51 = vld [vmem:[%s17557_s11 + $0x198] sm:$0xff]  ;;  %v14282_v52 = vpack.c.bf16 %v10968_v14, %v10967_v18  ;;  %v11007_v14 = vld [vmem:[%s17557_s11 + $0x140] sm:$0xff] }
0x16fe   :  { %14117 = vmatprep.subr.bf16.mxu1 %v10047_v27  ;;  %14245 = vmatprep.subr.bf16.mxu0 %v10049_v25  ;;  %v14314_v27 = vpack.c.bf16 %v11000_v57, %v10999_v3  ;;  %v10969_v25 = vld [vmem:[%s17557_s11 + $0x10] sm:$0xff]  ;;  %v11026_v57 = vld [vmem:[%s17557_s11 + $0x1d8] sm:$0xff] }
0x16ff   :  { %v11025_v3 = vld [vmem:[%s17557_s11 + $0x1d0] sm:$0xff] }
0x1701   :  { %14119 = vmatpush1.bf16.msra.mxu1 %v10046_v31  ;;  %14247 = vmatpush1.bf16.msra.mxu0 %v10048_v54  ;;  %v10970_v31 = vld [vmem:[%s17557_s11 + $0x18] sm:$0xff]  ;;  %v17362_v54 = vmax.f32 %v14346_v8, 0.0  ;;  %v11008_v8 = vld [vmem:[%s17557_s11 + $0x148] sm:$0xff] }
0x1702   :  { %14121 = vmatprep.subr.bf16.mxu1 %v10051_v44  ;;  %14249 = vmatprep.subr.bf16.mxu0 %v10053_v49  ;;  %v14284_v44 = vpack.c.bf16 %v10986_v2, %v10985_v62  ;;  %v14316_v49 = vpack.c.bf16 %v11018_v51, %v11017_v42  ;;  %v14330_v2 = vpack.c.bf16 %v11008_v8, %v11007_v14  ;;  %v10977_v42 = vld [vmem:[%s17557_s11 + $0x50] sm:$0xff] }
0x1705   :  { %14123 = vmatpush1.bf16.msra.mxu1 %v10050_v19  ;;  %14251 = vmatpush1.bf16.msra.mxu0 %v10052_v46  ;;  %v11001_v19 = vld [vmem:[%s17557_s11 + $0x110] sm:$0xff]  ;;  %v11002_v46 = vld [vmem:[%s17557_s11 + $0x118] sm:$0xff] }
0x1706   :  { %14125 = vmatprep.subr.bf16.mxu1 %v10055_v37  ;;  %14253 = vmatprep.subr.bf16.mxu0 %v10057_v59  ;;  %v10987_v37 = vld [vmem:[%s17557_s11 + $0xa0] sm:$0xff]  ;;  %v10988_v59 = vld [vmem:[%s17557_s11 + $0xa8] sm:$0xff] }
0x1709   :  { %14127 = vmatpush1.bf16.msra.mxu1 %v10054_v4  ;;  %14255 = vmatpush1.bf16.msra.mxu0 %v10056_v61  ;;  %v11019_v4 = vld [vmem:[%s17557_s11 + $0x1a0] sm:$0xff]  ;;  %v11020_v61 = vld [vmem:[%s17557_s11 + $0x1a8] sm:$0xff] }
0x170a   :  { %14129 = vmatprep.subr.bf16.mxu1 %v10059_v22  ;;  %14257 = vmatprep.subr.bf16.mxu0 %v10061_v16  ;;  %v14286_v22 = vpack.c.bf16 %v10970_v31, %v10969_v25  ;;  %v14318_v16 = vpack.c.bf16 %v11002_v46, %v11001_v19  ;;  %v11009_v25 = vld [vmem:[%s17557_s11 + $0x150] sm:$0xff]  ;;  %v11010_v31 = vld [vmem:[%s17557_s11 + $0x158] sm:$0xff]  ;;  %v10995_v19 = vld [vmem:[%s17557_s11 + $0xe0] sm:$0xff] }
0x170b   :  { %v10996_v46 = vld [vmem:[%s17557_s11 + $0xe8] sm:$0xff] }
0x170d   :  { %14131 = vmatpush1.bf16.msra.mxu1 %v10058_v20  ;;  %14259 = vmatpush1.bf16.msra.mxu0 %v10060_v15  ;;  %v10971_v20 = vld [vmem:[%s17557_s11 + $0x20] sm:$0xff]  ;;  %v10972_v15 = vld [vmem:[%s17557_s11 + $0x28] sm:$0xff] }
0x170e   :  { %14133 = vmatprep.subr.bf16.mxu1 %v10063_v34  ;;  %14261 = vmatprep.subr.bf16.mxu0 %v10065_v50  ;;  %v14288_v34 = vpack.c.bf16 %v10988_v59, %v10987_v37  ;;  %v14320_v50 = vpack.c.bf16 %v11020_v61, %v11019_v4  ;;  %v11027_v37 = vld [vmem:[%s17557_s11 + $0x1e0] sm:$0xff]  ;;  %v14304_v59 = vpack.c.bf16 %v10996_v46, %v10995_v19  ;;  %v11028_v4 = vld [vmem:[%s17557_s11 + $0x1e8] sm:$0xff] }
0x170f   :  { %v10979_v61 = vld [vmem:[%s17557_s11 + $0x60] sm:$0xff] }
0x1711   :  { %14135 = vmatpush1.bf16.msra.mxu1 %v10062_v48  ;;  %14263 = vmatpush1.bf16.msra.mxu0 %v10064_v58  ;;  %v11003_v48 = vld [vmem:[%s17557_s11 + $0x120] sm:$0xff]  ;;  %v11004_v58 = vld [vmem:[%s17557_s11 + $0x128] sm:$0xff] }
0x1712   :  { %14137 = vmatprep.subr.bf16.mxu1 %v10067_v40  ;;  %14265 = vmatprep.subr.bf16.mxu0 %v10069_v56  ;;  %v10989_v40 = vld [vmem:[%s17557_s11 + $0xb0] sm:$0xff]  ;;  %v10990_v56 = vld [vmem:[%s17557_s11 + $0xb8] sm:$0xff] }
0x1715   :  { %14139 = vmatpush1.bf16.msra.mxu1 %v10066_v6  ;;  %14267 = vmatpush1.bf16.msra.mxu0 %v10068_v55  ;;  %v11021_v6 = vld [vmem:[%s17557_s11 + $0x1b0] sm:$0xff]  ;;  %v11022_v55 = vld [vmem:[%s17557_s11 + $0x1b8] sm:$0xff] }
0x1716   :  { %14141 = vmatprep.subr.bf16.mxu1 %v10071_v9  ;;  %14269 = vmatprep.subr.bf16.mxu0 %v10073_v28  ;;  %v14290_v9 = vpack.c.bf16 %v10972_v15, %v10971_v20  ;;  %v14322_v28 = vpack.c.bf16 %v11004_v58, %v11003_v48  ;;  %v11011_v15 = vld [vmem:[%s17557_s11 + $0x160] sm:$0xff]  ;;  %v10997_v48 = vld [vmem:[%s17557_s11 + $0xf0] sm:$0xff]  ;;  %v10998_v58 = vld [vmem:[%s17557_s11 + $0xf8] sm:$0xff] }
0x1719   :  { %14143 = vmatpush1.bf16.msra.mxu1 %v10070_v30  ;;  %14271 = vmatpush1.bf16.msra.mxu0 %v10072_v60  ;;  %v10973_v30 = vld [vmem:[%s17557_s11 + $0x30] sm:$0xff]  ;;  %v10974_v60 = vld [vmem:[%s17557_s11 + $0x38] sm:$0xff] }
0x171a   :  { %14145 = vmatprep.subr.bf16.mxu1 %v10075_v26  ;;  %14273 = vmatprep.subr.bf16.mxu0 %v10077_v10  ;;  %v14292_v26 = vpack.c.bf16 %v10990_v56, %v10989_v40  ;;  %v14324_v10 = vpack.c.bf16 %v11022_v55, %v11021_v6  ;;  %v14294_v29 = vpack.c.bf16 %v10974_v60, %v10973_v30  ;;  %v11029_v40 = vld [vmem:[%s17557_s11 + $0x1f0] sm:$0xff]  ;;  %v11030_v6 = vld [vmem:[%s17557_s11 + $0x1f8] sm:$0xff] }
0x171b   :  { %v14308_v56 = vpack.c.bf16 %v10998_v58, %v10997_v48  ;;  %v10981_v55 = vld [vmem:[%s17557_s11 + $0x70] sm:$0xff] }
0x171c   :  { %v11013_v60 = vld [vmem:[%s17557_s11 + $0x170] sm:$0xff] }
0x171d   :  { %14147 = vmatpush1.bf16.msra.mxu1 %v10074_v43  ;;  %14275 = vmatpush1.bf16.msra.mxu0 %v10076_v12  ;;  %v11005_v43 = vld [vmem:[%s17557_s11 + $0x130] sm:$0xff]  ;;  %v11006_v12 = vld [vmem:[%s17557_s11 + $0x138] sm:$0xff] }
0x171e   :  { %14149 = vmatprep.subr.bf16.mxu1 %v10079_v5  ;;  %14277 = vmatprep.subr.bf16.mxu0 %v10081_v33  ;;  %v10992_v5 = vld [vmem:[%s17557_s11 + $0xc8] sm:$0xff]  ;;  %v11023_v33 = vld [vmem:[%s17557_s11 + $0x1c0] sm:$0xff]  ;;  %v14326_v39 = vpack.c.bf16 %v11006_v12, %v11005_v43 }
0x171f   :  { %v14328_v18 = vpack.c.bf16 %v11024_v63, %v11023_v33  ;;  %v11280_v43 = vld [vmem:[%s17556_s10 + $0x1] ss:$2 sm:$0xf] }
0x1720   :  { %v10654_v12 = vrot.slane %v11280_v43, %v17892_v36  ;;  %v10666_v33 = vrot.slane %v11280_v43, %v17891_v21  ;;  %v10962_v21 = vadd.f32 %v17311_v7, %v17278_v1 }
0x1721   :  { %14151 = vmatpush1.bf16.msra.mxu1 %v10078_v38  ;;  %14279 = vmatpush1.bf16.msra.mxu0 %v10080_v35  ;;  %v10976_v38 = vld [vmem:[%s17557_s11 + $0x48] sm:$0xff]  ;;  %v14296_v35 = vpack.c.bf16 %v10992_v5, %v10991_v0  ;;  %v10662_v0 = vrot.slane %v11280_v43, %v17890_v17  ;;  %v10658_v5 = vrot.slane %v11280_v43, %v17893_v11 }
0x1722   :  { %14281 = vmatprep.subr.bf16.mxu1 %v14280_v24  ;;  %14313 = vmatprep.subr.bf16.mxu0 %v14312_v23  ;;  %v10993_v24 = vld [vmem:[%s17557_s11 + $0xd0] sm:$0xff]  ;;  %v10994_v23 = vld [vmem:[%s17557_s11 + $0xd8] sm:$0xff]  ;;  %v14298_v62 = vpack.c.bf16 %v10976_v38, %v10975_v13  ;;  %v10960_v17 = vadd.f32 %v17305_v45, %v17282_v47  ;;  %v11281_v47 = vld [vmem:[%s17558_s12] ss:$0 sm:$0xff] }
0x1723   :  { %v14300_v51 = vpack.c.bf16 %v10994_v23, %v10993_v24  ;;  %v10959_v24 = vadd.f32 %v17307_v41, %v17280_v53 }
0x1724   :  { %10807 = vmatmul.mubr.f32.vlgmr.msra.gmra.mrb[82].mxu1 %v17362_v54  ;;  %10949 = vmatmul.mubr.f32.vlgmr.msra.gmra.mrb[84].mxu0 %v17362_v54 }
0x1725   :  { %14283 = vmatpush3.bf16.msra.mxu1 %v14282_v52  ;;  %14315 = vmatpush3.bf16.msra.mxu0 %v14314_v27  ;;  %v14332_v52 = vpack.c.bf16 %v11026_v57, %v11025_v3  ;;  %v10978_v27 = vld [vmem:[%s17557_s11 + $0x58] sm:$0xff]  ;;  %v10961_v57 = vadd.f32 %v17362_v54, %v17276_v32 }
0x1726   :  { %14285 = vmatprep.subr.bf16.mxu1 %v14284_v44  ;;  %14317 = vmatprep.subr.bf16.mxu0 %v14316_v49  ;;  %v14302_v44 = vpack.c.bf16 %v10978_v27, %v10977_v42  ;;  %v14334_v49 = vpack.c.bf16 %v11010_v31, %v11009_v25 }
0x1729   :  { %14287 = vmatpush3.bf16.msra.mxu1 %v14286_v22  ;;  %14319 = vmatpush3.bf16.msra.mxu0 %v14318_v16  ;;  %v10980_v22 = vld [vmem:[%s17557_s11 + $0x68] sm:$0xff]  ;;  %v14336_v16 = vpack.c.bf16 %v11028_v4, %v11027_v37 }
0x172a   :  { %14289 = vmatprep.subr.bf16.mxu1 %v14288_v34  ;;  %14321 = vmatprep.subr.bf16.mxu0 %v14320_v50  ;;  %v14306_v20 = vpack.c.bf16 %v10980_v22, %v10979_v61  ;;  %v11012_v34 = vld [vmem:[%s17557_s11 + $0x168] sm:$0xff] }
0x172b   :  { %v14338_v50 = vpack.c.bf16 %v11012_v34, %v11011_v15 }
0x172d   :  { %14291 = vmatpush3.bf16.msra.mxu1 %v14290_v9  ;;  %14323 = vmatpush3.bf16.msra.mxu0 %v14322_v28  ;;  %v10982_v9 = vld [vmem:[%s17557_s11 + $0x78] sm:$0xff]  ;;  %v14340_v28 = vpack.c.bf16 %v11030_v6, %v11029_v40 }
0x172e   :  { %14293 = vmatprep.subr.bf16.mxu1 %v14292_v26  ;;  %14325 = vmatprep.subr.bf16.mxu0 %v14324_v10  ;;  %v14310_v30 = vpack.c.bf16 %v10982_v9, %v10981_v55  ;;  %v11014_v26 = vld [vmem:[%s17557_s11 + $0x178] sm:$0xff] }
0x172f   :  { %v14342_v10 = vpack.c.bf16 %v11014_v26, %v11013_v60 }
0x1731   :  { %14295 = vmatpush3.bf16.msra.mxu1 %v14294_v29  ;;  %14327 = vmatpush3.bf16.msra.mxu0 %v14326_v39 }
0x1732   :  { %14297 = vmatprep.subr.bf16.mxu1 %v14296_v35  ;;  %14329 = vmatprep.subr.bf16.mxu0 %v14328_v18 }
0x1735   :  { %14299 = vmatpush3.bf16.msra.mxu1 %v14298_v62  ;;  %14331 = vmatpush3.bf16.msra.mxu0 %v14330_v2 }
0x1736   :  { %14301 = vmatprep.subr.bf16.mxu1 %v14300_v51  ;;  %14333 = vmatprep.subr.bf16.mxu0 %v14332_v52 }
0x1739   :  { %14303 = vmatpush3.bf16.msra.mxu1 %v14302_v44  ;;  %14335 = vmatpush3.bf16.msra.mxu0 %v14334_v49 }
0x173a   :  { %14305 = vmatprep.subr.bf16.mxu1 %v14304_v59  ;;  %14337 = vmatprep.subr.bf16.mxu0 %v14336_v16 }
0x173d   :  { %14307 = vmatpush3.bf16.msra.mxu1 %v14306_v20  ;;  %14339 = vmatpush3.bf16.msra.mxu0 %v14338_v50 }
0x173e   :  { %14309 = vmatprep.subr.bf16.mxu1 %v14308_v56  ;;  %14341 = vmatprep.subr.bf16.mxu0 %v14340_v28 }
0x1741   :  { %14311 = vmatpush3.bf16.msra.mxu1 %v14310_v30  ;;  %14343 = vmatpush3.bf16.msra.mxu0 %v14342_v10 }
0x17f7   :  { %v10808_v63 = vpop.f32.mrb[82].mxu1  ;;  %v10950_v29 = vpop.f32.mrb[84].mxu0 }
0x17f8   :  { %v14348_v39 = vadd.f32 %v10808_v63, %v10654_v12  ;;  %v14350_v13 = vadd.f32 %v10950_v29, %v10662_v0  ;;  %v10810_v38 = vpop.f32.mrb[83].mxu1  ;;  %v10952_v35 = vpop.f32.mrb[85].mxu0 }
0x17f9   :  { %v14349_v18 = vadd.f32 %v10810_v38, %v10658_v5  ;;  %v14351_v14 = vadd.f32 %v10952_v35, %v10666_v33 }
0x17fa   :  { %v10955_v8 = vmax.f32 %v14348_v39, 0.0  ;;  %v10957_v23 = vmax.f32 %v14350_v13, 0.0 }
0x17fb   :  { %v10956_v36 = vmax.f32 %v14349_v18, 0.0  ;;  %v10958_v11 = vmax.f32 %v14351_v14, 0.0 }
0x17fc   :  { %v10963_v3 = vadd.f32 %v10959_v24, %v10955_v8  ;;  %v10965_v42 = vadd.f32 %v10961_v57, %v10957_v23 }
0x17fd   :  { %v10964_v62 = vadd.f32 %v10960_v17, %v10956_v36  ;;  %v10966_v2 = vadd.f32 %v10962_v21, %v10958_v11 }
0x17ff   :  { %11102 = vmatprep.mubr.f32.mxu1 %v10964_v62  ;;  %11172 = vmatprep.mubr.f32.mxu0 %v10966_v2 }
0x1800   :  { %11103 = vmatmul.mubr.f32.vlgmr.msra.gmra.mrb[84].mxu1 %v10963_v3  ;;  %11173 = vmatmul.mubr.f32.vlgmr.msra.gmra.mrb[86].mxu0 %v10965_v42 }
0x18d3   :  { %v11327_v53 = vpop.f32.mrb[84].mxu1  ;;  %v11362_v41 = vpop.f32.mrb[86].mxu0 }
0x18d4   :  { %v11328_v45 = vpop.f32.mrb[85].mxu1  ;;  %v11363_v51 = vpop.f32.mrb[87].mxu0 }
0x18d5   :  { %v11329_v1 = vadd.f32 %v11328_v45, %v11327_v53  ;;  %v11364_v7 = vadd.f32 %v11363_v51, %v11362_v41 }
0x18d7   :  { %v11105_v32 = vadd.f32 %v11329_v1, %v11281_v47 }
0x18d9   :  { %v11175_v54 = vadd.f32 %v11364_v7, %v11105_v32 }
0x18db   :  { %11179 = vst.msk [vmem:[#allocation13] sm:$0x3] %vm11178_vm3, %v11175_v54 }
0x18dc   :  { %14658 = shalt.err (!%p14655_p6)
}
0x18dd   :  { %s14659_s16 = scalar_lea.hbm %s17559_s13, 32 }
0x18de   :  { %p14660_p7 = scmp.ne.s32.totalorder %s17559_s13, %s14659_s16  ;;  %p14663_p8 = scmp.lt.u32.totalorder %s14659_s16, %s17559_s13 }
0x18e0   :  { %p14665_p9 = pnand %p14663_p8, %p14660_p7 }
0x18e2   :  { %14668 = shalt.err (!%p14665_p9)
}
0x18e3   :  { %11189 = dma.vmem_to_hbm [thread:$0]  %s11187_s26, 32, %s17559_s13, [#allocation12]  }
0x18e4   :  { %14677 = dma.done.wait [#allocation12], 32  }
0x18e5   :  { %14678 = vsyncadd [#allocation12], 4294967264 }
0x18e6   :  { %11193 = vsyncpa [#allocation11], 1 }
0x18e7   :  { %11194 = vsyncpa [#allocation12], 1 }
0x18e8   :  { %11195 = vsyncmov [#allocation9] }
0x18eb   :  { %s11196_s18 = vpop.sfrf %11195 }
0x18ec   :  { %p11282_p10 = scmp.ne.s32.totalorder %s11196_s18, 0 }
0x18ee   :  { %11200 = shalt.err (%p11282_p10)  }
0x18ef   :  { %11202 = vsyncmov [#allocation9 + $0x1] }
0x18f2   :  { %s11203_s6 = vpop.sfrf %11202 }
0x18f3   :  { %p11283_p11 = scmp.ne.s32.totalorder %s11203_s6, 0 }
0x18f5   :  { %11207 = shalt.err (%p11283_p11)  }
0x18f6   :  { %11209 = vsyncmov [#allocation9 + $0x2] }
0x18f9   :  { %s11210_s1 = vpop.sfrf %11209 }
0x18fa   :  { %p11284_p12 = scmp.ne.s32.totalorder %s11210_s1, 0 }
0x18fc   :  { %11214 = shalt.err (%p11284_p12)  }

</bundles_post_ra>
